<compile_context>
chip_gen: v7x
topology: tpu7x:2x2x1
jax: 0.10.0
libtpu: 0.0.40
codegen_flags: <defaults>
</compile_context>

<pallas_src>
import functools

import jax
import jax.numpy as jnp
from jax.experimental import pallas as pl
from jax.experimental.pallas import tpu as pltpu

LANES = 128


def _round_up(x, m):
    return ((x + m - 1) // m) * m


def _choose_tile_m(M, max_tm=1024):
    """Largest multiple-of-8 row tile <= max_tm dividing round_up(M, 8).

    Avoids M padding when possible and keeps >=2 grid steps for larger M
    (megacore friendliness on v7x)."""
    Mp = _round_up(M, 8)
    limit = min(max_tm, Mp if Mp < 16 else max(8, Mp // 2))
    best = 8
    for t in range(8, limit + 1, 8):
        if Mp % t == 0:
            best = t
    return best, Mp


# ---------------------------------------------------------------------------
# Pallas kernels
# ---------------------------------------------------------------------------

def _mm_bias_kernel(x_ref, w_ref, b_ref, o_ref, *, relu):
    """Fused (tm, K)bf16 @ (K, N)bf16 + bias (+ ReLU) with f32 accumulation."""
    acc = jnp.dot(x_ref[...], w_ref[...], preferred_element_type=jnp.float32)
    acc = acc + b_ref[...]
    if relu:
        acc = jnp.maximum(acc, 0.0)
    o_ref[...] = acc.astype(o_ref.dtype)


def matmul_bias_act(x, w, b, *, relu, out_dtype):
    """x: (M, K) bf16, w: (K, N) bf16 (K, N pre-padded), b: (1, N) f32 -> (M, N)."""
    M, K = x.shape
    Kw, N = w.shape
    assert K == Kw and b.shape == (1, N), (x.shape, w.shape, b.shape)

    tm, Mp = _choose_tile_m(M)
    if Mp != M:
        x = jnp.pad(x, ((0, Mp - M), (0, 0)))

    out = pl.pallas_call(
        functools.partial(_mm_bias_kernel, relu=relu),
        out_shape=jax.ShapeDtypeStruct((Mp, N), out_dtype),
        grid_spec=pltpu.PrefetchScalarGridSpec(
            num_scalar_prefetch=0,
            grid=(Mp // tm,),
            in_specs=[
                pl.BlockSpec((tm, K), lambda i: (i, 0)),
                pl.BlockSpec((K, N), lambda i: (0, 0)),
                pl.BlockSpec((1, N), lambda i: (0, 0)),
            ],
            out_specs=pl.BlockSpec((tm, N), lambda i: (i, 0)),
        ),
        compiler_params=pltpu.CompilerParams(
            dimension_semantics=("parallel",)),
    )(x, w, b)
    return out if Mp == M else out[:M]


def _max8_kernel(x0, x1, x2, x3, x4, x5, x6, x7, o_ref):
    """Elementwise max of the 8 pooling-window corner slabs, one load at a time."""
    m = jnp.maximum(x0[...], x1[...])
    for r in (x2, x3, x4, x5, x6, x7):
        m = jnp.maximum(m, r[...])
    o_ref[...] = m


def maxpool3d_2(y):
    """MaxPool3d(kernel=2, stride=2) on channels-last y: (B, D, H, W, C).

    C must be a multiple of 128 (lane-dense).  Returns (B*Do*Ho*Wo, C) with rows
    ordered (b, do, ho, wo)."""
    B, D, H, W, C = y.shape
    Do, Ho, Wo = D // 2, H // 2, W // 2
    M = B * Do * Ho * Wo
    slabs = [y[:, i::2, j::2, k::2, :].reshape(M, C)
             for i in range(2) for j in range(2) for k in range(2)]

    tm, Mp = _choose_tile_m(M)
    if Mp != M:
        slabs = [jnp.pad(s, ((0, Mp - M), (0, 0))) for s in slabs]

    spec = pl.BlockSpec((tm, C), lambda i: (i, 0))
    out = pl.pallas_call(
        _max8_kernel,
        out_shape=jax.ShapeDtypeStruct((Mp, C), y.dtype),
        grid_spec=pltpu.PrefetchScalarGridSpec(
            num_scalar_prefetch=0,
            grid=(Mp // tm,),
            in_specs=[spec] * 8,
            out_specs=spec,
        ),
        compiler_params=pltpu.CompilerParams(
            dimension_semantics=("parallel",)),
    )(*slabs)
    return out if Mp == M else out[:M]


def _fc_fused_kernel(x_ref, w1_ref, b1_ref, w2_ref, b2_ref, o_ref):
    """Linear(6912->128)+ReLU followed by Linear(128->Np); intermediate stays in VMEM."""
    h = jnp.dot(x_ref[...], w1_ref[...], preferred_element_type=jnp.float32)
    h = jnp.maximum(h + b1_ref[...], 0.0)
    o = jnp.dot(h.astype(w2_ref.dtype), w2_ref[...],
                preferred_element_type=jnp.float32)
    o_ref[...] = (o + b2_ref[...]).astype(o_ref.dtype)


def fc_fused(x, w1, b1, w2, b2):
    """x: (B, K) bf16; w1: (K, 128) bf16; w2: (128, Np) bf16 -> (B, Np) f32."""
    B, _ = x.shape
    Bp = _round_up(max(B, 8), 8)
    if Bp != B:
        x = jnp.pad(x, ((0, Bp - B), (0, 0)))
    out = pl.pallas_call(
        _fc_fused_kernel,
        out_shape=jax.ShapeDtypeStruct((Bp, w2.shape[1]), jnp.float32),
    )(x.astype(jnp.bfloat16), w1, b1, w2, b2)
    return out[:B]


# ---------------------------------------------------------------------------
# Channels-last im2col (glue: strided slices + one concat, no transposes)
# ---------------------------------------------------------------------------

def _im2col3d_cl(x, k, stride, k_pad):
    """x: (B, D, H, W, C) -> (B*Do*Ho*Wo, k_pad), feature order (kd, kh, kw, C),
    zero-padded from k^3*C up to k_pad."""
    B, D, H, W, C = x.shape
    Do = (D - k) // stride + 1
    Ho = (H - k) // stride + 1
    Wo = (W - k) // stride + 1
    slabs = []
    for dz in range(k):
        for dy in range(k):
            for dx in range(k):
                slabs.append(
                    x[:, dz:dz + (Do - 1) * stride + 1:stride,
                         dy:dy + (Ho - 1) * stride + 1:stride,
                         dx:dx + (Wo - 1) * stride + 1:stride, :])
    p = jnp.concatenate(slabs, axis=-1)                 # (B, Do, Ho, Wo, k^3*C)
    K = k * k * k * C
    if k_pad > K:
        p = jnp.pad(p, ((0, 0), (0, 0), (0, 0), (0, 0), (0, k_pad - K)))
    return p.reshape(B * Do * Ho * Wo, k_pad), (Do, Ho, Wo)


# ---------------------------------------------------------------------------
# Parameters
# ---------------------------------------------------------------------------

def init_torch_params(key, num_classes):
    """Parameters in the PyTorch layouts (as nn.Conv3d / nn.Linear store them)."""
    ks = jax.random.split(key, 8)

    def u(k, shape, fan_in):
        bound = 1.0 / (fan_in ** 0.5)
        return jax.random.uniform(k, shape, jnp.float32, -bound, bound)

    return {
        "conv1_w": u(ks[0], (32, 1, 5, 5, 5), 125),
        "conv1_b": u(ks[1], (32,), 125),
        "conv2_w": u(ks[2], (32, 32, 3, 3, 3), 864),
        "conv2_b": u(ks[3], (32,), 864),
        "fc1_w":   u(ks[4], (128, 32 * 6 * 6 * 6), 6912),
        "fc1_b":   u(ks[5], (128,), 6912),
        "fc2_w":   u(ks[6], (num_classes, 128), 128),
        "fc2_b":   u(ks[7], (num_classes,), 128),
    }


def prepare_params(tp):
    """One-time relayout of PyTorch params into kernel-friendly padded tensors."""
    def pad2(a, rows, cols):
        r, c = a.shape
        return jnp.pad(a, ((0, rows - r), (0, cols - c)))

    # Conv weights: (Cout, Cin, kd, kh, kw) -> ((kd, kh, kw, Cin), Cout)
    w1 = tp["conv1_w"].transpose(2, 3, 4, 1, 0).reshape(125, 32)
    w2 = tp["conv2_w"].transpose(2, 3, 4, 1, 0).reshape(864, 32)
    # fc1: reorder input features from NCDHW flatten (c,d,h,w) to channels-last (d,h,w,c)
    wf1 = (tp["fc1_w"].reshape(128, 32, 6, 6, 6)
           .transpose(0, 2, 3, 4, 1).reshape(128, 6912).T)
    wf2 = tp["fc2_w"].T
    nc = tp["fc2_w"].shape[0]
    return {
        "w1":  pad2(w1, LANES, LANES).astype(jnp.bfloat16),       # (128, 128)
        "b1":  pad2(tp["conv1_b"].reshape(1, 32), 1, LANES),      # (1, 128) f32
        "w2":  pad2(w2, 896, LANES).astype(jnp.bfloat16),         # (896, 128)
        "b2":  pad2(tp["conv2_b"].reshape(1, 32), 1, LANES),
        "wf1": wf1.astype(jnp.bfloat16),                          # (6912, 128)
        "bf1": tp["fc1_b"].reshape(1, 128),
        "wf2": pad2(wf2, LANES, LANES).astype(jnp.bfloat16),      # (128, 128)
        "bf2": pad2(tp["fc2_b"].reshape(1, nc), 1, LANES),
    }


# ---------------------------------------------------------------------------
# VoxNet forward
# ---------------------------------------------------------------------------

def voxnet_forward(x, params, *, num_classes):
    """x: (B, 1, 32, 32, 32) float32, NCDHW (matching the PyTorch module)."""
    B = x.shape[0]
    # NCDHW -> channels-last NDHWC (Cin=1, so this is effectively a reshape), bf16.
    xl = x.astype(jnp.bfloat16).transpose(0, 2, 3, 4, 1)

    # conv_1 (k=5, s=2) + ReLU -> (B, 14, 14, 14, 32), lane-padded to 128 channels.
    # drop_1 = identity (inference).
    p1, (sd1, sh1, sw1) = _im2col3d_cl(xl, 5, 2, LANES)          # K: 125 -> 128
    y1 = matmul_bias_act(p1, params["w1"], params["b1"],
                         relu=True, out_dtype=jnp.bfloat16)       # (B*2744, 128)
    y1 = y1.reshape(B, sd1, sh1, sw1, LANES)[..., :32]            # drop pad channels

    # conv_2 (k=3, s=1) + ReLU -> (B, 12, 12, 12, 32), lane-padded to 128 channels.
    p2, (sd2, sh2, sw2) = _im2col3d_cl(y1, 3, 1, 896)             # K: 864 -> 896
    y2 = matmul_bias_act(p2, params["w2"], params["b2"],
                         relu=True, out_dtype=jnp.bfloat16)       # (B*1728, 128)
    y2 = y2.reshape(B, sd2, sh2, sw2, LANES)

    # MaxPool3d(2) -> (B, 6, 6, 6, 32); padded channels are zeros and stay zero.
    # drop_2 = identity (inference).
    pooled = maxpool3d_2(y2)                                      # (B*216, 128)
    dp, hp, wp = sd2 // 2, sh2 // 2, sw2 // 2
    feats = (pooled.reshape(B, dp, hp, wp, LANES)[..., :32]
             .reshape(B, dp * hp * wp * 32))                      # (B, 6912), (d,h,w,c) order

    # full: Linear(6912 -> 128) + ReLU, out: Linear(128 -> num_classes), fused.
    logits = fc_fused(feats, params["wf1"], params["bf1"],
                      params["wf2"], params["bf2"])               # (B, 128) padded
    return logits[:, :num_classes]


if __name__ == "__main__":
    num_classes = 10
    batch = 2

    key = jax.random.PRNGKey(0)
    k_x, k_p = jax.random.split(key)
    # 32^3 voxel grid is required by Linear(32 * 6 * 6 * 6, 128).
    x = jax.random.normal(k_x, (batch, 1, 32, 32, 32), jnp.float32)

    torch_params = init_torch_params(k_p, num_classes)
    params = prepare_params(torch_params)        # one-time relayout, outside jit

    fwd = jax.jit(functools.partial(voxnet_forward, num_classes=num_classes))
    logits = fwd(x, params)
    jax.block_until_ready(logits)

    assert logits.shape == (batch, num_classes), logits.shape
    assert logits.dtype == jnp.float32
    assert bool(jnp.all(jnp.isfinite(logits)))
    print("KERNEL_OK")
</pallas_src>

<mosaic_0001>
module attributes {stable_mosaic.version = 11 : i64} {
  func.func @_mm_bias_kernel(%arg0: i32, %arg1: memref<784x128xbf16, #tpu.memory_space<vmem>>, %arg2: memref<128x128xbf16, #tpu.memory_space<vmem>>, %arg3: memref<1x128xf32, #tpu.memory_space<vmem>>, %arg4: memref<784x128xbf16, #tpu.memory_space<vmem>>) attributes {dimension_semantics = [#tpu.dimension_semantics<parallel>], iteration_bounds = array<i64: 7>, scalar_prefetch = 0 : i64, scratch_operands = 0 : i64, tpu.core_type = #tpu.core_type<tc>, window_params = [{transform_indices = @transform_0, window_bounds = array<i64: 784, 128>}, {pipeline_mode = #tpu.pipeline_mode<synchronous>, transform_indices = @transform_1, window_bounds = array<i64: 128, 128>}, {pipeline_mode = #tpu.pipeline_mode<synchronous>, transform_indices = @transform_2, window_bounds = array<i64: 1, 128>}, {transform_indices = @transform_3, window_bounds = array<i64: 784, 128>}]} {
    %c0 = arith.constant 0 : index
    %c0_0 = arith.constant 0 : index
    %0 = vector.load %arg1[%c0, %c0_0] : memref<784x128xbf16, #tpu.memory_space<vmem>>, vector<784x128xbf16>
    %c0_1 = arith.constant 0 : index
    %c0_2 = arith.constant 0 : index
    %1 = vector.load %arg2[%c0_1, %c0_2] : memref<128x128xbf16, #tpu.memory_space<vmem>>, vector<128x128xbf16>
    %cst = arith.constant dense<0.000000e+00> : vector<784x128xf32>
    %2 = tpu.matmul %0, %1, %cst {dimension_numbers = #tpu.dot_dimension_numbers<[1], [0], [0], [1], [0, 0, 1, 1], [], []>} : vector<784x128xbf16>, vector<128x128xbf16>, vector<784x128xf32> -> vector<784x128xf32>
    %c0_3 = arith.constant 0 : index
    %c0_4 = arith.constant 0 : index
    %3 = vector.load %arg3[%c0_3, %c0_4] : memref<1x128xf32, #tpu.memory_space<vmem>>, vector<1x128xf32>
    %4 = vector.broadcast %3 : vector<1x128xf32> to vector<784x128xf32>
    %5 = arith.addf %2, %4 : vector<784x128xf32>
    %cst_5 = arith.constant 0.000000e+00 : f32
    %6 = vector.broadcast %cst_5 : f32 to vector<784x128xf32>
    %7 = arith.maximumf %5, %6 : vector<784x128xf32>
    %8 = arith.truncf %7 : vector<784x128xf32> to vector<784x128xbf16>
    %c0_6 = arith.constant 0 : index
    %c0_7 = arith.constant 0 : index
    %9 = vector.load %arg4[%c0_6, %c0_7] : memref<784x128xbf16, #tpu.memory_space<vmem>>, vector<784x128xbf16>
    tpu.vector_store %arg4[%c0_6, %c0_7], %8 {strides = array<i32>} : memref<784x128xbf16, #tpu.memory_space<vmem>>, vector<784x128xbf16>,
    return
  }
  func.func @transform_0(%arg0: i32) -> (i32, i32) {
    %c0_i32 = arith.constant 0 : i32
    %c0_i32_0 = arith.constant 0 : i32
    return %arg0, %c0_i32 : i32, i32
  }
  func.func @transform_1(%arg0: i32) -> (i32, i32) {
    %c0_i32 = arith.constant 0 : i32
    %c0_i32_0 = arith.constant 0 : i32
    %c0_i32_1 = arith.constant 0 : i32
    return %c0_i32, %c0_i32_0 : i32, i32
  }
  func.func @transform_2(%arg0: i32) -> (i32, i32) {
    %c0_i32 = arith.constant 0 : i32
    %c0_i32_0 = arith.constant 0 : i32
    %c0_i32_1 = arith.constant 0 : i32
    return %c0_i32, %c0_i32_0 : i32, i32
  }
  func.func @transform_3(%arg0: i32) -> (i32, i32) {
    %c0_i32 = arith.constant 0 : i32
    %c0_i32_0 = arith.constant 0 : i32
    return %arg0, %c0_i32 : i32, i32
  }
}

module attributes {stable_mosaic.version = 11 : i64} {
  func.func @_mm_bias_kernel(%arg0: i32, %arg1: memref<864x896xbf16, #tpu.memory_space<vmem>>, %arg2: memref<896x128xbf16, #tpu.memory_space<vmem>>, %arg3: memref<1x128xf32, #tpu.memory_space<vmem>>, %arg4: memref<864x128xbf16, #tpu.memory_space<vmem>>) attributes {dimension_semantics = [#tpu.dimension_semantics<parallel>], iteration_bounds = array<i64: 4>, scalar_prefetch = 0 : i64, scratch_operands = 0 : i64, tpu.core_type = #tpu.core_type<tc>, window_params = [{transform_indices = @transform_0, window_bounds = array<i64: 864, 896>}, {pipeline_mode = #tpu.pipeline_mode<synchronous>, transform_indices = @transform_1, window_bounds = array<i64: 896, 128>}, {pipeline_mode = #tpu.pipeline_mode<synchronous>, transform_indices = @transform_2, window_bounds = array<i64: 1, 128>}, {transform_indices = @transform_3, window_bounds = array<i64: 864, 128>}]} {
    %c0 = arith.constant 0 : index
    %c0_0 = arith.constant 0 : index
    %0 = vector.load %arg1[%c0, %c0_0] : memref<864x896xbf16, #tpu.memory_space<vmem>>, vector<864x896xbf16>
    %c0_1 = arith.constant 0 : index
    %c0_2 = arith.constant 0 : index
    %1 = vector.load %arg2[%c0_1, %c0_2] : memref<896x128xbf16, #tpu.memory_space<vmem>>, vector<896x128xbf16>
    %cst = arith.constant dense<0.000000e+00> : vector<864x128xf32>
    %2 = tpu.matmul %0, %1, %cst {dimension_numbers = #tpu.dot_dimension_numbers<[1], [0], [0], [1], [0, 0, 1, 1], [], []>} : vector<864x896xbf16>, vector<896x128xbf16>, vector<864x128xf32> -> vector<864x128xf32>
    %c0_3 = arith.constant 0 : index
    %c0_4 = arith.constant 0 : index
    %3 = vector.load %arg3[%c0_3, %c0_4] : memref<1x128xf32, #tpu.memory_space<vmem>>, vector<1x128xf32>
    %4 = vector.broadcast %3 : vector<1x128xf32> to vector<864x128xf32>
    %5 = arith.addf %2, %4 : vector<864x128xf32>
    %cst_5 = arith.constant 0.000000e+00 : f32
    %6 = vector.broadcast %cst_5 : f32 to vector<864x128xf32>
    %7 = arith.maximumf %5, %6 : vector<864x128xf32>
    %8 = arith.truncf %7 : vector<864x128xf32> to vector<864x128xbf16>
    %c0_6 = arith.constant 0 : index
    %c0_7 = arith.constant 0 : index
    %9 = vector.load %arg4[%c0_6, %c0_7] : memref<864x128xbf16, #tpu.memory_space<vmem>>, vector<864x128xbf16>
    tpu.vector_store %arg4[%c0_6, %c0_7], %8 {strides = array<i32>} : memref<864x128xbf16, #tpu.memory_space<vmem>>, vector<864x128xbf16>,
    return
  }
  func.func @transform_0(%arg0: i32) -> (i32, i32) {
    %c0_i32 = arith.constant 0 : i32
    %c0_i32_0 = arith.constant 0 : i32
    return %arg0, %c0_i32 : i32, i32
  }
  func.func @transform_1(%arg0: i32) -> (i32, i32) {
    %c0_i32 = arith.constant 0 : i32
    %c0_i32_0 = arith.constant 0 : i32
    %c0_i32_1 = arith.constant 0 : i32
    return %c0_i32, %c0_i32_0 : i32, i32
  }
  func.func @transform_2(%arg0: i32) -> (i32, i32) {
    %c0_i32 = arith.constant 0 : i32
    %c0_i32_0 = arith.constant 0 : i32
    %c0_i32_1 = arith.constant 0 : i32
    return %c0_i32, %c0_i32_0 : i32, i32
  }
  func.func @transform_3(%arg0: i32) -> (i32, i32) {
    %c0_i32 = arith.constant 0 : i32
    %c0_i32_0 = arith.constant 0 : i32
    return %arg0, %c0_i32 : i32, i32
  }
}

module attributes {stable_mosaic.version = 11 : i64} {
  func.func @_max8_kernel(%arg0: i32, %arg1: memref<216x128xbf16, #tpu.memory_space<vmem>>, %arg2: memref<216x128xbf16, #tpu.memory_space<vmem>>, %arg3: memref<216x128xbf16, #tpu.memory_space<vmem>>, %arg4: memref<216x128xbf16, #tpu.memory_space<vmem>>, %arg5: memref<216x128xbf16, #tpu.memory_space<vmem>>, %arg6: memref<216x128xbf16, #tpu.memory_space<vmem>>, %arg7: memref<216x128xbf16, #tpu.memory_space<vmem>>, %arg8: memref<216x128xbf16, #tpu.memory_space<vmem>>, %arg9: memref<216x128xbf16, #tpu.memory_space<vmem>>) attributes {dimension_semantics = [#tpu.dimension_semantics<parallel>], iteration_bounds = array<i64: 2>, scalar_prefetch = 0 : i64, scratch_operands = 0 : i64, tpu.core_type = #tpu.core_type<tc>, window_params = [{transform_indices = @transform_0, window_bounds = array<i64: 216, 128>}, {transform_indices = @transform_1, window_bounds = array<i64: 216, 128>}, {transform_indices = @transform_2, window_bounds = array<i64: 216, 128>}, {transform_indices = @transform_3, window_bounds = array<i64: 216, 128>}, {transform_indices = @transform_4, window_bounds = array<i64: 216, 128>}, {transform_indices = @transform_5, window_bounds = array<i64: 216, 128>}, {transform_indices = @transform_6, window_bounds = array<i64: 216, 128>}, {transform_indices = @transform_7, window_bounds = array<i64: 216, 128>}, {transform_indices = @transform_8, window_bounds = array<i64: 216, 128>}]} {
    %c0 = arith.constant 0 : index
    %c0_0 = arith.constant 0 : index
    %0 = vector.load %arg1[%c0, %c0_0] : memref<216x128xbf16, #tpu.memory_space<vmem>>, vector<216x128xbf16>
    %c0_1 = arith.constant 0 : index
    %c0_2 = arith.constant 0 : index
    %1 = vector.load %arg2[%c0_1, %c0_2] : memref<216x128xbf16, #tpu.memory_space<vmem>>, vector<216x128xbf16>
    %2 = arith.maximumf %0, %1 : vector<216x128xbf16>
    %c0_3 = arith.constant 0 : index
    %c0_4 = arith.constant 0 : index
    %3 = vector.load %arg3[%c0_3, %c0_4] : memref<216x128xbf16, #tpu.memory_space<vmem>>, vector<216x128xbf16>
    %4 = arith.maximumf %2, %3 : vector<216x128xbf16>
    %c0_5 = arith.constant 0 : index
    %c0_6 = arith.constant 0 : index
    %5 = vector.load %arg4[%c0_5, %c0_6] : memref<216x128xbf16, #tpu.memory_space<vmem>>, vector<216x128xbf16>
    %6 = arith.maximumf %4, %5 : vector<216x128xbf16>
    %c0_7 = arith.constant 0 : index
    %c0_8 = arith.constant 0 : index
    %7 = vector.load %arg5[%c0_7, %c0_8] : memref<216x128xbf16, #tpu.memory_space<vmem>>, vector<216x128xbf16>
    %8 = arith.maximumf %6, %7 : vector<216x128xbf16>
    %c0_9 = arith.constant 0 : index
    %c0_10 = arith.constant 0 : index
    %9 = vector.load %arg6[%c0_9, %c0_10] : memref<216x128xbf16, #tpu.memory_space<vmem>>, vector<216x128xbf16>
    %10 = arith.maximumf %8, %9 : vector<216x128xbf16>
    %c0_11 = arith.constant 0 : index
    %c0_12 = arith.constant 0 : index
    %11 = vector.load %arg7[%c0_11, %c0_12] : memref<216x128xbf16, #tpu.memory_space<vmem>>, vector<216x128xbf16>
    %12 = arith.maximumf %10, %11 : vector<216x128xbf16>
    %c0_13 = arith.constant 0 : index
    %c0_14 = arith.constant 0 : index
    %13 = vector.load %arg8[%c0_13, %c0_14] : memref<216x128xbf16, #tpu.memory_space<vmem>>, vector<216x128xbf16>
    %14 = arith.maximumf %12, %13 : vector<216x128xbf16>
    %c0_15 = arith.constant 0 : index
    %c0_16 = arith.constant 0 : index
    %15 = vector.load %arg9[%c0_15, %c0_16] : memref<216x128xbf16, #tpu.memory_space<vmem>>, vector<216x128xbf16>
    tpu.vector_store %arg9[%c0_15, %c0_16], %14 {strides = array<i32>} : memref<216x128xbf16, #tpu.memory_space<vmem>>, vector<216x128xbf16>,
    return
  }
  func.func @transform_0(%arg0: i32) -> (i32, i32) {
    %c0_i32 = arith.constant 0 : i32
    %c0_i32_0 = arith.constant 0 : i32
    return %arg0, %c0_i32 : i32, i32
  }
  func.func @transform_1(%arg0: i32) -> (i32, i32) {
    %c0_i32 = arith.constant 0 : i32
    %c0_i32_0 = arith.constant 0 : i32
    return %arg0, %c0_i32 : i32, i32
  }
  func.func @transform_2(%arg0: i32) -> (i32, i32) {
    %c0_i32 = arith.constant 0 : i32
    %c0_i32_0 = arith.constant 0 : i32
    return %arg0, %c0_i32 : i32, i32
  }
  func.func @transform_3(%arg0: i32) -> (i32, i32) {
    %c0_i32 = arith.constant 0 : i32
    %c0_i32_0 = arith.constant 0 : i32
    return %arg0, %c0_i32 : i32, i32
  }
  func.func @transform_4(%arg0: i32) -> (i32, i32) {
    %c0_i32 = arith.constant 0 : i32
    %c0_i32_0 = arith.constant 0 : i32
    return %arg0, %c0_i32 : i32, i32
  }
  func.func @transform_5(%arg0: i32) -> (i32, i32) {
    %c0_i32 = arith.constant 0 : i32
    %c0_i32_0 = arith.constant 0 : i32
    return %arg0, %c0_i32 : i32, i32
  }
  func.func @transform_6(%arg0: i32) -> (i32, i32) {
    %c0_i32 = arith.constant 0 : i32
    %c0_i32_0 = arith.constant 0 : i32
    return %arg0, %c0_i32 : i32, i32
  }
  func.func @transform_7(%arg0: i32) -> (i32, i32) {
    %c0_i32 = arith.constant 0 : i32
    %c0_i32_0 = arith.constant 0 : i32
    return %arg0, %c0_i32 : i32, i32
  }
  func.func @transform_8(%arg0: i32) -> (i32, i32) {
    %c0_i32 = arith.constant 0 : i32
    %c0_i32_0 = arith.constant 0 : i32
    return %arg0, %c0_i32 : i32, i32
  }
}

module attributes {stable_mosaic.version = 11 : i64} {
  func.func @_fc_fused_kernel(%arg0: memref<8x6912xbf16, #tpu.memory_space<vmem>>, %arg1: memref<6912x128xbf16, #tpu.memory_space<vmem>>, %arg2: memref<1x128xf32, #tpu.memory_space<vmem>>, %arg3: memref<128x128xbf16, #tpu.memory_space<vmem>>, %arg4: memref<1x128xf32, #tpu.memory_space<vmem>>, %arg5: memref<8x128xf32, #tpu.memory_space<vmem>>) attributes {dimension_semantics = [], scalar_prefetch = 0 : i64, scratch_operands = 0 : i64, tpu.core_type = #tpu.core_type<tc>} {
    %c0 = arith.constant 0 : index
    %c0_0 = arith.constant 0 : index
    %0 = vector.load %arg0[%c0, %c0_0] : memref<8x6912xbf16, #tpu.memory_space<vmem>>, vector<8x6912xbf16>
    %c0_1 = arith.constant 0 : index
    %c0_2 = arith.constant 0 : index
    %1 = vector.load %arg1[%c0_1, %c0_2] : memref<6912x128xbf16, #tpu.memory_space<vmem>>, vector<6912x128xbf16>
    %cst = arith.constant dense<0.000000e+00> : vector<8x128xf32>
    %2 = tpu.matmul %0, %1, %cst {dimension_numbers = #tpu.dot_dimension_numbers<[1], [0], [0], [1], [0, 0, 1, 1], [], []>} : vector<8x6912xbf16>, vector<6912x128xbf16>, vector<8x128xf32> -> vector<8x128xf32>
    %c0_3 = arith.constant 0 : index
    %c0_4 = arith.constant 0 : index
    %3 = vector.load %arg2[%c0_3, %c0_4] : memref<1x128xf32, #tpu.memory_space<vmem>>, vector<1x128xf32>
    %4 = vector.broadcast %3 : vector<1x128xf32> to vector<8x128xf32>
    %5 = arith.addf %2, %4 : vector<8x128xf32>
    %cst_5 = arith.constant 0.000000e+00 : f32
    %6 = vector.broadcast %cst_5 : f32 to vector<8x128xf32>
    %7 = arith.maximumf %5, %6 : vector<8x128xf32>
    %8 = arith.truncf %7 : vector<8x128xf32> to vector<8x128xbf16>
    %c0_6 = arith.constant 0 : index
    %c0_7 = arith.constant 0 : index
    %9 = vector.load %arg3[%c0_6, %c0_7] : memref<128x128xbf16, #tpu.memory_space<vmem>>, vector<128x128xbf16>
    %cst_8 = arith.constant dense<0.000000e+00> : vector<8x128xf32>
    %10 = tpu.matmul %8, %9, %cst_8 {dimension_numbers = #tpu.dot_dimension_numbers<[1], [0], [0], [1], [0, 0, 1, 1], [], []>} : vector<8x128xbf16>, vector<128x128xbf16>, vector<8x128xf32> -> vector<8x128xf32>
    %c0_9 = arith.constant 0 : index
    %c0_10 = arith.constant 0 : index
    %11 = vector.load %arg4[%c0_9, %c0_10] : memref<1x128xf32, #tpu.memory_space<vmem>>, vector<1x128xf32>
    %12 = vector.broadcast %11 : vector<1x128xf32> to vector<8x128xf32>
    %13 = arith.addf %10, %12 : vector<8x128xf32>
    %c0_11 = arith.constant 0 : index
    %c0_12 = arith.constant 0 : index
    %14 = vector.load %arg5[%c0_11, %c0_12] : memref<8x128xf32, #tpu.memory_space<vmem>>, vector<8x128xf32>
    tpu.vector_store %arg5[%c0_11, %c0_12], %13 {strides = array<i32>} : memref<8x128xf32, #tpu.memory_space<vmem>>, vector<8x128xf32>,
    return
  }
}

</mosaic_0001>

<bundles_post_ra>
// kernel: voxnet_forward.4
= control target key start
LH: loop header
LB: loop body
LE: loop exit
PB: predicated region body
PF: predicated region fallthrough
CT: control target
= control target key end

     0   :  { %s2645_s12 = smov 0   ;;  %s3012_s0 = inlined_call_operand.vmem [shape: bf16[5488,128], index: 0, kind: input, shape index: {}]   ;;  %s3013_s1 = inlined_call_operand.vmem [shape: bf16[128,128], index: 1, kind: input, shape index: {}]   ;;  %s3014_s2 = inlined_call_operand.vmem [shape: f32[1,128], index: 2, kind: input, shape index: {}]   ;;  %s3015_s3 = inlined_call_operand.vmem [shape: bf16[5488,128], index: 3, kind: output, shape index: {}]  }
   0x1 LB: > { %s1707_s13 = sadd.s32 4294967295, %s2621_s12   ;;  %p1711_p0 = scmp.ge.s32.totalorder %s2621_s12, 1  ;;  %s2621_s12 = sphi %s2645_s12, %s13_s12  }
   0x2   : > { %p138_p1 = scmp.lt.s32.totalorder %s2621_s12, 8 }
   0x4   : > { %p139_p2 = pnand %p1711_p0, %p138_p1 }
   0x5   : > { %v2558_v0 = vld [vmem:[%s3013_s1] sm:$0xff] (!%p139_p2)   ;;  %v2623_v1 = vmov (!%p139_p2), 0.0   ;;  %v2559_v2 = vld [vmem:[%s3013_s1 + $0x8] sm:$0xff] (!%p139_p2)   ;;  %s162_s18 = smul.u32 (!%p139_p2), 98, %s1707_s13  ;;  %vm2624_vm0 = vmmov (!%p139_p2), 0   ;;  %v2560_v3 = vld [vmem:[%s3013_s1 + $0x10] sm:$0xff] (!%p139_p2)  }
   0x6   : > { %142 = sbr.rel (%p139_p2) target bundleno = 451 (0x1c3), region = 32  ;;  %2320 = vmatprep.subr.bf16.mxu0 (!%p139_p2), %v2623_v1  ;;  %2532 = vmatprep.subr.bf16.mxu1 (!%p139_p2), %v2623_v1  ;;  %v2561_v4 = vld [vmem:[%s3013_s1 + $0x18] sm:$0xff] (!%p139_p2)   ;;  %v2562_v5 = vld [vmem:[%s3013_s1 + $0x20] sm:$0xff] (!%p139_p2)   ;;  %v2563_v6 = vld [vmem:[%s3013_s1 + $0x28] sm:$0xff] (!%p139_p2)  }
   0x7   : > { %2321 = vmatpush3.bf16.msra.mxu0 (!%p139_p2), %v2558_v0  ;;  %2540 = vmatpush3.bf16.msra.mxu1 (!%p139_p2), %v2558_v0  ;;  %p163_p3 = scmp.lt.s32.totalorder (!%p139_p2), %s162_s18, 685  ;;  %v2564_v7 = vld [vmem:[%s3013_s1 + $0x30] sm:$0xff] (!%p139_p2)   ;;  %v2565_v8 = vld [vmem:[%s3013_s1 + $0x38] sm:$0xff] (!%p139_p2)   ;;  %v2853_v58 = vld [vmem:[%s3014_s2] ss:$0 sm:$0xff] (!%p139_p2) }
   0x8   : > { %2322 = vmatprep.subr.bf16.mxu0 (!%p139_p2), %v2623_v1  ;;  %2533 = vmatprep.subr.bf16.mxu1 (!%p139_p2), %v2623_v1 }
   0x9   : > { %2336 = vmatprep.mubr.msk.bf16.mxu0 (!%p139_p2), %vm2624_vm0, %v2623_v1  ;;  %2436 = vmatprep.mubr.msk.bf16.mxu1 (!%p139_p2), %vm2624_vm0, %v2623_v1 }
   0xb   : > { %2323 = vmatpush3.bf16.msra.mxu0 (!%p139_p2), %v2559_v2  ;;  %2541 = vmatpush3.bf16.msra.mxu1 (!%p139_p2), %v2559_v2 }
   0xc   : > { %2324 = vmatprep.subr.bf16.mxu0 (!%p139_p2), %v2623_v1  ;;  %2534 = vmatprep.subr.bf16.mxu1 (!%p139_p2), %v2623_v1 }
   0xd   : > { %s3017_s18 = smov (!%p163_p3, %s162_s18), 685 }
   0xe   : > { %s1712_s21 = sshll.u32 %s3017_s18, 2 }
   0xf   : > { %s2680_s24 = scalar_lea.vmem %s3012_s0, %s1712_s21  ;;  %2325 = vmatpush3.bf16.msra.mxu0 %v2560_v3  ;;  %2542 = vmatpush3.bf16.msra.mxu1 %v2560_v3  ;;  %s2864_s13 = scalar_lea.vmem %s3015_s3, %s1712_s21 }
  0x10   : > { %2326 = vmatprep.subr.bf16.mxu0 %v2623_v1  ;;  %2535 = vmatprep.subr.bf16.mxu1 %v2623_v1  ;;  %v2566_v9 = vld [vmem:[%s2680_s24] sm:$0xff]   ;;  %v2567_v10 = vld [vmem:[%s2680_s24 + $0xc8] sm:$0xff]   ;;  %v2569_v12 = vld [vmem:[%s2680_s24 + $0xd0] sm:$0xff]  }
  0x11   : > { %v2568_v11 = vld [vmem:[%s2680_s24 + $0x8] sm:$0xff]   ;;  %v2570_v13 = vld [vmem:[%s2680_s24 + $0x10] sm:$0xff]   ;;  %v2571_v14 = vld [vmem:[%s2680_s24 + $0xd8] sm:$0xff]  }
  0x12   : > { %v2572_v15 = vld [vmem:[%s2680_s24 + $0x18] sm:$0xff]   ;;  %v2573_v16 = vld [vmem:[%s2680_s24 + $0xe0] sm:$0xff]   ;;  %v2575_v18 = vld [vmem:[%s2680_s24 + $0xe8] sm:$0xff]  }
  0x13   : > { %2327 = vmatpush3.bf16.msra.mxu0 %v2561_v4  ;;  %2543 = vmatpush3.bf16.msra.mxu1 %v2561_v4  ;;  %v2574_v17 = vld [vmem:[%s2680_s24 + $0x20] sm:$0xff]   ;;  %v2576_v19 = vld [vmem:[%s2680_s24 + $0x28] sm:$0xff]   ;;  %v2577_v20 = vld [vmem:[%s2680_s24 + $0xf0] sm:$0xff]  }
  0x14   : > { %2328 = vmatprep.subr.bf16.mxu0 %v2623_v1  ;;  %2536 = vmatprep.subr.bf16.mxu1 %v2623_v1  ;;  %v2578_v21 = vld [vmem:[%s2680_s24 + $0x30] sm:$0xff]   ;;  %v2579_v22 = vld [vmem:[%s2680_s24 + $0xf8] sm:$0xff]   ;;  %v2581_v24 = vld [vmem:[%s2680_s24 + $0x100] sm:$0xff]  }
  0x15   : > { %v2580_v23 = vld [vmem:[%s2680_s24 + $0x38] sm:$0xff]   ;;  %v2582_v25 = vld [vmem:[%s2680_s24 + $0x40] sm:$0xff]   ;;  %v2583_v26 = vld [vmem:[%s2680_s24 + $0x108] sm:$0xff]  }
  0x16   : > { %v2584_v27 = vld [vmem:[%s2680_s24 + $0x48] sm:$0xff]   ;;  %v2585_v28 = vld [vmem:[%s2680_s24 + $0x110] sm:$0xff]   ;;  %v2587_v30 = vld [vmem:[%s2680_s24 + $0x118] sm:$0xff]  }
  0x17   : > { %2329 = vmatpush3.bf16.msra.mxu0 %v2562_v5  ;;  %2544 = vmatpush3.bf16.msra.mxu1 %v2562_v5  ;;  %v2586_v29 = vld [vmem:[%s2680_s24 + $0x50] sm:$0xff]   ;;  %v2588_v31 = vld [vmem:[%s2680_s24 + $0x58] sm:$0xff]   ;;  %v2589_v32 = vld [vmem:[%s2680_s24 + $0x120] sm:$0xff]  }
  0x18   : > { %2330 = vmatprep.subr.bf16.mxu0 %v2623_v1  ;;  %2537 = vmatprep.subr.bf16.mxu1 %v2623_v1  ;;  %v2590_v33 = vld [vmem:[%s2680_s24 + $0x60] sm:$0xff]   ;;  %v2591_v34 = vld [vmem:[%s2680_s24 + $0x128] sm:$0xff]   ;;  %v2593_v36 = vld [vmem:[%s2680_s24 + $0x130] sm:$0xff]  }
  0x19   : > { %v2592_v35 = vld [vmem:[%s2680_s24 + $0x68] sm:$0xff]   ;;  %v2594_v37 = vld [vmem:[%s2680_s24 + $0x70] sm:$0xff]   ;;  %v2595_v38 = vld [vmem:[%s2680_s24 + $0x138] sm:$0xff]  }
  0x1a   : > { %v2596_v39 = vld [vmem:[%s2680_s24 + $0x78] sm:$0xff]   ;;  %v2597_v40 = vld [vmem:[%s2680_s24 + $0x140] sm:$0xff]   ;;  %v2599_v42 = vld [vmem:[%s2680_s24 + $0x148] sm:$0xff]  }
  0x1b   : > { %2331 = vmatpush3.bf16.msra.mxu0 %v2563_v6  ;;  %2545 = vmatpush3.bf16.msra.mxu1 %v2563_v6  ;;  %v2598_v41 = vld [vmem:[%s2680_s24 + $0x80] sm:$0xff]   ;;  %v2600_v43 = vld [vmem:[%s2680_s24 + $0x88] sm:$0xff]   ;;  %v2601_v44 = vld [vmem:[%s2680_s24 + $0x150] sm:$0xff]  }
  0x1c   : > { %2332 = vmatprep.subr.bf16.mxu0 %v2623_v1  ;;  %2538 = vmatprep.subr.bf16.mxu1 %v2623_v1  ;;  %v2602_v45 = vld [vmem:[%s2680_s24 + $0x90] sm:$0xff]   ;;  %v2603_v46 = vld [vmem:[%s2680_s24 + $0x158] sm:$0xff]   ;;  %v2605_v48 = vld [vmem:[%s2680_s24 + $0x160] sm:$0xff]  }
  0x1d   : > { %v2604_v47 = vld [vmem:[%s2680_s24 + $0x98] sm:$0xff]   ;;  %v2606_v49 = vld [vmem:[%s2680_s24 + $0xa0] sm:$0xff]   ;;  %v2607_v50 = vld [vmem:[%s2680_s24 + $0x168] sm:$0xff]  }
  0x1e   : > { %v2608_v51 = vld [vmem:[%s2680_s24 + $0xa8] sm:$0xff]   ;;  %v2609_v52 = vld [vmem:[%s2680_s24 + $0x170] sm:$0xff]   ;;  %v2611_v54 = vld [vmem:[%s2680_s24 + $0x178] sm:$0xff]  }
  0x1f   : > { %2333 = vmatpush3.bf16.msra.mxu0 %v2564_v7  ;;  %2546 = vmatpush3.bf16.msra.mxu1 %v2564_v7  ;;  %v2610_v53 = vld [vmem:[%s2680_s24 + $0xb0] sm:$0xff]   ;;  %v2612_v55 = vld [vmem:[%s2680_s24 + $0xb8] sm:$0xff]   ;;  %v2613_v56 = vld [vmem:[%s2680_s24 + $0x180] sm:$0xff]  }
  0x20   : > { %2334 = vmatprep.subr.bf16.mxu0 %v2623_v1  ;;  %2539 = vmatprep.subr.bf16.mxu1 %v2623_v1  ;;  %v2614_v57 = vld [vmem:[%s2680_s24 + $0xc0] sm:$0xff]  }
  0x23   : > { %2335 = vmatpush3.bf16.msra.mxu0 %v2565_v8  ;;  %2547 = vmatpush3.bf16.msra.mxu1 %v2565_v8 }
  0x26   : > { %2337 = vmatmul.mubr.bf16.vlgmr.msra.gmra.mrb[0].mxu0 %v2566_v9  ;;  %2437 = vmatmul.mubr.bf16.vlgmr.msra.gmra.mrb[0].mxu1 %v2567_v10 }
  0x27   : > { %2340 = vmatprep.mubr.msk.bf16.mxu0 %vm2624_vm0, %v2623_v1  ;;  %2440 = vmatprep.mubr.msk.bf16.mxu1 %vm2624_vm0, %v2623_v1 }
  0x2e   : > { %2341 = vmatmul.mubr.bf16.gmra.mrb[4].mxu0 %v2568_v11  ;;  %2441 = vmatmul.mubr.bf16.gmra.mrb[4].mxu1 %v2569_v12 }
  0x2f   : > { %2344 = vmatprep.mubr.msk.bf16.mxu0 %vm2624_vm0, %v2623_v1  ;;  %2444 = vmatprep.mubr.msk.bf16.mxu1 %vm2624_vm0, %v2623_v1 }
  0x36   : > { %2345 = vmatmul.mubr.bf16.gmra.mrb[8].mxu0 %v2570_v13  ;;  %2445 = vmatmul.mubr.bf16.gmra.mrb[8].mxu1 %v2571_v14 }
  0x37   : > { %2348 = vmatprep.mubr.msk.bf16.mxu0 %vm2624_vm0, %v2623_v1  ;;  %2448 = vmatprep.mubr.msk.bf16.mxu1 %vm2624_vm0, %v2623_v1 }
  0x3e   : > { %2349 = vmatmul.mubr.bf16.gmra.mrb[12].mxu0 %v2572_v15  ;;  %2449 = vmatmul.mubr.bf16.gmra.mrb[12].mxu1 %v2573_v16 }
  0x3f   : > { %2352 = vmatprep.mubr.msk.bf16.mxu0 %vm2624_vm0, %v2623_v1  ;;  %2452 = vmatprep.mubr.msk.bf16.mxu1 %vm2624_vm0, %v2623_v1 }
  0x46   : > { %2353 = vmatmul.mubr.bf16.gmra.mrb[16].mxu0 %v2574_v17  ;;  %2453 = vmatmul.mubr.bf16.gmra.mrb[16].mxu1 %v2575_v18 }
  0x47   : > { %2356 = vmatprep.mubr.msk.bf16.mxu0 %vm2624_vm0, %v2623_v1  ;;  %2456 = vmatprep.mubr.msk.bf16.mxu1 %vm2624_vm0, %v2623_v1 }
  0x4e   : > { %2357 = vmatmul.mubr.bf16.gmra.mrb[20].mxu0 %v2576_v19  ;;  %2457 = vmatmul.mubr.bf16.gmra.mrb[20].mxu1 %v2577_v20 }
  0x4f   : > { %2360 = vmatprep.mubr.msk.bf16.mxu0 %vm2624_vm0, %v2623_v1  ;;  %2460 = vmatprep.mubr.msk.bf16.mxu1 %vm2624_vm0, %v2623_v1 }
  0x56   : > { %2361 = vmatmul.mubr.bf16.gmra.mrb[24].mxu0 %v2578_v21  ;;  %2461 = vmatmul.mubr.bf16.gmra.mrb[24].mxu1 %v2579_v22 }
  0x57   : > { %2364 = vmatprep.mubr.msk.bf16.mxu0 %vm2624_vm0, %v2623_v1  ;;  %2464 = vmatprep.mubr.msk.bf16.mxu1 %vm2624_vm0, %v2623_v1 }
  0x5e   : > { %2365 = vmatmul.mubr.bf16.gmra.mrb[28].mxu0 %v2580_v23  ;;  %2465 = vmatmul.mubr.bf16.gmra.mrb[28].mxu1 %v2581_v24 }
  0x5f   : > { %2368 = vmatprep.mubr.msk.bf16.mxu0 %vm2624_vm0, %v2623_v1  ;;  %2468 = vmatprep.mubr.msk.bf16.mxu1 %vm2624_vm0, %v2623_v1 }
  0x66   : > { %2369 = vmatmul.mubr.bf16.gmra.mrb[32].mxu0 %v2582_v25  ;;  %2469 = vmatmul.mubr.bf16.gmra.mrb[32].mxu1 %v2583_v26 }
  0x67   : > { %2372 = vmatprep.mubr.msk.bf16.mxu0 %vm2624_vm0, %v2623_v1  ;;  %2472 = vmatprep.mubr.msk.bf16.mxu1 %vm2624_vm0, %v2623_v1 }
  0x6e   : > { %2373 = vmatmul.mubr.bf16.gmra.mrb[36].mxu0 %v2584_v27  ;;  %2473 = vmatmul.mubr.bf16.gmra.mrb[36].mxu1 %v2585_v28 }
  0x6f   : > { %2376 = vmatprep.mubr.msk.bf16.mxu0 %vm2624_vm0, %v2623_v1  ;;  %2476 = vmatprep.mubr.msk.bf16.mxu1 %vm2624_vm0, %v2623_v1 }
  0x76   : > { %2377 = vmatmul.mubr.bf16.gmra.mrb[40].mxu0 %v2586_v29  ;;  %2477 = vmatmul.mubr.bf16.gmra.mrb[40].mxu1 %v2587_v30 }
  0x77   : > { %2380 = vmatprep.mubr.msk.bf16.mxu0 %vm2624_vm0, %v2623_v1  ;;  %2480 = vmatprep.mubr.msk.bf16.mxu1 %vm2624_vm0, %v2623_v1 }
  0x7e   : > { %2381 = vmatmul.mubr.bf16.gmra.mrb[44].mxu0 %v2588_v31  ;;  %2481 = vmatmul.mubr.bf16.gmra.mrb[44].mxu1 %v2589_v32 }
  0x7f   : > { %2384 = vmatprep.mubr.msk.bf16.mxu0 %vm2624_vm0, %v2623_v1  ;;  %2484 = vmatprep.mubr.msk.bf16.mxu1 %vm2624_vm0, %v2623_v1 }
  0x86   : > { %2385 = vmatmul.mubr.bf16.gmra.mrb[48].mxu0 %v2590_v33  ;;  %2485 = vmatmul.mubr.bf16.gmra.mrb[48].mxu1 %v2591_v34 }
  0x87   : > { %2388 = vmatprep.mubr.msk.bf16.mxu0 %vm2624_vm0, %v2623_v1  ;;  %2488 = vmatprep.mubr.msk.bf16.mxu1 %vm2624_vm0, %v2623_v1 }
  0x8e   : > { %2389 = vmatmul.mubr.bf16.gmra.mrb[52].mxu0 %v2592_v35  ;;  %2489 = vmatmul.mubr.bf16.gmra.mrb[52].mxu1 %v2593_v36 }
  0x8f   : > { %2392 = vmatprep.mubr.msk.bf16.mxu0 %vm2624_vm0, %v2623_v1  ;;  %2492 = vmatprep.mubr.msk.bf16.mxu1 %vm2624_vm0, %v2623_v1 }
  0x96   : > { %2393 = vmatmul.mubr.bf16.gmra.mrb[56].mxu0 %v2594_v37  ;;  %2493 = vmatmul.mubr.bf16.gmra.mrb[56].mxu1 %v2595_v38 }
  0x97   : > { %2396 = vmatprep.mubr.msk.bf16.mxu0 %vm2624_vm0, %v2623_v1  ;;  %2496 = vmatprep.mubr.msk.bf16.mxu1 %vm2624_vm0, %v2623_v1 }
  0x9e   : > { %2397 = vmatmul.mubr.bf16.gmra.mrb[60].mxu0 %v2596_v39  ;;  %2497 = vmatmul.mubr.bf16.gmra.mrb[60].mxu1 %v2597_v40 }
  0x9f   : > { %2400 = vmatprep.mubr.msk.bf16.mxu0 %vm2624_vm0, %v2623_v1  ;;  %2500 = vmatprep.mubr.msk.bf16.mxu1 %vm2624_vm0, %v2623_v1 }
  0xa6   : > { %2401 = vmatmul.mubr.bf16.gmra.mrb[64].mxu0 %v2598_v41  ;;  %2501 = vmatmul.mubr.bf16.gmra.mrb[64].mxu1 %v2599_v42 }
  0xa7   : > { %2404 = vmatprep.mubr.msk.bf16.mxu0 %vm2624_vm0, %v2623_v1  ;;  %2504 = vmatprep.mubr.msk.bf16.mxu1 %vm2624_vm0, %v2623_v1 }
  0xae   : > { %2405 = vmatmul.mubr.bf16.gmra.mrb[68].mxu0 %v2600_v43  ;;  %2505 = vmatmul.mubr.bf16.gmra.mrb[68].mxu1 %v2601_v44 }
  0xaf   : > { %2408 = vmatprep.mubr.msk.bf16.mxu0 %vm2624_vm0, %v2623_v1  ;;  %2508 = vmatprep.mubr.msk.bf16.mxu1 %vm2624_vm0, %v2623_v1 }
  0xb6   : > { %2409 = vmatmul.mubr.bf16.gmra.mrb[72].mxu0 %v2602_v45  ;;  %2509 = vmatmul.mubr.bf16.gmra.mrb[72].mxu1 %v2603_v46 }
  0xb7   : > { %2412 = vmatprep.mubr.msk.bf16.mxu0 %vm2624_vm0, %v2623_v1  ;;  %2512 = vmatprep.mubr.msk.bf16.mxu1 %vm2624_vm0, %v2623_v1 }
  0xbe   : > { %2413 = vmatmul.mubr.bf16.gmra.mrb[76].mxu0 %v2604_v47  ;;  %2513 = vmatmul.mubr.bf16.gmra.mrb[76].mxu1 %v2605_v48 }
  0xbf   : > { %2416 = vmatprep.mubr.msk.bf16.mxu0 %vm2624_vm0, %v2623_v1  ;;  %2516 = vmatprep.mubr.msk.bf16.mxu1 %vm2624_vm0, %v2623_v1 }
  0xc6   : > { %2417 = vmatmul.mubr.bf16.gmra.mrb[80].mxu0 %v2606_v49  ;;  %2517 = vmatmul.mubr.bf16.gmra.mrb[80].mxu1 %v2607_v50 }
  0xc7   : > { %2420 = vmatprep.mubr.msk.bf16.mxu0 %vm2624_vm0, %v2623_v1  ;;  %2520 = vmatprep.mubr.msk.bf16.mxu1 %vm2624_vm0, %v2623_v1 }
  0xce   : > { %2421 = vmatmul.mubr.bf16.gmra.mrb[84].mxu0 %v2608_v51  ;;  %2521 = vmatmul.mubr.bf16.gmra.mrb[84].mxu1 %v2609_v52 }
  0xcf   : > { %2424 = vmatprep.mubr.msk.bf16.mxu0 %vm2624_vm0, %v2623_v1  ;;  %2524 = vmatprep.mubr.msk.bf16.mxu1 %vm2624_vm0, %v2623_v1 }
  0xd6   : > { %2425 = vmatmul.mubr.bf16.gmra.mrb[88].mxu0 %v2610_v53  ;;  %2525 = vmatmul.mubr.bf16.gmra.mrb[88].mxu1 %v2611_v54 }
  0xd7   : > { %2428 = vmatprep.mubr.msk.bf16.mxu0 %vm2624_vm0, %v2623_v1  ;;  %2528 = vmatprep.mubr.msk.bf16.mxu1 %vm2624_vm0, %v2623_v1 }
  0xde   : > { %2429 = vmatmul.mubr.bf16.gmra.mrb[92].mxu0 %v2612_v55  ;;  %2529 = vmatmul.mubr.bf16.gmra.mrb[92].mxu1 %v2613_v56 }
  0xdf   : > { %2432 = vmatprep.mubr.msk.bf16.mxu0 %vm2624_vm0, %v2623_v1 }
  0xe6   : > { %2433 = vmatmul.mubr.bf16.gmra.mrb[96].mxu0 %v2614_v57 }
  0xf9   : > { %v672_v59 = vpop.f32.mrb[0].mxu0  ;;  %v872_v60 = vpop.f32.mrb[0].mxu1 }
  0xfa   : > { %v673_v61 = vadd.f32 %v2853_v58, %v672_v59  ;;  %v2338_v62 = vpop.f32.mrb[1].mxu0  ;;  %v873_v63 = vadd.f32 %v2853_v58, %v872_v60  ;;  %v2438_v0 = vpop.f32.mrb[1].mxu1 }
  0xfb   : > { %v675_v2 = vpop.f32.mrb[2].mxu0  ;;  %v875_v3 = vpop.f32.mrb[2].mxu1 }
  0xfc   : > { %v676_v1 = vadd.f32 %v2853_v58, %v675_v2  ;;  %v2339_v4 = vpop.f32.mrb[3].mxu0  ;;  %v1113_v5 = vmax.f32 %v873_v63, 0.0  ;;  %v876_v6 = vadd.f32 %v2853_v58, %v875_v3  ;;  %v2439_v7 = vpop.f32.mrb[3].mxu1  ;;  %v1063_v8 = vmax.f32 %v673_v61, 0.0 }
  0xfe   : > { %v1064_v9 = vmax.f32 %v676_v1, 0.0  ;;  %v1114_v10 = vmax.f32 %v876_v6, 0.0 }
 0x100   : > { %v1973_v11 = vpack.c.bf16 %v1064_v9, %v1063_v8  ;;  %v2098_v12 = vpack.c.bf16 %v1114_v10, %v1113_v5 }
 0x101   : > { %v680_v13 = vpop.f32.mrb[4].mxu0  ;;  %v880_v14 = vpop.f32.mrb[4].mxu1 }
 0x102   : > { %1974 = vst [vmem:[%s2864_s13] sm:$0xff] %v1973_v11   ;;  %2239 = vst [vmem:[%s2864_s13 + $0xc8] sm:$0xff] %v2098_v12   ;;  %v681_v15 = vadd.f32 %v2853_v58, %v680_v13  ;;  %v2342_v16 = vpop.f32.mrb[5].mxu0  ;;  %v881_v17 = vadd.f32 %v2853_v58, %v880_v14  ;;  %v2442_v18 = vpop.f32.mrb[5].mxu1 }
 0x103   : > { %v683_v19 = vpop.f32.mrb[6].mxu0  ;;  %v883_v20 = vpop.f32.mrb[6].mxu1 }
 0x104   : > { %v684_v21 = vadd.f32 %v2853_v58, %v683_v19  ;;  %v2343_v22 = vpop.f32.mrb[7].mxu0  ;;  %v1115_v23 = vmax.f32 %v881_v17, 0.0  ;;  %v884_v24 = vadd.f32 %v2853_v58, %v883_v20  ;;  %v2443_v25 = vpop.f32.mrb[7].mxu1  ;;  %v1065_v26 = vmax.f32 %v681_v15, 0.0 }
 0x106   : > { %v1066_v27 = vmax.f32 %v684_v21, 0.0  ;;  %v1116_v28 = vmax.f32 %v884_v24, 0.0 }
 0x108   : > { %v1978_v29 = vpack.c.bf16 %v1066_v27, %v1065_v26  ;;  %v2103_v30 = vpack.c.bf16 %v1116_v28, %v1115_v23 }
 0x109   : > { %v688_v31 = vpop.f32.mrb[8].mxu0  ;;  %v888_v32 = vpop.f32.mrb[8].mxu1 }
 0x10a   : > { %2215 = vst [vmem:[%s2864_s13 + $0x8] sm:$0xff] %v1978_v29   ;;  %2240 = vst [vmem:[%s2864_s13 + $0xd0] sm:$0xff] %v2103_v30   ;;  %v689_v33 = vadd.f32 %v2853_v58, %v688_v31  ;;  %v2346_v34 = vpop.f32.mrb[9].mxu0  ;;  %v889_v35 = vadd.f32 %v2853_v58, %v888_v32  ;;  %v2446_v36 = vpop.f32.mrb[9].mxu1 }
 0x10b   : > { %v691_v37 = vpop.f32.mrb[10].mxu0  ;;  %v891_v38 = vpop.f32.mrb[10].mxu1 }
 0x10c   : > { %v692_v39 = vadd.f32 %v2853_v58, %v691_v37  ;;  %v2347_v40 = vpop.f32.mrb[11].mxu0  ;;  %v1117_v41 = vmax.f32 %v889_v35, 0.0  ;;  %v892_v42 = vadd.f32 %v2853_v58, %v891_v38  ;;  %v2447_v43 = vpop.f32.mrb[11].mxu1  ;;  %v1067_v44 = vmax.f32 %v689_v33, 0.0 }
 0x10e   : > { %v1068_v45 = vmax.f32 %v692_v39, 0.0  ;;  %v1118_v46 = vmax.f32 %v892_v42, 0.0 }
 0x110   : > { %v1983_v47 = vpack.c.bf16 %v1068_v45, %v1067_v44  ;;  %v2108_v48 = vpack.c.bf16 %v1118_v46, %v1117_v41 }
 0x111   : > { %v696_v49 = vpop.f32.mrb[12].mxu0  ;;  %v896_v50 = vpop.f32.mrb[12].mxu1 }
 0x112   : > { %2216 = vst [vmem:[%s2864_s13 + $0x10] sm:$0xff] %v1983_v47   ;;  %2241 = vst [vmem:[%s2864_s13 + $0xd8] sm:$0xff] %v2108_v48   ;;  %v697_v51 = vadd.f32 %v2853_v58, %v696_v49  ;;  %v2350_v52 = vpop.f32.mrb[13].mxu0  ;;  %v897_v53 = vadd.f32 %v2853_v58, %v896_v50  ;;  %v2450_v54 = vpop.f32.mrb[13].mxu1 }
 0x113   : > { %v699_v55 = vpop.f32.mrb[14].mxu0  ;;  %v899_v56 = vpop.f32.mrb[14].mxu1 }
 0x114   : > { %v700_v57 = vadd.f32 %v2853_v58, %v699_v55  ;;  %v2351_v59 = vpop.f32.mrb[15].mxu0  ;;  %v1119_v60 = vmax.f32 %v897_v53, 0.0  ;;  %v900_v61 = vadd.f32 %v2853_v58, %v899_v56  ;;  %v2451_v62 = vpop.f32.mrb[15].mxu1  ;;  %v1069_v63 = vmax.f32 %v697_v51, 0.0 }
 0x116   : > { %v1070_v0 = vmax.f32 %v700_v57, 0.0  ;;  %v1120_v2 = vmax.f32 %v900_v61, 0.0 }
 0x118   : > { %v1988_v3 = vpack.c.bf16 %v1070_v0, %v1069_v63  ;;  %v2113_v1 = vpack.c.bf16 %v1120_v2, %v1119_v60 }
 0x119   : > { %v704_v4 = vpop.f32.mrb[16].mxu0  ;;  %v904_v5 = vpop.f32.mrb[16].mxu1 }
 0x11a   : > { %2217 = vst [vmem:[%s2864_s13 + $0x18] sm:$0xff] %v1988_v3   ;;  %2242 = vst [vmem:[%s2864_s13 + $0xe0] sm:$0xff] %v2113_v1   ;;  %v705_v6 = vadd.f32 %v2853_v58, %v704_v4  ;;  %v2354_v7 = vpop.f32.mrb[17].mxu0  ;;  %v905_v8 = vadd.f32 %v2853_v58, %v904_v5  ;;  %v2454_v9 = vpop.f32.mrb[17].mxu1 }
 0x11b   : > { %v707_v10 = vpop.f32.mrb[18].mxu0  ;;  %v907_v11 = vpop.f32.mrb[18].mxu1 }
 0x11c   : > { %v708_v12 = vadd.f32 %v2853_v58, %v707_v10  ;;  %v2355_v13 = vpop.f32.mrb[19].mxu0  ;;  %v1121_v14 = vmax.f32 %v905_v8, 0.0  ;;  %v908_v15 = vadd.f32 %v2853_v58, %v907_v11  ;;  %v2455_v16 = vpop.f32.mrb[19].mxu1  ;;  %v1071_v17 = vmax.f32 %v705_v6, 0.0 }
 0x11e   : > { %v1072_v18 = vmax.f32 %v708_v12, 0.0  ;;  %v1122_v19 = vmax.f32 %v908_v15, 0.0 }
 0x120   : > { %v1993_v20 = vpack.c.bf16 %v1072_v18, %v1071_v17  ;;  %v2118_v21 = vpack.c.bf16 %v1122_v19, %v1121_v14 }
 0x121   : > { %v712_v22 = vpop.f32.mrb[20].mxu0  ;;  %v912_v23 = vpop.f32.mrb[20].mxu1 }
 0x122   : > { %2218 = vst [vmem:[%s2864_s13 + $0x20] sm:$0xff] %v1993_v20   ;;  %2243 = vst [vmem:[%s2864_s13 + $0xe8] sm:$0xff] %v2118_v21   ;;  %v713_v24 = vadd.f32 %v2853_v58, %v712_v22  ;;  %v2358_v25 = vpop.f32.mrb[21].mxu0  ;;  %v913_v26 = vadd.f32 %v2853_v58, %v912_v23  ;;  %v2458_v27 = vpop.f32.mrb[21].mxu1 }
 0x123   : > { %v715_v28 = vpop.f32.mrb[22].mxu0  ;;  %v915_v29 = vpop.f32.mrb[22].mxu1 }
 0x124   : > { %v716_v30 = vadd.f32 %v2853_v58, %v715_v28  ;;  %v2359_v31 = vpop.f32.mrb[23].mxu0  ;;  %v1123_v32 = vmax.f32 %v913_v26, 0.0  ;;  %v916_v33 = vadd.f32 %v2853_v58, %v915_v29  ;;  %v2459_v34 = vpop.f32.mrb[23].mxu1  ;;  %v1073_v35 = vmax.f32 %v713_v24, 0.0 }
 0x126   : > { %v1074_v36 = vmax.f32 %v716_v30, 0.0  ;;  %v1124_v37 = vmax.f32 %v916_v33, 0.0 }
 0x128   : > { %v1998_v38 = vpack.c.bf16 %v1074_v36, %v1073_v35  ;;  %v2123_v39 = vpack.c.bf16 %v1124_v37, %v1123_v32 }
 0x129   : > { %v720_v40 = vpop.f32.mrb[24].mxu0  ;;  %v920_v41 = vpop.f32.mrb[24].mxu1 }
 0x12a   : > { %2219 = vst [vmem:[%s2864_s13 + $0x28] sm:$0xff] %v1998_v38   ;;  %2244 = vst [vmem:[%s2864_s13 + $0xf0] sm:$0xff] %v2123_v39   ;;  %v721_v42 = vadd.f32 %v2853_v58, %v720_v40  ;;  %v2362_v43 = vpop.f32.mrb[25].mxu0  ;;  %v921_v44 = vadd.f32 %v2853_v58, %v920_v41  ;;  %v2462_v45 = vpop.f32.mrb[25].mxu1 }
 0x12b   : > { %v723_v46 = vpop.f32.mrb[26].mxu0  ;;  %v923_v47 = vpop.f32.mrb[26].mxu1 }
 0x12c   : > { %v724_v48 = vadd.f32 %v2853_v58, %v723_v46  ;;  %v2363_v49 = vpop.f32.mrb[27].mxu0  ;;  %v1125_v50 = vmax.f32 %v921_v44, 0.0  ;;  %v924_v51 = vadd.f32 %v2853_v58, %v923_v47  ;;  %v2463_v52 = vpop.f32.mrb[27].mxu1  ;;  %v1075_v53 = vmax.f32 %v721_v42, 0.0 }
 0x12e   : > { %v1076_v54 = vmax.f32 %v724_v48, 0.0  ;;  %v1126_v55 = vmax.f32 %v924_v51, 0.0 }
 0x130   : > { %v2003_v56 = vpack.c.bf16 %v1076_v54, %v1075_v53  ;;  %v2128_v57 = vpack.c.bf16 %v1126_v55, %v1125_v50 }
 0x131   : > { %v728_v59 = vpop.f32.mrb[28].mxu0  ;;  %v928_v60 = vpop.f32.mrb[28].mxu1 }
 0x132   : > { %2220 = vst [vmem:[%s2864_s13 + $0x30] sm:$0xff] %v2003_v56   ;;  %2245 = vst [vmem:[%s2864_s13 + $0xf8] sm:$0xff] %v2128_v57   ;;  %v729_v61 = vadd.f32 %v2853_v58, %v728_v59  ;;  %v2366_v62 = vpop.f32.mrb[29].mxu0  ;;  %v929_v63 = vadd.f32 %v2853_v58, %v928_v60  ;;  %v2466_v0 = vpop.f32.mrb[29].mxu1 }
 0x133   : > { %v731_v2 = vpop.f32.mrb[30].mxu0  ;;  %v931_v3 = vpop.f32.mrb[30].mxu1 }
 0x134   : > { %v732_v1 = vadd.f32 %v2853_v58, %v731_v2  ;;  %v2367_v4 = vpop.f32.mrb[31].mxu0  ;;  %v1127_v5 = vmax.f32 %v929_v63, 0.0  ;;  %v932_v6 = vadd.f32 %v2853_v58, %v931_v3  ;;  %v2467_v7 = vpop.f32.mrb[31].mxu1  ;;  %v1077_v8 = vmax.f32 %v729_v61, 0.0 }
 0x136   : > { %v1078_v9 = vmax.f32 %v732_v1, 0.0  ;;  %v1128_v10 = vmax.f32 %v932_v6, 0.0 }
 0x138   : > { %v2008_v11 = vpack.c.bf16 %v1078_v9, %v1077_v8  ;;  %v2133_v12 = vpack.c.bf16 %v1128_v10, %v1127_v5 }
 0x139   : > { %v736_v13 = vpop.f32.mrb[32].mxu0  ;;  %v936_v14 = vpop.f32.mrb[32].mxu1 }
 0x13a   : > { %2221 = vst [vmem:[%s2864_s13 + $0x38] sm:$0xff] %v2008_v11   ;;  %2246 = vst [vmem:[%s2864_s13 + $0x100] sm:$0xff] %v2133_v12   ;;  %v737_v15 = vadd.f32 %v2853_v58, %v736_v13  ;;  %v2370_v16 = vpop.f32.mrb[33].mxu0  ;;  %v937_v17 = vadd.f32 %v2853_v58, %v936_v14  ;;  %v2470_v18 = vpop.f32.mrb[33].mxu1 }
 0x13b   : > { %v739_v19 = vpop.f32.mrb[34].mxu0  ;;  %v939_v20 = vpop.f32.mrb[34].mxu1 }
 0x13c   : > { %v740_v21 = vadd.f32 %v2853_v58, %v739_v19  ;;  %v2371_v22 = vpop.f32.mrb[35].mxu0  ;;  %v1129_v23 = vmax.f32 %v937_v17, 0.0  ;;  %v940_v24 = vadd.f32 %v2853_v58, %v939_v20  ;;  %v2471_v25 = vpop.f32.mrb[35].mxu1  ;;  %v1079_v26 = vmax.f32 %v737_v15, 0.0 }
 0x13e   : > { %v1080_v27 = vmax.f32 %v740_v21, 0.0  ;;  %v1130_v28 = vmax.f32 %v940_v24, 0.0 }
 0x140   : > { %v2013_v29 = vpack.c.bf16 %v1080_v27, %v1079_v26  ;;  %v2138_v30 = vpack.c.bf16 %v1130_v28, %v1129_v23 }
 0x141   : > { %v744_v31 = vpop.f32.mrb[36].mxu0  ;;  %v944_v32 = vpop.f32.mrb[36].mxu1 }
 0x142   : > { %2222 = vst [vmem:[%s2864_s13 + $0x40] sm:$0xff] %v2013_v29   ;;  %2247 = vst [vmem:[%s2864_s13 + $0x108] sm:$0xff] %v2138_v30   ;;  %v745_v33 = vadd.f32 %v2853_v58, %v744_v31  ;;  %v2374_v34 = vpop.f32.mrb[37].mxu0  ;;  %v945_v35 = vadd.f32 %v2853_v58, %v944_v32  ;;  %v2474_v36 = vpop.f32.mrb[37].mxu1 }
 0x143   : > { %v747_v37 = vpop.f32.mrb[38].mxu0  ;;  %v947_v38 = vpop.f32.mrb[38].mxu1 }
 0x144   : > { %v748_v39 = vadd.f32 %v2853_v58, %v747_v37  ;;  %v2375_v40 = vpop.f32.mrb[39].mxu0  ;;  %v1131_v41 = vmax.f32 %v945_v35, 0.0  ;;  %v948_v42 = vadd.f32 %v2853_v58, %v947_v38  ;;  %v2475_v43 = vpop.f32.mrb[39].mxu1  ;;  %v1081_v44 = vmax.f32 %v745_v33, 0.0 }
 0x146   : > { %v1082_v45 = vmax.f32 %v748_v39, 0.0  ;;  %v1132_v46 = vmax.f32 %v948_v42, 0.0 }
 0x148   : > { %v2018_v47 = vpack.c.bf16 %v1082_v45, %v1081_v44  ;;  %v2143_v48 = vpack.c.bf16 %v1132_v46, %v1131_v41 }
 0x149   : > { %v752_v49 = vpop.f32.mrb[40].mxu0  ;;  %v952_v50 = vpop.f32.mrb[40].mxu1 }
 0x14a   : > { %2223 = vst [vmem:[%s2864_s13 + $0x48] sm:$0xff] %v2018_v47   ;;  %2248 = vst [vmem:[%s2864_s13 + $0x110] sm:$0xff] %v2143_v48   ;;  %v753_v51 = vadd.f32 %v2853_v58, %v752_v49  ;;  %v2378_v52 = vpop.f32.mrb[41].mxu0  ;;  %v953_v53 = vadd.f32 %v2853_v58, %v952_v50  ;;  %v2478_v54 = vpop.f32.mrb[41].mxu1 }
 0x14b   : > { %v755_v55 = vpop.f32.mrb[42].mxu0  ;;  %v955_v56 = vpop.f32.mrb[42].mxu1 }
 0x14c   : > { %v756_v57 = vadd.f32 %v2853_v58, %v755_v55  ;;  %v2379_v59 = vpop.f32.mrb[43].mxu0  ;;  %v1133_v60 = vmax.f32 %v953_v53, 0.0  ;;  %v956_v61 = vadd.f32 %v2853_v58, %v955_v56  ;;  %v2479_v62 = vpop.f32.mrb[43].mxu1  ;;  %v1083_v63 = vmax.f32 %v753_v51, 0.0 }
 0x14e   : > { %v1084_v0 = vmax.f32 %v756_v57, 0.0  ;;  %v1134_v2 = vmax.f32 %v956_v61, 0.0 }
 0x150   : > { %v2023_v3 = vpack.c.bf16 %v1084_v0, %v1083_v63  ;;  %v2148_v1 = vpack.c.bf16 %v1134_v2, %v1133_v60 }
 0x151   : > { %v760_v4 = vpop.f32.mrb[44].mxu0  ;;  %v960_v5 = vpop.f32.mrb[44].mxu1 }
 0x152   : > { %2224 = vst [vmem:[%s2864_s13 + $0x50] sm:$0xff] %v2023_v3   ;;  %2249 = vst [vmem:[%s2864_s13 + $0x118] sm:$0xff] %v2148_v1   ;;  %v761_v6 = vadd.f32 %v2853_v58, %v760_v4  ;;  %v2382_v7 = vpop.f32.mrb[45].mxu0  ;;  %v961_v8 = vadd.f32 %v2853_v58, %v960_v5  ;;  %v2482_v9 = vpop.f32.mrb[45].mxu1 }
 0x153   : > { %v763_v10 = vpop.f32.mrb[46].mxu0  ;;  %v963_v11 = vpop.f32.mrb[46].mxu1 }
 0x154   : > { %v764_v12 = vadd.f32 %v2853_v58, %v763_v10  ;;  %v2383_v13 = vpop.f32.mrb[47].mxu0  ;;  %v1135_v14 = vmax.f32 %v961_v8, 0.0  ;;  %v964_v15 = vadd.f32 %v2853_v58, %v963_v11  ;;  %v2483_v16 = vpop.f32.mrb[47].mxu1  ;;  %v1085_v17 = vmax.f32 %v761_v6, 0.0 }
 0x156   : > { %v1086_v18 = vmax.f32 %v764_v12, 0.0  ;;  %v1136_v19 = vmax.f32 %v964_v15, 0.0 }
 0x158   : > { %v2028_v20 = vpack.c.bf16 %v1086_v18, %v1085_v17  ;;  %v2153_v21 = vpack.c.bf16 %v1136_v19, %v1135_v14 }
 0x159   : > { %v768_v22 = vpop.f32.mrb[48].mxu0  ;;  %v968_v23 = vpop.f32.mrb[48].mxu1 }
 0x15a   : > { %2225 = vst [vmem:[%s2864_s13 + $0x58] sm:$0xff] %v2028_v20   ;;  %2250 = vst [vmem:[%s2864_s13 + $0x120] sm:$0xff] %v2153_v21   ;;  %v769_v24 = vadd.f32 %v2853_v58, %v768_v22  ;;  %v2386_v25 = vpop.f32.mrb[49].mxu0  ;;  %v969_v26 = vadd.f32 %v2853_v58, %v968_v23  ;;  %v2486_v27 = vpop.f32.mrb[49].mxu1 }
 0x15b   : > { %v771_v28 = vpop.f32.mrb[50].mxu0  ;;  %v971_v29 = vpop.f32.mrb[50].mxu1 }
 0x15c   : > { %v772_v30 = vadd.f32 %v2853_v58, %v771_v28  ;;  %v2387_v31 = vpop.f32.mrb[51].mxu0  ;;  %v1137_v32 = vmax.f32 %v969_v26, 0.0  ;;  %v972_v33 = vadd.f32 %v2853_v58, %v971_v29  ;;  %v2487_v34 = vpop.f32.mrb[51].mxu1  ;;  %v1087_v35 = vmax.f32 %v769_v24, 0.0 }
 0x15e   : > { %v1088_v36 = vmax.f32 %v772_v30, 0.0  ;;  %v1138_v37 = vmax.f32 %v972_v33, 0.0 }
 0x160   : > { %v2033_v38 = vpack.c.bf16 %v1088_v36, %v1087_v35  ;;  %v2158_v39 = vpack.c.bf16 %v1138_v37, %v1137_v32 }
 0x161   : > { %v776_v40 = vpop.f32.mrb[52].mxu0  ;;  %v976_v41 = vpop.f32.mrb[52].mxu1 }
 0x162   : > { %2226 = vst [vmem:[%s2864_s13 + $0x60] sm:$0xff] %v2033_v38   ;;  %2251 = vst [vmem:[%s2864_s13 + $0x128] sm:$0xff] %v2158_v39   ;;  %v777_v42 = vadd.f32 %v2853_v58, %v776_v40  ;;  %v2390_v43 = vpop.f32.mrb[53].mxu0  ;;  %v977_v44 = vadd.f32 %v2853_v58, %v976_v41  ;;  %v2490_v45 = vpop.f32.mrb[53].mxu1 }
 0x163   : > { %v779_v46 = vpop.f32.mrb[54].mxu0  ;;  %v979_v47 = vpop.f32.mrb[54].mxu1 }
 0x164   : > { %v780_v48 = vadd.f32 %v2853_v58, %v779_v46  ;;  %v2391_v49 = vpop.f32.mrb[55].mxu0  ;;  %v1139_v50 = vmax.f32 %v977_v44, 0.0  ;;  %v980_v51 = vadd.f32 %v2853_v58, %v979_v47  ;;  %v2491_v52 = vpop.f32.mrb[55].mxu1  ;;  %v1089_v53 = vmax.f32 %v777_v42, 0.0 }
 0x166   : > { %v1090_v54 = vmax.f32 %v780_v48, 0.0  ;;  %v1140_v55 = vmax.f32 %v980_v51, 0.0 }
 0x168   : > { %v2038_v56 = vpack.c.bf16 %v1090_v54, %v1089_v53  ;;  %v2163_v57 = vpack.c.bf16 %v1140_v55, %v1139_v50 }
 0x169   : > { %v784_v59 = vpop.f32.mrb[56].mxu0  ;;  %v984_v60 = vpop.f32.mrb[56].mxu1 }
 0x16a   : > { %2227 = vst [vmem:[%s2864_s13 + $0x68] sm:$0xff] %v2038_v56   ;;  %2252 = vst [vmem:[%s2864_s13 + $0x130] sm:$0xff] %v2163_v57   ;;  %v785_v61 = vadd.f32 %v2853_v58, %v784_v59  ;;  %v2394_v62 = vpop.f32.mrb[57].mxu0  ;;  %v985_v63 = vadd.f32 %v2853_v58, %v984_v60  ;;  %v2494_v0 = vpop.f32.mrb[57].mxu1 }
 0x16b   : > { %v787_v2 = vpop.f32.mrb[58].mxu0  ;;  %v987_v3 = vpop.f32.mrb[58].mxu1 }
 0x16c   : > { %v788_v1 = vadd.f32 %v2853_v58, %v787_v2  ;;  %v2395_v4 = vpop.f32.mrb[59].mxu0  ;;  %v1141_v5 = vmax.f32 %v985_v63, 0.0  ;;  %v988_v6 = vadd.f32 %v2853_v58, %v987_v3  ;;  %v2495_v7 = vpop.f32.mrb[59].mxu1  ;;  %v1091_v8 = vmax.f32 %v785_v61, 0.0 }
 0x16e   : > { %v1092_v9 = vmax.f32 %v788_v1, 0.0  ;;  %v1142_v10 = vmax.f32 %v988_v6, 0.0 }
 0x170   : > { %v2043_v11 = vpack.c.bf16 %v1092_v9, %v1091_v8  ;;  %v2168_v12 = vpack.c.bf16 %v1142_v10, %v1141_v5 }
 0x171   : > { %v792_v13 = vpop.f32.mrb[60].mxu0  ;;  %v992_v14 = vpop.f32.mrb[60].mxu1 }
 0x172   : > { %2228 = vst [vmem:[%s2864_s13 + $0x70] sm:$0xff] %v2043_v11   ;;  %2253 = vst [vmem:[%s2864_s13 + $0x138] sm:$0xff] %v2168_v12   ;;  %v793_v15 = vadd.f32 %v2853_v58, %v792_v13  ;;  %v2398_v16 = vpop.f32.mrb[61].mxu0  ;;  %v993_v17 = vadd.f32 %v2853_v58, %v992_v14  ;;  %v2498_v18 = vpop.f32.mrb[61].mxu1 }
 0x173   : > { %v795_v19 = vpop.f32.mrb[62].mxu0  ;;  %v995_v20 = vpop.f32.mrb[62].mxu1 }
 0x174   : > { %v796_v21 = vadd.f32 %v2853_v58, %v795_v19  ;;  %v2399_v22 = vpop.f32.mrb[63].mxu0  ;;  %v1143_v23 = vmax.f32 %v993_v17, 0.0  ;;  %v996_v24 = vadd.f32 %v2853_v58, %v995_v20  ;;  %v2499_v25 = vpop.f32.mrb[63].mxu1  ;;  %v1093_v26 = vmax.f32 %v793_v15, 0.0 }
 0x176   : > { %v1094_v27 = vmax.f32 %v796_v21, 0.0  ;;  %v1144_v28 = vmax.f32 %v996_v24, 0.0 }
 0x178   : > { %v2048_v29 = vpack.c.bf16 %v1094_v27, %v1093_v26  ;;  %v2173_v30 = vpack.c.bf16 %v1144_v28, %v1143_v23 }
 0x179   : > { %v800_v31 = vpop.f32.mrb[64].mxu0  ;;  %v1000_v32 = vpop.f32.mrb[64].mxu1 }
 0x17a   : > { %2229 = vst [vmem:[%s2864_s13 + $0x78] sm:$0xff] %v2048_v29   ;;  %2254 = vst [vmem:[%s2864_s13 + $0x140] sm:$0xff] %v2173_v30   ;;  %v801_v33 = vadd.f32 %v2853_v58, %v800_v31  ;;  %v2402_v34 = vpop.f32.mrb[65].mxu0  ;;  %v1001_v35 = vadd.f32 %v2853_v58, %v1000_v32  ;;  %v2502_v36 = vpop.f32.mrb[65].mxu1 }
 0x17b   : > { %v803_v37 = vpop.f32.mrb[66].mxu0  ;;  %v1003_v38 = vpop.f32.mrb[66].mxu1 }
 0x17c   : > { %v804_v39 = vadd.f32 %v2853_v58, %v803_v37  ;;  %v2403_v40 = vpop.f32.mrb[67].mxu0  ;;  %v1145_v41 = vmax.f32 %v1001_v35, 0.0  ;;  %v1004_v42 = vadd.f32 %v2853_v58, %v1003_v38  ;;  %v2503_v43 = vpop.f32.mrb[67].mxu1  ;;  %v1095_v44 = vmax.f32 %v801_v33, 0.0 }
 0x17e   : > { %v1096_v45 = vmax.f32 %v804_v39, 0.0  ;;  %v1146_v46 = vmax.f32 %v1004_v42, 0.0 }
 0x180   : > { %v2053_v47 = vpack.c.bf16 %v1096_v45, %v1095_v44  ;;  %v2178_v48 = vpack.c.bf16 %v1146_v46, %v1145_v41 }
 0x181   : > { %v808_v49 = vpop.f32.mrb[68].mxu0  ;;  %v1008_v50 = vpop.f32.mrb[68].mxu1 }
 0x182   : > { %2230 = vst [vmem:[%s2864_s13 + $0x80] sm:$0xff] %v2053_v47   ;;  %2255 = vst [vmem:[%s2864_s13 + $0x148] sm:$0xff] %v2178_v48   ;;  %v809_v51 = vadd.f32 %v2853_v58, %v808_v49  ;;  %v2406_v52 = vpop.f32.mrb[69].mxu0  ;;  %v1009_v53 = vadd.f32 %v2853_v58, %v1008_v50  ;;  %v2506_v54 = vpop.f32.mrb[69].mxu1 }
 0x183   : > { %v811_v55 = vpop.f32.mrb[70].mxu0  ;;  %v1011_v56 = vpop.f32.mrb[70].mxu1 }
 0x184   : > { %v812_v57 = vadd.f32 %v2853_v58, %v811_v55  ;;  %v2407_v59 = vpop.f32.mrb[71].mxu0  ;;  %v1147_v60 = vmax.f32 %v1009_v53, 0.0  ;;  %v1012_v61 = vadd.f32 %v2853_v58, %v1011_v56  ;;  %v2507_v62 = vpop.f32.mrb[71].mxu1  ;;  %v1097_v63 = vmax.f32 %v809_v51, 0.0 }
 0x186   : > { %v1098_v0 = vmax.f32 %v812_v57, 0.0  ;;  %v1148_v2 = vmax.f32 %v1012_v61, 0.0 }
 0x188   : > { %v2058_v3 = vpack.c.bf16 %v1098_v0, %v1097_v63  ;;  %v2183_v1 = vpack.c.bf16 %v1148_v2, %v1147_v60 }
 0x189   : > { %v816_v4 = vpop.f32.mrb[72].mxu0  ;;  %v1016_v5 = vpop.f32.mrb[72].mxu1 }
 0x18a   : > { %2231 = vst [vmem:[%s2864_s13 + $0x88] sm:$0xff] %v2058_v3   ;;  %2256 = vst [vmem:[%s2864_s13 + $0x150] sm:$0xff] %v2183_v1   ;;  %v817_v6 = vadd.f32 %v2853_v58, %v816_v4  ;;  %v2410_v7 = vpop.f32.mrb[73].mxu0  ;;  %v1017_v8 = vadd.f32 %v2853_v58, %v1016_v5  ;;  %v2510_v9 = vpop.f32.mrb[73].mxu1 }
 0x18b   : > { %v819_v10 = vpop.f32.mrb[74].mxu0  ;;  %v1019_v11 = vpop.f32.mrb[74].mxu1 }
 0x18c   : > { %v820_v12 = vadd.f32 %v2853_v58, %v819_v10  ;;  %v2411_v13 = vpop.f32.mrb[75].mxu0  ;;  %v1149_v14 = vmax.f32 %v1017_v8, 0.0  ;;  %v1020_v15 = vadd.f32 %v2853_v58, %v1019_v11  ;;  %v2511_v16 = vpop.f32.mrb[75].mxu1  ;;  %v1099_v17 = vmax.f32 %v817_v6, 0.0 }
 0x18e   : > { %v1100_v18 = vmax.f32 %v820_v12, 0.0  ;;  %v1150_v19 = vmax.f32 %v1020_v15, 0.0 }
 0x190   : > { %v2063_v20 = vpack.c.bf16 %v1100_v18, %v1099_v17  ;;  %v2188_v21 = vpack.c.bf16 %v1150_v19, %v1149_v14 }
 0x191   : > { %v824_v22 = vpop.f32.mrb[76].mxu0  ;;  %v1024_v23 = vpop.f32.mrb[76].mxu1 }
 0x192   : > { %2232 = vst [vmem:[%s2864_s13 + $0x90] sm:$0xff] %v2063_v20   ;;  %2257 = vst [vmem:[%s2864_s13 + $0x158] sm:$0xff] %v2188_v21   ;;  %v825_v24 = vadd.f32 %v2853_v58, %v824_v22  ;;  %v2414_v25 = vpop.f32.mrb[77].mxu0  ;;  %v1025_v26 = vadd.f32 %v2853_v58, %v1024_v23  ;;  %v2514_v27 = vpop.f32.mrb[77].mxu1 }
 0x193   : > { %v827_v28 = vpop.f32.mrb[78].mxu0  ;;  %v1027_v29 = vpop.f32.mrb[78].mxu1 }
 0x194   : > { %v828_v30 = vadd.f32 %v2853_v58, %v827_v28  ;;  %v2415_v31 = vpop.f32.mrb[79].mxu0  ;;  %v1151_v32 = vmax.f32 %v1025_v26, 0.0  ;;  %v1028_v33 = vadd.f32 %v2853_v58, %v1027_v29  ;;  %v2515_v34 = vpop.f32.mrb[79].mxu1  ;;  %v1101_v35 = vmax.f32 %v825_v24, 0.0 }
 0x196   : > { %v1102_v36 = vmax.f32 %v828_v30, 0.0  ;;  %v1152_v37 = vmax.f32 %v1028_v33, 0.0 }
 0x198   : > { %v2068_v38 = vpack.c.bf16 %v1102_v36, %v1101_v35  ;;  %v2193_v39 = vpack.c.bf16 %v1152_v37, %v1151_v32 }
 0x199   : > { %v832_v40 = vpop.f32.mrb[80].mxu0  ;;  %v1032_v41 = vpop.f32.mrb[80].mxu1 }
 0x19a   : > { %2233 = vst [vmem:[%s2864_s13 + $0x98] sm:$0xff] %v2068_v38   ;;  %2258 = vst [vmem:[%s2864_s13 + $0x160] sm:$0xff] %v2193_v39   ;;  %v833_v42 = vadd.f32 %v2853_v58, %v832_v40  ;;  %v2418_v43 = vpop.f32.mrb[81].mxu0  ;;  %v1033_v44 = vadd.f32 %v2853_v58, %v1032_v41  ;;  %v2518_v45 = vpop.f32.mrb[81].mxu1 }
 0x19b   : > { %v835_v46 = vpop.f32.mrb[82].mxu0  ;;  %v1035_v47 = vpop.f32.mrb[82].mxu1 }
 0x19c   : > { %v836_v48 = vadd.f32 %v2853_v58, %v835_v46  ;;  %v2419_v49 = vpop.f32.mrb[83].mxu0  ;;  %v1153_v50 = vmax.f32 %v1033_v44, 0.0  ;;  %v1036_v51 = vadd.f32 %v2853_v58, %v1035_v47  ;;  %v2519_v52 = vpop.f32.mrb[83].mxu1  ;;  %v1103_v53 = vmax.f32 %v833_v42, 0.0 }
 0x19e   : > { %v1104_v54 = vmax.f32 %v836_v48, 0.0  ;;  %v1154_v55 = vmax.f32 %v1036_v51, 0.0 }
 0x1a0   : > { %v2073_v56 = vpack.c.bf16 %v1104_v54, %v1103_v53  ;;  %v2198_v57 = vpack.c.bf16 %v1154_v55, %v1153_v50 }
 0x1a1   : > { %v840_v59 = vpop.f32.mrb[84].mxu0  ;;  %v1040_v60 = vpop.f32.mrb[84].mxu1 }
 0x1a2   : > { %2234 = vst [vmem:[%s2864_s13 + $0xa0] sm:$0xff] %v2073_v56   ;;  %2259 = vst [vmem:[%s2864_s13 + $0x168] sm:$0xff] %v2198_v57   ;;  %v841_v61 = vadd.f32 %v2853_v58, %v840_v59  ;;  %v2422_v62 = vpop.f32.mrb[85].mxu0  ;;  %v1041_v63 = vadd.f32 %v2853_v58, %v1040_v60  ;;  %v2522_v0 = vpop.f32.mrb[85].mxu1 }
 0x1a3   : > { %v843_v2 = vpop.f32.mrb[86].mxu0  ;;  %v1043_v3 = vpop.f32.mrb[86].mxu1 }
 0x1a4   : > { %v844_v1 = vadd.f32 %v2853_v58, %v843_v2  ;;  %v2423_v4 = vpop.f32.mrb[87].mxu0  ;;  %v1155_v5 = vmax.f32 %v1041_v63, 0.0  ;;  %v1044_v6 = vadd.f32 %v2853_v58, %v1043_v3  ;;  %v2523_v7 = vpop.f32.mrb[87].mxu1  ;;  %v1105_v8 = vmax.f32 %v841_v61, 0.0 }
 0x1a6   : > { %v1106_v9 = vmax.f32 %v844_v1, 0.0  ;;  %v1156_v10 = vmax.f32 %v1044_v6, 0.0 }
 0x1a8   : > { %v2078_v11 = vpack.c.bf16 %v1106_v9, %v1105_v8  ;;  %v2203_v12 = vpack.c.bf16 %v1156_v10, %v1155_v5 }
 0x1a9   : > { %v848_v13 = vpop.f32.mrb[88].mxu0  ;;  %v1048_v14 = vpop.f32.mrb[88].mxu1 }
 0x1aa   : > { %2235 = vst [vmem:[%s2864_s13 + $0xa8] sm:$0xff] %v2078_v11   ;;  %2260 = vst [vmem:[%s2864_s13 + $0x170] sm:$0xff] %v2203_v12   ;;  %v849_v15 = vadd.f32 %v2853_v58, %v848_v13  ;;  %v2426_v16 = vpop.f32.mrb[89].mxu0  ;;  %v1049_v17 = vadd.f32 %v2853_v58, %v1048_v14  ;;  %v2526_v18 = vpop.f32.mrb[89].mxu1 }
 0x1ab   : > { %v851_v19 = vpop.f32.mrb[90].mxu0  ;;  %v1051_v20 = vpop.f32.mrb[90].mxu1 }
 0x1ac   : > { %v852_v21 = vadd.f32 %v2853_v58, %v851_v19  ;;  %v2427_v22 = vpop.f32.mrb[91].mxu0  ;;  %v1157_v23 = vmax.f32 %v1049_v17, 0.0  ;;  %v1052_v24 = vadd.f32 %v2853_v58, %v1051_v20  ;;  %v2527_v25 = vpop.f32.mrb[91].mxu1  ;;  %v1107_v26 = vmax.f32 %v849_v15, 0.0 }
 0x1ae   : > { %v1108_v27 = vmax.f32 %v852_v21, 0.0  ;;  %v1158_v28 = vmax.f32 %v1052_v24, 0.0 }
 0x1b0   : > { %v2083_v29 = vpack.c.bf16 %v1108_v27, %v1107_v26  ;;  %v2208_v30 = vpack.c.bf16 %v1158_v28, %v1157_v23 }
 0x1b1   : > { %v856_v31 = vpop.f32.mrb[92].mxu0  ;;  %v1056_v32 = vpop.f32.mrb[92].mxu1 }
 0x1b2   : > { %2236 = vst [vmem:[%s2864_s13 + $0xb0] sm:$0xff] %v2083_v29   ;;  %2261 = vst [vmem:[%s2864_s13 + $0x178] sm:$0xff] %v2208_v30   ;;  %v857_v33 = vadd.f32 %v2853_v58, %v856_v31  ;;  %v2430_v34 = vpop.f32.mrb[93].mxu0  ;;  %v1057_v35 = vadd.f32 %v2853_v58, %v1056_v32  ;;  %v2530_v36 = vpop.f32.mrb[93].mxu1 }
 0x1b3   : > { %v859_v37 = vpop.f32.mrb[94].mxu0  ;;  %v1059_v38 = vpop.f32.mrb[94].mxu1 }
 0x1b4   : > { %v860_v39 = vadd.f32 %v2853_v58, %v859_v37  ;;  %v2431_v40 = vpop.f32.mrb[95].mxu0  ;;  %v1159_v41 = vmax.f32 %v1057_v35, 0.0  ;;  %v1060_v42 = vadd.f32 %v2853_v58, %v1059_v38  ;;  %v2531_v43 = vpop.f32.mrb[95].mxu1  ;;  %v1109_v44 = vmax.f32 %v857_v33, 0.0 }
 0x1b6   : > { %v1110_v45 = vmax.f32 %v860_v39, 0.0  ;;  %v1160_v46 = vmax.f32 %v1060_v42, 0.0 }
 0x1b8   : > { %v2088_v47 = vpack.c.bf16 %v1110_v45, %v1109_v44  ;;  %v2213_v48 = vpack.c.bf16 %v1160_v46, %v1159_v41 }
 0x1b9   : > { %v864_v49 = vpop.f32.mrb[96].mxu0 }
 0x1ba   : > { %2237 = vst [vmem:[%s2864_s13 + $0xb8] sm:$0xff] %v2088_v47   ;;  %2262 = vst [vmem:[%s2864_s13 + $0x180] sm:$0xff] %v2213_v48   ;;  %v865_v50 = vadd.f32 %v2853_v58, %v864_v49  ;;  %v2434_v51 = vpop.f32.mrb[97].mxu0 }
 0x1bb   : > { %v867_v52 = vpop.f32.mrb[98].mxu0 }
 0x1bc   : > { %v868_v53 = vadd.f32 %v2853_v58, %v867_v52  ;;  %v2435_v54 = vpop.f32.mrb[99].mxu0  ;;  %v1111_v55 = vmax.f32 %v865_v50, 0.0 }
 0x1be   : > { %v1112_v56 = vmax.f32 %v868_v53, 0.0 }
 0x1c0   : > { %v2093_v57 = vpack.c.bf16 %v1112_v56, %v1111_v55 }
 0x1c2   : > { %2238 = vst [vmem:[%s2864_s13 + $0xc0] sm:$0xff] %v2093_v57  }
 0x1c3 PF: > { %s13_s12 = sadd.s32 1, %s2621_s12  }
 0x1c4   : > { %p10_p4 = scmp.ge.s32.totalorder %s13_s12, 9  }
 0x1c6   :  { %12 = sbr.rel (!%p10_p4) target bundleno = 1 (0x1), region = 62 }

// kernel: voxnet_forward.5
= control target key start
LH: loop header
LB: loop body
LE: loop exit
PB: predicated region body
PF: predicated region fallthrough
CT: control target
= control target key end

     0   :  { %s7843_s12 = smov 0   ;;  %s9331_s0 = inlined_call_operand.vmem [shape: bf16[3456,896], index: 0, kind: input, shape index: {}]   ;;  %s9332_s1 = inlined_call_operand.vmem [shape: bf16[896,128], index: 1, kind: input, shape index: {}]   ;;  %s9333_s2 = inlined_call_operand.vmem [shape: f32[1,128], index: 2, kind: input, shape index: {}]   ;;  %s9334_s3 = inlined_call_operand.vmem [shape: bf16[3456,128], index: 3, kind: output, shape index: {}]  }
   0x1 LB: > { %s5573_s13 = sadd.s32 4294967295, %s7820_s12   ;;  %p5577_p0 = scmp.ge.s32.totalorder %s7820_s12, 1  ;;  %s7820_s12 = sphi %s7843_s12, %s13_s12  }
   0x2   : > { %p139_p1 = scmp.lt.s32.totalorder %s7820_s12, 5 }
   0x4   : > { %p140_p2 = pnand %p5577_p0, %p139_p1 }
   0x6   : > { %143 = sbr.rel (%p140_p2) target bundleno = 1053 (0x41d), region = 32 }
   0xd   : > { %v7216_v0 = vld [vmem:[%s9332_s1] sm:$0xff]   ;;  %v7822_v1 = vmov 0   ;;  %v7218_v3 = vld [vmem:[%s9332_s1 + $0x8] sm:$0xff]   ;;  %v7220_v5 = vld [vmem:[%s9332_s1 + $0x10] sm:$0xff]   ;;  %s164_s5 = smul.u32 108, %s5573_s13 }
   0xe   : > { %3009 = vmatprep.subr.bf16.mxu1 %v7822_v1  ;;  %3474 = vmatprep.subr.bf16.mxu0 %v7822_v1  ;;  %v7859_v2 = vld [vmem:[%s9332_s1 + $0x80] sm:$0xff]   ;;  %v7869_v4 = vld [vmem:[%s9332_s1 + $0x88] sm:$0xff]   ;;  %v7880_v6 = vld [vmem:[%s9332_s1 + $0x90] sm:$0xff]  }
   0xf   : > { %3010 = vmatpush1.bf16.msra.mxu1 %v7216_v0  ;;  %3475 = vmatpush1.bf16.msra.mxu0 %v7859_v2  ;;  %v7222_v7 = vld [vmem:[%s9332_s1 + $0x18] sm:$0xff]   ;;  %v7224_v9 = vld [vmem:[%s9332_s1 + $0x20] sm:$0xff]   ;;  %v7226_v11 = vld [vmem:[%s9332_s1 + $0x28] sm:$0xff]   ;;  %p165_p3 = scmp.lt.s32.totalorder %s164_s5, 431 }
  0x10   : > { %3011 = vmatprep.subr.bf16.mxu1 %v7822_v1  ;;  %3476 = vmatprep.subr.bf16.mxu0 %v7822_v1  ;;  %v7891_v8 = vld [vmem:[%s9332_s1 + $0x98] sm:$0xff]   ;;  %v7904_v10 = vld [vmem:[%s9332_s1 + $0xa0] sm:$0xff]   ;;  %v7915_v12 = vld [vmem:[%s9332_s1 + $0xa8] sm:$0xff]  }
  0x11   : > { %v7228_v13 = vld [vmem:[%s9332_s1 + $0x30] sm:$0xff]   ;;  %s9468_s5 = smov (!%p165_p3, %s164_s5), 431  ;;  %v7230_v15 = vld [vmem:[%s9332_s1 + $0x38] sm:$0xff]   ;;  %v7232_v17 = vld [vmem:[%s9332_s1 + $0x40] sm:$0xff]  }
  0x12   : > { %v7928_v14 = vld [vmem:[%s9332_s1 + $0xb0] sm:$0xff]   ;;  %s7206_s19 = smul.u32 28, %s9468_s5  ;;  %v7940_v16 = vld [vmem:[%s9332_s1 + $0xb8] sm:$0xff]   ;;  %v7956_v18 = vld [vmem:[%s9332_s1 + $0xc0] sm:$0xff]   ;;  %s5579_s9 = sshll.u32 %s9468_s5, 2 }
  0x13   : > { %3012 = vmatpush1.bf16.msra.mxu1 %v7218_v3  ;;  %3477 = vmatpush1.bf16.msra.mxu0 %v7869_v4  ;;  %v7234_v20 = vld [vmem:[%s9332_s1 + $0x48] sm:$0xff]   ;;  %v7236_v23 = vld [vmem:[%s9332_s1 + $0x50] sm:$0xff]   ;;  %v7238_v25 = vld [vmem:[%s9332_s1 + $0x58] sm:$0xff]   ;;  %s8984_s13 = scalar_lea.vmem %s9334_s3, %s5579_s9 }
  0x14   : > { %3013 = vmatprep.subr.bf16.mxu1 %v7822_v1  ;;  %3478 = vmatprep.subr.bf16.mxu0 %v7822_v1  ;;  %s7949_s26 = scalar_lea.vmem %s9331_s0, %s7206_s19  ;;  %v7969_v22 = vld [vmem:[%s9332_s1 + $0xc8] sm:$0xff]   ;;  %v7980_v24 = vld [vmem:[%s9332_s1 + $0xd0] sm:$0xff]   ;;  %v7991_v26 = vld [vmem:[%s9332_s1 + $0xd8] sm:$0xff]  }
  0x15   : > { %v7250_v19 = vld [vmem:[%s7949_s26 + $0x4] ss:$28 sps:$4 sm:$0xff]   ;;  %v7253_v21 = vld [vmem:[%s7949_s26 + $0xc] ss:$28 sps:$4 sm:$0xff]   ;;  %v7244_v31 = vld [vmem:[%s9332_s1 + $0x70] sm:$0xff]  }
  0x16   : > { %3041 = vmatprep.mubr.bf16.mxu1 %v7250_v19  ;;  %3506 = vmatprep.mubr.bf16.mxu0 %v7253_v21  ;;  %v7240_v27 = vld [vmem:[%s9332_s1 + $0x60] sm:$0xff]   ;;  %v7242_v29 = vld [vmem:[%s9332_s1 + $0x68] sm:$0xff]   ;;  %v8024_v32 = vld [vmem:[%s9332_s1 + $0xf0] sm:$0xff]  }
  0x17   : > { %3014 = vmatpush1.bf16.msra.mxu1 %v7220_v5  ;;  %3479 = vmatpush1.bf16.msra.mxu0 %v7880_v6  ;;  %v8002_v28 = vld [vmem:[%s9332_s1 + $0xe0] sm:$0xff]   ;;  %v8013_v30 = vld [vmem:[%s9332_s1 + $0xe8] sm:$0xff]   ;;  %v7246_v33 = vld [vmem:[%s9332_s1 + $0x78] sm:$0xff]  }
  0x18   : > { %3015 = vmatprep.subr.bf16.mxu1 %v7822_v1  ;;  %3480 = vmatprep.subr.bf16.mxu0 %v7822_v1  ;;  %v8035_v34 = vld [vmem:[%s9332_s1 + $0xf8] sm:$0xff]   ;;  %v7251_v36 = vld [vmem:[%s7949_s26 + $0x8] ss:$28 sps:$4 sm:$0xff]   ;;  %v7261_v43 = vld [vmem:[%s7949_s26 + $0x74] ss:$28 sps:$4 sm:$0xff]  }
  0x19   : > { %v7248_v35 = vld [vmem:[%s7949_s26] ss:$28 sps:$4 sm:$0xff]   ;;  %v7267_v40 = vld [vmem:[%s9332_s1 + $0x108] sm:$0xff]   ;;  %v7259_v41 = vld [vmem:[%s7949_s26 + $0x38] ss:$28 sps:$4 sm:$0xff]  }
  0x1a   : > { %v7254_v37 = vld [vmem:[%s9332_s1 + $0x100] sm:$0xff]   ;;  %v7255_v38 = vld [vmem:[%s7949_s26 + $0x3c] ss:$28 sps:$4 sm:$0xff]   ;;  %v7286_v45 = vld [vmem:[%s9332_s1 + $0x110] sm:$0xff]  }
  0x1b   : > { %3016 = vmatpush1.bf16.msra.mxu1 %v7222_v7  ;;  %3481 = vmatpush1.bf16.msra.mxu0 %v7891_v8  ;;  %v7257_v39 = vld [vmem:[%s7949_s26 + $0x44] ss:$28 sps:$4 sm:$0xff]   ;;  %v7263_v44 = vld [vmem:[%s7949_s26 + $0x7c] ss:$28 sps:$4 sm:$0xff]   ;;  %v7265_v47 = vld [vmem:[%s7949_s26 + $0x70] ss:$28 sps:$4 sm:$0xff]  }
  0x1c   : > { %3017 = vmatprep.subr.bf16.mxu1 %v7822_v1  ;;  %3482 = vmatprep.subr.bf16.mxu0 %v7822_v1  ;;  %v7260_v42 = vld [vmem:[%s7949_s26 + $0x40] ss:$28 sps:$4 sm:$0xff]   ;;  %v7266_v48 = vld [vmem:[%s7949_s26 + $0x78] ss:$28 sps:$4 sm:$0xff]   ;;  %v7268_v49 = vld [vmem:[%s7949_s26 + $0xac] ss:$28 sps:$4 sm:$0xff]  }
  0x1d   : > { %v7303_v46 = vld [vmem:[%s9332_s1 + $0x118] sm:$0xff]   ;;  %v7270_v50 = vld [vmem:[%s7949_s26 + $0xb4] ss:$28 sps:$4 sm:$0xff]   ;;  %v7318_v51 = vld [vmem:[%s9332_s1 + $0x120] sm:$0xff]  }
  0x1e   : > { %v7337_v52 = vld [vmem:[%s9332_s1 + $0x128] sm:$0xff]   ;;  %v7274_v55 = vld [vmem:[%s7949_s26 + $0xe4] ss:$28 sps:$4 sm:$0xff]   ;;  %v7350_v57 = vld [vmem:[%s9332_s1 + $0x130] sm:$0xff]  }
  0x1f   : > { %3018 = vmatpush1.bf16.msra.mxu1 %v7224_v9  ;;  %3483 = vmatpush1.bf16.msra.mxu0 %v7904_v10  ;;  %v7272_v53 = vld [vmem:[%s7949_s26 + $0xa8] ss:$28 sps:$4 sm:$0xff]   ;;  %v7273_v54 = vld [vmem:[%s7949_s26 + $0xb0] ss:$28 sps:$4 sm:$0xff]   ;;  %v7369_v58 = vld [vmem:[%s9332_s1 + $0x138] sm:$0xff]  }
  0x20   : > { %3019 = vmatprep.subr.bf16.mxu1 %v7822_v1  ;;  %3484 = vmatprep.subr.bf16.mxu0 %v7822_v1  ;;  %v7276_v56 = vld [vmem:[%s7949_s26 + $0xec] ss:$28 sps:$4 sm:$0xff]   ;;  %v7278_v59 = vld [vmem:[%s7949_s26 + $0xe0] ss:$28 sps:$4 sm:$0xff]   ;;  %v7284_v0 = vld [vmem:[%s7949_s26 + $0x118] ss:$28 sps:$4 sm:$0xff]  }
  0x21   : > { %v7279_v60 = vld [vmem:[%s7949_s26 + $0xe8] ss:$28 sps:$4 sm:$0xff]   ;;  %v7280_v61 = vld [vmem:[%s7949_s26 + $0x11c] ss:$28 sps:$4 sm:$0xff]   ;;  %v7287_v3 = vld [vmem:[%s7949_s26 + $0x154] ss:$28 sps:$4 sm:$0xff]  }
  0x22   : > { %v7282_v62 = vld [vmem:[%s7949_s26 + $0x124] ss:$28 sps:$4 sm:$0xff]   ;;  %v7291_v5 = vld [vmem:[%s7949_s26 + $0x150] ss:$28 sps:$4 sm:$0xff]   ;;  %v7314_v21 = vld [vmem:[%s7949_s26 + $0x23c] ss:$28 sps:$4 sm:$0xff]  }
  0x23   : > { %3020 = vmatpush1.bf16.msra.mxu1 %v7226_v11  ;;  %3485 = vmatpush1.bf16.msra.mxu0 %v7915_v12  ;;  %v7382_v63 = vld [vmem:[%s9332_s1 + $0x140] sm:$0xff]   ;;  %v7293_v7 = vld [vmem:[%s7949_s26 + $0x18c] ss:$28 sps:$4 sm:$0xff]  }
  0x24   : > { %3021 = vmatprep.subr.bf16.mxu1 %v7822_v1  ;;  %3486 = vmatprep.subr.bf16.mxu0 %v7822_v1  ;;  %v7297_v9 = vld [vmem:[%s7949_s26 + $0x188] ss:$28 sps:$4 sm:$0xff]   ;;  %v7311_v19 = vld [vmem:[%s7949_s26 + $0x200] ss:$28 sps:$4 sm:$0xff]  }
  0x25   : > { %v7299_v11 = vld [vmem:[%s7949_s26 + $0x1c4] ss:$28 sps:$4 sm:$0xff]  }
  0x27   : > { %3022 = vmatpush1.bf16.msra.mxu1 %v7228_v13  ;;  %3487 = vmatpush1.bf16.msra.mxu0 %v7928_v14  ;;  %v7401_v13 = vld [vmem:[%s9332_s1 + $0x148] sm:$0xff]  }
  0x28   : > { %3023 = vmatprep.subr.bf16.mxu1 %v7822_v1  ;;  %3488 = vmatprep.subr.bf16.mxu0 %v7822_v1 }
  0x2b   : > { %3024 = vmatpush1.bf16.msra.mxu1 %v7230_v15  ;;  %3489 = vmatpush1.bf16.msra.mxu0 %v7940_v16  ;;  %v7305_v15 = vld [vmem:[%s7949_s26 + $0x1c8] ss:$28 sps:$4 sm:$0xff]  }
  0x2c   : > { %3025 = vmatprep.subr.bf16.mxu1 %v7822_v1  ;;  %3490 = vmatprep.subr.bf16.mxu0 %v7822_v1 }
  0x2f   : > { %3026 = vmatpush1.bf16.msra.mxu1 %v7232_v17  ;;  %3491 = vmatpush1.bf16.msra.mxu0 %v7956_v18  ;;  %v7308_v17 = vld [vmem:[%s7949_s26 + $0x204] ss:$28 sps:$4 sm:$0xff]  }
  0x30   : > { %3027 = vmatprep.subr.bf16.mxu1 %v7822_v1  ;;  %3492 = vmatprep.subr.bf16.mxu0 %v7822_v1 }
  0x33   : > { %3028 = vmatpush1.bf16.msra.mxu1 %v7234_v20  ;;  %3493 = vmatpush1.bf16.msra.mxu0 %v7969_v22  ;;  %v7312_v20 = vld [vmem:[%s7949_s26 + $0x234] ss:$28 sps:$4 sm:$0xff]  }
  0x34   : > { %3029 = vmatprep.subr.bf16.mxu1 %v7822_v1  ;;  %3494 = vmatprep.subr.bf16.mxu0 %v7822_v1 }
  0x37   : > { %3030 = vmatpush1.bf16.msra.mxu1 %v7236_v23  ;;  %3495 = vmatpush1.bf16.msra.mxu0 %v7980_v24  ;;  %v7316_v23 = vld [vmem:[%s7949_s26 + $0x230] ss:$28 sps:$4 sm:$0xff]  }
  0x38   : > { %3031 = vmatprep.subr.bf16.mxu1 %v7822_v1  ;;  %3496 = vmatprep.subr.bf16.mxu0 %v7822_v1 }
  0x3b   : > { %3032 = vmatpush1.bf16.msra.mxu1 %v7238_v25  ;;  %3497 = vmatpush1.bf16.msra.mxu0 %v7991_v26  ;;  %v7319_v25 = vld [vmem:[%s7949_s26 + $0x26c] ss:$28 sps:$4 sm:$0xff]  }
  0x3c   : > { %3033 = vmatprep.subr.bf16.mxu1 %v7822_v1  ;;  %3498 = vmatprep.subr.bf16.mxu0 %v7822_v1 }
  0x3f   : > { %3034 = vmatpush1.bf16.msra.mxu1 %v7240_v27  ;;  %3499 = vmatpush1.bf16.msra.mxu0 %v8002_v28  ;;  %v7323_v27 = vld [vmem:[%s7949_s26 + $0x268] ss:$28 sps:$4 sm:$0xff]  }
  0x40   : > { %3035 = vmatprep.subr.bf16.mxu1 %v7822_v1  ;;  %3500 = vmatprep.subr.bf16.mxu0 %v7822_v1 }
  0x43   : > { %3036 = vmatpush1.bf16.msra.mxu1 %v7242_v29  ;;  %3501 = vmatpush1.bf16.msra.mxu0 %v8013_v30  ;;  %v7325_v29 = vld [vmem:[%s7949_s26 + $0x2a4] ss:$28 sps:$4 sm:$0xff]  }
  0x44   : > { %3037 = vmatprep.subr.bf16.mxu1 %v7822_v1  ;;  %3502 = vmatprep.subr.bf16.mxu0 %v7822_v1 }
  0x47   : > { %3038 = vmatpush1.bf16.msra.mxu1 %v7244_v31  ;;  %3503 = vmatpush1.bf16.msra.mxu0 %v8024_v32  ;;  %v7329_v31 = vld [vmem:[%s7949_s26 + $0x2a0] ss:$28 sps:$4 sm:$0xff]  }
  0x48   : > { %3039 = vmatprep.subr.bf16.mxu1 %v7822_v1  ;;  %3504 = vmatprep.subr.bf16.mxu0 %v7822_v1 }
  0x4b   : > { %3040 = vmatpush1.bf16.msra.mxu1 %v7246_v33  ;;  %3505 = vmatpush1.bf16.msra.mxu0 %v8035_v34  ;;  %v7331_v33 = vld [vmem:[%s7949_s26 + $0x2dc] ss:$28 sps:$4 sm:$0xff]  }
  0x4c   : > { %6742 = vmatprep.subr.bf16.mxu1 %v7822_v1  ;;  %3939 = vmatprep.subr.bf16.mxu0 %v7822_v1 }
  0x4e   : > { %3042 = vmatmul.mubr.bf16.vlgmr.msra.gmra.mrb[0].mxu1 %v7248_v35  ;;  %3507 = vmatmul.mubr.bf16.vlgmr.msra.gmra.mrb[0].mxu0 %v7251_v36  ;;  %v7433_v35 = vld [vmem:[%s9332_s1 + $0x158] sm:$0xff]  }
  0x4f   : > { %3049 = vmatprep.mubr.bf16.mxu1 %v7255_v38  ;;  %3940 = vmatpush1.bf16.msra.mxu0 %v7254_v37  ;;  %v7335_v36 = vld [vmem:[%s7949_s26 + $0x2d8] ss:$28 sps:$4 sm:$0xff]   ;;  %v7336_v37 = vld [vmem:[%s7949_s26 + $0x2e0] ss:$28 sps:$4 sm:$0xff]  }
  0x50   : > { %3514 = vmatprep.mubr.bf16.mxu0 %v7257_v39  ;;  %6758 = vmatpush1.bf16.msra.mxu1 %v7859_v2  ;;  %v7285_v2 = vld [vmem:[%s7949_s26 + $0x120] ss:$28 sps:$4 sm:$0xff]   ;;  %v7338_v38 = vld [vmem:[%s7949_s26 + $0x314] ss:$28 sps:$4 sm:$0xff]  }
  0x51   : > { %3941 = vmatprep.subr.bf16.mxu0 %v7822_v1  ;;  %6743 = vmatprep.subr.bf16.mxu1 %v7822_v1  ;;  %v7340_v39 = vld [vmem:[%s7949_s26 + $0x31c] ss:$28 sps:$4 sm:$0xff]  }
  0x53   : > { %3942 = vmatpush1.bf16.msra.mxu0 %v7267_v40  ;;  %v7342_v40 = vld [vmem:[%s7949_s26 + $0x310] ss:$28 sps:$4 sm:$0xff]  }
  0x54   : > { %6759 = vmatpush1.bf16.msra.mxu1 %v7869_v4  ;;  %3943 = vmatprep.subr.bf16.mxu0 %v7822_v1  ;;  %v7289_v4 = vld [vmem:[%s7949_s26 + $0x15c] ss:$28 sps:$4 sm:$0xff]  }
  0x55   : > { %6744 = vmatprep.subr.bf16.mxu1 %v7822_v1 }
  0x56   : > { %3050 = vmatmul.mubr.bf16.gmra.mrb[4].mxu1 %v7259_v41  ;;  %3515 = vmatmul.mubr.bf16.gmra.mrb[4].mxu0 %v7260_v42  ;;  %v7343_v41 = vld [vmem:[%s7949_s26 + $0x318] ss:$28 sps:$4 sm:$0xff]   ;;  %v7344_v42 = vld [vmem:[%s7949_s26 + $0x34c] ss:$28 sps:$4 sm:$0xff]  }
  0x57   : > { %3057 = vmatprep.mubr.bf16.mxu1 %v7261_v43  ;;  %3522 = vmatprep.mubr.bf16.mxu0 %v7263_v44  ;;  %v7346_v43 = vld [vmem:[%s7949_s26 + $0x354] ss:$28 sps:$4 sm:$0xff]   ;;  %v7348_v44 = vld [vmem:[%s7949_s26 + $0x348] ss:$28 sps:$4 sm:$0xff]  }
  0x58   : > { %3944 = vmatpush1.bf16.msra.mxu0 %v7286_v45  ;;  %6760 = vmatpush1.bf16.msra.mxu1 %v7880_v6  ;;  %v7292_v6 = vld [vmem:[%s7949_s26 + $0x158] ss:$28 sps:$4 sm:$0xff]   ;;  %v7450_v45 = vld [vmem:[%s9332_s1 + $0x160] sm:$0xff]  }
  0x59   : > { %3945 = vmatprep.subr.bf16.mxu0 %v7822_v1  ;;  %6745 = vmatprep.subr.bf16.mxu1 %v7822_v1 }
  0x5c   : > { %3946 = vmatpush1.bf16.msra.mxu0 %v7303_v46  ;;  %6761 = vmatpush1.bf16.msra.mxu1 %v7891_v8  ;;  %v7295_v8 = vld [vmem:[%s7949_s26 + $0x194] ss:$28 sps:$4 sm:$0xff]  }
  0x5d   : > { %3947 = vmatprep.subr.bf16.mxu0 %v7822_v1  ;;  %6746 = vmatprep.subr.bf16.mxu1 %v7822_v1  ;;  %v7349_v46 = vld [vmem:[%s7949_s26 + $0x350] ss:$28 sps:$4 sm:$0xff]  }
  0x5e   : > { %3058 = vmatmul.mubr.bf16.gmra.mrb[8].mxu1 %v7265_v47  ;;  %3523 = vmatmul.mubr.bf16.gmra.mrb[8].mxu0 %v7266_v48  ;;  %v7351_v47 = vld [vmem:[%s7949_s26 + $0x384] ss:$28 sps:$4 sm:$0xff]   ;;  %v7353_v48 = vld [vmem:[%s7949_s26 + $0x38c] ss:$28 sps:$4 sm:$0xff]  }
  0x5f   : > { %3065 = vmatprep.mubr.bf16.mxu1 %v7268_v49  ;;  %3530 = vmatprep.mubr.bf16.mxu0 %v7270_v50  ;;  %v7355_v49 = vld [vmem:[%s7949_s26 + $0x380] ss:$28 sps:$4 sm:$0xff]   ;;  %v7356_v50 = vld [vmem:[%s7949_s26 + $0x388] ss:$28 sps:$4 sm:$0xff]  }
  0x60   : > { %3948 = vmatpush1.bf16.msra.mxu0 %v7318_v51  ;;  %6762 = vmatpush1.bf16.msra.mxu1 %v7904_v10  ;;  %v7298_v10 = vld [vmem:[%s7949_s26 + $0x190] ss:$28 sps:$4 sm:$0xff]   ;;  %v7357_v51 = vld [vmem:[%s7949_s26 + $0x3bc] ss:$28 sps:$4 sm:$0xff]  }
  0x61   : > { %3949 = vmatprep.subr.bf16.mxu0 %v7822_v1  ;;  %6747 = vmatprep.subr.bf16.mxu1 %v7822_v1 }
  0x64   : > { %3950 = vmatpush1.bf16.msra.mxu0 %v7337_v52  ;;  %6763 = vmatpush1.bf16.msra.mxu1 %v7915_v12  ;;  %v7301_v12 = vld [vmem:[%s7949_s26 + $0x1cc] ss:$28 sps:$4 sm:$0xff]   ;;  %v7359_v52 = vld [vmem:[%s7949_s26 + $0x3c4] ss:$28 sps:$4 sm:$0xff]  }
  0x65   : > { %3951 = vmatprep.subr.bf16.mxu0 %v7822_v1  ;;  %6748 = vmatprep.subr.bf16.mxu1 %v7822_v1 }
  0x66   : > { %3066 = vmatmul.mubr.bf16.gmra.mrb[12].mxu1 %v7272_v53  ;;  %3531 = vmatmul.mubr.bf16.gmra.mrb[12].mxu0 %v7273_v54  ;;  %v7361_v53 = vld [vmem:[%s7949_s26 + $0x3b8] ss:$28 sps:$4 sm:$0xff]   ;;  %v7362_v54 = vld [vmem:[%s7949_s26 + $0x3c0] ss:$28 sps:$4 sm:$0xff]  }
  0x67   : > { %3073 = vmatprep.mubr.bf16.mxu1 %v7274_v55  ;;  %3538 = vmatprep.mubr.bf16.mxu0 %v7276_v56  ;;  %v7363_v55 = vld [vmem:[%s7949_s26 + $0x3f4] ss:$28 sps:$4 sm:$0xff]   ;;  %v7365_v56 = vld [vmem:[%s7949_s26 + $0x3fc] ss:$28 sps:$4 sm:$0xff]  }
  0x68   : > { %3952 = vmatpush1.bf16.msra.mxu0 %v7350_v57  ;;  %6764 = vmatpush1.bf16.msra.mxu1 %v7928_v14  ;;  %v7304_v14 = vld [vmem:[%s7949_s26 + $0x1c0] ss:$28 sps:$4 sm:$0xff]   ;;  %v7465_v57 = vld [vmem:[%s9332_s1 + $0x168] sm:$0xff]  }
  0x69   : > { %3953 = vmatprep.subr.bf16.mxu0 %v7822_v1  ;;  %6749 = vmatprep.subr.bf16.mxu1 %v7822_v1 }
  0x6c   : > { %3954 = vmatpush1.bf16.msra.mxu0 %v7369_v58  ;;  %6765 = vmatpush1.bf16.msra.mxu1 %v7940_v16  ;;  %v7306_v16 = vld [vmem:[%s7949_s26 + $0x1fc] ss:$28 sps:$4 sm:$0xff]   ;;  %v7367_v58 = vld [vmem:[%s7949_s26 + $0x3f0] ss:$28 sps:$4 sm:$0xff]  }
  0x6d   : > { %3955 = vmatprep.subr.bf16.mxu0 %v7822_v1  ;;  %6750 = vmatprep.subr.bf16.mxu1 %v7822_v1 }
  0x6e   : > { %3074 = vmatmul.mubr.bf16.gmra.mrb[16].mxu1 %v7278_v59  ;;  %3539 = vmatmul.mubr.bf16.gmra.mrb[16].mxu0 %v7279_v60  ;;  %v7368_v59 = vld [vmem:[%s7949_s26 + $0x3f8] ss:$28 sps:$4 sm:$0xff]   ;;  %v7370_v60 = vld [vmem:[%s7949_s26 + $0x42c] ss:$28 sps:$4 sm:$0xff]  }
  0x6f   : > { %3081 = vmatprep.mubr.bf16.mxu1 %v7280_v61  ;;  %3546 = vmatprep.mubr.bf16.mxu0 %v7282_v62  ;;  %v7372_v61 = vld [vmem:[%s7949_s26 + $0x434] ss:$28 sps:$4 sm:$0xff]   ;;  %v7374_v62 = vld [vmem:[%s7949_s26 + $0x428] ss:$28 sps:$4 sm:$0xff]  }
  0x70   : > { %3956 = vmatpush1.bf16.msra.mxu0 %v7382_v63  ;;  %6766 = vmatpush1.bf16.msra.mxu1 %v7956_v18  ;;  %v7310_v18 = vld [vmem:[%s7949_s26 + $0x1f8] ss:$28 sps:$4 sm:$0xff]   ;;  %v7375_v63 = vld [vmem:[%s7949_s26 + $0x430] ss:$28 sps:$4 sm:$0xff]  }
  0x71   : > { %3957 = vmatprep.subr.bf16.mxu0 %v7822_v1  ;;  %6751 = vmatprep.subr.bf16.mxu1 %v7822_v1 }
  0x74   : > { %6767 = vmatpush1.bf16.msra.mxu1 %v7969_v22  ;;  %3958 = vmatpush1.bf16.msra.mxu0 %v7401_v13  ;;  %v7414_v22 = vld [vmem:[%s9332_s1 + $0x150] sm:$0xff]  }
  0x75   : > { %6752 = vmatprep.subr.bf16.mxu1 %v7822_v1  ;;  %3959 = vmatprep.subr.bf16.mxu0 %v7822_v1  ;;  %v7394_v13 = vld [vmem:[%s7949_s26 + $0x4d8] ss:$28 sps:$4 sm:$0xff]  }
  0x76   : > { %3082 = vmatmul.mubr.bf16.gmra.mrb[20].mxu1 %v7284_v0  ;;  %3547 = vmatmul.mubr.bf16.gmra.mrb[20].mxu0 %v7285_v2  ;;  %v7376_v0 = vld [vmem:[%s7949_s26 + $0x464] ss:$28 sps:$4 sm:$0xff]   ;;  %v7378_v2 = vld [vmem:[%s7949_s26 + $0x46c] ss:$28 sps:$4 sm:$0xff]  }
  0x77   : > { %3089 = vmatprep.mubr.bf16.mxu1 %v7287_v3  ;;  %3554 = vmatprep.mubr.bf16.mxu0 %v7289_v4  ;;  %v7380_v3 = vld [vmem:[%s7949_s26 + $0x460] ss:$28 sps:$4 sm:$0xff]   ;;  %v7381_v4 = vld [vmem:[%s7949_s26 + $0x468] ss:$28 sps:$4 sm:$0xff]  }
  0x78   : > { %6768 = vmatpush1.bf16.msra.mxu1 %v7980_v24  ;;  %v7317_v24 = vld [vmem:[%s7949_s26 + $0x238] ss:$28 sps:$4 sm:$0xff]   ;;  %3960 = vmatpush1.bf16.msra.mxu0 %v7414_v22 }
  0x79   : > { %6753 = vmatprep.subr.bf16.mxu1 %v7822_v1  ;;  %3961 = vmatprep.subr.bf16.mxu0 %v7822_v1  ;;  %v7408_v22 = vld [vmem:[%s7949_s26 + $0x57c] ss:$28 sps:$4 sm:$0xff]  }
  0x7c   : > { %6769 = vmatpush1.bf16.msra.mxu1 %v7991_v26  ;;  %v7321_v26 = vld [vmem:[%s7949_s26 + $0x274] ss:$28 sps:$4 sm:$0xff]   ;;  %3962 = vmatpush1.bf16.msra.mxu0 %v7433_v35 }
  0x7d   : > { %6754 = vmatprep.subr.bf16.mxu1 %v7822_v1  ;;  %3963 = vmatprep.subr.bf16.mxu0 %v7822_v1  ;;  %v7426_v35 = vld [vmem:[%s7949_s26 + $0x5f0] ss:$28 sps:$4 sm:$0xff]  }
  0x7e   : > { %3090 = vmatmul.mubr.bf16.gmra.mrb[24].mxu1 %v7291_v5  ;;  %3555 = vmatmul.mubr.bf16.gmra.mrb[24].mxu0 %v7292_v6  ;;  %v7383_v5 = vld [vmem:[%s7949_s26 + $0x49c] ss:$28 sps:$4 sm:$0xff]   ;;  %v7385_v6 = vld [vmem:[%s7949_s26 + $0x4a4] ss:$28 sps:$4 sm:$0xff]  }
  0x7f   : > { %3097 = vmatprep.mubr.bf16.mxu1 %v7293_v7  ;;  %3562 = vmatprep.mubr.bf16.mxu0 %v7295_v8  ;;  %v7484_v7 = vld [vmem:[%s9332_s1 + $0x170] sm:$0xff]  }
  0x80   : > { %6770 = vmatpush1.bf16.msra.mxu1 %v8002_v28  ;;  %v7324_v28 = vld [vmem:[%s7949_s26 + $0x270] ss:$28 sps:$4 sm:$0xff]   ;;  %3964 = vmatpush1.bf16.msra.mxu0 %v7450_v45  ;;  %v7387_v8 = vld [vmem:[%s7949_s26 + $0x498] ss:$28 sps:$4 sm:$0xff]  }
  0x81   : > { %6755 = vmatprep.subr.bf16.mxu1 %v7822_v1  ;;  %3965 = vmatprep.subr.bf16.mxu0 %v7822_v1  ;;  %v7434_v45 = vld [vmem:[%s7949_s26 + $0x65c] ss:$28 sps:$4 sm:$0xff]  }
  0x84   : > { %6771 = vmatpush1.bf16.msra.mxu1 %v8013_v30  ;;  %v7327_v30 = vld [vmem:[%s7949_s26 + $0x2ac] ss:$28 sps:$4 sm:$0xff]   ;;  %3966 = vmatpush1.bf16.msra.mxu0 %v7465_v57 }
  0x85   : > { %6756 = vmatprep.subr.bf16.mxu1 %v7822_v1  ;;  %3967 = vmatprep.subr.bf16.mxu0 %v7822_v1  ;;  %v7444_v57 = vld [vmem:[%s7949_s26 + $0x690] ss:$28 sps:$4 sm:$0xff]  }
  0x86   : > { %3098 = vmatmul.mubr.bf16.gmra.mrb[28].mxu1 %v7297_v9  ;;  %3563 = vmatmul.mubr.bf16.gmra.mrb[28].mxu0 %v7298_v10  ;;  %v7388_v9 = vld [vmem:[%s7949_s26 + $0x4a0] ss:$28 sps:$4 sm:$0xff]   ;;  %v7389_v10 = vld [vmem:[%s7949_s26 + $0x4d4] ss:$28 sps:$4 sm:$0xff]  }
  0x87   : > { %3105 = vmatprep.mubr.bf16.mxu1 %v7299_v11  ;;  %3570 = vmatprep.mubr.bf16.mxu0 %v7301_v12  ;;  %v7391_v11 = vld [vmem:[%s7949_s26 + $0x4dc] ss:$28 sps:$4 sm:$0xff]   ;;  %v7393_v12 = vld [vmem:[%s7949_s26 + $0x4d0] ss:$28 sps:$4 sm:$0xff]  }
  0x88   : > { %6772 = vmatpush1.bf16.msra.mxu1 %v8024_v32  ;;  %v7330_v32 = vld [vmem:[%s7949_s26 + $0x2a8] ss:$28 sps:$4 sm:$0xff]   ;;  %3968 = vmatpush1.bf16.msra.mxu0 %v7484_v7 }
  0x89   : > { %6757 = vmatprep.subr.bf16.mxu1 %v7822_v1  ;;  %3969 = vmatprep.subr.bf16.mxu0 %v7822_v1  ;;  %v7497_v1 = vld [vmem:[%s9332_s1 + $0x178] sm:$0xff]  }
  0x8c   : > { %6773 = vmatpush1.bf16.msra.mxu1 %v8035_v34  ;;  %v7333_v34 = vld [vmem:[%s7949_s26 + $0x2e4] ss:$28 sps:$4 sm:$0xff]   ;;  %3970 = vmatpush1.bf16.msra.mxu0 %v7497_v1 }
  0x8d   : > { %v7461_v1 = vld [vmem:[%s7949_s26 + $0x744] ss:$28 sps:$4 sm:$0xff]  }
  0x8e   : > { %3106 = vmatmul.mubr.bf16.gmra.mrb[32].mxu1 %v7304_v14  ;;  %3571 = vmatmul.mubr.bf16.gmra.mrb[32].mxu0 %v7305_v15  ;;  %v7395_v14 = vld [vmem:[%s7949_s26 + $0x50c] ss:$28 sps:$4 sm:$0xff]   ;;  %v7397_v15 = vld [vmem:[%s7949_s26 + $0x514] ss:$28 sps:$4 sm:$0xff]  }
  0x8f   : > { %3113 = vmatprep.mubr.bf16.mxu1 %v7306_v16  ;;  %3578 = vmatprep.mubr.bf16.mxu0 %v7308_v17  ;;  %v7399_v16 = vld [vmem:[%s7949_s26 + $0x508] ss:$28 sps:$4 sm:$0xff]   ;;  %v7400_v17 = vld [vmem:[%s7949_s26 + $0x510] ss:$28 sps:$4 sm:$0xff]  }
  0x96   : > { %3114 = vmatmul.mubr.bf16.gmra.mrb[36].mxu1 %v7310_v18  ;;  %3579 = vmatmul.mubr.bf16.gmra.mrb[36].mxu0 %v7311_v19  ;;  %v7402_v18 = vld [vmem:[%s7949_s26 + $0x544] ss:$28 sps:$4 sm:$0xff]   ;;  %v7404_v19 = vld [vmem:[%s7949_s26 + $0x54c] ss:$28 sps:$4 sm:$0xff]  }
  0x97   : > { %3121 = vmatprep.mubr.bf16.mxu1 %v7312_v20  ;;  %3586 = vmatprep.mubr.bf16.mxu0 %v7314_v21  ;;  %v7406_v20 = vld [vmem:[%s7949_s26 + $0x540] ss:$28 sps:$4 sm:$0xff]   ;;  %v7407_v21 = vld [vmem:[%s7949_s26 + $0x548] ss:$28 sps:$4 sm:$0xff]  }
  0x9e   : > { %3122 = vmatmul.mubr.bf16.gmra.mrb[40].mxu1 %v7316_v23  ;;  %3587 = vmatmul.mubr.bf16.gmra.mrb[40].mxu0 %v7317_v24  ;;  %v7410_v23 = vld [vmem:[%s7949_s26 + $0x584] ss:$28 sps:$4 sm:$0xff]   ;;  %v7412_v24 = vld [vmem:[%s7949_s26 + $0x578] ss:$28 sps:$4 sm:$0xff]  }
  0x9f   : > { %3129 = vmatprep.mubr.bf16.mxu1 %v7319_v25  ;;  %3594 = vmatprep.mubr.bf16.mxu0 %v7321_v26  ;;  %v7413_v25 = vld [vmem:[%s7949_s26 + $0x580] ss:$28 sps:$4 sm:$0xff]   ;;  %v7415_v26 = vld [vmem:[%s7949_s26 + $0x5b4] ss:$28 sps:$4 sm:$0xff]  }
  0xa6   : > { %3130 = vmatmul.mubr.bf16.gmra.mrb[44].mxu1 %v7323_v27  ;;  %3595 = vmatmul.mubr.bf16.gmra.mrb[44].mxu0 %v7324_v28  ;;  %v7417_v27 = vld [vmem:[%s7949_s26 + $0x5bc] ss:$28 sps:$4 sm:$0xff]   ;;  %v7419_v28 = vld [vmem:[%s7949_s26 + $0x5b0] ss:$28 sps:$4 sm:$0xff]  }
  0xa7   : > { %3137 = vmatprep.mubr.bf16.mxu1 %v7325_v29  ;;  %3602 = vmatprep.mubr.bf16.mxu0 %v7327_v30  ;;  %v7420_v29 = vld [vmem:[%s7949_s26 + $0x5b8] ss:$28 sps:$4 sm:$0xff]   ;;  %v7421_v30 = vld [vmem:[%s7949_s26 + $0x5ec] ss:$28 sps:$4 sm:$0xff]  }
  0xae   : > { %3138 = vmatmul.mubr.bf16.gmra.mrb[48].mxu1 %v7329_v31  ;;  %3603 = vmatmul.mubr.bf16.gmra.mrb[48].mxu0 %v7330_v32  ;;  %v7423_v31 = vld [vmem:[%s7949_s26 + $0x5f4] ss:$28 sps:$4 sm:$0xff]  }
  0xaf   : > { %3145 = vmatprep.mubr.bf16.mxu1 %v7331_v33  ;;  %3610 = vmatprep.mubr.bf16.mxu0 %v7333_v34  ;;  %v7425_v33 = vld [vmem:[%s7949_s26 + $0x5e8] ss:$28 sps:$4 sm:$0xff]  }
  0xb6   : > { %3146 = vmatmul.mubr.bf16.gmra.mrb[52].mxu1 %v7335_v36  ;;  %3611 = vmatmul.mubr.bf16.gmra.mrb[52].mxu0 %v7336_v37  ;;  %v7427_v37 = vld [vmem:[%s7949_s26 + $0x624] ss:$28 sps:$4 sm:$0xff]  }
  0xb7   : > { %3153 = vmatprep.mubr.bf16.mxu1 %v7338_v38  ;;  %3618 = vmatprep.mubr.bf16.mxu0 %v7340_v39  ;;  %v7429_v39 = vld [vmem:[%s7949_s26 + $0x62c] ss:$28 sps:$4 sm:$0xff]  }
  0xbe   : > { %3154 = vmatmul.mubr.bf16.gmra.mrb[56].mxu1 %v7342_v40  ;;  %3619 = vmatmul.mubr.bf16.gmra.mrb[56].mxu0 %v7343_v41  ;;  %v7431_v41 = vld [vmem:[%s7949_s26 + $0x620] ss:$28 sps:$4 sm:$0xff]  }
  0xbf   : > { %3161 = vmatprep.mubr.bf16.mxu1 %v7344_v42  ;;  %3626 = vmatprep.mubr.bf16.mxu0 %v7346_v43  ;;  %v7432_v43 = vld [vmem:[%s7949_s26 + $0x628] ss:$28 sps:$4 sm:$0xff]  }
  0xc6   : > { %3162 = vmatmul.mubr.bf16.gmra.mrb[60].mxu1 %v7348_v44  ;;  %3627 = vmatmul.mubr.bf16.gmra.mrb[60].mxu0 %v7349_v46 }
  0xc7   : > { %3169 = vmatprep.mubr.bf16.mxu1 %v7351_v47  ;;  %3634 = vmatprep.mubr.bf16.mxu0 %v7353_v48  ;;  %v7436_v47 = vld [vmem:[%s7949_s26 + $0x664] ss:$28 sps:$4 sm:$0xff]  }
  0xce   : > { %3170 = vmatmul.mubr.bf16.gmra.mrb[64].mxu1 %v7355_v49  ;;  %3635 = vmatmul.mubr.bf16.gmra.mrb[64].mxu0 %v7356_v50  ;;  %v7438_v49 = vld [vmem:[%s7949_s26 + $0x658] ss:$28 sps:$4 sm:$0xff]  }
  0xcf   : > { %3177 = vmatprep.mubr.bf16.mxu1 %v7357_v51  ;;  %3642 = vmatprep.mubr.bf16.mxu0 %v7359_v52  ;;  %v7439_v51 = vld [vmem:[%s7949_s26 + $0x660] ss:$28 sps:$4 sm:$0xff]  }
  0xd6   : > { %3178 = vmatmul.mubr.bf16.gmra.mrb[68].mxu1 %v7361_v53  ;;  %3643 = vmatmul.mubr.bf16.gmra.mrb[68].mxu0 %v7362_v54  ;;  %v7440_v53 = vld [vmem:[%s7949_s26 + $0x694] ss:$28 sps:$4 sm:$0xff]  }
  0xd7   : > { %3185 = vmatprep.mubr.bf16.mxu1 %v7363_v55  ;;  %3650 = vmatprep.mubr.bf16.mxu0 %v7365_v56  ;;  %v7442_v55 = vld [vmem:[%s7949_s26 + $0x69c] ss:$28 sps:$4 sm:$0xff]  }
  0xde   : > { %3186 = vmatmul.mubr.bf16.gmra.mrb[72].mxu1 %v7367_v58  ;;  %3651 = vmatmul.mubr.bf16.gmra.mrb[72].mxu0 %v7368_v59  ;;  %v7445_v59 = vld [vmem:[%s7949_s26 + $0x698] ss:$28 sps:$4 sm:$0xff]  }
  0xdf   : > { %3193 = vmatprep.mubr.bf16.mxu1 %v7370_v60  ;;  %3658 = vmatprep.mubr.bf16.mxu0 %v7372_v61  ;;  %v7446_v61 = vld [vmem:[%s7949_s26 + $0x6cc] ss:$28 sps:$4 sm:$0xff]  }
  0xe6   : > { %3194 = vmatmul.mubr.bf16.gmra.mrb[76].mxu1 %v7374_v62  ;;  %3659 = vmatmul.mubr.bf16.gmra.mrb[76].mxu0 %v7375_v63  ;;  %v7448_v63 = vld [vmem:[%s7949_s26 + $0x6d4] ss:$28 sps:$4 sm:$0xff]  }
  0xe7   : > { %3201 = vmatprep.mubr.bf16.mxu1 %v7376_v0  ;;  %3666 = vmatprep.mubr.bf16.mxu0 %v7378_v2  ;;  %v7451_v2 = vld [vmem:[%s7949_s26 + $0x6c8] ss:$28 sps:$4 sm:$0xff]  }
  0xee   : > { %3202 = vmatmul.mubr.bf16.gmra.mrb[80].mxu1 %v7380_v3  ;;  %3667 = vmatmul.mubr.bf16.gmra.mrb[80].mxu0 %v7381_v4  ;;  %v7452_v4 = vld [vmem:[%s7949_s26 + $0x6d0] ss:$28 sps:$4 sm:$0xff]  }
  0xef   : > { %3209 = vmatprep.mubr.bf16.mxu1 %v7383_v5  ;;  %3674 = vmatprep.mubr.bf16.mxu0 %v7385_v6  ;;  %v7453_v6 = vld [vmem:[%s7949_s26 + $0x704] ss:$28 sps:$4 sm:$0xff]  }
  0xf6   : > { %3210 = vmatmul.mubr.bf16.gmra.mrb[84].mxu1 %v7387_v8  ;;  %3675 = vmatmul.mubr.bf16.gmra.mrb[84].mxu0 %v7388_v9  ;;  %v7455_v8 = vld [vmem:[%s7949_s26 + $0x70c] ss:$28 sps:$4 sm:$0xff]  }
  0xf7   : > { %3217 = vmatprep.mubr.bf16.mxu1 %v7389_v10  ;;  %3682 = vmatprep.mubr.bf16.mxu0 %v7391_v11  ;;  %v7457_v10 = vld [vmem:[%s7949_s26 + $0x700] ss:$28 sps:$4 sm:$0xff]  }
  0xfe   : > { %3218 = vmatmul.mubr.bf16.gmra.mrb[88].mxu1 %v7393_v12  ;;  %3683 = vmatmul.mubr.bf16.gmra.mrb[88].mxu0 %v7394_v13  ;;  %v7458_v12 = vld [vmem:[%s7949_s26 + $0x708] ss:$28 sps:$4 sm:$0xff]  }
  0xff   : > { %3225 = vmatprep.mubr.bf16.mxu1 %v7395_v14  ;;  %3690 = vmatprep.mubr.bf16.mxu0 %v7397_v15  ;;  %v7459_v14 = vld [vmem:[%s7949_s26 + $0x73c] ss:$28 sps:$4 sm:$0xff]  }
 0x106   : > { %3226 = vmatmul.mubr.bf16.gmra.mrb[92].mxu1 %v7399_v16  ;;  %3691 = vmatmul.mubr.bf16.gmra.mrb[92].mxu0 %v7400_v17  ;;  %v7463_v17 = vld [vmem:[%s7949_s26 + $0x738] ss:$28 sps:$4 sm:$0xff]  }
 0x107   : > { %3233 = vmatprep.mubr.bf16.mxu1 %v7402_v18  ;;  %3698 = vmatprep.mubr.bf16.mxu0 %v7404_v19  ;;  %v7464_v19 = vld [vmem:[%s7949_s26 + $0x740] ss:$28 sps:$4 sm:$0xff]  }
 0x10e   : > { %3234 = vmatmul.mubr.bf16.gmra.mrb[96].mxu1 %v7406_v20  ;;  %3699 = vmatmul.mubr.bf16.gmra.mrb[96].mxu0 %v7407_v21  ;;  %v7466_v21 = vld [vmem:[%s7949_s26 + $0x774] ss:$28 sps:$4 sm:$0xff]  }
 0x10f   : > { %3241 = vmatprep.mubr.bf16.mxu1 %v7408_v22  ;;  %3706 = vmatprep.mubr.bf16.mxu0 %v7410_v23  ;;  %v7468_v23 = vld [vmem:[%s7949_s26 + $0x77c] ss:$28 sps:$4 sm:$0xff]  }
 0x116   : > { %3242 = vmatmul.mubr.bf16.gmra.mrb[100].mxu1 %v7412_v24  ;;  %3707 = vmatmul.mubr.bf16.gmra.mrb[100].mxu0 %v7413_v25  ;;  %v7470_v25 = vld [vmem:[%s7949_s26 + $0x770] ss:$28 sps:$4 sm:$0xff]  }
 0x117   : > { %3249 = vmatprep.mubr.bf16.mxu1 %v7415_v26  ;;  %3714 = vmatprep.mubr.bf16.mxu0 %v7417_v27  ;;  %v7471_v27 = vld [vmem:[%s7949_s26 + $0x778] ss:$28 sps:$4 sm:$0xff]  }
 0x11e   : > { %3250 = vmatmul.mubr.bf16.gmra.mrb[104].mxu1 %v7419_v28  ;;  %3715 = vmatmul.mubr.bf16.gmra.mrb[104].mxu0 %v7420_v29  ;;  %v7472_v29 = vld [vmem:[%s7949_s26 + $0x7ac] ss:$28 sps:$4 sm:$0xff]  }
 0x11f   : > { %3257 = vmatprep.mubr.bf16.mxu1 %v7421_v30  ;;  %3722 = vmatprep.mubr.bf16.mxu0 %v7423_v31  ;;  %v7474_v31 = vld [vmem:[%s7949_s26 + $0x7b4] ss:$28 sps:$4 sm:$0xff]  }
 0x121   : > { %v8243_v32 = vpop.f32.mrb[0].mxu1 }
 0x122   : > { %v3045_v34 = vpop.f32.mrb[1].mxu1 }
 0x123   : > { %v8247_v36 = vpop.f32.mrb[2].mxu1  ;;  %v7476_v34 = vld [vmem:[%s7949_s26 + $0x7a8] ss:$28 sps:$4 sm:$0xff]  }
 0x124   : > { %v3048_v38 = vpop.f32.mrb[3].mxu1 }
 0x126   : > { %3258 = vmatmul.mubr.bf16.gmra.mrb[108].mxu1 %v7425_v33  ;;  %3723 = vmatmul.mubr.bf16.gmra.mrb[108].mxu0 %v7426_v35 }
 0x127   : > { %3265 = vmatprep.mubr.bf16.mxu1 %v7427_v37  ;;  %3730 = vmatprep.mubr.bf16.mxu0 %v7429_v39  ;;  %v7477_v37 = vld [vmem:[%s7949_s26 + $0x7b0] ss:$28 sps:$4 sm:$0xff]   ;;  %v7478_v39 = vld [vmem:[%s7949_s26 + $0x7e4] ss:$28 sps:$4 sm:$0xff]  }
 0x129   : > { %v8251_v40 = vpop.f32.mrb[4].mxu1 }
 0x12a   : > { %v3053_v42 = vpop.f32.mrb[5].mxu1 }
 0x12b   : > { %v8255_v44 = vpop.f32.mrb[6].mxu1  ;;  %v7480_v42 = vld [vmem:[%s7949_s26 + $0x7ec] ss:$28 sps:$4 sm:$0xff]  }
 0x12c   : > { %v3056_v46 = vpop.f32.mrb[7].mxu1 }
 0x12e   : > { %3266 = vmatmul.mubr.bf16.gmra.mrb[112].mxu1 %v7431_v41  ;;  %3731 = vmatmul.mubr.bf16.gmra.mrb[112].mxu0 %v7432_v43 }
 0x12f   : > { %3273 = vmatprep.mubr.bf16.mxu1 %v7434_v45  ;;  %3738 = vmatprep.mubr.bf16.mxu0 %v7436_v47  ;;  %v7482_v45 = vld [vmem:[%s7949_s26 + $0x7e0] ss:$28 sps:$4 sm:$0xff]   ;;  %v7483_v47 = vld [vmem:[%s7949_s26 + $0x7e8] ss:$28 sps:$4 sm:$0xff]  }
 0x131   : > { %v8259_v48 = vpop.f32.mrb[8].mxu1 }
 0x132   : > { %v3061_v50 = vpop.f32.mrb[9].mxu1 }
 0x133   : > { %v8263_v52 = vpop.f32.mrb[10].mxu1  ;;  %v7485_v50 = vld [vmem:[%s7949_s26 + $0x81c] ss:$28 sps:$4 sm:$0xff]  }
 0x134   : > { %v3064_v54 = vpop.f32.mrb[11].mxu1 }
 0x136   : > { %3274 = vmatmul.mubr.bf16.gmra.mrb[116].mxu1 %v7438_v49  ;;  %3739 = vmatmul.mubr.bf16.gmra.mrb[116].mxu0 %v7439_v51 }
 0x137   : > { %3281 = vmatprep.mubr.bf16.mxu1 %v7440_v53  ;;  %3746 = vmatprep.mubr.bf16.mxu0 %v7442_v55  ;;  %v7487_v53 = vld [vmem:[%s7949_s26 + $0x824] ss:$28 sps:$4 sm:$0xff]   ;;  %v7489_v55 = vld [vmem:[%s7949_s26 + $0x818] ss:$28 sps:$4 sm:$0xff]  }
 0x139   : > { %v8267_v56 = vpop.f32.mrb[12].mxu1 }
 0x13a   : > { %v3069_v58 = vpop.f32.mrb[13].mxu1 }
 0x13b   : > { %v8271_v60 = vpop.f32.mrb[14].mxu1  ;;  %v7490_v58 = vld [vmem:[%s7949_s26 + $0x820] ss:$28 sps:$4 sm:$0xff]  }
 0x13c   : > { %v3072_v62 = vpop.f32.mrb[15].mxu1 }
 0x13e   : > { %3282 = vmatmul.mubr.bf16.gmra.mrb[120].mxu1 %v7444_v57  ;;  %3747 = vmatmul.mubr.bf16.gmra.mrb[120].mxu0 %v7445_v59 }
 0x13f   : > { %3289 = vmatprep.mubr.bf16.mxu1 %v7446_v61  ;;  %3754 = vmatprep.mubr.bf16.mxu0 %v7448_v63  ;;  %v7491_v61 = vld [vmem:[%s7949_s26 + $0x854] ss:$28 sps:$4 sm:$0xff]   ;;  %v7493_v63 = vld [vmem:[%s7949_s26 + $0x85c] ss:$28 sps:$4 sm:$0xff]  }
 0x141   : > { %v8275_v0 = vpop.f32.mrb[16].mxu1 }
 0x142   : > { %v3077_v3 = vpop.f32.mrb[17].mxu1 }
 0x143   : > { %v8279_v5 = vpop.f32.mrb[18].mxu1  ;;  %v7495_v3 = vld [vmem:[%s7949_s26 + $0x850] ss:$28 sps:$4 sm:$0xff]  }
 0x144   : > { %v3080_v7 = vpop.f32.mrb[19].mxu1 }
 0x146   : > { %3290 = vmatmul.mubr.bf16.gmra.mrb[124].mxu1 %v7451_v2  ;;  %3755 = vmatmul.mubr.bf16.gmra.mrb[124].mxu0 %v7452_v4 }
 0x147   : > { %3297 = vmatprep.mubr.bf16.mxu1 %v7453_v6  ;;  %3762 = vmatprep.mubr.bf16.mxu0 %v7455_v8  ;;  %v7496_v6 = vld [vmem:[%s7949_s26 + $0x858] ss:$28 sps:$4 sm:$0xff]   ;;  %v7498_v8 = vld [vmem:[%s7949_s26 + $0x88c] ss:$28 sps:$4 sm:$0xff]  }
 0x149   : > { %v8283_v9 = vpop.f32.mrb[20].mxu1 }
 0x14a   : > { %v3085_v11 = vpop.f32.mrb[21].mxu1 }
 0x14b   : > { %v8287_v13 = vpop.f32.mrb[22].mxu1  ;;  %v7500_v11 = vld [vmem:[%s7949_s26 + $0x894] ss:$28 sps:$4 sm:$0xff]  }
 0x14c   : > { %v3088_v15 = vpop.f32.mrb[23].mxu1 }
 0x14e   : > { %3298 = vmatmul.mubr.bf16.gmra.mrb[128].mxu1 %v7457_v10  ;;  %3763 = vmatmul.mubr.bf16.gmra.mrb[128].mxu0 %v7458_v12 }
 0x14f   : > { %3305 = vmatprep.mubr.bf16.mxu1 %v7459_v14  ;;  %3770 = vmatprep.mubr.bf16.mxu0 %v7461_v1  ;;  %v7502_v14 = vld [vmem:[%s7949_s26 + $0x888] ss:$28 sps:$4 sm:$0xff]   ;;  %v7503_v1 = vld [vmem:[%s7949_s26 + $0x890] ss:$28 sps:$4 sm:$0xff]  }
 0x151   : > { %v8291_v16 = vpop.f32.mrb[24].mxu1 }
 0x152   : > { %v3093_v18 = vpop.f32.mrb[25].mxu1 }
 0x153   : > { %v8295_v20 = vpop.f32.mrb[26].mxu1  ;;  %v7504_v18 = vld [vmem:[%s7949_s26 + $0x8c4] ss:$28 sps:$4 sm:$0xff]  }
 0x154   : > { %v3096_v22 = vpop.f32.mrb[27].mxu1 }
 0x155   : > { %v8350_v22 = vld [vmem:[%s9332_s1 + $0x180] sm:$0xff]  }
 0x156   : > { %3306 = vmatmul.mubr.bf16.gmra.mrb[132].mxu1 %v7463_v17  ;;  %3771 = vmatmul.mubr.bf16.gmra.mrb[132].mxu0 %v7464_v19 }
 0x157   : > { %3313 = vmatprep.mubr.bf16.mxu1 %v7466_v21  ;;  %3778 = vmatprep.mubr.bf16.mxu0 %v7468_v23  ;;  %v7506_v21 = vld [vmem:[%s7949_s26 + $0x8cc] ss:$28 sps:$4 sm:$0xff]  }
 0x158   : > { %6618 = vmatprep.subr.bf16.mxu1 %v8350_v22 }
 0x159   : > { %v8299_v24 = vpop.f32.mrb[28].mxu1 }
 0x15a   : > { %v3101_v26 = vpop.f32.mrb[29].mxu1 }
 0x15b   : > { %v8303_v28 = vpop.f32.mrb[30].mxu1 }
 0x15c   : > { %v3104_v30 = vpop.f32.mrb[31].mxu1 }
 0x15d   : > { %v7510_v30 = vld [vmem:[%s7949_s26 + $0x8fc] ss:$28 sps:$4 sm:$0xff]  }
 0x15e   : > { %3314 = vmatmul.mubr.bf16.gmra.mrb[136].mxu1 %v7470_v25  ;;  %3779 = vmatmul.mubr.bf16.gmra.mrb[136].mxu0 %v7471_v27  ;;  %v7508_v25 = vld [vmem:[%s7949_s26 + $0x8c0] ss:$28 sps:$4 sm:$0xff]   ;;  %v7509_v27 = vld [vmem:[%s7949_s26 + $0x8c8] ss:$28 sps:$4 sm:$0xff]  }
 0x15f   : > { %3321 = vmatprep.mubr.bf16.mxu1 %v7472_v29  ;;  %3786 = vmatprep.mubr.bf16.mxu0 %v7474_v31 }
 0x161   : > { %v8307_v33 = vpop.f32.mrb[32].mxu1 }
 0x162   : > { %v3109_v35 = vpop.f32.mrb[33].mxu1 }
 0x163   : > { %v8311_v38 = vpop.f32.mrb[34].mxu1 }
 0x164   : > { %v3112_v41 = vpop.f32.mrb[35].mxu1 }
 0x165   : > { %v7512_v41 = vld [vmem:[%s7949_s26 + $0x10] ss:$28 sps:$4 sm:$0xff]  }
 0x166   : > { %3322 = vmatmul.mubr.bf16.gmra.mrb[140].mxu1 %v7476_v34  ;;  %3787 = vmatmul.mubr.bf16.gmra.mrb[140].mxu0 %v7477_v37  ;;  %v7514_v34 = vld [vmem:[%s7949_s26 + $0x14] ss:$28 sps:$4 sm:$0xff]  }
 0x167   : > { %3329 = vmatprep.mubr.bf16.mxu1 %v7478_v39  ;;  %3794 = vmatprep.mubr.bf16.mxu0 %v7480_v42  ;;  %v7515_v37 = vld [vmem:[%s7949_s26 + $0x8f8] ss:$28 sps:$4 sm:$0xff]  }
 0x169   : > { %v8315_v43 = vpop.f32.mrb[36].mxu1 }
 0x16a   : > { %v3117_v46 = vpop.f32.mrb[37].mxu1 }
 0x16b   : > { %v8319_v49 = vpop.f32.mrb[38].mxu1 }
 0x16c   : > { %v3120_v51 = vpop.f32.mrb[39].mxu1 }
 0x16d   : > { %v7520_v51 = vld [vmem:[%s7949_s26 + $0x930] ss:$28 sps:$4 sm:$0xff]  }
 0x16e   : > { %3330 = vmatmul.mubr.bf16.gmra.mrb[144].mxu1 %v7482_v45  ;;  %3795 = vmatmul.mubr.bf16.gmra.mrb[144].mxu0 %v7483_v47  ;;  %v7516_v45 = vld [vmem:[%s7949_s26 + $0x934] ss:$28 sps:$4 sm:$0xff]   ;;  %v7518_v47 = vld [vmem:[%s7949_s26 + $0x4c] ss:$28 sps:$4 sm:$0xff]  }
 0x16f   : > { %3337 = vmatprep.mubr.bf16.mxu1 %v7485_v50  ;;  %3802 = vmatprep.mubr.bf16.mxu0 %v7487_v53 }
 0x171   : > { %v8323_v54 = vpop.f32.mrb[40].mxu1 }
 0x172   : > { %v3125_v57 = vpop.f32.mrb[41].mxu1 }
 0x173   : > { %v8327_v59 = vpop.f32.mrb[42].mxu1 }
 0x174   : > { %v3128_v62 = vpop.f32.mrb[43].mxu1 }
 0x175   : > { %v7524_v62 = vld [vmem:[%s7949_s26 + $0x84] ss:$28 sps:$4 sm:$0xff]  }
 0x176   : > { %3338 = vmatmul.mubr.bf16.gmra.mrb[148].mxu1 %v7489_v55  ;;  %3803 = vmatmul.mubr.bf16.gmra.mrb[148].mxu0 %v7490_v58  ;;  %v7521_v55 = vld [vmem:[%s7949_s26 + $0x48] ss:$28 sps:$4 sm:$0xff]  }
 0x177   : > { %3345 = vmatprep.mubr.bf16.mxu1 %v7491_v61  ;;  %3810 = vmatprep.mubr.bf16.mxu0 %v7493_v63  ;;  %v7522_v58 = vld [vmem:[%s7949_s26 + $0x96c] ss:$28 sps:$4 sm:$0xff]  }
 0x179   : > { %v8331_v2 = vpop.f32.mrb[44].mxu1 }
 0x17a   : > { %v3133_v4 = vpop.f32.mrb[45].mxu1 }
 0x17b   : > { %v8335_v7 = vpop.f32.mrb[46].mxu1 }
 0x17c   : > { %v3136_v10 = vpop.f32.mrb[47].mxu1 }
 0x17d   : > { %v7528_v10 = vld [vmem:[%s7949_s26 + $0x9a4] ss:$28 sps:$4 sm:$0xff]  }
 0x17e   : > { %3346 = vmatmul.mubr.bf16.gmra.mrb[152].mxu1 %v7495_v3  ;;  %3811 = vmatmul.mubr.bf16.gmra.mrb[152].mxu0 %v7496_v6  ;;  %v7526_v3 = vld [vmem:[%s7949_s26 + $0x968] ss:$28 sps:$4 sm:$0xff]   ;;  %v7527_v6 = vld [vmem:[%s7949_s26 + $0x80] ss:$28 sps:$4 sm:$0xff]  }
 0x17f   : > { %3353 = vmatprep.mubr.bf16.mxu1 %v7498_v8  ;;  %3818 = vmatprep.mubr.bf16.mxu0 %v7500_v11 }
 0x181   : > { %v8339_v12 = vpop.f32.mrb[48].mxu1 }
 0x182   : > { %v3141_v15 = vpop.f32.mrb[49].mxu1 }
 0x183   : > { %v8343_v17 = vpop.f32.mrb[50].mxu1 }
 0x184   : > { %v3144_v19 = vpop.f32.mrb[51].mxu1 }
 0x185   : > { %v7533_v19 = vld [vmem:[%s7949_s26 + $0xb8] ss:$28 sps:$4 sm:$0xff]  }
 0x186   : > { %3354 = vmatmul.mubr.bf16.gmra.mrb[156].mxu1 %v7502_v14  ;;  %3819 = vmatmul.mubr.bf16.gmra.mrb[156].mxu0 %v7503_v1  ;;  %v7530_v14 = vld [vmem:[%s7949_s26 + $0xbc] ss:$28 sps:$4 sm:$0xff]  }
 0x187   : > { %3361 = vmatprep.mubr.bf16.mxu1 %v7504_v18  ;;  %3826 = vmatprep.mubr.bf16.mxu0 %v7506_v21  ;;  %v7532_v1 = vld [vmem:[%s7949_s26 + $0x9a0] ss:$28 sps:$4 sm:$0xff]  }
 0x189   : > { %v8352_v23 = vpop.f32.mrb[52].mxu1 }
 0x18a   : > { %v3149_v26 = vpop.f32.mrb[53].mxu1 }
 0x18b   : > { %v8357_v29 = vpop.f32.mrb[54].mxu1 }
 0x18c   : > { %v3152_v31 = vpop.f32.mrb[55].mxu1 }
 0x18d   : > { %v7538_v31 = vld [vmem:[%s7949_s26 + $0x9d8] ss:$28 sps:$4 sm:$0xff]  }
 0x18e   : > { %3362 = vmatmul.mubr.bf16.gmra.mrb[160].mxu1 %v7508_v25  ;;  %3827 = vmatmul.mubr.bf16.gmra.mrb[160].mxu0 %v7509_v27  ;;  %v7534_v25 = vld [vmem:[%s7949_s26 + $0x9dc] ss:$28 sps:$4 sm:$0xff]   ;;  %v7536_v27 = vld [vmem:[%s7949_s26 + $0xf4] ss:$28 sps:$4 sm:$0xff]  }
 0x18f   : > { %3369 = vmatprep.mubr.bf16.mxu1 %v7510_v30  ;;  %3971 = vmatprep.mubr.bf16.mxu0 %v7514_v34 }
 0x191   : > { %v8361_v35 = vpop.f32.mrb[56].mxu1 }
 0x192   : > { %v3157_v39 = vpop.f32.mrb[57].mxu1 }
 0x193   : > { %v8365_v42 = vpop.f32.mrb[58].mxu1 }
 0x194   : > { %v3160_v46 = vpop.f32.mrb[59].mxu1 }
 0x195   : > { %v7542_v46 = vld [vmem:[%s7949_s26 + $0x12c] ss:$28 sps:$4 sm:$0xff]  }
 0x196   : > { %3370 = vmatmul.mubr.bf16.gmra.mrb[164].mxu1 %v7515_v37  ;;  %3972 = vmatmul.mubr.bf16.vlgmr.msra.gmra.mrb[0].mxu0 %v7512_v41  ;;  %v7539_v37 = vld [vmem:[%s7949_s26 + $0xf0] ss:$28 sps:$4 sm:$0xff]  }
 0x197   : > { %3377 = vmatprep.mubr.bf16.mxu1 %v7516_v45  ;;  %3979 = vmatprep.mubr.bf16.mxu0 %v7518_v47  ;;  %v7540_v41 = vld [vmem:[%s7949_s26 + $0xa14] ss:$28 sps:$4 sm:$0xff]  }
 0x199   : > { %v8369_v50 = vpop.f32.mrb[60].mxu1 }
 0x19a   : > { %v3165_v53 = vpop.f32.mrb[61].mxu1 }
 0x19b   : > { %v8373_v57 = vpop.f32.mrb[62].mxu1 }
 0x19c   : > { %v3168_v61 = vpop.f32.mrb[63].mxu1 }
 0x19d   : > { %v7546_v61 = vld [vmem:[%s7949_s26 + $0xa4c] ss:$28 sps:$4 sm:$0xff]  }
 0x19e   : > { %3378 = vmatmul.mubr.bf16.gmra.mrb[168].mxu1 %v7520_v51  ;;  %3980 = vmatmul.mubr.bf16.gmra.mrb[4].mxu0 %v7521_v55  ;;  %v7544_v51 = vld [vmem:[%s7949_s26 + $0xa10] ss:$28 sps:$4 sm:$0xff]   ;;  %v7545_v55 = vld [vmem:[%s7949_s26 + $0x128] ss:$28 sps:$4 sm:$0xff]  }
 0x19f   : > { %3385 = vmatprep.mubr.bf16.mxu1 %v7522_v58  ;;  %3987 = vmatprep.mubr.bf16.mxu0 %v7524_v62 }
 0x1a1   : > { %v8377_v63 = vpop.f32.mrb[64].mxu1 }
 0x1a2   : > { %v3173_v4 = vpop.f32.mrb[65].mxu1 }
 0x1a3   : > { %v8381_v8 = vpop.f32.mrb[66].mxu1 }
 0x1a4   : > { %v3176_v11 = vpop.f32.mrb[67].mxu1 }
 0x1a5   : > { %v7551_v11 = vld [vmem:[%s7949_s26 + $0x160] ss:$28 sps:$4 sm:$0xff]  }
 0x1a6   : > { %3386 = vmatmul.mubr.bf16.gmra.mrb[172].mxu1 %v7526_v3  ;;  %3988 = vmatmul.mubr.bf16.gmra.mrb[8].mxu0 %v7527_v6  ;;  %v7548_v3 = vld [vmem:[%s7949_s26 + $0x164] ss:$28 sps:$4 sm:$0xff]  }
 0x1a7   : > { %3393 = vmatprep.mubr.bf16.mxu1 %v7528_v10  ;;  %3995 = vmatprep.mubr.bf16.mxu0 %v7530_v14  ;;  %v7550_v6 = vld [vmem:[%s7949_s26 + $0xa48] ss:$28 sps:$4 sm:$0xff]  }
 0x1a9   : > { %v8385_v15 = vpop.f32.mrb[68].mxu1 }
 0x1aa   : > { %v3181_v18 = vpop.f32.mrb[69].mxu1 }
 0x1ab   : > { %v8389_v21 = vpop.f32.mrb[70].mxu1 }
 0x1ac   : > { %v3184_v26 = vpop.f32.mrb[71].mxu1 }
 0x1ad   : > { %v7556_v26 = vld [vmem:[%s7949_s26 + $0xa80] ss:$28 sps:$4 sm:$0xff]  }
 0x1ae   : > { %3394 = vmatmul.mubr.bf16.gmra.mrb[176].mxu1 %v7532_v1  ;;  %3996 = vmatmul.mubr.bf16.gmra.mrb[12].mxu0 %v7533_v19  ;;  %v7552_v1 = vld [vmem:[%s7949_s26 + $0xa84] ss:$28 sps:$4 sm:$0xff]   ;;  %v7554_v19 = vld [vmem:[%s7949_s26 + $0x19c] ss:$28 sps:$4 sm:$0xff]  }
 0x1af   : > { %3401 = vmatprep.mubr.bf16.mxu1 %v7534_v25  ;;  %4003 = vmatprep.mubr.bf16.mxu0 %v7536_v27 }
 0x1b1   : > { %v8393_v30 = vpop.f32.mrb[72].mxu1 }
 0x1b2   : > { %v3189_v34 = vpop.f32.mrb[73].mxu1 }
 0x1b3   : > { %v8397_v39 = vpop.f32.mrb[74].mxu1 }
 0x1b4   : > { %v3192_v45 = vpop.f32.mrb[75].mxu1 }
 0x1b5   : > { %v7560_v45 = vld [vmem:[%s7949_s26 + $0x1d4] ss:$28 sps:$4 sm:$0xff]  }
 0x1b6   : > { %3402 = vmatmul.mubr.bf16.gmra.mrb[180].mxu1 %v7538_v31  ;;  %4004 = vmatmul.mubr.bf16.gmra.mrb[16].mxu0 %v7539_v37  ;;  %v7557_v31 = vld [vmem:[%s7949_s26 + $0x198] ss:$28 sps:$4 sm:$0xff]  }
 0x1b7   : > { %3409 = vmatprep.mubr.bf16.mxu1 %v7540_v41  ;;  %4011 = vmatprep.mubr.bf16.mxu0 %v7542_v46  ;;  %v7558_v37 = vld [vmem:[%s7949_s26 + $0xabc] ss:$28 sps:$4 sm:$0xff]  }
 0x1b9   : > { %v8401_v47 = vpop.f32.mrb[76].mxu1 }
 0x1ba   : > { %v3197_v53 = vpop.f32.mrb[77].mxu1 }
 0x1bb   : > { %v8405_v58 = vpop.f32.mrb[78].mxu1 }
 0x1bc   : > { %v3200_v62 = vpop.f32.mrb[79].mxu1 }
 0x1bd   : > { %v7564_v62 = vld [vmem:[%s7949_s26 + $0xaf4] ss:$28 sps:$4 sm:$0xff]  }
 0x1be   : > { %3410 = vmatmul.mubr.bf16.gmra.mrb[184].mxu1 %v7544_v51  ;;  %4012 = vmatmul.mubr.bf16.gmra.mrb[20].mxu0 %v7545_v55  ;;  %v7562_v51 = vld [vmem:[%s7949_s26 + $0xab8] ss:$28 sps:$4 sm:$0xff]   ;;  %v7563_v55 = vld [vmem:[%s7949_s26 + $0x1d0] ss:$28 sps:$4 sm:$0xff]  }
 0x1bf   : > { %3417 = vmatprep.mubr.bf16.mxu1 %v7546_v61  ;;  %4019 = vmatprep.mubr.bf16.mxu0 %v7548_v3 }
 0x1c1   : > { %v8409_v4 = vpop.f32.mrb[80].mxu1 }
 0x1c2   : > { %v3205_v10 = vpop.f32.mrb[81].mxu1 }
 0x1c3   : > { %v8413_v14 = vpop.f32.mrb[82].mxu1 }
 0x1c4   : > { %v3208_v18 = vpop.f32.mrb[83].mxu1 }
 0x1c5   : > { %v7569_v18 = vld [vmem:[%s7949_s26 + $0x208] ss:$28 sps:$4 sm:$0xff]  }
 0x1c6   : > { %3418 = vmatmul.mubr.bf16.gmra.mrb[188].mxu1 %v7550_v6  ;;  %4020 = vmatmul.mubr.bf16.gmra.mrb[24].mxu0 %v7551_v11  ;;  %v7566_v6 = vld [vmem:[%s7949_s26 + $0x20c] ss:$28 sps:$4 sm:$0xff]  }
 0x1c7   : > { %3425 = vmatprep.mubr.bf16.mxu1 %v7552_v1  ;;  %4027 = vmatprep.mubr.bf16.mxu0 %v7554_v19  ;;  %v7568_v11 = vld [vmem:[%s7949_s26 + $0xaf0] ss:$28 sps:$4 sm:$0xff]  }
 0x1c9   : > { %v8417_v25 = vpop.f32.mrb[84].mxu1 }
 0x1ca   : > { %v3213_v27 = vpop.f32.mrb[85].mxu1 }
 0x1cb   : > { %v8421_v34 = vpop.f32.mrb[86].mxu1 }
 0x1cc   : > { %v3216_v41 = vpop.f32.mrb[87].mxu1 }
 0x1cd   : > { %v7574_v41 = vld [vmem:[%s7949_s26 + $0xb28] ss:$28 sps:$4 sm:$0xff]  }
 0x1ce   : > { %3426 = vmatmul.mubr.bf16.gmra.mrb[192].mxu1 %v7556_v26  ;;  %4028 = vmatmul.mubr.bf16.gmra.mrb[28].mxu0 %v7557_v31  ;;  %v7570_v26 = vld [vmem:[%s7949_s26 + $0xb2c] ss:$28 sps:$4 sm:$0xff]   ;;  %v7572_v31 = vld [vmem:[%s7949_s26 + $0x244] ss:$28 sps:$4 sm:$0xff]  }
 0x1cf   : > { %3433 = vmatprep.mubr.bf16.mxu1 %v7558_v37  ;;  %4035 = vmatprep.mubr.bf16.mxu0 %v7560_v45 }
 0x1d1   : > { %v8425_v46 = vpop.f32.mrb[88].mxu1 }
 0x1d2   : > { %v3221_v53 = vpop.f32.mrb[89].mxu1 }
 0x1d3   : > { %v8429_v61 = vpop.f32.mrb[90].mxu1 }
 0x1d4   : > { %v3224_v3 = vpop.f32.mrb[91].mxu1 }
 0x1d5   : > { %v7578_v3 = vld [vmem:[%s7949_s26 + $0x27c] ss:$28 sps:$4 sm:$0xff]  }
 0x1d6   : > { %3434 = vmatmul.mubr.bf16.gmra.mrb[196].mxu1 %v7562_v51  ;;  %4036 = vmatmul.mubr.bf16.gmra.mrb[32].mxu0 %v7563_v55  ;;  %v7575_v51 = vld [vmem:[%s7949_s26 + $0x240] ss:$28 sps:$4 sm:$0xff]  }
 0x1d7   : > { %3441 = vmatprep.mubr.bf16.mxu1 %v7564_v62  ;;  %4043 = vmatprep.mubr.bf16.mxu0 %v7566_v6  ;;  %v7576_v55 = vld [vmem:[%s7949_s26 + $0xb64] ss:$28 sps:$4 sm:$0xff]  }
 0x1d9   : > { %v8433_v10 = vpop.f32.mrb[92].mxu1 }
 0x1da   : > { %v3229_v1 = vpop.f32.mrb[93].mxu1 }
 0x1db   : > { %v8437_v19 = vpop.f32.mrb[94].mxu1 }
 0x1dc   : > { %v3232_v27 = vpop.f32.mrb[95].mxu1 }
 0x1dd   : > { %v7582_v27 = vld [vmem:[%s7949_s26 + $0xb9c] ss:$28 sps:$4 sm:$0xff]  }
 0x1de   : > { %3442 = vmatmul.mubr.bf16.gmra.mrb[200].mxu1 %v7568_v11  ;;  %4044 = vmatmul.mubr.bf16.gmra.mrb[36].mxu0 %v7569_v18  ;;  %v7580_v11 = vld [vmem:[%s7949_s26 + $0xb60] ss:$28 sps:$4 sm:$0xff]   ;;  %v7581_v18 = vld [vmem:[%s7949_s26 + $0x278] ss:$28 sps:$4 sm:$0xff]  }
 0x1df   : > { %3449 = vmatprep.mubr.bf16.mxu1 %v7570_v26  ;;  %4051 = vmatprep.mubr.bf16.mxu0 %v7572_v31 }
 0x1e1   : > { %v8441_v37 = vpop.f32.mrb[96].mxu1 }
 0x1e2   : > { %v3237_v45 = vpop.f32.mrb[97].mxu1 }
 0x1e3   : > { %v8445_v53 = vpop.f32.mrb[98].mxu1  ;;  %v7584_v45 = vld [vmem:[%s7949_s26 + $0x2b4] ss:$28 sps:$4 sm:$0xff]  }
 0x1e4   : > { %v3240_v62 = vpop.f32.mrb[99].mxu1 }
 0x1e5   : > { %v7587_v62 = vld [vmem:[%s7949_s26 + $0x2b0] ss:$28 sps:$4 sm:$0xff]  }
 0x1e6   : > { %3450 = vmatmul.mubr.bf16.gmra.mrb[204].mxu1 %v7574_v41  ;;  %4052 = vmatmul.mubr.bf16.gmra.mrb[40].mxu0 %v7575_v51  ;;  %v7586_v51 = vld [vmem:[%s7949_s26 + $0xb98] ss:$28 sps:$4 sm:$0xff]  }
 0x1e7   : > { %3457 = vmatprep.mubr.bf16.mxu1 %v7576_v55  ;;  %4059 = vmatprep.mubr.bf16.mxu0 %v7578_v3 }
 0x1e9   : > { %v8449_v6 = vpop.f32.mrb[100].mxu1 }
 0x1ea   : > { %9335 = vst [vmem:[#allocation2_spill] sm:$0xff] %v8449_v6  ;;  %v3245_v1 = vpop.f32.mrb[101].mxu1  ;;  %v7591_v6 = vld [vmem:[%s7949_s26 + $0x2ec] ss:$28 sps:$4 sm:$0xff]  }
 0x1eb   : > { %v8453_v26 = vpop.f32.mrb[102].mxu1  ;;  %v7590_v1 = vld [vmem:[%s7949_s26 + $0x904] ss:$28 sps:$4 sm:$0xff]  }
 0x1ec   : > { %9336 = vst [vmem:[#allocation3_spill] sm:$0xff] %v8453_v26  ;;  %v3248_v31 = vpop.f32.mrb[103].mxu1 }
 0x1ed   : > { %v7593_v31 = vld [vmem:[%s7949_s26 + $0x2e8] ss:$28 sps:$4 sm:$0xff]  }
 0x1ee   : > { %3458 = vmatmul.mubr.bf16.gmra.mrb[208].mxu1 %v7580_v11  ;;  %4060 = vmatmul.mubr.bf16.gmra.mrb[44].mxu0 %v7581_v18  ;;  %v7588_v18 = vld [vmem:[%s7949_s26 + $0x900] ss:$28 sps:$4 sm:$0xff]  }
 0x1ef   : > { %3465 = vmatprep.mubr.bf16.mxu1 %v7582_v27  ;;  %4067 = vmatprep.mubr.bf16.mxu0 %v7584_v45 }
 0x1f1   : > { %v8457_v41 = vpop.f32.mrb[104].mxu1 }
 0x1f2   : > { %9337 = vst [vmem:[#allocation4_spill] sm:$0xff] %v8457_v41  ;;  %v3253_v55 = vpop.f32.mrb[105].mxu1 }
 0x1f3   : > { %v8461_v3 = vpop.f32.mrb[106].mxu1  ;;  %v7594_v55 = vld [vmem:[%s7949_s26 + $0x93c] ss:$28 sps:$4 sm:$0xff]  }
 0x1f4   : > { %9338 = vst [vmem:[#allocation5_spill] sm:$0xff] %v8461_v3  ;;  %v3256_v26 = vpop.f32.mrb[107].mxu1  ;;  %v7596_v3 = vld [vmem:[%s7949_s26 + $0x324] ss:$28 sps:$4 sm:$0xff]  }
 0x1f5   : > { %v7607_v26 = vld [vmem:[%s9332_s1 + $0x188] sm:$0xff]  }
 0x1f6   : > { %3466 = vmatmul.mubr.bf16.gmra.mrb[212].mxu1 %v7586_v51  ;;  %4068 = vmatmul.mubr.bf16.gmra.mrb[48].mxu0 %v7587_v62  ;;  %v7620_v51 = vld [vmem:[%s9332_s1 + $0x190] sm:$0xff]  }
 0x1f7   : > { %3834 = vmatprep.mubr.bf16.mxu1 %v7590_v1  ;;  %4075 = vmatprep.mubr.bf16.mxu0 %v7591_v6  ;;  %v7599_v1 = vld [vmem:[%s7949_s26 + $0x320] ss:$28 sps:$4 sm:$0xff]  }
 0x1f9   : > { %v8465_v11 = vpop.f32.mrb[108].mxu1 }
 0x1fa   : > { %9339 = vst [vmem:[#allocation6_spill] sm:$0xff] %v8465_v11  ;;  %v3261_v27 = vpop.f32.mrb[109].mxu1  ;;  %v7623_v11 = vld [vmem:[%s7949_s26 + $0x404] ss:$28 sps:$4 sm:$0xff]  }
 0x1fb   : > { %v8469_v45 = vpop.f32.mrb[110].mxu1 }
 0x1fc   : > { %9340 = vst [vmem:[#allocation7_spill] sm:$0xff] %v8469_v45  ;;  %v3264_v41 = vpop.f32.mrb[111].mxu1  ;;  %v7601_v45 = vld [vmem:[%s7949_s26 + $0x974] ss:$28 sps:$4 sm:$0xff]  }
 0x1fd   : > { %v7598_v41 = vld [vmem:[%s7949_s26 + $0x938] ss:$28 sps:$4 sm:$0xff]  }
 0x1fe   : > { %3835 = vmatmul.mubr.bf16.vlgmr.msra.gmra.mrb[164].mxu1 %v7588_v18  ;;  %4076 = vmatmul.mubr.bf16.gmra.mrb[52].mxu0 %v7593_v31  ;;  %v7603_v31 = vld [vmem:[%s7949_s26 + $0x35c] ss:$28 sps:$4 sm:$0xff]  }
 0x1ff   : > { %3842 = vmatprep.mubr.bf16.mxu1 %v7594_v55  ;;  %4083 = vmatprep.mubr.bf16.mxu0 %v7596_v3  ;;  %v7640_v55 = vld [vmem:[%s9332_s1 + $0x1a0] sm:$0xff]  }
 0x200   : > { %6619 = vmatpush3.bf16.msra.mxu1 %v8350_v22  ;;  %v7633_v22 = vld [vmem:[%s9332_s1 + $0x198] sm:$0xff]  }
 0x201   : > { %v8477_v6 = vpop.f32.mrb[112].mxu1  ;;  %6620 = vmatprep.subr.bf16.mxu1 %v7607_v26 }
 0x202   : > { %9341 = vst [vmem:[#allocation8_spill] sm:$0xff] %v8477_v6  ;;  %v3269_v62 = vpop.f32.mrb[113].mxu1  ;;  %v7608_v6 = vld [vmem:[%s7949_s26 + $0x9ac] ss:$28 sps:$4 sm:$0xff]  }
 0x203   : > { %v8484_v27 = vpop.f32.mrb[114].mxu1  ;;  %v7605_v62 = vld [vmem:[%s7949_s26 + $0x970] ss:$28 sps:$4 sm:$0xff]  }
 0x204   : > { %9342 = vst [vmem:[#allocation9_spill] sm:$0xff] %v8484_v27  ;;  %v3272_v18 = vpop.f32.mrb[115].mxu1  ;;  %6621 = vmatpush3.bf16.msra.mxu1 %v7607_v26 }
 0x205   : > { %6622 = vmatprep.subr.bf16.mxu1 %v7620_v51  ;;  %v7606_v18 = vld [vmem:[%s7949_s26 + $0x358] ss:$28 sps:$4 sm:$0xff]  }
 0x206   : > { %3843 = vmatmul.mubr.bf16.gmra.mrb[168].mxu1 %v7598_v41  ;;  %4084 = vmatmul.mubr.bf16.gmra.mrb[56].mxu0 %v7599_v1  ;;  %v7610_v1 = vld [vmem:[%s7949_s26 + $0x394] ss:$28 sps:$4 sm:$0xff]  }
 0x207   : > { %3850 = vmatprep.mubr.bf16.mxu1 %v7601_v45  ;;  %4091 = vmatprep.mubr.bf16.mxu0 %v7603_v31  ;;  %v7653_v45 = vld [vmem:[%s9332_s1 + $0x1a8] sm:$0xff]   ;;  %v7664_v31 = vld [vmem:[%s9332_s1 + $0x1b0] sm:$0xff]  }
 0x208   : > { %6623 = vmatpush3.bf16.msra.mxu1 %v7620_v51 }
 0x209   : > { %v8491_v3 = vpop.f32.mrb[116].mxu1  ;;  %6624 = vmatprep.subr.bf16.mxu1 %v7633_v22 }
 0x20a   : > { %9343 = vst [vmem:[#allocation10_spill] sm:$0xff] %v8491_v3  ;;  %v3277_v26 = vpop.f32.mrb[117].mxu1  ;;  %v7614_v3 = vld [vmem:[%s7949_s26 + $0x9e4] ss:$28 sps:$4 sm:$0xff]  }
 0x20b   : > { %v8498_v27 = vpop.f32.mrb[118].mxu1  ;;  %v7612_v26 = vld [vmem:[%s7949_s26 + $0x9a8] ss:$28 sps:$4 sm:$0xff]  }
 0x20c   : > { %9344 = vst [vmem:[#allocation11_spill] sm:$0xff] %v8498_v27  ;;  %v3280_v41 = vpop.f32.mrb[119].mxu1  ;;  %6625 = vmatpush3.bf16.msra.mxu1 %v7633_v22 }
 0x20d   : > { %6626 = vmatprep.subr.bf16.mxu1 %v7640_v55  ;;  %v7613_v41 = vld [vmem:[%s7949_s26 + $0x390] ss:$28 sps:$4 sm:$0xff]  }
 0x20e   : > { %3851 = vmatmul.mubr.bf16.gmra.mrb[172].mxu1 %v7605_v62  ;;  %4092 = vmatmul.mubr.bf16.gmra.mrb[60].mxu0 %v7606_v18 }
 0x20f   : > { %3858 = vmatprep.mubr.bf16.mxu1 %v7608_v6  ;;  %4099 = vmatprep.mubr.bf16.mxu0 %v7610_v1  ;;  %v7616_v6 = vld [vmem:[%s7949_s26 + $0x3cc] ss:$28 sps:$4 sm:$0xff]   ;;  %v7618_v1 = vld [vmem:[%s7949_s26 + $0x9e0] ss:$28 sps:$4 sm:$0xff]  }
 0x210   : > { %6627 = vmatpush3.bf16.msra.mxu1 %v7640_v55  ;;  %v7673_v55 = vld [vmem:[%s9332_s1 + $0x1b8] sm:$0xff]  }
 0x211   : > { %v8505_v51 = vpop.f32.mrb[120].mxu1  ;;  %6628 = vmatprep.subr.bf16.mxu1 %v7653_v45 }
 0x212   : > { %9345 = vst [vmem:[#allocation12_spill] sm:$0xff] %v8505_v51  ;;  %v3285_v22 = vpop.f32.mrb[121].mxu1 }
 0x213   : > { %v8512_v27 = vpop.f32.mrb[122].mxu1 }
 0x214   : > { %9346 = vst [vmem:[#allocation13_spill] sm:$0xff] %v8512_v27  ;;  %v3288_v62 = vpop.f32.mrb[123].mxu1  ;;  %6629 = vmatpush3.bf16.msra.mxu1 %v7653_v45  ;;  %v7619_v45 = vld [vmem:[%s7949_s26 + $0x3c8] ss:$28 sps:$4 sm:$0xff]   ;;  %v7621_v27 = vld [vmem:[%s7949_s26 + $0xa1c] ss:$28 sps:$4 sm:$0xff]  }
 0x215   : > { %6630 = vmatprep.subr.bf16.mxu1 %v7664_v31 }
 0x216   : > { %3859 = vmatmul.mubr.bf16.gmra.mrb[176].mxu1 %v7612_v26  ;;  %4100 = vmatmul.mubr.bf16.gmra.mrb[64].mxu0 %v7613_v41  ;;  %v7626_v41 = vld [vmem:[%s7949_s26 + $0x400] ss:$28 sps:$4 sm:$0xff]  }
 0x217   : > { %3866 = vmatprep.mubr.bf16.mxu1 %v7614_v3  ;;  %4107 = vmatprep.mubr.bf16.mxu0 %v7616_v6 }
 0x218   : > { %6631 = vmatpush3.bf16.msra.mxu1 %v7664_v31  ;;  %v7625_v31 = vld [vmem:[%s7949_s26 + $0xa18] ss:$28 sps:$4 sm:$0xff]  }
 0x219   : > { %v8519_v18 = vpop.f32.mrb[124].mxu1  ;;  %6632 = vmatprep.subr.bf16.mxu1 %v7673_v55 }
 0x21a   : > { %9347 = vst [vmem:[#allocation14_spill] sm:$0xff] %v8519_v18  ;;  %v3293_v22 = vpop.f32.mrb[125].mxu1 }
 0x21b   : > { %v8523_v62 = vpop.f32.mrb[126].mxu1  ;;  %v7627_v22 = vld [vmem:[%s7949_s26 + $0xa54] ss:$28 sps:$4 sm:$0xff]  }
 0x21c   : > { %9348 = vst [vmem:[#allocation15_spill] sm:$0xff] %v8523_v62  ;;  %v3296_v51 = vpop.f32.mrb[127].mxu1  ;;  %6633 = vmatpush3.bf16.msra.mxu1 %v7673_v55 }
 0x21d   : > { %v7629_v51 = vld [vmem:[%s7949_s26 + $0x43c] ss:$28 sps:$4 sm:$0xff]  }
 0x21e   : > { %3867 = vmatmul.mubr.bf16.gmra.mrb[180].mxu1 %v7618_v1  ;;  %4108 = vmatmul.mubr.bf16.gmra.mrb[68].mxu0 %v7619_v45  ;;  %v7632_v1 = vld [vmem:[%s7949_s26 + $0x438] ss:$28 sps:$4 sm:$0xff]  }
 0x21f   : > { %3874 = vmatprep.mubr.bf16.mxu1 %v7621_v27  ;;  %4115 = vmatprep.mubr.bf16.mxu0 %v7623_v11  ;;  %v7631_v27 = vld [vmem:[%s7949_s26 + $0xa50] ss:$28 sps:$4 sm:$0xff]  }
 0x221   : > { %v8527_v3 = vpop.f32.mrb[128].mxu1 }
 0x222   : > { %9349 = vst [vmem:[#allocation16_spill] sm:$0xff] %v8527_v3  ;;  %v3301_v26 = vpop.f32.mrb[129].mxu1  ;;  %v7636_v3 = vld [vmem:[%s7949_s26 + $0x474] ss:$28 sps:$4 sm:$0xff]  }
 0x223   : > { %v8531_v6 = vpop.f32.mrb[130].mxu1  ;;  %v7634_v26 = vld [vmem:[%s7949_s26 + $0xa8c] ss:$28 sps:$4 sm:$0xff]  }
 0x224   : > { %9350 = vst [vmem:[#allocation17_spill] sm:$0xff] %v8531_v6  ;;  %v3304_v62 = vpop.f32.mrb[131].mxu1 }
 0x226   : > { %3875 = vmatmul.mubr.bf16.gmra.mrb[184].mxu1 %v7625_v31  ;;  %4116 = vmatmul.mubr.bf16.gmra.mrb[72].mxu0 %v7626_v41  ;;  %v7638_v31 = vld [vmem:[%s7949_s26 + $0xa88] ss:$28 sps:$4 sm:$0xff]  }
 0x227   : > { %3882 = vmatprep.mubr.bf16.mxu1 %v7627_v22  ;;  %4123 = vmatprep.mubr.bf16.mxu0 %v7629_v51  ;;  %v7639_v22 = vld [vmem:[%s7949_s26 + $0x470] ss:$28 sps:$4 sm:$0xff]  }
 0x229   : > { %v8535_v11 = vpop.f32.mrb[132].mxu1 }
 0x22a   : > { %9351 = vst [vmem:[#allocation18_spill] sm:$0xff] %v8535_v11  ;;  %v3309_v55 = vpop.f32.mrb[133].mxu1  ;;  %v7643_v11 = vld [vmem:[%s7949_s26 + $0x4ac] ss:$28 sps:$4 sm:$0xff]  }
 0x22b   : > { %v8539_v45 = vpop.f32.mrb[134].mxu1  ;;  %v7641_v55 = vld [vmem:[%s7949_s26 + $0xac4] ss:$28 sps:$4 sm:$0xff]  }
 0x22c   : > { %9352 = vst [vmem:[#allocation19_spill] sm:$0xff] %v8539_v45  ;;  %v3312_v6 = vpop.f32.mrb[135].mxu1 }
 0x22d   : > { %v7645_v6 = vld [vmem:[%s7949_s26 + $0xac0] ss:$28 sps:$4 sm:$0xff]  }
 0x22e   : > { %3883 = vmatmul.mubr.bf16.gmra.mrb[188].mxu1 %v7631_v27  ;;  %4124 = vmatmul.mubr.bf16.gmra.mrb[76].mxu0 %v7632_v1  ;;  %v7646_v1 = vld [vmem:[%s7949_s26 + $0x4a8] ss:$28 sps:$4 sm:$0xff]  }
 0x22f   : > { %3890 = vmatprep.mubr.bf16.mxu1 %v7634_v26  ;;  %4131 = vmatprep.mubr.bf16.mxu0 %v7636_v3 }
 0x231   : > { %v8543_v62 = vpop.f32.mrb[136].mxu1 }
 0x232   : > { %9353 = vst [vmem:[#allocation20_spill] sm:$0xff] %v8543_v62  ;;  %v3317_v41 = vpop.f32.mrb[137].mxu1  ;;  %v7649_v62 = vld [vmem:[%s7949_s26 + $0x4e4] ss:$28 sps:$4 sm:$0xff]  }
 0x233   : > { %v8547_v51 = vpop.f32.mrb[138].mxu1  ;;  %v7647_v41 = vld [vmem:[%s7949_s26 + $0xafc] ss:$28 sps:$4 sm:$0xff]  }
 0x234   : > { %9354 = vst [vmem:[#allocation21_spill] sm:$0xff] %v8547_v51  ;;  %v3320_v45 = vpop.f32.mrb[139].mxu1 }
 0x235   : > { %v7651_v45 = vld [vmem:[%s7949_s26 + $0xaf8] ss:$28 sps:$4 sm:$0xff]  }
 0x236   : > { %3891 = vmatmul.mubr.bf16.gmra.mrb[192].mxu1 %v7638_v31  ;;  %4132 = vmatmul.mubr.bf16.gmra.mrb[80].mxu0 %v7639_v22  ;;  %v7652_v22 = vld [vmem:[%s7949_s26 + $0x4e0] ss:$28 sps:$4 sm:$0xff]  }
 0x237   : > { %3898 = vmatprep.mubr.bf16.mxu1 %v7641_v55  ;;  %4139 = vmatprep.mubr.bf16.mxu0 %v7643_v11 }
 0x239   : > { %v8551_v3 = vpop.f32.mrb[140].mxu1 }
 0x23a   : > { %9355 = vst [vmem:[#allocation22_spill] sm:$0xff] %v8551_v3  ;;  %v3325_v27 = vpop.f32.mrb[141].mxu1  ;;  %v7656_v3 = vld [vmem:[%s7949_s26 + $0x51c] ss:$28 sps:$4 sm:$0xff]  }
 0x23b   : > { %v8555_v26 = vpop.f32.mrb[142].mxu1  ;;  %v7654_v27 = vld [vmem:[%s7949_s26 + $0xb34] ss:$28 sps:$4 sm:$0xff]  }
 0x23c   : > { %9356 = vst [vmem:[#allocation23_spill] sm:$0xff] %v8555_v26  ;;  %v3328_v51 = vpop.f32.mrb[143].mxu1 }
 0x23d   : > { %v7658_v51 = vld [vmem:[%s7949_s26 + $0xb30] ss:$28 sps:$4 sm:$0xff]  }
 0x23e   : > { %3899 = vmatmul.mubr.bf16.gmra.mrb[196].mxu1 %v7645_v6  ;;  %4140 = vmatmul.mubr.bf16.gmra.mrb[84].mxu0 %v7646_v1  ;;  %v7659_v1 = vld [vmem:[%s7949_s26 + $0x518] ss:$28 sps:$4 sm:$0xff]  }
 0x23f   : > { %3906 = vmatprep.mubr.bf16.mxu1 %v7647_v41  ;;  %4147 = vmatprep.mubr.bf16.mxu0 %v7649_v62 }
 0x241   : > { %v8559_v11 = vpop.f32.mrb[144].mxu1 }
 0x242   : > { %9357 = vst [vmem:[#allocation24_spill] sm:$0xff] %v8559_v11  ;;  %v3333_v31 = vpop.f32.mrb[145].mxu1  ;;  %v7662_v11 = vld [vmem:[%s7949_s26 + $0x554] ss:$28 sps:$4 sm:$0xff]  }
 0x243   : > { %v8563_v55 = vpop.f32.mrb[146].mxu1  ;;  %v7660_v31 = vld [vmem:[%s7949_s26 + $0xb6c] ss:$28 sps:$4 sm:$0xff]  }
 0x244   : > { %9358 = vst [vmem:[#allocation25_spill] sm:$0xff] %v8563_v55  ;;  %v3336_v26 = vpop.f32.mrb[147].mxu1 }
 0x245   : > { %v7665_v26 = vld [vmem:[%s7949_s26 + $0xb68] ss:$28 sps:$4 sm:$0xff]  }
 0x246   : > { %3907 = vmatmul.mubr.bf16.gmra.mrb[200].mxu1 %v7651_v45  ;;  %4148 = vmatmul.mubr.bf16.gmra.mrb[88].mxu0 %v7652_v22  ;;  %v7666_v22 = vld [vmem:[%s7949_s26 + $0x550] ss:$28 sps:$4 sm:$0xff]  }
 0x247   : > { %3914 = vmatprep.mubr.bf16.mxu1 %v7654_v27  ;;  %4155 = vmatprep.mubr.bf16.mxu0 %v7656_v3 }
 0x249   : > { %v8567_v62 = vpop.f32.mrb[148].mxu1 }
 0x24a   : > { %9359 = vst [vmem:[#allocation26_spill] sm:$0xff] %v8567_v62  ;;  %v3341_v6 = vpop.f32.mrb[149].mxu1  ;;  %v7669_v62 = vld [vmem:[%s7949_s26 + $0x58c] ss:$28 sps:$4 sm:$0xff]  }
 0x24b   : > { %v8571_v41 = vpop.f32.mrb[150].mxu1  ;;  %v7667_v6 = vld [vmem:[%s7949_s26 + $0xba4] ss:$28 sps:$4 sm:$0xff]  }
 0x24c   : > { %9360 = vst [vmem:[#allocation27_spill] sm:$0xff] %v8571_v41  ;;  %v3344_v55 = vpop.f32.mrb[151].mxu1 }
 0x24d   : > { %v7671_v55 = vld [vmem:[%s7949_s26 + $0xba0] ss:$28 sps:$4 sm:$0xff]  }
 0x24e   : > { %3915 = vmatmul.mubr.bf16.gmra.mrb[204].mxu1 %v7658_v51  ;;  %4156 = vmatmul.mubr.bf16.gmra.mrb[92].mxu0 %v7659_v1  ;;  %v7672_v1 = vld [vmem:[%s7949_s26 + $0x588] ss:$28 sps:$4 sm:$0xff]  }
 0x24f   : > { %3922 = vmatprep.mubr.bf16.mxu1 %v7660_v31  ;;  %4163 = vmatprep.mubr.bf16.mxu0 %v7662_v11 }
 0x251   : > { %v8575_v3 = vpop.f32.mrb[152].mxu1 }
 0x252   : > { %9361 = vst [vmem:[#allocation28_spill] sm:$0xff] %v8575_v3  ;;  %v3349_v45 = vpop.f32.mrb[153].mxu1  ;;  %v7674_v3 = vld [vmem:[%s7949_s26 + $0x5c4] ss:$28 sps:$4 sm:$0xff]  }
 0x253   : > { %v8579_v27 = vpop.f32.mrb[154].mxu1  ;;  %v7676_v45 = vld [vmem:[%s7949_s26 + $0x18] ss:$28 sps:$4 sm:$0xff]  }
 0x254   : > { %9362 = vst [vmem:[#allocation29_spill] sm:$0xff] %v8579_v27  ;;  %v3352_v41 = vpop.f32.mrb[155].mxu1 }
 0x256   : > { %3923 = vmatmul.mubr.bf16.gmra.mrb[208].mxu1 %v7665_v26  ;;  %4164 = vmatmul.mubr.bf16.gmra.mrb[96].mxu0 %v7666_v22  ;;  %v7677_v22 = vld [vmem:[%s7949_s26 + $0x5c0] ss:$28 sps:$4 sm:$0xff]  }
 0x257   : > { %3930 = vmatprep.mubr.bf16.mxu1 %v7667_v6  ;;  %4171 = vmatprep.mubr.bf16.mxu0 %v7669_v62  ;;  %v7678_v62 = vld [vmem:[%s7949_s26 + $0x50] ss:$28 sps:$4 sm:$0xff]  }
 0x259   : > { %v8583_v11 = vpop.f32.mrb[156].mxu1 }
 0x25a   : > { %9363 = vst [vmem:[#allocation30_spill] sm:$0xff] %v8583_v11  ;;  %v3357_v51 = vpop.f32.mrb[157].mxu1 }
 0x25b   : > { %v8587_v31 = vpop.f32.mrb[158].mxu1  ;;  %v7681_v51 = vld [vmem:[%s7949_s26 + $0x88] ss:$28 sps:$4 sm:$0xff]  }
 0x25c   : > { %9364 = vst [vmem:[#allocation31_spill] sm:$0xff] %v8587_v31  ;;  %v3360_v27 = vpop.f32.mrb[159].mxu1  ;;  %v7679_v31 = vld [vmem:[%s7949_s26 + $0x5fc] ss:$28 sps:$4 sm:$0xff]  }
 0x25d   : > { %v8602_v27 = vld [vmem:[%s9333_s2] ss:$0 sm:$0xff] }
 0x25e   : > { %3931 = vmatmul.mubr.bf16.gmra.mrb[212].mxu1 %v7671_v55  ;;  %4172 = vmatmul.mubr.bf16.gmra.mrb[100].mxu0 %v7672_v1  ;;  %v7683_v1 = vld [vmem:[%s7949_s26 + $0xc0] ss:$28 sps:$4 sm:$0xff]   ;;  %v3055_v18 = vadd.f32 %v8602_v27, %v8255_v44 }
 0x25f   : > { %6634 = vmatprep.mubr.bf16.mxu1 %v7676_v45  ;;  %4179 = vmatprep.mubr.bf16.mxu0 %v7674_v3  ;;  %v3044_v3 = vadd.f32 %v8602_v27, %v8243_v32  ;;  %v3052_v32 = vadd.f32 %v8602_v27, %v8251_v40  ;;  %v3060_v40 = vadd.f32 %v8602_v27, %v8259_v48 }
 0x260   : > { %v3068_v48 = vadd.f32 %v8602_v27, %v8267_v56  ;;  %v3076_v56 = vadd.f32 %v8602_v27, %v8275_v0  ;;  %v3084_v0 = vadd.f32 %v8602_v27, %v8283_v9  ;;  %v3092_v9 = vadd.f32 %v8602_v27, %v8291_v16 }
 0x261   : > { %v8591_v41 = vpop.f32.mrb[160].mxu1  ;;  %v3100_v16 = vadd.f32 %v8602_v27, %v8299_v24  ;;  %v3108_v24 = vadd.f32 %v8602_v27, %v8307_v33  ;;  %v3116_v33 = vadd.f32 %v8602_v27, %v8315_v43  ;;  %v3124_v43 = vadd.f32 %v8602_v27, %v8323_v54 }
 0x262   : > { %9365 = vst [vmem:[#allocation32_spill] sm:$0xff] %v8591_v41  ;;  %v3365_v26 = vpop.f32.mrb[161].mxu1  ;;  %v7686_v41 = vld [vmem:[%s7949_s26 + $0xf8] ss:$28 sps:$4 sm:$0xff]   ;;  %v3132_v54 = vadd.f32 %v8602_v27, %v8331_v2  ;;  %v3140_v2 = vadd.f32 %v8602_v27, %v8339_v12 }
 0x263   : > { %v8595_v6 = vpop.f32.mrb[162].mxu1  ;;  %v3047_v26 = vadd.f32 %v8602_v27, %v8247_v36 }
 0x264   : > { %9366 = vst [vmem:[#allocation33_spill] sm:$0xff] %v8595_v6  ;;  %v3368_v11 = vpop.f32.mrb[163].mxu1  ;;  %v7682_v6 = vld [vmem:[%s7949_s26 + $0x5f8] ss:$28 sps:$4 sm:$0xff]  }
 0x266   : > { %6635 = vmatmul.mubr.bf16.vlgmr.msra.gmra.mrb[216].mxu1 %v7678_v62  ;;  %4180 = vmatmul.mubr.bf16.gmra.mrb[104].mxu0 %v7677_v22  ;;  %v7684_v22 = vld [vmem:[%s7949_s26 + $0x634] ss:$28 sps:$4 sm:$0xff]  }
 0x267   : > { %6638 = vmatprep.mubr.bf16.mxu1 %v7681_v51  ;;  %4187 = vmatprep.mubr.bf16.mxu0 %v7679_v31 }
 0x269   : > { %v3973_v55 = vpop.f32.mrb[0].mxu0 }
 0x26a   : > { %v8607_v45 = vadd.f32 %v3973_v55, %v3044_v3  ;;  %v3975_v11 = vpop.f32.mrb[1].mxu0  ;;  %v7688_v55 = vld [vmem:[%s7949_s26 + $0x130] ss:$28 sps:$4 sm:$0xff]  }
 0x26b   : > { %v3976_v62 = vpop.f32.mrb[2].mxu0 }
 0x26c   : > { %9367 = vst [vmem:[#allocation34_spill] sm:$0xff] %v8607_v45  ;;  %v8614_v31 = vadd.f32 %v3976_v62, %v3047_v26  ;;  %v3978_v51 = vpop.f32.mrb[3].mxu0  ;;  %v7687_v45 = vld [vmem:[%s7949_s26 + $0x630] ss:$28 sps:$4 sm:$0xff]   ;;  %v7691_v26 = vld [vmem:[%s7949_s26 + $0x168] ss:$28 sps:$4 sm:$0xff]  }
 0x26d   : > { %v7693_v51 = vld [vmem:[%s7949_s26 + $0x1a0] ss:$28 sps:$4 sm:$0xff]  }
 0x26e   : > { %6639 = vmatmul.mubr.bf16.gmra.mrb[220].mxu1 %v7683_v1  ;;  %4188 = vmatmul.mubr.bf16.gmra.mrb[108].mxu0 %v7682_v6  ;;  %v7689_v6 = vld [vmem:[%s7949_s26 + $0x66c] ss:$28 sps:$4 sm:$0xff]  }
 0x26f   : > { %6642 = vmatprep.mubr.bf16.mxu1 %v7686_v41  ;;  %4195 = vmatprep.mubr.bf16.mxu0 %v7684_v22 }
 0x271   : > { %v3981_v3 = vpop.f32.mrb[4].mxu0 }
 0x272   : > { %v8619_v36 = vadd.f32 %v3981_v3, %v3052_v32  ;;  %v3983_v11 = vpop.f32.mrb[5].mxu0  ;;  %v3063_v3 = vadd.f32 %v8602_v27, %v8263_v52 }
 0x273   : > { %v3984_v1 = vpop.f32.mrb[6].mxu0  ;;  %v7692_v11 = vld [vmem:[%s7949_s26 + $0x668] ss:$28 sps:$4 sm:$0xff]  }
 0x274   : > { %v8626_v41 = vadd.f32 %v3984_v1, %v3055_v18  ;;  %v3986_v62 = vpop.f32.mrb[7].mxu0  ;;  %v7696_v18 = vld [vmem:[%s7949_s26 + $0x1d8] ss:$28 sps:$4 sm:$0xff]  }
 0x275   : > { %v7698_v62 = vld [vmem:[%s7949_s26 + $0x210] ss:$28 sps:$4 sm:$0xff]  }
 0x276   : > { %6643 = vmatmul.mubr.bf16.gmra.mrb[224].mxu1 %v7688_v55  ;;  %4196 = vmatmul.mubr.bf16.gmra.mrb[112].mxu0 %v7687_v45  ;;  %v7694_v45 = vld [vmem:[%s7949_s26 + $0x6a4] ss:$28 sps:$4 sm:$0xff]  }
 0x277   : > { %6646 = vmatprep.mubr.bf16.mxu1 %v7691_v26  ;;  %4203 = vmatprep.mubr.bf16.mxu0 %v7689_v6 }
 0x279   : > { %v3989_v22 = vpop.f32.mrb[8].mxu0 }
 0x27a   : > { %v8631_v44 = vadd.f32 %v3989_v22, %v3060_v40  ;;  %v3991_v32 = vpop.f32.mrb[9].mxu0  ;;  %v3071_v22 = vadd.f32 %v8602_v27, %v8271_v60 }
 0x27b   : > { %v3992_v55 = vpop.f32.mrb[10].mxu0  ;;  %v7697_v32 = vld [vmem:[%s7949_s26 + $0x6a0] ss:$28 sps:$4 sm:$0xff]  }
 0x27c   : > { %v8638_v26 = vadd.f32 %v3992_v55, %v3063_v3  ;;  %v3994_v1 = vpop.f32.mrb[11].mxu0  ;;  %v7701_v3 = vld [vmem:[%s7949_s26 + $0x248] ss:$28 sps:$4 sm:$0xff]  }
 0x27d   : > { %v7703_v1 = vld [vmem:[%s7949_s26 + $0x280] ss:$28 sps:$4 sm:$0xff]  }
 0x27e   : > { %6647 = vmatmul.mubr.bf16.gmra.mrb[228].mxu1 %v7693_v51  ;;  %4204 = vmatmul.mubr.bf16.gmra.mrb[116].mxu0 %v7692_v11  ;;  %v7699_v11 = vld [vmem:[%s7949_s26 + $0x6dc] ss:$28 sps:$4 sm:$0xff]  }
 0x27f   : > { %6650 = vmatprep.mubr.bf16.mxu1 %v7696_v18  ;;  %4211 = vmatprep.mubr.bf16.mxu0 %v7694_v45 }
 0x281   : > { %v3997_v6 = vpop.f32.mrb[12].mxu0 }
 0x282   : > { %v8643_v52 = vadd.f32 %v3997_v6, %v3068_v48  ;;  %v3999_v40 = vpop.f32.mrb[13].mxu0  ;;  %v3079_v6 = vadd.f32 %v8602_v27, %v8279_v5 }
 0x283   : > { %v4000_v51 = vpop.f32.mrb[14].mxu0  ;;  %v7702_v40 = vld [vmem:[%s7949_s26 + $0x6d8] ss:$28 sps:$4 sm:$0xff]  }
 0x284   : > { %v8650_v18 = vadd.f32 %v4000_v51, %v3071_v22  ;;  %v4002_v55 = vpop.f32.mrb[15].mxu0  ;;  %v7706_v22 = vld [vmem:[%s7949_s26 + $0x2b8] ss:$28 sps:$4 sm:$0xff]  }
 0x285   : > { %v7708_v55 = vld [vmem:[%s7949_s26 + $0x2f0] ss:$28 sps:$4 sm:$0xff]  }
 0x286   : > { %6651 = vmatmul.mubr.bf16.gmra.mrb[232].mxu1 %v7698_v62  ;;  %4212 = vmatmul.mubr.bf16.gmra.mrb[120].mxu0 %v7697_v32  ;;  %v7704_v32 = vld [vmem:[%s7949_s26 + $0x714] ss:$28 sps:$4 sm:$0xff]  }
 0x287   : > { %6654 = vmatprep.mubr.bf16.mxu1 %v7701_v3  ;;  %4219 = vmatprep.mubr.bf16.mxu0 %v7699_v11 }
 0x289   : > { %v4005_v45 = vpop.f32.mrb[16].mxu0 }
 0x28a   : > { %v8655_v60 = vadd.f32 %v4005_v45, %v3076_v56  ;;  %v4007_v48 = vpop.f32.mrb[17].mxu0  ;;  %v3087_v45 = vadd.f32 %v8602_v27, %v8287_v13 }
 0x28b   : > { %v4008_v62 = vpop.f32.mrb[18].mxu0  ;;  %v7707_v48 = vld [vmem:[%s7949_s26 + $0x710] ss:$28 sps:$4 sm:$0xff]  }
 0x28c   : > { %v8662_v3 = vadd.f32 %v4008_v62, %v3079_v6  ;;  %v4010_v51 = vpop.f32.mrb[19].mxu0  ;;  %v7711_v6 = vld [vmem:[%s7949_s26 + $0x328] ss:$28 sps:$4 sm:$0xff]  }
 0x28d   : > { %v7713_v51 = vld [vmem:[%s7949_s26 + $0x360] ss:$28 sps:$4 sm:$0xff]  }
 0x28e   : > { %6655 = vmatmul.mubr.bf16.gmra.mrb[236].mxu1 %v7703_v1  ;;  %4220 = vmatmul.mubr.bf16.gmra.mrb[124].mxu0 %v7702_v40  ;;  %v7709_v40 = vld [vmem:[%s7949_s26 + $0x74c] ss:$28 sps:$4 sm:$0xff]  }
 0x28f   : > { %6658 = vmatprep.mubr.bf16.mxu1 %v7706_v22  ;;  %4227 = vmatprep.mubr.bf16.mxu0 %v7704_v32 }
 0x291   : > { %v4013_v11 = vpop.f32.mrb[20].mxu0 }
 0x292   : > { %v8667_v5 = vadd.f32 %v4013_v11, %v3084_v0  ;;  %v4015_v56 = vpop.f32.mrb[21].mxu0  ;;  %v3095_v11 = vadd.f32 %v8602_v27, %v8295_v20 }
 0x293   : > { %v4016_v1 = vpop.f32.mrb[22].mxu0  ;;  %v7712_v56 = vld [vmem:[%s7949_s26 + $0x748] ss:$28 sps:$4 sm:$0xff]  }
 0x294   : > { %v8674_v22 = vadd.f32 %v4016_v1, %v3087_v45  ;;  %v4018_v62 = vpop.f32.mrb[23].mxu0  ;;  %v7716_v45 = vld [vmem:[%s7949_s26 + $0x398] ss:$28 sps:$4 sm:$0xff]  }
 0x295   : > { %v7718_v62 = vld [vmem:[%s7949_s26 + $0x3d0] ss:$28 sps:$4 sm:$0xff]  }
 0x296   : > { %6659 = vmatmul.mubr.bf16.gmra.mrb[240].mxu1 %v7708_v55  ;;  %4228 = vmatmul.mubr.bf16.gmra.mrb[128].mxu0 %v7707_v48  ;;  %v7714_v48 = vld [vmem:[%s7949_s26 + $0x784] ss:$28 sps:$4 sm:$0xff]  }
 0x297   : > { %6662 = vmatprep.mubr.bf16.mxu1 %v7711_v6  ;;  %4235 = vmatprep.mubr.bf16.mxu0 %v7709_v40 }
 0x299   : > { %v4021_v32 = vpop.f32.mrb[24].mxu0 }
 0x29a   : > { %v8679_v13 = vadd.f32 %v4021_v32, %v3092_v9  ;;  %v4023_v0 = vpop.f32.mrb[25].mxu0  ;;  %v3103_v32 = vadd.f32 %v8602_v27, %v8303_v28 }
 0x29b   : > { %v4024_v55 = vpop.f32.mrb[26].mxu0  ;;  %v7717_v0 = vld [vmem:[%s7949_s26 + $0x780] ss:$28 sps:$4 sm:$0xff]  }
 0x29c   : > { %v8686_v6 = vadd.f32 %v4024_v55, %v3095_v11  ;;  %v4026_v1 = vpop.f32.mrb[27].mxu0  ;;  %v7721_v11 = vld [vmem:[%s7949_s26 + $0x408] ss:$28 sps:$4 sm:$0xff]  }
 0x29d   : > { %v7723_v1 = vld [vmem:[%s7949_s26 + $0x440] ss:$28 sps:$4 sm:$0xff]  }
 0x29e   : > { %6663 = vmatmul.mubr.bf16.gmra.mrb[244].mxu1 %v7713_v51  ;;  %4236 = vmatmul.mubr.bf16.gmra.mrb[132].mxu0 %v7712_v56  ;;  %v7719_v56 = vld [vmem:[%s7949_s26 + $0x7bc] ss:$28 sps:$4 sm:$0xff]  }
 0x29f   : > { %6666 = vmatprep.mubr.bf16.mxu1 %v7716_v45  ;;  %4243 = vmatprep.mubr.bf16.mxu0 %v7714_v48 }
 0x2a1   : > { %v4029_v40 = vpop.f32.mrb[28].mxu0 }
 0x2a2   : > { %v8691_v20 = vadd.f32 %v4029_v40, %v3100_v16  ;;  %v4031_v9 = vpop.f32.mrb[29].mxu0  ;;  %v3111_v40 = vadd.f32 %v8602_v27, %v8311_v38 }
 0x2a3   : > { %v4032_v51 = vpop.f32.mrb[30].mxu0  ;;  %v7722_v9 = vld [vmem:[%s7949_s26 + $0x7b8] ss:$28 sps:$4 sm:$0xff]  }
 0x2a4   : > { %v8698_v45 = vadd.f32 %v4032_v51, %v3103_v32  ;;  %v4034_v55 = vpop.f32.mrb[31].mxu0  ;;  %v7726_v32 = vld [vmem:[%s7949_s26 + $0x478] ss:$28 sps:$4 sm:$0xff]  }
 0x2a5   : > { %v7728_v55 = vld [vmem:[%s7949_s26 + $0x4b0] ss:$28 sps:$4 sm:$0xff]  }
 0x2a6   : > { %6667 = vmatmul.mubr.bf16.gmra.mrb[248].mxu1 %v7718_v62  ;;  %4244 = vmatmul.mubr.bf16.gmra.mrb[136].mxu0 %v7717_v0  ;;  %v7724_v0 = vld [vmem:[%s7949_s26 + $0x7f4] ss:$28 sps:$4 sm:$0xff]  }
 0x2a7   : > { %6670 = vmatprep.mubr.bf16.mxu1 %v7721_v11  ;;  %4251 = vmatprep.mubr.bf16.mxu0 %v7719_v56 }
 0x2a9   : > { %v4037_v48 = vpop.f32.mrb[32].mxu0 }
 0x2aa   : > { %v8703_v28 = vadd.f32 %v4037_v48, %v3108_v24  ;;  %v4039_v16 = vpop.f32.mrb[33].mxu0  ;;  %v3119_v48 = vadd.f32 %v8602_v27, %v8319_v49 }
 0x2ab   : > { %v4040_v62 = vpop.f32.mrb[34].mxu0  ;;  %v7727_v16 = vld [vmem:[%s7949_s26 + $0x7f0] ss:$28 sps:$4 sm:$0xff]  }
 0x2ac   : > { %v8710_v11 = vadd.f32 %v4040_v62, %v3111_v40  ;;  %v4042_v51 = vpop.f32.mrb[35].mxu0  ;;  %v7731_v40 = vld [vmem:[%s7949_s26 + $0x4e8] ss:$28 sps:$4 sm:$0xff]  }
 0x2ad   : > { %v7733_v51 = vld [vmem:[%s7949_s26 + $0x520] ss:$28 sps:$4 sm:$0xff]  }
 0x2ae   : > { %6671 = vmatmul.mubr.bf16.gmra.mrb[252].mxu1 %v7723_v1  ;;  %4252 = vmatmul.mubr.bf16.gmra.mrb[140].mxu0 %v7722_v9  ;;  %v7729_v9 = vld [vmem:[%s7949_s26 + $0x82c] ss:$28 sps:$4 sm:$0xff]  }
 0x2af   : > { %6674 = vmatprep.mubr.bf16.mxu1 %v7726_v32  ;;  %4259 = vmatprep.mubr.bf16.mxu0 %v7724_v0 }
 0x2b1   : > { %v4045_v56 = vpop.f32.mrb[36].mxu0 }
 0x2b2   : > { %v8715_v38 = vadd.f32 %v4045_v56, %v3116_v33  ;;  %v4047_v24 = vpop.f32.mrb[37].mxu0  ;;  %v3127_v56 = vadd.f32 %v8602_v27, %v8327_v59 }
 0x2b3   : > { %v4048_v1 = vpop.f32.mrb[38].mxu0  ;;  %v7732_v24 = vld [vmem:[%s7949_s26 + $0x828] ss:$28 sps:$4 sm:$0xff]  }
 0x2b4   : > { %v8722_v32 = vadd.f32 %v4048_v1, %v3119_v48  ;;  %v4050_v62 = vpop.f32.mrb[39].mxu0  ;;  %v7736_v48 = vld [vmem:[%s7949_s26 + $0x558] ss:$28 sps:$4 sm:$0xff]  }
 0x2b5   : > { %v7738_v62 = vld [vmem:[%s7949_s26 + $0x590] ss:$28 sps:$4 sm:$0xff]  }
 0x2b6   : > { %6675 = vmatmul.mubr.bf16.gmra.mrb[0].mxu1 %v7728_v55  ;;  %4260 = vmatmul.mubr.bf16.gmra.mrb[144].mxu0 %v7727_v16  ;;  %v7734_v16 = vld [vmem:[%s7949_s26 + $0x864] ss:$28 sps:$4 sm:$0xff]  }
 0x2b7   : > { %6678 = vmatprep.mubr.bf16.mxu1 %v7731_v40  ;;  %4267 = vmatprep.mubr.bf16.mxu0 %v7729_v9 }
 0x2b9   : > { %v4053_v0 = vpop.f32.mrb[40].mxu0 }
 0x2ba   : > { %v8727_v49 = vadd.f32 %v4053_v0, %v3124_v43  ;;  %v4055_v33 = vpop.f32.mrb[41].mxu0  ;;  %v3135_v0 = vadd.f32 %v8602_v27, %v8335_v7 }
 0x2bb   : > { %v4056_v55 = vpop.f32.mrb[42].mxu0  ;;  %v7737_v33 = vld [vmem:[%s7949_s26 + $0x860] ss:$28 sps:$4 sm:$0xff]  }
 0x2bc   : > { %v8734_v40 = vadd.f32 %v4056_v55, %v3127_v56  ;;  %v4058_v1 = vpop.f32.mrb[43].mxu0  ;;  %v7741_v56 = vld [vmem:[%s7949_s26 + $0x5c8] ss:$28 sps:$4 sm:$0xff]  }
 0x2bd   : > { %v7743_v1 = vld [vmem:[%s7949_s26 + $0x600] ss:$28 sps:$4 sm:$0xff]  }
 0x2be   : > { %6679 = vmatmul.mubr.bf16.gmra.mrb[4].mxu1 %v7733_v51  ;;  %4268 = vmatmul.mubr.bf16.gmra.mrb[148].mxu0 %v7732_v24  ;;  %v7739_v24 = vld [vmem:[%s7949_s26 + $0x89c] ss:$28 sps:$4 sm:$0xff]  }
 0x2bf   : > { %6682 = vmatprep.mubr.bf16.mxu1 %v7736_v48  ;;  %4275 = vmatprep.mubr.bf16.mxu0 %v7734_v16 }
 0x2c1   : > { %v4061_v9 = vpop.f32.mrb[44].mxu0 }
 0x2c2   : > { %v8739_v59 = vadd.f32 %v4061_v9, %v3132_v54  ;;  %v4063_v43 = vpop.f32.mrb[45].mxu0  ;;  %v3143_v9 = vadd.f32 %v8602_v27, %v8343_v17 }
 0x2c3   : > { %v4064_v51 = vpop.f32.mrb[46].mxu0  ;;  %v7742_v43 = vld [vmem:[%s7949_s26 + $0x898] ss:$28 sps:$4 sm:$0xff]  }
 0x2c4   : > { %v8746_v48 = vadd.f32 %v4064_v51, %v3135_v0  ;;  %v4066_v55 = vpop.f32.mrb[47].mxu0  ;;  %v7746_v0 = vld [vmem:[%s7949_s26 + $0x638] ss:$28 sps:$4 sm:$0xff]  }
 0x2c5   : > { %v7744_v55 = vld [vmem:[%s7949_s26 + $0x8d4] ss:$28 sps:$4 sm:$0xff]  }
 0x2c6   : > { %6683 = vmatmul.mubr.bf16.gmra.mrb[8].mxu1 %v7738_v62  ;;  %4276 = vmatmul.mubr.bf16.gmra.mrb[152].mxu0 %v7737_v33 }
 0x2c7   : > { %6686 = vmatprep.mubr.bf16.mxu1 %v7741_v56  ;;  %4283 = vmatprep.mubr.bf16.mxu0 %v7739_v24  ;;  %v3148_v56 = vadd.f32 %v8602_v27, %v8352_v23 }
 0x2c9   : > { %v4069_v16 = vpop.f32.mrb[48].mxu0 }
 0x2ca   : > { %v8751_v7 = vadd.f32 %v4069_v16, %v3140_v2  ;;  %v4071_v54 = vpop.f32.mrb[49].mxu0  ;;  %v7748_v2 = vld [vmem:[%s7949_s26 + $0x670] ss:$28 sps:$4 sm:$0xff]  }
 0x2cb   : > { %v4072_v51 = vpop.f32.mrb[50].mxu0 }
 0x2cc   : > { %v8758_v62 = vadd.f32 %v4072_v51, %v3143_v9  ;;  %v4074_v33 = vpop.f32.mrb[51].mxu0 }
 0x2cd   : > { %v7749_v33 = vld [vmem:[%s7949_s26 + $0x90c] ss:$28 sps:$4 sm:$0xff]  }
 0x2ce   : > { %6687 = vmatmul.mubr.bf16.gmra.mrb[12].mxu1 %v7743_v1  ;;  %4284 = vmatmul.mubr.bf16.gmra.mrb[156].mxu0 %v7742_v43  ;;  %v3151_v1 = vadd.f32 %v8602_v27, %v8357_v29  ;;  %v7747_v43 = vld [vmem:[%s7949_s26 + $0x8d0] ss:$28 sps:$4 sm:$0xff]   ;;  %v3156_v29 = vadd.f32 %v8602_v27, %v8361_v35 }
 0x2cf   : > { %6690 = vmatprep.mubr.bf16.mxu1 %v7746_v0  ;;  %4291 = vmatprep.mubr.bf16.mxu0 %v7744_v55  ;;  %v7751_v0 = vld [vmem:[%s7949_s26 + $0x6a8] ss:$28 sps:$4 sm:$0xff]  }
 0x2d1   : > { %v8760_v12 = vpop.f32.mrb[164].mxu1  ;;  %v4077_v17 = vpop.f32.mrb[52].mxu0 }
 0x2d2   : > { %9368 = vst [vmem:[#allocation35_spill] sm:$0xff] %v8760_v12  ;;  %v3838_v24 = vpop.f32.mrb[165].mxu1  ;;  %v8765_v16 = vadd.f32 %v4077_v17, %v3148_v56  ;;  %v4079_v54 = vpop.f32.mrb[53].mxu0 }
 0x2d3   : > { %v8767_v9 = vpop.f32.mrb[166].mxu1  ;;  %v4080_v51 = vpop.f32.mrb[54].mxu0  ;;  %v7753_v54 = vld [vmem:[%s7949_s26 + $0x6e0] ss:$28 sps:$4 sm:$0xff]  }
 0x2d4   : > { %9369 = vst [vmem:[#allocation36_spill] sm:$0xff] %v8767_v9  ;;  %v3841_v55 = vpop.f32.mrb[167].mxu1  ;;  %v8774_v12 = vadd.f32 %v4080_v51, %v3151_v1  ;;  %v4082_v23 = vpop.f32.mrb[55].mxu0 }
 0x2d5   : > { %v7754_v23 = vld [vmem:[%s7949_s26 + $0x944] ss:$28 sps:$4 sm:$0xff]  }
 0x2d6   : > { %6691 = vmatmul.mubr.bf16.gmra.mrb[16].mxu1 %v7748_v2  ;;  %4292 = vmatmul.mubr.bf16.gmra.mrb[160].mxu0 %v7747_v43  ;;  %v3159_v2 = vadd.f32 %v8602_v27, %v8365_v42  ;;  %v7752_v43 = vld [vmem:[%s7949_s26 + $0x908] ss:$28 sps:$4 sm:$0xff]   ;;  %v3164_v42 = vadd.f32 %v8602_v27, %v8369_v50 }
 0x2d7   : > { %6694 = vmatprep.mubr.bf16.mxu1 %v7751_v0  ;;  %4299 = vmatprep.mubr.bf16.mxu0 %v7749_v33  ;;  %v7756_v0 = vld [vmem:[%s7949_s26 + $0x718] ss:$28 sps:$4 sm:$0xff]  }
 0x2d9   : > { %v8776_v56 = vpop.f32.mrb[168].mxu1  ;;  %v4085_v17 = vpop.f32.mrb[56].mxu0 }
 0x2da   : > { %9370 = vst [vmem:[#allocation37_spill] sm:$0xff] %v8776_v56  ;;  %v3846_v24 = vpop.f32.mrb[169].mxu1  ;;  %v8781_v55 = vadd.f32 %v4085_v17, %v3156_v29  ;;  %v4087_v9 = vpop.f32.mrb[57].mxu0 }
 0x2db   : > { %v8783_v1 = vpop.f32.mrb[170].mxu1  ;;  %v4088_v51 = vpop.f32.mrb[58].mxu0  ;;  %v7758_v24 = vld [vmem:[%s7949_s26 + $0x750] ss:$28 sps:$4 sm:$0xff]  }
 0x2dc   : > { %9371 = vst [vmem:[#allocation38_spill] sm:$0xff] %v8783_v1  ;;  %v3849_v33 = vpop.f32.mrb[171].mxu1  ;;  %v8790_v56 = vadd.f32 %v4088_v51, %v3159_v2  ;;  %v4090_v35 = vpop.f32.mrb[59].mxu0 }
 0x2dd   : > { %v7759_v35 = vld [vmem:[%s7949_s26 + $0x97c] ss:$28 sps:$4 sm:$0xff]  }
 0x2de   : > { %6695 = vmatmul.mubr.bf16.gmra.mrb[20].mxu1 %v7753_v54  ;;  %4300 = vmatmul.mubr.bf16.gmra.mrb[164].mxu0 %v7752_v43  ;;  %v3167_v54 = vadd.f32 %v8602_v27, %v8373_v57  ;;  %v7757_v43 = vld [vmem:[%s7949_s26 + $0x940] ss:$28 sps:$4 sm:$0xff]   ;;  %v3172_v57 = vadd.f32 %v8602_v27, %v8377_v63 }
 0x2df   : > { %6698 = vmatprep.mubr.bf16.mxu1 %v7756_v0  ;;  %4307 = vmatprep.mubr.bf16.mxu0 %v7754_v23  ;;  %v7761_v0 = vld [vmem:[%s7949_s26 + $0x788] ss:$28 sps:$4 sm:$0xff]  }
 0x2e1   : > { %v8792_v9 = vpop.f32.mrb[172].mxu1  ;;  %v4093_v29 = vpop.f32.mrb[60].mxu0 }
 0x2e2   : > { %9372 = vst [vmem:[#allocation39_spill] sm:$0xff] %v8792_v9  ;;  %v3854_v17 = vpop.f32.mrb[173].mxu1  ;;  %v8797_v33 = vadd.f32 %v4093_v29, %v3164_v42  ;;  %v4095_v1 = vpop.f32.mrb[61].mxu0 }
 0x2e3   : > { %v8799_v2 = vpop.f32.mrb[174].mxu1  ;;  %v4096_v51 = vpop.f32.mrb[62].mxu0  ;;  %v7763_v17 = vld [vmem:[%s7949_s26 + $0x7c0] ss:$28 sps:$4 sm:$0xff]  }
 0x2e4   : > { %9373 = vst [vmem:[#allocation40_spill] sm:$0xff] %v8799_v2  ;;  %v3857_v23 = vpop.f32.mrb[175].mxu1  ;;  %v8806_v9 = vadd.f32 %v4096_v51, %v3167_v54  ;;  %v4098_v50 = vpop.f32.mrb[63].mxu0 }
 0x2e5   : > { %v7764_v50 = vld [vmem:[%s7949_s26 + $0x9b4] ss:$28 sps:$4 sm:$0xff]  }
 0x2e6   : > { %6699 = vmatmul.mubr.bf16.gmra.mrb[24].mxu1 %v7758_v24  ;;  %4308 = vmatmul.mubr.bf16.gmra.mrb[168].mxu0 %v7757_v43  ;;  %v3175_v24 = vadd.f32 %v8602_v27, %v8381_v8  ;;  %v7762_v43 = vld [vmem:[%s7949_s26 + $0x978] ss:$28 sps:$4 sm:$0xff]  }
 0x2e7   : > { %6702 = vmatprep.mubr.bf16.mxu1 %v7761_v0  ;;  %4315 = vmatprep.mubr.bf16.mxu0 %v7759_v35  ;;  %v7766_v0 = vld [vmem:[%s7949_s26 + $0x7f8] ss:$28 sps:$4 sm:$0xff]  }
 0x2e9   : > { %v8808_v1 = vpop.f32.mrb[176].mxu1  ;;  %v4101_v42 = vpop.f32.mrb[64].mxu0 }
 0x2ea   : > { %9374 = vst [vmem:[#allocation41_spill] sm:$0xff] %v8808_v1  ;;  %v3862_v29 = vpop.f32.mrb[177].mxu1  ;;  %v8813_v23 = vadd.f32 %v4101_v42, %v3172_v57  ;;  %v4103_v2 = vpop.f32.mrb[65].mxu0 }
 0x2eb   : > { %v8815_v54 = vpop.f32.mrb[178].mxu1  ;;  %v4104_v51 = vpop.f32.mrb[66].mxu0  ;;  %v3180_v2 = vadd.f32 %v8602_v27, %v8385_v15  ;;  %v7768_v29 = vld [vmem:[%s7949_s26 + $0x830] ss:$28 sps:$4 sm:$0xff]  }
 0x2ec   : > { %9375 = vst [vmem:[#allocation42_spill] sm:$0xff] %v8815_v54  ;;  %v3865_v35 = vpop.f32.mrb[179].mxu1  ;;  %v8822_v1 = vadd.f32 %v4104_v51, %v3175_v24  ;;  %v4106_v63 = vpop.f32.mrb[67].mxu0  ;;  %v7769_v54 = vld [vmem:[%s7949_s26 + $0x9ec] ss:$28 sps:$4 sm:$0xff]  }
 0x2ed   : > { %v3183_v35 = vadd.f32 %v8602_v27, %v8389_v21  ;;  %v3188_v21 = vadd.f32 %v8602_v27, %v8393_v30 }
 0x2ee   : > { %6703 = vmatmul.mubr.bf16.gmra.mrb[28].mxu1 %v7763_v17  ;;  %4316 = vmatmul.mubr.bf16.gmra.mrb[172].mxu0 %v7762_v43  ;;  %v7767_v17 = vld [vmem:[%s7949_s26 + $0x9b0] ss:$28 sps:$4 sm:$0xff]   ;;  %v7771_v43 = vld [vmem:[%s7949_s26 + $0x868] ss:$28 sps:$4 sm:$0xff]  }
 0x2ef   : > { %6706 = vmatprep.mubr.bf16.mxu1 %v7766_v0  ;;  %4323 = vmatprep.mubr.bf16.mxu0 %v7764_v50 }
 0x2f1   : > { %v8826_v8 = vpop.f32.mrb[180].mxu1  ;;  %v4109_v57 = vpop.f32.mrb[68].mxu0 }
 0x2f2   : > { %9376 = vst [vmem:[#allocation43_spill] sm:$0xff] %v8826_v8  ;;  %v3870_v42 = vpop.f32.mrb[181].mxu1  ;;  %v8831_v24 = vadd.f32 %v4109_v57, %v3180_v2  ;;  %v4111_v51 = vpop.f32.mrb[69].mxu0  ;;  %v7774_v8 = vld [vmem:[%s7949_s26 + $0xa24] ss:$28 sps:$4 sm:$0xff]  }
 0x2f3   : > { %v8833_v63 = vpop.f32.mrb[182].mxu1  ;;  %v4112_v0 = vpop.f32.mrb[70].mxu0 }
 0x2f4   : > { %9377 = vst [vmem:[#allocation44_spill] sm:$0xff] %v8833_v63  ;;  %v3873_v50 = vpop.f32.mrb[183].mxu1  ;;  %v8838_v15 = vadd.f32 %v4112_v0, %v3183_v35  ;;  %v4114_v42 = vpop.f32.mrb[71].mxu0  ;;  %v7773_v63 = vld [vmem:[%s7949_s26 + $0x8a0] ss:$28 sps:$4 sm:$0xff]  }
 0x2f5   : > { %v3191_v50 = vadd.f32 %v8602_v27, %v8397_v39  ;;  %v3196_v39 = vadd.f32 %v8602_v27, %v8401_v47 }
 0x2f6   : > { %6707 = vmatmul.mubr.bf16.gmra.mrb[32].mxu1 %v7768_v29  ;;  %4324 = vmatmul.mubr.bf16.gmra.mrb[176].mxu0 %v7767_v17  ;;  %v7772_v29 = vld [vmem:[%s7949_s26 + $0x9e8] ss:$28 sps:$4 sm:$0xff]   ;;  %v7776_v17 = vld [vmem:[%s7949_s26 + $0x8d8] ss:$28 sps:$4 sm:$0xff]  }
 0x2f7   : > { %6710 = vmatprep.mubr.bf16.mxu1 %v7771_v43  ;;  %4331 = vmatprep.mubr.bf16.mxu0 %v7769_v54 }
 0x2f9   : > { %v8842_v2 = vpop.f32.mrb[184].mxu1  ;;  %v4117_v57 = vpop.f32.mrb[72].mxu0 }
 0x2fa   : > { %9378 = vst [vmem:[#allocation45_spill] sm:$0xff] %v8842_v2  ;;  %v3878_v51 = vpop.f32.mrb[185].mxu1  ;;  %v8847_v35 = vadd.f32 %v4117_v57, %v3188_v21  ;;  %v4119_v0 = vpop.f32.mrb[73].mxu0  ;;  %v7779_v2 = vld [vmem:[%s7949_s26 + $0xa5c] ss:$28 sps:$4 sm:$0xff]  }
 0x2fb   : > { %v8849_v42 = vpop.f32.mrb[186].mxu1  ;;  %v4120_v54 = vpop.f32.mrb[74].mxu0 }
 0x2fc   : > { %9379 = vst [vmem:[#allocation46_spill] sm:$0xff] %v8849_v42  ;;  %v3881_v43 = vpop.f32.mrb[187].mxu1  ;;  %v8854_v30 = vadd.f32 %v4120_v54, %v3191_v50  ;;  %v4122_v51 = vpop.f32.mrb[75].mxu0  ;;  %v7778_v42 = vld [vmem:[%s7949_s26 + $0x910] ss:$28 sps:$4 sm:$0xff]  }
 0x2fd   : > { %v3199_v43 = vadd.f32 %v8602_v27, %v8405_v58  ;;  %v3204_v58 = vadd.f32 %v8602_v27, %v8409_v4 }
 0x2fe   : > { %6711 = vmatmul.mubr.bf16.gmra.mrb[36].mxu1 %v7773_v63  ;;  %4332 = vmatmul.mubr.bf16.gmra.mrb[180].mxu0 %v7772_v29  ;;  %v7777_v63 = vld [vmem:[%s7949_s26 + $0xa20] ss:$28 sps:$4 sm:$0xff]   ;;  %v7781_v29 = vld [vmem:[%s7949_s26 + $0x948] ss:$28 sps:$4 sm:$0xff]  }
 0x2ff   : > { %6714 = vmatprep.mubr.bf16.mxu1 %v7776_v17  ;;  %4339 = vmatprep.mubr.bf16.mxu0 %v7774_v8 }
 0x301   : > { %v8858_v21 = vpop.f32.mrb[188].mxu1  ;;  %v4125_v57 = vpop.f32.mrb[76].mxu0 }
 0x302   : > { %9380 = vst [vmem:[#allocation47_spill] sm:$0xff] %v8858_v21  ;;  %v3886_v0 = vpop.f32.mrb[189].mxu1  ;;  %v8863_v50 = vadd.f32 %v4125_v57, %v3196_v39  ;;  %v4127_v54 = vpop.f32.mrb[77].mxu0  ;;  %v7784_v21 = vld [vmem:[%s7949_s26 + $0xa94] ss:$28 sps:$4 sm:$0xff]  }
 0x303   : > { %v8865_v51 = vpop.f32.mrb[190].mxu1  ;;  %v4128_v8 = vpop.f32.mrb[78].mxu0 }
 0x304   : > { %9381 = vst [vmem:[#allocation48_spill] sm:$0xff] %v8865_v51  ;;  %v3889_v17 = vpop.f32.mrb[191].mxu1  ;;  %v8870_v47 = vadd.f32 %v4128_v8, %v3199_v43  ;;  %v4130_v0 = vpop.f32.mrb[79].mxu0  ;;  %v7783_v51 = vld [vmem:[%s7949_s26 + $0x980] ss:$28 sps:$4 sm:$0xff]  }
 0x305   : > { %v3207_v17 = vadd.f32 %v8602_v27, %v8413_v14  ;;  %v3212_v14 = vadd.f32 %v8602_v27, %v8417_v25 }
 0x306   : > { %6715 = vmatmul.mubr.bf16.gmra.mrb[40].mxu1 %v7778_v42  ;;  %4340 = vmatmul.mubr.bf16.gmra.mrb[184].mxu0 %v7777_v63  ;;  %v7782_v42 = vld [vmem:[%s7949_s26 + $0xa58] ss:$28 sps:$4 sm:$0xff]  }
 0x307   : > { %6718 = vmatprep.mubr.bf16.mxu1 %v7781_v29  ;;  %4347 = vmatprep.mubr.bf16.mxu0 %v7779_v2  ;;  %v7786_v63 = vld [vmem:[%s7949_s26 + $0x9b8] ss:$28 sps:$4 sm:$0xff]  }
 0x309   : > { %v8874_v39 = vpop.f32.mrb[192].mxu1  ;;  %v4133_v57 = vpop.f32.mrb[80].mxu0 }
 0x30a   : > { %9382 = vst [vmem:[#allocation49_spill] sm:$0xff] %v8874_v39  ;;  %v3894_v54 = vpop.f32.mrb[193].mxu1  ;;  %v8879_v43 = vadd.f32 %v4133_v57, %v3204_v58  ;;  %v4135_v8 = vpop.f32.mrb[81].mxu0  ;;  %v7789_v39 = vld [vmem:[%s7949_s26 + $0xacc] ss:$28 sps:$4 sm:$0xff]  }
 0x30b   : > { %v8881_v0 = vpop.f32.mrb[194].mxu1  ;;  %v4136_v2 = vpop.f32.mrb[82].mxu0 }
 0x30c   : > { %9383 = vst [vmem:[#allocation50_spill] sm:$0xff] %v8881_v0  ;;  %v3897_v29 = vpop.f32.mrb[195].mxu1  ;;  %v8886_v4 = vadd.f32 %v4136_v2, %v3207_v17  ;;  %v4138_v54 = vpop.f32.mrb[83].mxu0  ;;  %v7788_v0 = vld [vmem:[%s7949_s26 + $0x9f0] ss:$28 sps:$4 sm:$0xff]  }
 0x30d   : > { %v3215_v29 = vadd.f32 %v8602_v27, %v8421_v34  ;;  %v3220_v34 = vadd.f32 %v8602_v27, %v8425_v46 }
 0x30e   : > { %6719 = vmatmul.mubr.bf16.gmra.mrb[44].mxu1 %v7783_v51  ;;  %4348 = vmatmul.mubr.bf16.gmra.mrb[188].mxu0 %v7782_v42  ;;  %v7787_v51 = vld [vmem:[%s7949_s26 + $0xa90] ss:$28 sps:$4 sm:$0xff]   ;;  %v7791_v42 = vld [vmem:[%s7949_s26 + $0xa28] ss:$28 sps:$4 sm:$0xff]  }
 0x30f   : > { %6722 = vmatprep.mubr.bf16.mxu1 %v7786_v63  ;;  %4355 = vmatprep.mubr.bf16.mxu0 %v7784_v21 }
 0x311   : > { %v8890_v58 = vpop.f32.mrb[196].mxu1  ;;  %v4141_v57 = vpop.f32.mrb[84].mxu0 }
 0x312   : > { %9384 = vst [vmem:[#allocation51_spill] sm:$0xff] %v8890_v58  ;;  %v3902_v8 = vpop.f32.mrb[197].mxu1  ;;  %v8895_v17 = vadd.f32 %v4141_v57, %v3212_v14  ;;  %v4143_v2 = vpop.f32.mrb[85].mxu0  ;;  %v7794_v58 = vld [vmem:[%s7949_s26 + $0xb04] ss:$28 sps:$4 sm:$0xff]  }
 0x313   : > { %v8897_v54 = vpop.f32.mrb[198].mxu1  ;;  %v4144_v21 = vpop.f32.mrb[86].mxu0 }
 0x314   : > { %9385 = vst [vmem:[#allocation52_spill] sm:$0xff] %v8897_v54  ;;  %v3905_v63 = vpop.f32.mrb[199].mxu1  ;;  %v8902_v25 = vadd.f32 %v4144_v21, %v3215_v29  ;;  %v4146_v8 = vpop.f32.mrb[87].mxu0  ;;  %v7793_v54 = vld [vmem:[%s7949_s26 + $0xa60] ss:$28 sps:$4 sm:$0xff]  }
 0x315   : > { %v3223_v63 = vadd.f32 %v8602_v27, %v8429_v61  ;;  %v3228_v61 = vadd.f32 %v8602_v27, %v8433_v10 }
 0x316   : > { %6723 = vmatmul.mubr.bf16.gmra.mrb[48].mxu1 %v7788_v0  ;;  %4356 = vmatmul.mubr.bf16.gmra.mrb[192].mxu0 %v7787_v51  ;;  %v7792_v0 = vld [vmem:[%s7949_s26 + $0xac8] ss:$28 sps:$4 sm:$0xff]   ;;  %v7796_v51 = vld [vmem:[%s7949_s26 + $0xa98] ss:$28 sps:$4 sm:$0xff]  }
 0x317   : > { %6726 = vmatprep.mubr.bf16.mxu1 %v7791_v42  ;;  %4363 = vmatprep.mubr.bf16.mxu0 %v7789_v39 }
 0x319   : > { %v8906_v14 = vpop.f32.mrb[200].mxu1  ;;  %v4149_v57 = vpop.f32.mrb[88].mxu0 }
 0x31a   : > { %9386 = vst [vmem:[#allocation53_spill] sm:$0xff] %v8906_v14  ;;  %v3910_v2 = vpop.f32.mrb[201].mxu1  ;;  %v8911_v29 = vadd.f32 %v4149_v57, %v3220_v34  ;;  %v4151_v21 = vpop.f32.mrb[89].mxu0  ;;  %v7799_v14 = vld [vmem:[%s7949_s26 + $0xb3c] ss:$28 sps:$4 sm:$0xff]  }
 0x31b   : > { %v8913_v8 = vpop.f32.mrb[202].mxu1  ;;  %v4152_v39 = vpop.f32.mrb[90].mxu0 }
 0x31c   : > { %9387 = vst [vmem:[#allocation54_spill] sm:$0xff] %v8911_v29  ;;  %9388 = vst [vmem:[#allocation55_spill] sm:$0xff] %v8913_v8  ;;  %v3913_v42 = vpop.f32.mrb[203].mxu1  ;;  %v8918_v46 = vadd.f32 %v4152_v39, %v3223_v63  ;;  %v4154_v2 = vpop.f32.mrb[91].mxu0  ;;  %v7798_v8 = vld [vmem:[%s7949_s26 + $0xad0] ss:$28 sps:$4 sm:$0xff]  }
 0x31d   : > { %v3231_v42 = vadd.f32 %v8602_v27, %v8437_v19  ;;  %v3236_v19 = vadd.f32 %v8602_v27, %v8441_v37 }
 0x31e   : > { %9389 = vst [vmem:[#allocation56_spill] sm:$0xff] %v8918_v46  ;;  %6727 = vmatmul.mubr.bf16.gmra.mrb[52].mxu1 %v7793_v54  ;;  %4364 = vmatmul.mubr.bf16.gmra.mrb[196].mxu0 %v7792_v0  ;;  %v7797_v54 = vld [vmem:[%s7949_s26 + $0xb00] ss:$28 sps:$4 sm:$0xff]   ;;  %v7801_v0 = vld [vmem:[%s7949_s26 + $0xb08] ss:$28 sps:$4 sm:$0xff]  }
 0x31f   : > { %6730 = vmatprep.mubr.bf16.mxu1 %v7796_v51  ;;  %4371 = vmatprep.mubr.bf16.mxu0 %v7794_v58 }
 0x321   : > { %v8922_v34 = vpop.f32.mrb[204].mxu1  ;;  %v4157_v57 = vpop.f32.mrb[92].mxu0 }
 0x322   : > { %9390 = vst [vmem:[#allocation57_spill] sm:$0xff] %v8922_v34  ;;  %v3918_v21 = vpop.f32.mrb[205].mxu1  ;;  %v8927_v63 = vadd.f32 %v4157_v57, %v3228_v61  ;;  %v4159_v39 = vpop.f32.mrb[93].mxu0  ;;  %v7804_v34 = vld [vmem:[%s7949_s26 + $0xb74] ss:$28 sps:$4 sm:$0xff]  }
 0x323   : > { %v8929_v2 = vpop.f32.mrb[206].mxu1  ;;  %v4160_v58 = vpop.f32.mrb[94].mxu0 }
 0x324   : > { %9391 = vst [vmem:[#allocation58_spill] sm:$0xff] %v8929_v2  ;;  %v3921_v51 = vpop.f32.mrb[207].mxu1  ;;  %v8934_v10 = vadd.f32 %v4160_v58, %v3231_v42  ;;  %v4162_v21 = vpop.f32.mrb[95].mxu0  ;;  %v7803_v2 = vld [vmem:[%s7949_s26 + $0xb40] ss:$28 sps:$4 sm:$0xff]  }
 0x325   : > { %v3239_v51 = vadd.f32 %v8602_v27, %v8445_v53  ;;  %v9397_v53 = vld [vmem:[#allocation2_spill] sm:$0xff] }
 0x326   : > { %9392 = vst [vmem:[#allocation59_spill] sm:$0xff] %v8934_v10  ;;  %6731 = vmatmul.mubr.bf16.gmra.mrb[56].mxu1 %v7798_v8  ;;  %4372 = vmatmul.mubr.bf16.gmra.mrb[200].mxu0 %v7797_v54  ;;  %v7802_v8 = vld [vmem:[%s7949_s26 + $0xb38] ss:$28 sps:$4 sm:$0xff]  }
 0x327   : > { %6734 = vmatprep.mubr.bf16.mxu1 %v7801_v0  ;;  %4379 = vmatprep.mubr.bf16.mxu0 %v7799_v14  ;;  %v7807_v54 = vld [vmem:[%s7949_s26 + $0xb78] ss:$28 sps:$4 sm:$0xff]  }
 0x329   : > { %v8938_v61 = vpop.f32.mrb[208].mxu1  ;;  %v4165_v57 = vpop.f32.mrb[96].mxu0 }
 0x32a   : > { %9393 = vst [vmem:[#allocation60_spill] sm:$0xff] %v8938_v61  ;;  %v3926_v39 = vpop.f32.mrb[209].mxu1  ;;  %v8943_v42 = vadd.f32 %v4165_v57, %v3236_v19  ;;  %v4167_v58 = vpop.f32.mrb[97].mxu0  ;;  %v3244_v19 = vadd.f32 %v8602_v27, %v9397_v53 }
 0x32b   : > { %v8945_v21 = vpop.f32.mrb[210].mxu1  ;;  %v4168_v14 = vpop.f32.mrb[98].mxu0 }
 0x32c   : > { %9394 = vst [vmem:[#allocation61_spill] sm:$0xff] %v8943_v42  ;;  %9395 = vst [vmem:[#allocation62_spill] sm:$0xff] %v8945_v21  ;;  %v3929_v0 = vpop.f32.mrb[211].mxu1  ;;  %v8950_v37 = vadd.f32 %v4168_v14, %v3239_v51  ;;  %v4170_v61 = vpop.f32.mrb[99].mxu0  ;;  %v7808_v21 = vld [vmem:[%s7949_s26 + $0xbb0] ss:$28 sps:$4 sm:$0xff]  }
 0x32d   : > { %v9399_v42 = vld [vmem:[#allocation3_spill] sm:$0xff] }
 0x32e   : > { %9396 = vst [vmem:[#allocation63_spill] sm:$0xff] %v8950_v37  ;;  %6735 = vmatmul.mubr.bf16.gmra.mrb[60].mxu1 %v7803_v2  ;;  %4380 = vmatmul.mubr.bf16.gmra.mrb[204].mxu0 %v7802_v8  ;;  %v3247_v0 = vadd.f32 %v8602_v27, %v9399_v42  ;;  %v7806_v2 = vld [vmem:[%s7949_s26 + $0xb70] ss:$28 sps:$4 sm:$0xff]  }
 0x32f   : > { %6738 = vmatprep.mubr.bf16.mxu1 %v7807_v54  ;;  %4387 = vmatprep.mubr.bf16.mxu0 %v7804_v34  ;;  %v7809_v34 = vld [vmem:[%s7949_s26 + $0xbac] ss:$28 sps:$4 sm:$0xff]  }
 0x331   : > { %v8954_v57 = vpop.f32.mrb[212].mxu1  ;;  %v4173_v39 = vpop.f32.mrb[100].mxu0 }
 0x332   : > { %9398 = vst [vmem:[#allocation2_spill] sm:$0xff] %v8954_v57  ;;  %v3934_v58 = vpop.f32.mrb[213].mxu1  ;;  %v8959_v46 = vadd.f32 %v4173_v39, %v3244_v19  ;;  %v4175_v51 = vpop.f32.mrb[101].mxu0  ;;  %v9404_v57 = vld [vmem:[#allocation5_spill] sm:$0xff] }
 0x333   : > { %v8961_v61 = vpop.f32.mrb[214].mxu1  ;;  %v4176_v8 = vpop.f32.mrb[102].mxu0  ;;  %v9403_v58 = vld [vmem:[#allocation4_spill] sm:$0xff] }
 0x334   : > { %9400 = vst [vmem:[#allocation3_spill] sm:$0xff] %v8959_v46  ;;  %9401 = vst [vmem:[#allocation64_spill] sm:$0xff] %v8961_v61  ;;  %v3937_v54 = vpop.f32.mrb[215].mxu1  ;;  %v8965_v14 = vadd.f32 %v4176_v8, %v3247_v0  ;;  %v4178_v53 = vpop.f32.mrb[103].mxu0  ;;  %v3252_v42 = vadd.f32 %v8602_v27, %v9403_v58  ;;  %v9405_v8 = vld [vmem:[#allocation34_spill] sm:$0xff] }
 0x335   : > { %v3255_v54 = vadd.f32 %v8602_v27, %v9404_v57 }
 0x336   : > { %9402 = vst [vmem:[#allocation65_spill] sm:$0xff] %v8965_v14  ;;  %6739 = vmatmul.mubr.bf16.gmra.mrb[64].mxu1 %v7808_v21  ;;  %4388 = vmatmul.mubr.bf16.gmra.mrb[208].mxu0 %v7806_v2  ;;  %v7811_v21 = vld [vmem:[%s7949_s26 + $0xba8] ss:$28 sps:$4 sm:$0xff]  }
 0x337   : > { %4395 = vmatprep.mubr.bf16.mxu0 %v7809_v34 }
 0x339   : > { %v6636_v19 = vpop.f32.mrb[216].mxu1  ;;  %v4181_v39 = vpop.f32.mrb[104].mxu0 }
 0x33a   : > { %v4447_v51 = vadd.f32 %v8619_v36, %v6636_v19  ;;  %v4438_v61 = vpop.f32.mrb[217].mxu1  ;;  %v8972_v37 = vadd.f32 %v4181_v39, %v3252_v42  ;;  %v4183_v0 = vpop.f32.mrb[105].mxu0 }
 0x33b   : > { %v4439_v53 = vadd.f32 %v9405_v8, %v4438_v61  ;;  %v6637_v14 = vpop.f32.mrb[218].mxu1  ;;  %v4184_v2 = vpop.f32.mrb[106].mxu0  ;;  %v9407_v0 = vld [vmem:[#allocation7_spill] sm:$0xff] }
 0x33c   : > { %v4450_v34 = vadd.f32 %v8626_v41, %v6637_v14  ;;  %v4441_v58 = vpop.f32.mrb[219].mxu1  ;;  %v8978_v46 = vadd.f32 %v4184_v2, %v3255_v54  ;;  %v4186_v10 = vpop.f32.mrb[107].mxu0  ;;  %v4871_v19 = vmax.f32 %v4447_v51, 0.0  ;;  %v9406_v41 = vld [vmem:[#allocation6_spill] sm:$0xff]  ;;  %v3263_v8 = vadd.f32 %v8602_v27, %v9407_v0 }
 0x33d   : > { %v4442_v36 = vadd.f32 %v8614_v31, %v4441_v58  ;;  %v4869_v57 = vmax.f32 %v4439_v53, 0.0  ;;  %v3260_v14 = vadd.f32 %v8602_v27, %v9406_v41 }
 0x33e   : > { %v4872_v29 = vmax.f32 %v4450_v34, 0.0  ;;  %4396 = vmatmul.mubr.bf16.gmra.mrb[212].mxu0 %v7811_v21 }
 0x33f   : > { %v4870_v61 = vmax.f32 %v4442_v36, 0.0 }
 0x340   : > { %v6241_v42 = vpack.c.bf16 %v4872_v29, %v4871_v19 }
 0x341   : > { %v6236_v39 = vpack.c.bf16 %v4870_v61, %v4869_v57  ;;  %v6640_v10 = vpop.f32.mrb[220].mxu1  ;;  %v4189_v31 = vpop.f32.mrb[108].mxu0 }
 0x342   : > { %6503 = vst [vmem:[%s8984_s13 + $0x8] sm:$0xff] %v6241_v42   ;;  %v4463_v51 = vadd.f32 %v8643_v52, %v6640_v10  ;;  %v4454_v54 = vpop.f32.mrb[221].mxu1  ;;  %v8993_v53 = vadd.f32 %v4189_v31, %v3260_v14  ;;  %v4191_v2 = vpop.f32.mrb[109].mxu0 }
 0x343   : > { %6237 = vst [vmem:[%s8984_s13] sm:$0xff] %v6236_v39   ;;  %v4455_v21 = vadd.f32 %v8631_v44, %v4454_v54  ;;  %v6641_v29 = vpop.f32.mrb[222].mxu1  ;;  %v4192_v34 = vpop.f32.mrb[110].mxu0  ;;  %v9003_v44 = vld [vmem:[%s9333_s2] ss:$0 sm:$0xff]  ;;  %v9408_v39 = vld [vmem:[#allocation8_spill] sm:$0xff] }
 0x344   : > { %v4466_v58 = vadd.f32 %v8650_v18, %v6641_v29  ;;  %v4457_v36 = vpop.f32.mrb[223].mxu1  ;;  %v8997_v19 = vadd.f32 %v4192_v34, %v3263_v8  ;;  %v4194_v57 = vpop.f32.mrb[111].mxu0  ;;  %v4875_v61 = vmax.f32 %v4463_v51, 0.0  ;;  %v3268_v18 = vadd.f32 %v9003_v44, %v9408_v39  ;;  %v9409_v51 = vld [vmem:[#allocation9_spill] sm:$0xff] }
 0x345   : > { %v4458_v52 = vadd.f32 %v8638_v26, %v4457_v36  ;;  %v4873_v42 = vmax.f32 %v4455_v21, 0.0  ;;  %v3271_v8 = vadd.f32 %v9003_v44, %v9409_v51  ;;  %v9411_v51 = vld [vmem:[#allocation11_spill] sm:$0xff] }
 0x346   : > { %v4876_v27 = vmax.f32 %v4466_v58, 0.0 }
 0x347   : > { %v4874_v41 = vmax.f32 %v4458_v52, 0.0 }
 0x348   : > { %v6251_v14 = vpack.c.bf16 %v4876_v27, %v4875_v61 }
 0x349   : > { %v6246_v10 = vpack.c.bf16 %v4874_v41, %v4873_v42  ;;  %v6644_v31 = vpop.f32.mrb[224].mxu1  ;;  %v4197_v54 = vpop.f32.mrb[112].mxu0 }
 0x34a   : > { %6505 = vst [vmem:[%s8984_s13 + $0x18] sm:$0xff] %v6251_v14   ;;  %v4479_v0 = vadd.f32 %v8667_v5, %v6644_v31  ;;  %v4470_v26 = vpop.f32.mrb[225].mxu1  ;;  %v9012_v2 = vadd.f32 %v4197_v54, %v3268_v18  ;;  %v4199_v21 = vpop.f32.mrb[113].mxu0  ;;  %v9410_v18 = vld [vmem:[#allocation10_spill] sm:$0xff] }
 0x34b   : > { %6504 = vst [vmem:[%s8984_s13 + $0x10] sm:$0xff] %v6246_v10   ;;  %v4471_v29 = vadd.f32 %v8655_v60, %v4470_v26  ;;  %v6645_v34 = vpop.f32.mrb[226].mxu1  ;;  %v4200_v58 = vpop.f32.mrb[114].mxu0  ;;  %v3276_v60 = vadd.f32 %v9003_v44, %v9410_v18 }
 0x34c   : > { %v4482_v36 = vadd.f32 %v8674_v22, %v6645_v34  ;;  %v4473_v57 = vpop.f32.mrb[227].mxu1  ;;  %v9016_v52 = vadd.f32 %v4200_v58, %v3271_v8  ;;  %v4202_v5 = vpop.f32.mrb[115].mxu0  ;;  %v4879_v27 = vmax.f32 %v4479_v0, 0.0  ;;  %v3279_v8 = vadd.f32 %v9003_v44, %v9411_v51 }
 0x34d   : > { %v4474_v61 = vadd.f32 %v8662_v3, %v4473_v57  ;;  %v4877_v41 = vmax.f32 %v4471_v29, 0.0 }
 0x34e   : > { %v4880_v42 = vmax.f32 %v4482_v36, 0.0 }
 0x34f   : > { %v4878_v14 = vmax.f32 %v4474_v61, 0.0 }
 0x350   : > { %v6261_v39 = vpack.c.bf16 %v4880_v42, %v4879_v27 }
 0x351   : > { %v6256_v10 = vpack.c.bf16 %v4878_v14, %v4877_v41  ;;  %v6648_v31 = vpop.f32.mrb[228].mxu1  ;;  %v4205_v54 = vpop.f32.mrb[116].mxu0 }
 0x352   : > { %6507 = vst [vmem:[%s8984_s13 + $0x28] sm:$0xff] %v6261_v39   ;;  %v4495_v22 = vadd.f32 %v8691_v20, %v6648_v31  ;;  %v4486_v26 = vpop.f32.mrb[229].mxu1  ;;  %v9026_v3 = vadd.f32 %v4205_v54, %v3276_v60  ;;  %v4207_v0 = vpop.f32.mrb[117].mxu0  ;;  %v9412_v39 = vld [vmem:[#allocation12_spill] sm:$0xff]  ;;  %v9413_v54 = vld [vmem:[#allocation13_spill] sm:$0xff] }
 0x353   : > { %6506 = vst [vmem:[%s8984_s13 + $0x20] sm:$0xff] %v6256_v10   ;;  %v4487_v21 = vadd.f32 %v8679_v13, %v4486_v26  ;;  %v6649_v29 = vpop.f32.mrb[230].mxu1  ;;  %v4208_v34 = vpop.f32.mrb[118].mxu0  ;;  %v3284_v13 = vadd.f32 %v9003_v44, %v9412_v39  ;;  %v3287_v26 = vadd.f32 %v9003_v44, %v9413_v54 }
 0x354   : > { %v4498_v58 = vadd.f32 %v8698_v45, %v6649_v29  ;;  %v4489_v36 = vpop.f32.mrb[231].mxu1  ;;  %v9030_v57 = vadd.f32 %v4208_v34, %v3279_v8  ;;  %v4210_v20 = vpop.f32.mrb[119].mxu0  ;;  %v4883_v61 = vmax.f32 %v4495_v22, 0.0 }
 0x355   : > { %v4490_v5 = vadd.f32 %v8686_v6, %v4489_v36  ;;  %v4881_v42 = vmax.f32 %v4487_v21, 0.0 }
 0x356   : > { %v4884_v27 = vmax.f32 %v4498_v58, 0.0 }
 0x357   : > { %v4882_v41 = vmax.f32 %v4490_v5, 0.0 }
 0x358   : > { %v6271_v14 = vpack.c.bf16 %v4884_v27, %v4883_v61 }
 0x359   : > { %v6266_v18 = vpack.c.bf16 %v4882_v41, %v4881_v42  ;;  %v6652_v60 = vpop.f32.mrb[232].mxu1  ;;  %v4213_v10 = vpop.f32.mrb[120].mxu0  ;;  %v9414_v42 = vld [vmem:[#allocation14_spill] sm:$0xff] }
 0x35a   : > { %6509 = vst [vmem:[%s8984_s13 + $0x38] sm:$0xff] %v6271_v14   ;;  %v4511_v45 = vadd.f32 %v8715_v38, %v6652_v60  ;;  %v4502_v31 = vpop.f32.mrb[233].mxu1  ;;  %v9040_v6 = vadd.f32 %v4213_v10, %v3284_v13  ;;  %v4215_v22 = vpop.f32.mrb[121].mxu0 }
 0x35b   : > { %6508 = vst [vmem:[%s8984_s13 + $0x30] sm:$0xff] %v6266_v18   ;;  %v4503_v51 = vadd.f32 %v8703_v28, %v4502_v31  ;;  %v6653_v8 = vpop.f32.mrb[234].mxu1  ;;  %v4216_v0 = vpop.f32.mrb[122].mxu0  ;;  %v3292_v28 = vadd.f32 %v9003_v44, %v9414_v42  ;;  %v9415_v18 = vld [vmem:[#allocation15_spill] sm:$0xff]  ;;  %v9417_v42 = vld [vmem:[#allocation17_spill] sm:$0xff] }
 0x35c   : > { %v4514_v21 = vadd.f32 %v8722_v32, %v6653_v8  ;;  %v4505_v29 = vpop.f32.mrb[235].mxu1  ;;  %v9044_v34 = vadd.f32 %v4216_v0, %v3287_v26  ;;  %v4218_v38 = vpop.f32.mrb[123].mxu0  ;;  %v4887_v36 = vmax.f32 %v4511_v45, 0.0  ;;  %v3295_v60 = vadd.f32 %v9003_v44, %v9415_v18 }
 0x35d   : > { %v4506_v58 = vadd.f32 %v8710_v11, %v4505_v29  ;;  %v4885_v5 = vmax.f32 %v4503_v51, 0.0 }
 0x35e   : > { %v4888_v20 = vmax.f32 %v4514_v21, 0.0 }
 0x35f   : > { %v4886_v61 = vmax.f32 %v4506_v58, 0.0 }
 0x360   : > { %v6281_v27 = vpack.c.bf16 %v4888_v20, %v4887_v36  ;;  %v9416_v36 = vld [vmem:[#allocation16_spill] sm:$0xff] }
 0x361   : > { %v6276_v41 = vpack.c.bf16 %v4886_v61, %v4885_v5  ;;  %v6656_v14 = vpop.f32.mrb[236].mxu1  ;;  %v4221_v39 = vpop.f32.mrb[124].mxu0 }
 0x362   : > { %6511 = vst [vmem:[%s8984_s13 + $0x48] sm:$0xff] %v6281_v27   ;;  %v4527_v32 = vadd.f32 %v8739_v59, %v6656_v14  ;;  %v4518_v13 = vpop.f32.mrb[237].mxu1  ;;  %v9054_v11 = vadd.f32 %v4221_v39, %v3292_v28  ;;  %v4223_v10 = vpop.f32.mrb[125].mxu0  ;;  %v3303_v28 = vadd.f32 %v9003_v44, %v9417_v42 }
 0x363   : > { %6510 = vst [vmem:[%s8984_s13 + $0x40] sm:$0xff] %v6276_v41   ;;  %v4519_v45 = vadd.f32 %v8727_v49, %v4518_v13  ;;  %v6657_v31 = vpop.f32.mrb[238].mxu1  ;;  %v4224_v54 = vpop.f32.mrb[126].mxu0  ;;  %v3300_v49 = vadd.f32 %v9003_v44, %v9416_v36 }
 0x364   : > { %v4530_v26 = vadd.f32 %v8746_v48, %v6657_v31  ;;  %v4521_v22 = vpop.f32.mrb[239].mxu1  ;;  %v9058_v51 = vadd.f32 %v4224_v54, %v3295_v60  ;;  %v4226_v59 = vpop.f32.mrb[127].mxu0  ;;  %v4891_v0 = vmax.f32 %v4527_v32, 0.0 }
 0x365   : > { %v4522_v8 = vadd.f32 %v8734_v40, %v4521_v22  ;;  %v4889_v29 = vmax.f32 %v4519_v45, 0.0  ;;  %v9418_v59 = vld [vmem:[#allocation18_spill] sm:$0xff] }
 0x366   : > { %v4892_v21 = vmax.f32 %v4530_v26, 0.0 }
 0x367   : > { %v4890_v38 = vmax.f32 %v4522_v8, 0.0 }
 0x368   : > { %v6291_v58 = vpack.c.bf16 %v4892_v21, %v4891_v0 }
 0x369   : > { %v6286_v20 = vpack.c.bf16 %v4890_v38, %v4889_v29  ;;  %v6660_v5 = vpop.f32.mrb[240].mxu1  ;;  %v4229_v61 = vpop.f32.mrb[128].mxu0  ;;  %v9419_v38 = vld [vmem:[#allocation19_spill] sm:$0xff] }
 0x36a   : > { %6513 = vst [vmem:[%s8984_s13 + $0x58] sm:$0xff] %v6291_v58   ;;  %v4543_v48 = vadd.f32 %v8765_v16, %v6660_v5  ;;  %v4534_v27 = vpop.f32.mrb[241].mxu1  ;;  %v9068_v40 = vadd.f32 %v4229_v61, %v3300_v49  ;;  %v4231_v41 = vpop.f32.mrb[129].mxu0  ;;  %v3311_v58 = vadd.f32 %v9003_v44, %v9419_v38 }
 0x36b   : > { %6512 = vst [vmem:[%s8984_s13 + $0x50] sm:$0xff] %v6286_v20   ;;  %v4535_v14 = vadd.f32 %v8751_v7, %v4534_v27  ;;  %v6661_v39 = vpop.f32.mrb[242].mxu1  ;;  %v4232_v32 = vpop.f32.mrb[130].mxu0  ;;  %v3308_v7 = vadd.f32 %v9003_v44, %v9418_v59 }
 0x36c   : > { %v4546_v13 = vadd.f32 %v8774_v12, %v6661_v39  ;;  %v4537_v18 = vpop.f32.mrb[243].mxu1  ;;  %v9072_v60 = vadd.f32 %v4232_v32, %v3303_v28  ;;  %v4234_v16 = vpop.f32.mrb[131].mxu0  ;;  %v4895_v45 = vmax.f32 %v4543_v48, 0.0 }
 0x36d   : > { %v4538_v10 = vadd.f32 %v8758_v62, %v4537_v18  ;;  %v4893_v54 = vmax.f32 %v4535_v14, 0.0 }
 0x36e   : > { %v4896_v31 = vmax.f32 %v4546_v13, 0.0  ;;  %v9420_v13 = vld [vmem:[#allocation20_spill] sm:$0xff] }
 0x36f   : > { %v4894_v26 = vmax.f32 %v4538_v10, 0.0 }
 0x370   : > { %v6301_v22 = vpack.c.bf16 %v4896_v31, %v4895_v45  ;;  %v9421_v31 = vld [vmem:[#allocation21_spill] sm:$0xff] }
 0x371   : > { %v6296_v8 = vpack.c.bf16 %v4894_v26, %v4893_v54  ;;  %v6664_v0 = vpop.f32.mrb[244].mxu1  ;;  %v4237_v21 = vpop.f32.mrb[132].mxu0  ;;  %v3319_v54 = vadd.f32 %v9003_v44, %v9421_v31 }
 0x372   : > { %6515 = vst [vmem:[%s8984_s13 + $0x68] sm:$0xff] %v6301_v22   ;;  %v4559_v12 = vadd.f32 %v8797_v33, %v6664_v0  ;;  %v4550_v29 = vpop.f32.mrb[245].mxu1  ;;  %v9082_v62 = vadd.f32 %v4237_v21, %v3308_v7  ;;  %v4239_v36 = vpop.f32.mrb[133].mxu0 }
 0x373   : > { %6514 = vst [vmem:[%s8984_s13 + $0x60] sm:$0xff] %v6296_v8   ;;  %v4551_v49 = vadd.f32 %v8781_v55, %v4550_v29  ;;  %v6665_v20 = vpop.f32.mrb[246].mxu1  ;;  %v4240_v5 = vpop.f32.mrb[134].mxu0  ;;  %v3316_v55 = vadd.f32 %v9003_v44, %v9420_v13 }
 0x374   : > { %v4562_v61 = vadd.f32 %v8806_v9, %v6665_v20  ;;  %v4553_v48 = vpop.f32.mrb[247].mxu1  ;;  %v9086_v27 = vadd.f32 %v4240_v5, %v3311_v58  ;;  %v4242_v33 = vpop.f32.mrb[135].mxu0  ;;  %v4899_v28 = vmax.f32 %v4559_v12, 0.0  ;;  %v9422_v20 = vld [vmem:[#allocation22_spill] sm:$0xff] }
 0x375   : > { %v4554_v42 = vadd.f32 %v8790_v56, %v4553_v48  ;;  %v4897_v14 = vmax.f32 %v4551_v49, 0.0 }
 0x376   : > { %v4900_v41 = vmax.f32 %v4562_v61, 0.0 }
 0x377   : > { %v4898_v39 = vmax.f32 %v4554_v42, 0.0  ;;  %v9423_v42 = vld [vmem:[#allocation23_spill] sm:$0xff] }
 0x378   : > { %v6311_v32 = vpack.c.bf16 %v4900_v41, %v4899_v28  ;;  %v3327_v28 = vadd.f32 %v9003_v44, %v9423_v42  ;;  %v9426_v42 = vld [vmem:[#allocation26_spill] sm:$0xff] }
 0x379   : > { %v6306_v18 = vpack.c.bf16 %v4898_v39, %v4897_v14  ;;  %v6668_v16 = vpop.f32.mrb[248].mxu1  ;;  %v4245_v10 = vpop.f32.mrb[136].mxu0 }
 0x37a   : > { %6517 = vst [vmem:[%s8984_s13 + $0x78] sm:$0xff] %v6311_v32   ;;  %v4575_v9 = vadd.f32 %v8831_v24, %v6668_v16  ;;  %v4566_v45 = vpop.f32.mrb[249].mxu1  ;;  %v9096_v56 = vadd.f32 %v4245_v10, %v3316_v55  ;;  %v4247_v26 = vpop.f32.mrb[137].mxu0 }
 0x37b   : > { %6516 = vst [vmem:[%s8984_s13 + $0x70] sm:$0xff] %v6306_v18   ;;  %v4567_v22 = vadd.f32 %v8813_v23, %v4566_v45  ;;  %v6669_v59 = vpop.f32.mrb[250].mxu1  ;;  %v4248_v7 = vpop.f32.mrb[138].mxu0  ;;  %v3324_v23 = vadd.f32 %v9003_v44, %v9422_v20  ;;  %v9424_v26 = vld [vmem:[#allocation24_spill] sm:$0xff] }
 0x37c   : > { %v4578_v8 = vadd.f32 %v8838_v15, %v6669_v59  ;;  %v4569_v0 = vpop.f32.mrb[251].mxu1  ;;  %v9100_v21 = vadd.f32 %v4248_v7, %v3319_v54  ;;  %v4250_v24 = vpop.f32.mrb[139].mxu0  ;;  %v4903_v29 = vmax.f32 %v4575_v9, 0.0 }
 0x37d   : > { %v4570_v12 = vadd.f32 %v8822_v1, %v4569_v0  ;;  %v4901_v58 = vmax.f32 %v4567_v22, 0.0  ;;  %v9425_v0 = vld [vmem:[#allocation25_spill] sm:$0xff] }
 0x37e   : > { %v4904_v38 = vmax.f32 %v4578_v8, 0.0  ;;  %v3335_v24 = vadd.f32 %v9003_v44, %v9425_v0 }
 0x37f   : > { %v4902_v36 = vmax.f32 %v4570_v12, 0.0 }
 0x380   : > { %v6321_v49 = vpack.c.bf16 %v4904_v38, %v4903_v29 }
 0x381   : > { %v6316_v5 = vpack.c.bf16 %v4902_v36, %v4901_v58  ;;  %v6672_v61 = vpop.f32.mrb[252].mxu1  ;;  %v4253_v48 = vpop.f32.mrb[140].mxu0 }
 0x382   : > { %6519 = vst [vmem:[%s8984_s13 + $0x88] sm:$0xff] %v6321_v49   ;;  %v4591_v15 = vadd.f32 %v8863_v50, %v6672_v61  ;;  %v4582_v33 = vpop.f32.mrb[253].mxu1  ;;  %v9110_v1 = vadd.f32 %v4253_v48, %v3324_v23  ;;  %v4255_v41 = vpop.f32.mrb[141].mxu0 }
 0x383   : > { %6518 = vst [vmem:[%s8984_s13 + $0x80] sm:$0xff] %v6316_v5   ;;  %v4583_v14 = vadd.f32 %v8847_v35, %v4582_v33  ;;  %v6673_v39 = vpop.f32.mrb[254].mxu1  ;;  %v4256_v32 = vpop.f32.mrb[142].mxu0  ;;  %v3332_v35 = vadd.f32 %v9003_v44, %v9424_v26 }
 0x384   : > { %v4594_v13 = vadd.f32 %v8870_v47, %v6673_v39  ;;  %v4585_v55 = vpop.f32.mrb[255].mxu1  ;;  %v9114_v18 = vadd.f32 %v4256_v32, %v3327_v28  ;;  %v4258_v50 = vpop.f32.mrb[143].mxu0  ;;  %v4907_v10 = vmax.f32 %v4591_v15, 0.0  ;;  %v9427_v32 = vld [vmem:[#allocation27_spill] sm:$0xff] }
 0x385   : > { %v4586_v16 = vadd.f32 %v8854_v30, %v4585_v55  ;;  %v4905_v45 = vmax.f32 %v4583_v14, 0.0  ;;  %v9428_v50 = vld [vmem:[#allocation54_spill] sm:$0xff] }
 0x386   : > { %v4908_v9 = vmax.f32 %v4594_v13, 0.0  ;;  %v3343_v13 = vadd.f32 %v9003_v44, %v9427_v32  ;;  %v9436_v32 = vld [vmem:[#allocation63_spill] sm:$0xff] }
 0x387   : > { %v4906_v31 = vmax.f32 %v4586_v16, 0.0 }
 0x388   : > { %v6331_v54 = vpack.c.bf16 %v4908_v9, %v4907_v10 }
 0x389   : > { %v6326_v22 = vpack.c.bf16 %v4906_v31, %v4905_v45  ;;  %v6676_v59 = vpop.f32.mrb[0].mxu1  ;;  %v4261_v7 = vpop.f32.mrb[144].mxu0  ;;  %v9429_v45 = vld [vmem:[#allocation59_spill] sm:$0xff] }
 0x38a   : > { %6521 = vst [vmem:[%s8984_s13 + $0x98] sm:$0xff] %v6331_v54   ;;  %v4607_v47 = vadd.f32 %v8895_v17, %v6676_v59  ;;  %v4598_v8 = vpop.f32.mrb[1].mxu1  ;;  %v9124_v30 = vadd.f32 %v4261_v7, %v3332_v35  ;;  %v4263_v12 = vpop.f32.mrb[145].mxu0  ;;  %v9430_v35 = vld [vmem:[#allocation56_spill] sm:$0xff] }
 0x38b   : > { %6520 = vst [vmem:[%s8984_s13 + $0x90] sm:$0xff] %v6326_v22   ;;  %v4599_v29 = vadd.f32 %v8879_v43, %v4598_v8  ;;  %v6677_v38 = vpop.f32.mrb[2].mxu1  ;;  %v4264_v58 = vpop.f32.mrb[146].mxu0  ;;  %v3340_v43 = vadd.f32 %v9003_v44, %v9426_v42 }
 0x38c   : > { %v4610_v36 = vadd.f32 %v8902_v25, %v6677_v38  ;;  %v4601_v49 = vpop.f32.mrb[3].mxu1  ;;  %v9128_v20 = vadd.f32 %v4264_v58, %v3335_v24  ;;  %v4266_v17 = vpop.f32.mrb[147].mxu0  ;;  %v4911_v5 = vmax.f32 %v4607_v47, 0.0  ;;  %v9431_v24 = vld [vmem:[#allocation28_spill] sm:$0xff] }
 0x38d   : > { %v4602_v23 = vadd.f32 %v8886_v4, %v4601_v49  ;;  %v4909_v48 = vmax.f32 %v4599_v29, 0.0  ;;  %v3348_v12 = vadd.f32 %v9003_v44, %v9431_v24 }
 0x38e   : > { %v4912_v61 = vmax.f32 %v4610_v36, 0.0  ;;  %v9432_v36 = vld [vmem:[#allocation3_spill] sm:$0xff] }
 0x38f   : > { %v4910_v15 = vmax.f32 %v4602_v23, 0.0  ;;  %v9433_v23 = vld [vmem:[#allocation29_spill] sm:$0xff] }
 0x390   : > { %v6341_v33 = vpack.c.bf16 %v4912_v61, %v4911_v5  ;;  %v3351_v5 = vadd.f32 %v9003_v44, %v9433_v23 }
 0x391   : > { %v6336_v28 = vpack.c.bf16 %v4910_v15, %v4909_v48  ;;  %v6680_v41 = vpop.f32.mrb[4].mxu1  ;;  %v4269_v14 = vpop.f32.mrb[148].mxu0  ;;  %v9434_v15 = vld [vmem:[#allocation61_spill] sm:$0xff] }
 0x392   : > { %6523 = vst [vmem:[%s8984_s13 + $0xa8] sm:$0xff] %v6341_v33   ;;  %v4623_v25 = vadd.f32 %v8927_v63, %v6680_v41  ;;  %v4614_v39 = vpop.f32.mrb[5].mxu1  ;;  %v9138_v4 = vadd.f32 %v4269_v14, %v3340_v43  ;;  %v4271_v55 = vpop.f32.mrb[149].mxu0 }
 0x393   : > { %6522 = vst [vmem:[%s8984_s13 + $0xa0] sm:$0xff] %v6336_v28   ;;  %v4615_v16 = vadd.f32 %v9428_v50, %v4614_v39  ;;  %v6681_v10 = vpop.f32.mrb[6].mxu1  ;;  %v4272_v9 = vpop.f32.mrb[150].mxu0  ;;  %v9435_v28 = vld [vmem:[#allocation65_spill] sm:$0xff] }
 0x394   : > { %v4626_v31 = vadd.f32 %v9429_v45, %v6681_v10  ;;  %v4617_v54 = vpop.f32.mrb[7].mxu1  ;;  %v9142_v26 = vadd.f32 %v4272_v9, %v3343_v13  ;;  %v4274_v63 = vpop.f32.mrb[151].mxu0  ;;  %v4915_v59 = vmax.f32 %v4623_v25, 0.0  ;;  %v9437_v45 = vld [vmem:[#allocation30_spill] sm:$0xff] }
 0x395   : > { %v4618_v22 = vadd.f32 %v9430_v35, %v4617_v54  ;;  %v4913_v47 = vmax.f32 %v4615_v16, 0.0 }
 0x396   : > { %v4916_v7 = vmax.f32 %v4626_v31, 0.0  ;;  %v3356_v31 = vadd.f32 %v9003_v44, %v9437_v45 }
 0x397   : > { %v4914_v8 = vmax.f32 %v4618_v22, 0.0 }
 0x398   : > { %v6351_v0 = vpack.c.bf16 %v4916_v7, %v4915_v59  ;;  %v9438_v7 = vld [vmem:[#allocation31_spill] sm:$0xff] }
 0x399   : > { %v6346_v29 = vpack.c.bf16 %v4914_v8, %v4913_v47  ;;  %v6684_v38 = vpop.f32.mrb[8].mxu1  ;;  %v4277_v58 = vpop.f32.mrb[152].mxu0  ;;  %v3359_v47 = vadd.f32 %v9003_v44, %v9438_v7 }
 0x39a   : > { %6525 = vst [vmem:[%s8984_s13 + $0xb8] sm:$0xff] %v6351_v0   ;;  %v4639_v49 = vadd.f32 %v9432_v36, %v6684_v38  ;;  %v4630_v17 = vpop.f32.mrb[9].mxu1  ;;  %v9152_v61 = vadd.f32 %v4277_v58, %v3348_v12  ;;  %v4279_v48 = vpop.f32.mrb[153].mxu0 }
 0x39b   : > { %6524 = vst [vmem:[%s8984_s13 + $0xb0] sm:$0xff] %v6346_v29   ;;  %v4631_v33 = vadd.f32 %v9434_v15, %v4630_v17  ;;  %v6685_v42 = vpop.f32.mrb[10].mxu1  ;;  %v4280_v43 = vpop.f32.mrb[154].mxu0 }
 0x39c   : > { %v4642_v41 = vadd.f32 %v9435_v28, %v6685_v42  ;;  %v4633_v14 = vpop.f32.mrb[11].mxu1  ;;  %v9156_v25 = vadd.f32 %v4280_v43, %v3351_v5  ;;  %v4282_v39 = vpop.f32.mrb[155].mxu0  ;;  %v4919_v55 = vmax.f32 %v4639_v49, 0.0 }
 0x39d   : > { %v4634_v13 = vadd.f32 %v9436_v32, %v4633_v14  ;;  %v4917_v16 = vmax.f32 %v4631_v33, 0.0  ;;  %v9439_v33 = vld [vmem:[#allocation32_spill] sm:$0xff]  ;;  %v9440_v14 = vld [vmem:[#allocation33_spill] sm:$0xff] }
 0x39e   : > { %v4920_v50 = vmax.f32 %v4642_v41, 0.0  ;;  %v3367_v39 = vadd.f32 %v9003_v44, %v9440_v14 }
 0x39f   : > { %v4918_v10 = vmax.f32 %v4634_v13, 0.0 }
 0x3a0   : > { %v6361_v9 = vpack.c.bf16 %v4920_v50, %v4919_v55 }
 0x3a1   : > { %v6356_v54 = vpack.c.bf16 %v4918_v10, %v4917_v16  ;;  %v6688_v63 = vpop.f32.mrb[12].mxu1  ;;  %v4285_v35 = vpop.f32.mrb[156].mxu0 }
 0x3a2   : > { %6527 = vst [vmem:[%s8984_s13 + $0xc8] sm:$0xff] %v6361_v9   ;;  %v4655_v22 = vadd.f32 %v8993_v53, %v6688_v63  ;;  %v4646_v59 = vpop.f32.mrb[13].mxu1  ;;  %v9166_v8 = vadd.f32 %v4285_v35, %v3356_v31  ;;  %v4287_v0 = vpop.f32.mrb[157].mxu0 }
 0x3a3   : > { %6526 = vst [vmem:[%s8984_s13 + $0xc0] sm:$0xff] %v6356_v54   ;;  %v4647_v24 = vadd.f32 %v8972_v37, %v4646_v59  ;;  %v6689_v12 = vpop.f32.mrb[14].mxu1  ;;  %v4288_v29 = vpop.f32.mrb[158].mxu0  ;;  %v3364_v37 = vadd.f32 %v9003_v44, %v9439_v33  ;;  %v9441_v59 = vld [vmem:[#allocation35_spill] sm:$0xff] }
 0x3a4   : > { %v4658_v38 = vadd.f32 %v8997_v19, %v6689_v12  ;;  %v4649_v58 = vpop.f32.mrb[15].mxu1  ;;  %v9170_v36 = vadd.f32 %v4288_v29, %v3359_v47  ;;  %v4290_v53 = vpop.f32.mrb[159].mxu0  ;;  %v4923_v17 = vmax.f32 %v4655_v22, 0.0  ;;  %v9442_v12 = vld [vmem:[#allocation36_spill] sm:$0xff] }
 0x3a5   : > { %v4650_v49 = vadd.f32 %v8978_v46, %v4649_v58  ;;  %v4921_v5 = vmax.f32 %v4647_v24, 0.0  ;;  %v6940_v29 = vadd.f32 %v9003_v44, %v9442_v12  ;;  %v9446_v12 = vld [vmem:[#allocation40_spill] sm:$0xff] }
 0x3a6   : > { %v4924_v23 = vmax.f32 %v4658_v38, 0.0 }
 0x3a7   : > { %v4922_v48 = vmax.f32 %v4650_v49, 0.0 }
 0x3a8   : > { %v6371_v15 = vpack.c.bf16 %v4924_v23, %v4923_v17 }
 0x3a9   : > { %v6366_v42 = vpack.c.bf16 %v4922_v48, %v4921_v5  ;;  %v6692_v43 = vpop.f32.mrb[16].mxu1  ;;  %v4293_v28 = vpop.f32.mrb[160].mxu0 }
 0x3aa   : > { %6529 = vst [vmem:[%s8984_s13 + $0xd8] sm:$0xff] %v6371_v15   ;;  %v4671_v19 = vadd.f32 %v9026_v3, %v6692_v43  ;;  %v4662_v41 = vpop.f32.mrb[17].mxu1  ;;  %v9180_v46 = vadd.f32 %v4293_v28, %v3364_v37  ;;  %v4295_v32 = vpop.f32.mrb[161].mxu0  ;;  %v9443_v28 = vld [vmem:[#allocation37_spill] sm:$0xff] }
 0x3ab   : > { %6528 = vst [vmem:[%s8984_s13 + $0xd0] sm:$0xff] %v6366_v42   ;;  %v4663_v13 = vadd.f32 %v9012_v2, %v4662_v41  ;;  %v6693_v55 = vpop.f32.mrb[18].mxu1  ;;  %v4296_v50 = vpop.f32.mrb[162].mxu0  ;;  %v6938_v2 = vadd.f32 %v9003_v44, %v9441_v59  ;;  %v9444_v32 = vld [vmem:[#allocation38_spill] sm:$0xff] }
 0x3ac   : > { %v4674_v16 = vadd.f32 %v9030_v57, %v6693_v55  ;;  %v4665_v10 = vpop.f32.mrb[19].mxu1  ;;  %v9184_v9 = vadd.f32 %v4296_v50, %v3367_v39  ;;  %v4298_v3 = vpop.f32.mrb[163].mxu0  ;;  %v4927_v31 = vmax.f32 %v4671_v19, 0.0 }
 0x3ad   : > { %v4666_v45 = vadd.f32 %v9016_v52, %v4665_v10  ;;  %v4925_v63 = vmax.f32 %v4663_v13, 0.0  ;;  %v6944_v13 = vadd.f32 %v9003_v44, %v9444_v32 }
 0x3ae   : > { %v4928_v54 = vmax.f32 %v4674_v16, 0.0 }
 0x3af   : > { %v4926_v35 = vmax.f32 %v4666_v45, 0.0 }
 0x3b0   : > { %v6381_v22 = vpack.c.bf16 %v4928_v54, %v4927_v31 }
 0x3b1   : > { %v6376_v7 = vpack.c.bf16 %v4926_v35, %v4925_v63  ;;  %v6696_v47 = vpop.f32.mrb[20].mxu1  ;;  %v4301_v0 = vpop.f32.mrb[164].mxu0 }
 0x3b2   : > { %6531 = vst [vmem:[%s8984_s13 + $0xe8] sm:$0xff] %v6381_v22   ;;  %v4687_v57 = vadd.f32 %v9054_v11, %v6696_v47  ;;  %v4678_v24 = vpop.f32.mrb[21].mxu1  ;;  %v9194_v52 = vadd.f32 %v6938_v2, %v4301_v0  ;;  %v4303_v38 = vpop.f32.mrb[165].mxu0 }
 0x3b3   : > { %6530 = vst [vmem:[%s8984_s13 + $0xe0] sm:$0xff] %v6376_v7   ;;  %v4679_v58 = vadd.f32 %v9040_v6, %v4678_v24  ;;  %v6697_v53 = vpop.f32.mrb[22].mxu1  ;;  %v4304_v49 = vpop.f32.mrb[166].mxu0  ;;  %v6942_v6 = vadd.f32 %v9003_v44, %v9443_v28  ;;  %v9445_v7 = vld [vmem:[#allocation39_spill] sm:$0xff]  ;;  %v9447_v28 = vld [vmem:[#allocation41_spill] sm:$0xff] }
 0x3b4   : > { %v4690_v17 = vadd.f32 %v9058_v51, %v6697_v53  ;;  %v4681_v23 = vpop.f32.mrb[23].mxu1  ;;  %v9198_v5 = vadd.f32 %v6940_v29, %v4304_v49  ;;  %v4306_v11 = vpop.f32.mrb[167].mxu0  ;;  %v4931_v15 = vmax.f32 %v4687_v57, 0.0  ;;  %v6948_v29 = vadd.f32 %v9003_v44, %v9446_v12 }
 0x3b5   : > { %v4682_v48 = vadd.f32 %v9044_v34, %v4681_v23  ;;  %v4929_v37 = vmax.f32 %v4679_v58, 0.0 }
 0x3b6   : > { %v4932_v33 = vmax.f32 %v4690_v17, 0.0 }
 0x3b7   : > { %v4930_v42 = vmax.f32 %v4682_v48, 0.0 }
 0x3b8   : > { %v6391_v43 = vpack.c.bf16 %v4932_v33, %v4931_v15 }
 0x3b9   : > { %v6386_v19 = vpack.c.bf16 %v4930_v42, %v4929_v37  ;;  %v6700_v41 = vpop.f32.mrb[24].mxu1  ;;  %v4309_v14 = vpop.f32.mrb[168].mxu0 }
 0x3ba   : > { %6533 = vst [vmem:[%s8984_s13 + $0xf8] sm:$0xff] %v6391_v43   ;;  %v4703_v51 = vadd.f32 %v9082_v62, %v6700_v41  ;;  %v4694_v39 = vpop.f32.mrb[25].mxu1  ;;  %v9208_v34 = vadd.f32 %v6942_v6, %v4309_v14  ;;  %v4311_v55 = vpop.f32.mrb[169].mxu0 }
 0x3bb   : > { %6532 = vst [vmem:[%s8984_s13 + $0xf0] sm:$0xff] %v6386_v19   ;;  %v4695_v50 = vadd.f32 %v9068_v40, %v4694_v39  ;;  %v6701_v16 = vpop.f32.mrb[26].mxu1  ;;  %v4312_v10 = vpop.f32.mrb[170].mxu0  ;;  %v6946_v40 = vadd.f32 %v9003_v44, %v9445_v7 }
 0x3bc   : > { %v4706_v3 = vadd.f32 %v9086_v27, %v6701_v16  ;;  %v4697_v45 = vpop.f32.mrb[27].mxu1  ;;  %v9212_v31 = vadd.f32 %v6944_v13, %v4312_v10  ;;  %v4314_v62 = vpop.f32.mrb[171].mxu0  ;;  %v4935_v63 = vmax.f32 %v4703_v51, 0.0  ;;  %v9448_v51 = vld [vmem:[#allocation42_spill] sm:$0xff] }
 0x3bd   : > { %v4698_v54 = vadd.f32 %v9072_v60, %v4697_v45  ;;  %v4933_v22 = vmax.f32 %v4695_v50, 0.0  ;;  %v6952_v39 = vadd.f32 %v9003_v44, %v9448_v51 }
 0x3be   : > { %v4936_v35 = vmax.f32 %v4706_v3, 0.0 }
 0x3bf   : > { %v4934_v59 = vmax.f32 %v4698_v54, 0.0 }
 0x3c0   : > { %v6401_v2 = vpack.c.bf16 %v4936_v35, %v4935_v63 }
 0x3c1   : > { %v6396_v47 = vpack.c.bf16 %v4934_v59, %v4933_v22  ;;  %v6704_v0 = vpop.f32.mrb[28].mxu1  ;;  %v4317_v57 = vpop.f32.mrb[172].mxu0  ;;  %v9449_v59 = vld [vmem:[#allocation43_spill] sm:$0xff] }
 0x3c2   : > { %6535 = vst [vmem:[%s8984_s13 + $0x108] sm:$0xff] %v6401_v2   ;;  %v4719_v27 = vadd.f32 %v9110_v1, %v6704_v0  ;;  %v4710_v24 = vpop.f32.mrb[29].mxu1  ;;  %v9222_v60 = vadd.f32 %v6946_v40, %v4317_v57  ;;  %v4319_v38 = vpop.f32.mrb[173].mxu0  ;;  %v9450_v0 = vld [vmem:[#allocation44_spill] sm:$0xff] }
 0x3c3   : > { %6534 = vst [vmem:[%s8984_s13 + $0x100] sm:$0xff] %v6396_v47   ;;  %v4711_v58 = vadd.f32 %v9096_v56, %v4710_v24  ;;  %v6705_v53 = vpop.f32.mrb[30].mxu1  ;;  %v4320_v49 = vpop.f32.mrb[174].mxu0  ;;  %v6950_v56 = vadd.f32 %v9003_v44, %v9447_v28  ;;  %v6956_v57 = vadd.f32 %v9003_v44, %v9450_v0 }
 0x3c4   : > { %v4722_v17 = vadd.f32 %v9114_v18, %v6705_v53  ;;  %v4713_v23 = vpop.f32.mrb[31].mxu1  ;;  %v9226_v11 = vadd.f32 %v6948_v29, %v4320_v49  ;;  %v4322_v1 = vpop.f32.mrb[175].mxu0  ;;  %v4939_v15 = vmax.f32 %v4719_v27, 0.0 }
 0x3c5   : > { %v4714_v48 = vadd.f32 %v9100_v21, %v4713_v23  ;;  %v4937_v37 = vmax.f32 %v4711_v58, 0.0 }
 0x3c6   : > { %v4940_v33 = vmax.f32 %v4722_v17, 0.0 }
 0x3c7   : > { %v4938_v42 = vmax.f32 %v4714_v48, 0.0 }
 0x3c8   : > { %v6411_v43 = vpack.c.bf16 %v4940_v33, %v4939_v15  ;;  %v9451_v33 = vld [vmem:[#allocation45_spill] sm:$0xff] }
 0x3c9   : > { %v6406_v6 = vpack.c.bf16 %v4938_v42, %v4937_v37  ;;  %v6708_v19 = vpop.f32.mrb[32].mxu1  ;;  %v4325_v41 = vpop.f32.mrb[176].mxu0 }
 0x3ca   : > { %6537 = vst [vmem:[%s8984_s13 + $0x118] sm:$0xff] %v6411_v43   ;;  %v4735_v18 = vadd.f32 %v9138_v4, %v6708_v19  ;;  %v4726_v14 = vpop.f32.mrb[33].mxu1  ;;  %v9236_v21 = vadd.f32 %v6950_v56, %v4325_v41  ;;  %v4327_v32 = vpop.f32.mrb[177].mxu0  ;;  %v9452_v56 = vld [vmem:[#allocation46_spill] sm:$0xff] }
 0x3cb   : > { %6536 = vst [vmem:[%s8984_s13 + $0x110] sm:$0xff] %v6406_v6   ;;  %v4727_v13 = vadd.f32 %v9124_v30, %v4726_v14  ;;  %v6709_v55 = vpop.f32.mrb[34].mxu1  ;;  %v4328_v50 = vpop.f32.mrb[178].mxu0  ;;  %v6954_v30 = vadd.f32 %v9003_v44, %v9449_v59  ;;  %v6960_v6 = vadd.f32 %v9003_v44, %v9452_v56 }
 0x3cc   : > { %v4738_v16 = vadd.f32 %v9142_v26, %v6709_v55  ;;  %v4729_v10 = vpop.f32.mrb[35].mxu1  ;;  %v9240_v3 = vadd.f32 %v6952_v39, %v4328_v50  ;;  %v4330_v4 = vpop.f32.mrb[179].mxu0  ;;  %v4943_v62 = vmax.f32 %v4735_v18, 0.0 }
 0x3cd   : > { %v4730_v45 = vadd.f32 %v9128_v20, %v4729_v10  ;;  %v4941_v63 = vmax.f32 %v4727_v13, 0.0 }
 0x3ce   : > { %v4944_v54 = vmax.f32 %v4738_v16, 0.0 }
 0x3cf   : > { %v4942_v35 = vmax.f32 %v4730_v45, 0.0  ;;  %v9453_v45 = vld [vmem:[#allocation47_spill] sm:$0xff] }
 0x3d0   : > { %v6421_v22 = vpack.c.bf16 %v4944_v54, %v4943_v62 }
 0x3d1   : > { %v6416_v2 = vpack.c.bf16 %v4942_v35, %v4941_v63  ;;  %v6712_v7 = vpop.f32.mrb[36].mxu1  ;;  %v4333_v40 = vpop.f32.mrb[180].mxu0 }
 0x3d2   : > { %6539 = vst [vmem:[%s8984_s13 + $0x128] sm:$0xff] %v6421_v22   ;;  %v4751_v26 = vadd.f32 %v9166_v8, %v6712_v7  ;;  %v4742_v47 = vpop.f32.mrb[37].mxu1  ;;  %v9250_v20 = vadd.f32 %v6954_v30, %v4333_v40  ;;  %v4335_v27 = vpop.f32.mrb[181].mxu0  ;;  %v9454_v22 = vld [vmem:[#allocation48_spill] sm:$0xff] }
 0x3d3   : > { %6538 = vst [vmem:[%s8984_s13 + $0x120] sm:$0xff] %v6416_v2   ;;  %v4743_v24 = vadd.f32 %v9152_v61, %v4742_v47  ;;  %v6713_v12 = vpop.f32.mrb[38].mxu1  ;;  %v4336_v29 = vpop.f32.mrb[182].mxu0  ;;  %v6958_v61 = vadd.f32 %v9003_v44, %v9451_v33  ;;  %v6964_v59 = vadd.f32 %v9003_v44, %v9454_v22 }
 0x3d4   : > { %v4754_v38 = vadd.f32 %v9170_v36, %v6713_v12  ;;  %v4745_v58 = vpop.f32.mrb[39].mxu1  ;;  %v9254_v53 = vadd.f32 %v6956_v57, %v4336_v29  ;;  %v4338_v8 = vpop.f32.mrb[183].mxu0  ;;  %v4947_v17 = vmax.f32 %v4751_v26, 0.0 }
 0x3d5   : > { %v4746_v49 = vadd.f32 %v9156_v25, %v4745_v58  ;;  %v4945_v1 = vmax.f32 %v4743_v24, 0.0  ;;  %v9455_v58 = vld [vmem:[#allocation49_spill] sm:$0xff] }
 0x3d6   : > { %v4948_v23 = vmax.f32 %v4754_v38, 0.0  ;;  %v6966_v8 = vadd.f32 %v9003_v44, %v9455_v58 }
 0x3d7   : > { %v4946_v48 = vmax.f32 %v4746_v49, 0.0 }
 0x3d8   : > { %v6431_v15 = vpack.c.bf16 %v4948_v23, %v4947_v17 }
 0x3d9   : > { %v6426_v37 = vpack.c.bf16 %v4946_v48, %v4945_v1  ;;  %v6716_v42 = vpop.f32.mrb[40].mxu1  ;;  %v4341_v43 = vpop.f32.mrb[184].mxu0  ;;  %v9456_v1 = vld [vmem:[#allocation50_spill] sm:$0xff] }
 0x3da   : > { %6541 = vst [vmem:[%s8984_s13 + $0x138] sm:$0xff] %v6431_v15   ;;  %v4767_v36 = vadd.f32 %v9194_v52, %v6716_v42  ;;  %v4758_v28 = vpop.f32.mrb[41].mxu1  ;;  %v9264_v25 = vadd.f32 %v6958_v61, %v4341_v43  ;;  %v4343_v19 = vpop.f32.mrb[185].mxu0  ;;  %v6968_v48 = vadd.f32 %v9003_v44, %v9456_v1 }
 0x3db   : > { %6540 = vst [vmem:[%s8984_s13 + $0x130] sm:$0xff] %v6426_v37   ;;  %v4759_v41 = vadd.f32 %v9180_v46, %v4758_v28  ;;  %v6717_v18 = vpop.f32.mrb[42].mxu1  ;;  %v4344_v14 = vpop.f32.mrb[186].mxu0  ;;  %v6962_v46 = vadd.f32 %v9003_v44, %v9453_v45 }
 0x3dc   : > { %v4770_v51 = vadd.f32 %v9198_v5, %v6717_v18  ;;  %v4761_v39 = vpop.f32.mrb[43].mxu1  ;;  %v9268_v32 = vadd.f32 %v6960_v6, %v4344_v14  ;;  %v4346_v52 = vpop.f32.mrb[187].mxu0  ;;  %v4951_v55 = vmax.f32 %v4767_v36, 0.0  ;;  %v9457_v14 = vld [vmem:[#allocation51_spill] sm:$0xff] }
 0x3dd   : > { %v4762_v13 = vadd.f32 %v9184_v9, %v4761_v39  ;;  %v4949_v16 = vmax.f32 %v4759_v41, 0.0 }
 0x3de   : > { %v4952_v50 = vmax.f32 %v4770_v51, 0.0  ;;  %v6970_v51 = vadd.f32 %v9003_v44, %v9457_v14 }
 0x3df   : > { %v4950_v10 = vmax.f32 %v4762_v13, 0.0 }
 0x3e0   : > { %v6441_v4 = vpack.c.bf16 %v4952_v50, %v4951_v55  ;;  %v9458_v55 = vld [vmem:[#allocation52_spill] sm:$0xff] }
 0x3e1   : > { %v6436_v62 = vpack.c.bf16 %v4950_v10, %v4949_v16  ;;  %v6720_v54 = vpop.f32.mrb[44].mxu1  ;;  %v4349_v63 = vpop.f32.mrb[188].mxu0  ;;  %v6972_v50 = vadd.f32 %v9003_v44, %v9458_v55 }
 0x3e2   : > { %6543 = vst [vmem:[%s8984_s13 + $0x148] sm:$0xff] %v6441_v4   ;;  %v4783_v5 = vadd.f32 %v9222_v60, %v6720_v54  ;;  %v4774_v35 = vpop.f32.mrb[45].mxu1  ;;  %v6963_v9 = vadd.f32 %v6962_v46, %v4349_v63  ;;  %v4351_v30 = vpop.f32.mrb[189].mxu0 }
 0x3e3   : > { %6542 = vst [vmem:[%s8984_s13 + $0x140] sm:$0xff] %v6436_v62   ;;  %v4775_v2 = vadd.f32 %v9208_v34, %v4774_v35  ;;  %v6721_v7 = vpop.f32.mrb[46].mxu1  ;;  %v4352_v40 = vpop.f32.mrb[190].mxu0  ;;  %v9302_v30 = vld [vmem:[%s9333_s2] ss:$0 sm:$0xff] }
 0x3e4   : > { %v4786_v26 = vadd.f32 %v9226_v11, %v6721_v7  ;;  %v4777_v47 = vpop.f32.mrb[47].mxu1  ;;  %v6965_v0 = vadd.f32 %v6964_v59, %v4352_v40  ;;  %v4354_v57 = vpop.f32.mrb[191].mxu0  ;;  %v4955_v27 = vmax.f32 %v4783_v5, 0.0 }
 0x3e5   : > { %v4778_v60 = vadd.f32 %v9212_v31, %v4777_v47  ;;  %v4953_v12 = vmax.f32 %v4775_v2, 0.0 }
 0x3e6   : > { %v4956_v24 = vmax.f32 %v4786_v26, 0.0 }
 0x3e7   : > { %v4954_v29 = vmax.f32 %v4778_v60, 0.0 }
 0x3e8   : > { %v6451_v38 = vpack.c.bf16 %v4956_v24, %v4955_v27 }
 0x3e9   : > { %v6446_v34 = vpack.c.bf16 %v4954_v29, %v4953_v12  ;;  %v6724_v49 = vpop.f32.mrb[48].mxu1  ;;  %v4357_v17 = vpop.f32.mrb[192].mxu0 }
 0x3ea   : > { %6545 = vst [vmem:[%s8984_s13 + $0x158] sm:$0xff] %v6451_v38   ;;  %v4799_v11 = vadd.f32 %v9250_v20, %v6724_v49  ;;  %v4790_v23 = vpop.f32.mrb[49].mxu1  ;;  %v6967_v31 = vadd.f32 %v6966_v8, %v4357_v17  ;;  %v4359_v15 = vpop.f32.mrb[193].mxu0 }
 0x3eb   : > { %6544 = vst [vmem:[%s8984_s13 + $0x150] sm:$0xff] %v6446_v34   ;;  %v4791_v33 = vadd.f32 %v9236_v21, %v4790_v23  ;;  %v6725_v61 = vpop.f32.mrb[50].mxu1  ;;  %v4360_v37 = vpop.f32.mrb[194].mxu0  ;;  %v9461_v15 = vld [vmem:[#allocation57_spill] sm:$0xff] }
 0x3ec   : > { %v4802_v42 = vadd.f32 %v9254_v53, %v6725_v61  ;;  %v4793_v43 = vpop.f32.mrb[51].mxu1  ;;  %v6969_v36 = vadd.f32 %v6968_v48, %v4360_v37  ;;  %v4362_v28 = vpop.f32.mrb[195].mxu0  ;;  %v4959_v56 = vmax.f32 %v4799_v11, 0.0 }
 0x3ed   : > { %v4794_v20 = vadd.f32 %v9240_v3, %v4793_v43  ;;  %v4957_v19 = vmax.f32 %v4791_v33, 0.0  ;;  %v6978_v33 = vadd.f32 %v9302_v30, %v9461_v15  ;;  %v9462_v43 = vld [vmem:[#allocation58_spill] sm:$0xff] }
 0x3ee   : > { %v4960_v6 = vmax.f32 %v4802_v42, 0.0  ;;  %v6980_v28 = vadd.f32 %v9302_v30, %v9462_v43 }
 0x3ef   : > { %v4958_v41 = vmax.f32 %v4794_v20, 0.0 }
 0x3f0   : > { %v6461_v18 = vpack.c.bf16 %v4960_v6, %v4959_v56 }
 0x3f1   : > { %v6456_v21 = vpack.c.bf16 %v4958_v41, %v4957_v19  ;;  %v6728_v39 = vpop.f32.mrb[52].mxu1  ;;  %v4365_v52 = vpop.f32.mrb[196].mxu0 }
 0x3f2   : > { %6547 = vst [vmem:[%s8984_s13 + $0x168] sm:$0xff] %v6461_v18   ;;  %v4815_v13 = vadd.f32 %v6963_v9, %v6728_v39  ;;  %v4806_v53 = vpop.f32.mrb[53].mxu1  ;;  %v6971_v16 = vadd.f32 %v6970_v51, %v4365_v52  ;;  %v4367_v3 = vpop.f32.mrb[197].mxu0 }
 0x3f3   : > { %6546 = vst [vmem:[%s8984_s13 + $0x160] sm:$0xff] %v6456_v21   ;;  %v4807_v10 = vadd.f32 %v9264_v25, %v4806_v53  ;;  %v6729_v4 = vpop.f32.mrb[54].mxu1  ;;  %v4368_v45 = vpop.f32.mrb[198].mxu0  ;;  %v9459_v25 = vld [vmem:[#allocation53_spill] sm:$0xff]  ;;  %v9463_v53 = vld [vmem:[#allocation60_spill] sm:$0xff] }
 0x3f4   : > { %v4818_v46 = vadd.f32 %v6965_v0, %v6729_v4  ;;  %v4809_v62 = vpop.f32.mrb[55].mxu1  ;;  %v6973_v54 = vadd.f32 %v6972_v50, %v4368_v45  ;;  %v4370_v63 = vpop.f32.mrb[199].mxu0  ;;  %v4963_v35 = vmax.f32 %v4815_v13, 0.0  ;;  %v6974_v2 = vadd.f32 %v9302_v30, %v9459_v25 }
 0x3f5   : > { %v4810_v5 = vadd.f32 %v9268_v32, %v4809_v62  ;;  %v4961_v59 = vmax.f32 %v4807_v10, 0.0  ;;  %v9460_v32 = vld [vmem:[#allocation55_spill] sm:$0xff]  ;;  %v6982_v55 = vadd.f32 %v9302_v30, %v9463_v53 }
 0x3f6   : > { %v4964_v22 = vmax.f32 %v4818_v46, 0.0  ;;  %v6976_v57 = vadd.f32 %v9302_v30, %v9460_v32  ;;  %v9464_v46 = vld [vmem:[#allocation62_spill] sm:$0xff]  ;;  %v9466_v32 = vld [vmem:[#allocation64_spill] sm:$0xff] }
 0x3f7   : > { %v4962_v9 = vmax.f32 %v4810_v5, 0.0  ;;  %v6984_v62 = vadd.f32 %v9302_v30, %v9464_v46 }
 0x3f8   : > { %v6471_v44 = vpack.c.bf16 %v4964_v22, %v4963_v35 }
 0x3f9   : > { %v6466_v7 = vpack.c.bf16 %v4962_v9, %v4961_v59  ;;  %v6732_v40 = vpop.f32.mrb[56].mxu1  ;;  %v4373_v26 = vpop.f32.mrb[200].mxu0 }
 0x3fa   : > { %6549 = vst [vmem:[%s8984_s13 + $0x178] sm:$0xff] %v6471_v44   ;;  %v4831_v47 = vadd.f32 %v6971_v16, %v6732_v40  ;;  %v4822_v0 = vpop.f32.mrb[57].mxu1  ;;  %v6975_v60 = vadd.f32 %v6974_v2, %v4373_v26  ;;  %v4375_v27 = vpop.f32.mrb[201].mxu0 }
 0x3fb   : > { %6548 = vst [vmem:[%s8984_s13 + $0x170] sm:$0xff] %v6466_v7   ;;  %v4823_v24 = vadd.f32 %v6967_v31, %v4822_v0  ;;  %v6733_v12 = vpop.f32.mrb[58].mxu1  ;;  %v4376_v29 = vpop.f32.mrb[202].mxu0  ;;  %v9465_v7 = vld [vmem:[#allocation2_spill] sm:$0xff] }
 0x3fc   : > { %v4834_v38 = vadd.f32 %v6973_v54, %v6733_v12  ;;  %v4825_v58 = vpop.f32.mrb[59].mxu1  ;;  %v6977_v8 = vadd.f32 %v6976_v57, %v4376_v29  ;;  %v4378_v34 = vpop.f32.mrb[203].mxu0  ;;  %v4967_v17 = vmax.f32 %v4831_v47, 0.0  ;;  %v6986_v40 = vadd.f32 %v9302_v30, %v9465_v7 }
 0x3fd   : > { %v4826_v49 = vadd.f32 %v6969_v36, %v4825_v58  ;;  %v4965_v23 = vmax.f32 %v4823_v24, 0.0  ;;  %v6988_v57 = vadd.f32 %v9302_v30, %v9466_v32 }
 0x3fe   : > { %v4968_v11 = vmax.f32 %v4834_v38, 0.0 }
 0x3ff   : > { %v4966_v1 = vmax.f32 %v4826_v49, 0.0 }
 0x400   : > { %v6481_v48 = vpack.c.bf16 %v4968_v11, %v4967_v17 }
 0x401   : > { %v6476_v61 = vpack.c.bf16 %v4966_v1, %v4965_v23  ;;  %v6736_v37 = vpop.f32.mrb[60].mxu1  ;;  %v4381_v31 = vpop.f32.mrb[204].mxu0 }
 0x402   : > { %6551 = vst [vmem:[%s8984_s13 + $0x188] sm:$0xff] %v6481_v48   ;;  %v4838_v42 = vpop.f32.mrb[61].mxu1  ;;  %v6979_v20 = vadd.f32 %v6978_v33, %v4381_v31  ;;  %v4383_v56 = vpop.f32.mrb[205].mxu0 }
 0x403   : > { %6550 = vst [vmem:[%s8984_s13 + $0x180] sm:$0xff] %v6476_v61   ;;  %v4839_v36 = vadd.f32 %v6975_v60, %v4838_v42  ;;  %v6737_v6 = vpop.f32.mrb[62].mxu1  ;;  %v4384_v19 = vpop.f32.mrb[206].mxu0 }
 0x404   : > { %v4841_v41 = vpop.f32.mrb[63].mxu1  ;;  %v4847_v18 = vadd.f32 %v6979_v20, %v6736_v37  ;;  %v6981_v14 = vadd.f32 %v6980_v28, %v4384_v19  ;;  %v4386_v51 = vpop.f32.mrb[207].mxu0 }
 0x405   : > { %v4842_v21 = vadd.f32 %v6977_v8, %v4841_v41  ;;  %v4969_v39 = vmax.f32 %v4839_v36, 0.0 }
 0x406   : > { %v4850_v52 = vadd.f32 %v6981_v14, %v6737_v6  ;;  %v4971_v50 = vmax.f32 %v4847_v18, 0.0 }
 0x407   : > { %v4970_v13 = vmax.f32 %v4842_v21, 0.0 }
 0x408   : > { %v4972_v16 = vmax.f32 %v4850_v52, 0.0 }
 0x409   : > { %v6486_v3 = vpack.c.bf16 %v4970_v13, %v4969_v39  ;;  %v6740_v10 = vpop.f32.mrb[64].mxu1  ;;  %v4389_v4 = vpop.f32.mrb[208].mxu0 }
 0x40a   : > { %v4854_v45 = vpop.f32.mrb[65].mxu1  ;;  %v6491_v54 = vpack.c.bf16 %v4972_v16, %v4971_v50  ;;  %v6983_v63 = vadd.f32 %v6982_v55, %v4389_v4  ;;  %v4391_v5 = vpop.f32.mrb[209].mxu0 }
 0x40b   : > { %6552 = vst [vmem:[%s8984_s13 + $0x190] sm:$0xff] %v6486_v3   ;;  %v6741_v35 = vpop.f32.mrb[66].mxu1  ;;  %v4392_v22 = vpop.f32.mrb[210].mxu0 }
 0x40c   : > { %v4857_v59 = vpop.f32.mrb[67].mxu1  ;;  %6553 = vst [vmem:[%s8984_s13 + $0x198] sm:$0xff] %v6491_v54   ;;  %v6985_v9 = vadd.f32 %v6984_v62, %v4392_v22  ;;  %v4855_v44 = vadd.f32 %v6983_v63, %v4854_v45  ;;  %v4394_v25 = vpop.f32.mrb[211].mxu0 }
 0x40e   : > { %v4858_v2 = vadd.f32 %v6985_v9, %v4857_v59  ;;  %v4973_v26 = vmax.f32 %v4855_v44, 0.0 }
 0x410   : > { %v4974_v47 = vmax.f32 %v4858_v2, 0.0 }
 0x411   : > { %v4397_v0 = vpop.f32.mrb[212].mxu0 }
 0x412   : > { %v6496_v60 = vpack.c.bf16 %v4974_v47, %v4973_v26  ;;  %v6987_v27 = vadd.f32 %v6986_v40, %v4397_v0  ;;  %v4399_v24 = vpop.f32.mrb[213].mxu0 }
 0x413   : > { %v4400_v12 = vpop.f32.mrb[214].mxu0 }
 0x414   : > { %6554 = vst [vmem:[%s8984_s13 + $0x1a0] sm:$0xff] %v6496_v60   ;;  %v4863_v29 = vadd.f32 %v6987_v27, %v6740_v10  ;;  %v6989_v38 = vadd.f32 %v6988_v57, %v4400_v12  ;;  %v4402_v58 = vpop.f32.mrb[215].mxu0 }
 0x416   : > { %v4866_v8 = vadd.f32 %v6989_v38, %v6741_v35  ;;  %v4975_v34 = vmax.f32 %v4863_v29, 0.0 }
 0x418   : > { %v4976_v49 = vmax.f32 %v4866_v8, 0.0 }
 0x41a   : > { %v6501_v17 = vpack.c.bf16 %v4976_v49, %v4975_v34 }
 0x41c   : > { %6555 = vst [vmem:[%s8984_s13 + $0x1a8] sm:$0xff] %v6501_v17  }
 0x41d PF: > { %s13_s12 = sadd.s32 1, %s7820_s12  }
 0x41e   : > { %p10_p4 = scmp.ge.s32.totalorder %s13_s12, 6  }
 0x420   :  { %12 = sbr.rel (!%p10_p4) target bundleno = 1 (0x1), region = 62 }

// kernel: voxnet_forward.6
= control target key start
LH: loop header
LB: loop body
LE: loop exit
PB: predicated region body
PF: predicated region fallthrough
CT: control target
= control target key end

     0   :  { %s1202_s27 = smov 0   ;;  %s1499_s0 = inlined_call_operand.vmem [shape: bf16[432,128], index: 0, kind: input, shape index: {}]   ;;  %s1500_s1 = inlined_call_operand.vmem [shape: bf16[432,128], index: 1, kind: input, shape index: {}]   ;;  %s1501_s2 = inlined_call_operand.vmem [shape: bf16[432,128], index: 2, kind: input, shape index: {}]   ;;  %s1502_s3 = inlined_call_operand.vmem [shape: bf16[432,128], index: 3, kind: input, shape index: {}]   ;;  %s1503_s4 = inlined_call_operand.vmem [shape: bf16[432,128], index: 4, kind: input, shape index: {}]   ;;  %s1504_s5 = inlined_call_operand.vmem [shape: bf16[432,128], index: 5, kind: input, shape index: {}]   ;;  %s1505_s6 = inlined_call_operand.vmem [shape: bf16[432,128], index: 6, kind: input, shape index: {}]   ;;  %s1506_s7 = inlined_call_operand.vmem [shape: bf16[432,128], index: 7, kind: input, shape index: {}]   ;;  %s1507_s8 = inlined_call_operand.vmem [shape: bf16[432,128], index: 8, kind: output, shape index: {}]  }
   0x1 LB: > { %s1035_s28 = sadd.s32 4294967295, %s1155_s27   ;;  %p1039_p0 = scmp.ge.s32.totalorder %s1155_s27, 1  ;;  %s1155_s27 = sphi %s1202_s27, %s18_s27  }
   0x2   : > { %p340_p1 = scmp.lt.s32.totalorder %s1155_s27, 3 }
   0x4   : > { %p341_p2 = pnand %p1039_p0, %p340_p1 }
   0x5   : > { %s409_s29 = smul.u32 (!%p341_p2), 27, %s1035_s28 }
   0x6   : > { %344 = sbr.rel (%p341_p2) target bundleno = 103 (0x67), region = 52 }
   0x7   : > { %p410_p3 = scmp.lt.s32.totalorder (!%p341_p2), %s409_s29, 53 }
   0xd   : > { %s1509_s29 = smov (!%p410_p3, %s409_s29), 53 }
   0xe   : > { %s1210_s30 = sshll.u32 %s1509_s29, 2 }
   0xf   : > { %s1216_s11 = scalar_lea.vmem %s1499_s0, %s1210_s30  ;;  %s1222_s14 = scalar_lea.vmem %s1500_s1, %s1210_s30 }
  0x10   : > { %s1228_s17 = scalar_lea.vmem %s1501_s2, %s1210_s30  ;;  %s1234_s20 = scalar_lea.vmem %s1502_s3, %s1210_s30  ;;  %v463_v0 = vld [vmem:[%s1216_s11] sm:$0xf]  ;;  %v464_v1 = vld [vmem:[%s1216_s11 + $0x4] sm:$0xf]  ;;  %v465_v17 = vld [vmem:[%s1216_s11 + $0x8] sm:$0xf] }
  0x11   : > { %v490_v2 = vld [vmem:[%s1222_s14] sm:$0xf]  ;;  %s1243_s23 = scalar_lea.vmem %s1503_s4, %s1210_s30  ;;  %s1249_s26 = scalar_lea.vmem %s1504_s5, %s1210_s30  ;;  %v491_v3 = vld [vmem:[%s1222_s14 + $0x4] sm:$0xf]  ;;  %v466_v18 = vld [vmem:[%s1216_s11 + $0xc] sm:$0xf] }
  0x12   : > { %v517_v4 = vmax.bf16 %v490_v2, %v463_v0  ;;  %v544_v5 = vld [vmem:[%s1228_s17] sm:$0xf]  ;;  %v545_v6 = vld [vmem:[%s1228_s17 + $0x4] sm:$0xf]  ;;  %v518_v7 = vmax.bf16 %v491_v3, %v464_v1  ;;  %s1260_s9 = scalar_lea.vmem %s1505_s6, %s1210_s30  ;;  %s1269_s13 = scalar_lea.vmem %s1506_s7, %s1210_s30  ;;  %v492_v20 = vld [vmem:[%s1222_s14 + $0x8] sm:$0xf] }
  0x13   : > { %v598_v8 = vld [vmem:[%s1234_s20] sm:$0xf]  ;;  %v599_v10 = vld [vmem:[%s1234_s20 + $0x4] sm:$0xf]  ;;  %v493_v21 = vld [vmem:[%s1222_s14 + $0xc] sm:$0xf]  ;;  %v519_v26 = vmax.bf16 %v492_v20, %v465_v17  ;;  %s1305_s18 = scalar_lea.vmem %s1507_s8, %s1210_s30 }
  0x14   : > { %v571_v9 = vmax.bf16 %v544_v5, %v517_v4  ;;  %v572_v11 = vmax.bf16 %v545_v6, %v518_v7  ;;  %v652_v12 = vld [vmem:[%s1243_s23] sm:$0xf]  ;;  %v653_v13 = vld [vmem:[%s1243_s23 + $0x4] sm:$0xf]  ;;  %v546_v22 = vld [vmem:[%s1228_s17 + $0x8] sm:$0xf]  ;;  %v520_v27 = vmax.bf16 %v493_v21, %v466_v18 }
  0x15   : > { %v706_v14 = vld [vmem:[%s1249_s26] sm:$0xf]  ;;  %v707_v16 = vld [vmem:[%s1249_s26 + $0x4] sm:$0xf]  ;;  %v547_v28 = vld [vmem:[%s1228_s17 + $0xc] sm:$0xf]  ;;  %v573_v35 = vmax.bf16 %v546_v22, %v519_v26 }
  0x16   : > { %v625_v15 = vmax.bf16 %v598_v8, %v571_v9  ;;  %v626_v19 = vmax.bf16 %v599_v10, %v572_v11  ;;  %v760_v24 = vld [vmem:[%s1260_s9] sm:$0xf]  ;;  %v761_v25 = vld [vmem:[%s1260_s9 + $0x4] sm:$0xf]  ;;  %v600_v31 = vld [vmem:[%s1234_s20 + $0x8] sm:$0xf]  ;;  %v574_v36 = vmax.bf16 %v547_v28, %v520_v27 }
  0x17   : > { %v814_v30 = vld [vmem:[%s1269_s13] sm:$0xf]  ;;  %v601_v32 = vld [vmem:[%s1234_s20 + $0xc] sm:$0xf]  ;;  %v815_v34 = vld [vmem:[%s1269_s13 + $0x4] sm:$0xf]  ;;  %v627_v44 = vmax.bf16 %v600_v31, %v573_v35 }
  0x18   : > { %v679_v23 = vmax.bf16 %v652_v12, %v625_v15  ;;  %v680_v29 = vmax.bf16 %v653_v13, %v626_v19  ;;  %v654_v37 = vld [vmem:[%s1243_s23 + $0x8] sm:$0xf]  ;;  %v655_v38 = vld [vmem:[%s1243_s23 + $0xc] sm:$0xf]  ;;  %v467_v42 = vld [vmem:[%s1216_s11 + $0x10] sm:$0xf]  ;;  %v628_v45 = vmax.bf16 %v601_v32, %v574_v36 }
  0x19   : > { %v708_v40 = vld [vmem:[%s1249_s26 + $0x8] sm:$0xf]  ;;  %v709_v41 = vld [vmem:[%s1249_s26 + $0xc] sm:$0xf]  ;;  %v468_v46 = vld [vmem:[%s1216_s11 + $0x14] sm:$0xf]  ;;  %v681_v56 = vmax.bf16 %v654_v37, %v627_v44 }
  0x1a   : > { %v733_v33 = vmax.bf16 %v706_v14, %v679_v23  ;;  %v734_v39 = vmax.bf16 %v707_v16, %v680_v29  ;;  %v494_v47 = vld [vmem:[%s1222_s14 + $0x10] sm:$0xf]  ;;  %v495_v48 = vld [vmem:[%s1222_s14 + $0x14] sm:$0xf]  ;;  %v762_v50 = vld [vmem:[%s1260_s9 + $0x8] sm:$0xf]  ;;  %v682_v57 = vmax.bf16 %v655_v38, %v628_v45 }
  0x1b   : > { %v521_v51 = vmax.bf16 %v494_v47, %v467_v42  ;;  %v522_v52 = vmax.bf16 %v495_v48, %v468_v46  ;;  %v548_v53 = vld [vmem:[%s1228_s17 + $0x10] sm:$0xf]  ;;  %v549_v54 = vld [vmem:[%s1228_s17 + $0x14] sm:$0xf]  ;;  %v763_v58 = vld [vmem:[%s1260_s9 + $0xc] sm:$0xf]  ;;  %v735_v3 = vmax.bf16 %v708_v40, %v681_v56 }
  0x1c   : > { %v787_v43 = vmax.bf16 %v760_v24, %v733_v33  ;;  %v788_v49 = vmax.bf16 %v761_v25, %v734_v39  ;;  %v602_v59 = vld [vmem:[%s1234_s20 + $0x10] sm:$0xf]  ;;  %v603_v60 = vld [vmem:[%s1234_s20 + $0x14] sm:$0xf]  ;;  %v816_v62 = vld [vmem:[%s1269_s13 + $0x8] sm:$0xf]  ;;  %v736_v4 = vmax.bf16 %v709_v41, %v682_v57 }
  0x1d   : > { %v817_v63 = vld [vmem:[%s1269_s13 + $0xc] sm:$0xf]  ;;  %v575_v0 = vmax.bf16 %v548_v53, %v521_v51  ;;  %v576_v1 = vmax.bf16 %v549_v54, %v522_v52  ;;  %v656_v2 = vld [vmem:[%s1243_s23 + $0x10] sm:$0xf]  ;;  %v657_v5 = vld [vmem:[%s1243_s23 + $0x14] sm:$0xf]  ;;  %v789_v14 = vmax.bf16 %v762_v50, %v735_v3 }
  0x1e   : > { %v841_v55 = vmax.bf16 %v814_v30, %v787_v43  ;;  %v842_v61 = vmax.bf16 %v815_v34, %v788_v49  ;;  %v710_v6 = vld [vmem:[%s1249_s26 + $0x10] sm:$0xf]  ;;  %v711_v7 = vld [vmem:[%s1249_s26 + $0x14] sm:$0xf]  ;;  %v469_v11 = vld [vmem:[%s1216_s11 + $0x18] sm:$0xf]  ;;  %v790_v15 = vmax.bf16 %v763_v58, %v736_v4 }
  0x1f   : > { %v629_v9 = vmax.bf16 %v602_v59, %v575_v0  ;;  %v630_v10 = vmax.bf16 %v603_v60, %v576_v1  ;;  %v470_v12 = vld [vmem:[%s1216_s11 + $0x1c] sm:$0xf]  ;;  %v496_v13 = vld [vmem:[%s1222_s14 + $0x18] sm:$0xf]  ;;  %v764_v22 = vld [vmem:[%s1260_s9 + $0x10] sm:$0xf]  ;;  %v843_v26 = vmax.bf16 %v816_v62, %v789_v14 }
  0x20   : > { %v1116_v8 = vcombine.low %v841_v55, %v842_v61  ;;  %v497_v16 = vld [vmem:[%s1222_s14 + $0x1c] sm:$0xf]  ;;  %v523_v17 = vmax.bf16 %v496_v13, %v469_v11  ;;  %v550_v18 = vld [vmem:[%s1228_s17 + $0x18] sm:$0xf]  ;;  %v765_v23 = vld [vmem:[%s1260_s9 + $0x14] sm:$0xf]  ;;  %v844_v27 = vmax.bf16 %v817_v63, %v790_v15 }
  0x21   : > { %v551_v19 = vld [vmem:[%s1228_s17 + $0x1c] sm:$0xf]  ;;  %v683_v20 = vmax.bf16 %v656_v2, %v629_v9  ;;  %v684_v21 = vmax.bf16 %v657_v5, %v630_v10  ;;  %v524_v24 = vmax.bf16 %v497_v16, %v470_v12  ;;  %v604_v25 = vld [vmem:[%s1234_s20 + $0x18] sm:$0xf]  ;;  %v818_v28 = vld [vmem:[%s1269_s13 + $0x10] sm:$0xf] }
  0x22   : > { %1055 = vst [vmem:[%s1305_s18] sm:$0xff] %v1116_v8   ;;  %v819_v29 = vld [vmem:[%s1269_s13 + $0x14] sm:$0xf]  ;;  %v577_v30 = vmax.bf16 %v550_v18, %v523_v17  ;;  %v605_v31 = vld [vmem:[%s1234_s20 + $0x1c] sm:$0xf]  ;;  %v658_v35 = vld [vmem:[%s1243_s23 + $0x18] sm:$0xf]  ;;  %v1117_v38 = vcombine.low %v843_v26, %v844_v27 }
  0x23   : > { %v737_v32 = vmax.bf16 %v710_v6, %v683_v20  ;;  %v738_v33 = vmax.bf16 %v711_v7, %v684_v21  ;;  %v578_v34 = vmax.bf16 %v551_v19, %v524_v24  ;;  %v659_v36 = vld [vmem:[%s1243_s23 + $0x1c] sm:$0xf]  ;;  %v712_v37 = vld [vmem:[%s1249_s26 + $0x18] sm:$0xf]  ;;  %v471_v41 = vld [vmem:[%s1216_s11 + $0x20] sm:$0xf] }
  0x24   : > { %v631_v39 = vmax.bf16 %v604_v25, %v577_v30  ;;  %v713_v40 = vld [vmem:[%s1249_s26 + $0x1c] sm:$0xf]  ;;  %v472_v42 = vld [vmem:[%s1216_s11 + $0x24] sm:$0xf]  ;;  %v498_v46 = vld [vmem:[%s1222_s14 + $0x20] sm:$0xf] }
  0x25   : > { %v791_v43 = vmax.bf16 %v764_v22, %v737_v32  ;;  %v792_v44 = vmax.bf16 %v765_v23, %v738_v33  ;;  %v632_v45 = vmax.bf16 %v605_v31, %v578_v34  ;;  %v499_v47 = vld [vmem:[%s1222_s14 + $0x24] sm:$0xf]  ;;  %v552_v48 = vld [vmem:[%s1228_s17 + $0x20] sm:$0xf]  ;;  %1118 = vst [vmem:[%s1305_s18 + $0x8] sm:$0xff] %v1117_v38   ;;  %v525_v52 = vmax.bf16 %v498_v46, %v471_v41 }
  0x26   : > { %v685_v49 = vmax.bf16 %v658_v35, %v631_v39  ;;  %v766_v50 = vld [vmem:[%s1260_s9 + $0x18] sm:$0xf]  ;;  %v767_v51 = vld [vmem:[%s1260_s9 + $0x1c] sm:$0xf]  ;;  %v526_v53 = vmax.bf16 %v499_v47, %v472_v42  ;;  %v553_v54 = vld [vmem:[%s1228_s17 + $0x24] sm:$0xf] }
  0x27   : > { %v845_v55 = vmax.bf16 %v818_v28, %v791_v43  ;;  %v846_v56 = vmax.bf16 %v819_v29, %v792_v44  ;;  %v686_v57 = vmax.bf16 %v659_v36, %v632_v45  ;;  %v820_v58 = vld [vmem:[%s1269_s13 + $0x18] sm:$0xf]  ;;  %v606_v59 = vld [vmem:[%s1234_s20 + $0x20] sm:$0xf]  ;;  %v607_v60 = vld [vmem:[%s1234_s20 + $0x24] sm:$0xf]  ;;  %v579_v63 = vmax.bf16 %v552_v48, %v525_v52 }
  0x28   : > { %v739_v61 = vmax.bf16 %v712_v37, %v685_v49  ;;  %v821_v62 = vld [vmem:[%s1269_s13 + $0x1c] sm:$0xf]  ;;  %v580_v0 = vmax.bf16 %v553_v54, %v526_v53  ;;  %v660_v1 = vld [vmem:[%s1243_s23 + $0x20] sm:$0xf]  ;;  %v661_v2 = vld [vmem:[%s1243_s23 + $0x24] sm:$0xf] }
  0x29   : > { %v1119_v3 = vcombine.low %v845_v55, %v846_v56  ;;  %v740_v4 = vmax.bf16 %v713_v40, %v686_v57  ;;  %v714_v5 = vld [vmem:[%s1249_s26 + $0x20] sm:$0xf]  ;;  %v715_v6 = vld [vmem:[%s1249_s26 + $0x24] sm:$0xf]  ;;  %v473_v7 = vld [vmem:[%s1216_s11 + $0x28] sm:$0xf]  ;;  %v633_v9 = vmax.bf16 %v606_v59, %v579_v63 }
  0x2a   : > { %v793_v8 = vmax.bf16 %v766_v50, %v739_v61  ;;  %v634_v10 = vmax.bf16 %v607_v60, %v580_v0  ;;  %v474_v11 = vld [vmem:[%s1216_s11 + $0x2c] sm:$0xf]  ;;  %v500_v12 = vld [vmem:[%s1222_s14 + $0x28] sm:$0xf]  ;;  %v768_v15 = vld [vmem:[%s1260_s9 + $0x20] sm:$0xf] }
  0x2b   : > { %v501_v13 = vld [vmem:[%s1222_s14 + $0x2c] sm:$0xf]  ;;  %1120 = vst [vmem:[%s1305_s18 + $0x10] sm:$0xff] %v1119_v3   ;;  %v794_v14 = vmax.bf16 %v767_v51, %v740_v4  ;;  %v527_v16 = vmax.bf16 %v500_v12, %v473_v7  ;;  %v554_v18 = vld [vmem:[%s1228_s17 + $0x28] sm:$0xf]  ;;  %v687_v21 = vmax.bf16 %v660_v1, %v633_v9 }
  0x2c   : > { %v528_v17 = vmax.bf16 %v501_v13, %v474_v11  ;;  %v555_v19 = vld [vmem:[%s1228_s17 + $0x2c] sm:$0xf]  ;;  %v847_v20 = vmax.bf16 %v820_v58, %v793_v8  ;;  %v688_v22 = vmax.bf16 %v661_v2, %v634_v10  ;;  %v769_v23 = vld [vmem:[%s1260_s9 + $0x24] sm:$0xf]  ;;  %v608_v24 = vld [vmem:[%s1234_s20 + $0x28] sm:$0xf] }
  0x2d   : > { %v609_v25 = vld [vmem:[%s1234_s20 + $0x2c] sm:$0xf]  ;;  %v848_v26 = vmax.bf16 %v821_v62, %v794_v14  ;;  %v822_v27 = vld [vmem:[%s1269_s13 + $0x20] sm:$0xf]  ;;  %v823_v28 = vld [vmem:[%s1269_s13 + $0x24] sm:$0xf]  ;;  %v581_v29 = vmax.bf16 %v554_v18, %v527_v16  ;;  %v741_v32 = vmax.bf16 %v714_v5, %v687_v21 }
  0x2e   : > { %v582_v30 = vmax.bf16 %v555_v19, %v528_v17  ;;  %v662_v31 = vld [vmem:[%s1243_s23 + $0x28] sm:$0xf]  ;;  %v742_v33 = vmax.bf16 %v715_v6, %v688_v22  ;;  %v663_v34 = vld [vmem:[%s1243_s23 + $0x2c] sm:$0xf]  ;;  %v475_v40 = vld [vmem:[%s1216_s11 + $0x30] sm:$0xf] }
  0x2f   : > { %v716_v35 = vld [vmem:[%s1249_s26 + $0x28] sm:$0xf]  ;;  %v717_v36 = vld [vmem:[%s1249_s26 + $0x2c] sm:$0xf]  ;;  %v1121_v37 = vcombine.low %v847_v20, %v848_v26  ;;  %v635_v38 = vmax.bf16 %v608_v24, %v581_v29  ;;  %v476_v41 = vld [vmem:[%s1216_s11 + $0x34] sm:$0xf]  ;;  %v795_v43 = vmax.bf16 %v768_v15, %v741_v32 }
  0x30   : > { %v636_v39 = vmax.bf16 %v609_v25, %v582_v30  ;;  %v502_v42 = vld [vmem:[%s1222_s14 + $0x30] sm:$0xf]  ;;  %v796_v44 = vmax.bf16 %v769_v23, %v742_v33  ;;  %v503_v45 = vld [vmem:[%s1222_s14 + $0x34] sm:$0xf]  ;;  %v770_v51 = vld [vmem:[%s1260_s9 + $0x28] sm:$0xf] }
  0x31   : > { %v529_v46 = vmax.bf16 %v502_v42, %v475_v40  ;;  %v556_v47 = vld [vmem:[%s1228_s17 + $0x30] sm:$0xf]  ;;  %v557_v48 = vld [vmem:[%s1228_s17 + $0x34] sm:$0xf]  ;;  %1122 = vst [vmem:[%s1305_s18 + $0x18] sm:$0xff] %v1121_v37   ;;  %v689_v49 = vmax.bf16 %v662_v31, %v635_v38  ;;  %v530_v53 = vmax.bf16 %v503_v45, %v476_v41  ;;  %v849_v55 = vmax.bf16 %v822_v27, %v795_v43 }
  0x32   : > { %v690_v50 = vmax.bf16 %v663_v34, %v636_v39  ;;  %v771_v52 = vld [vmem:[%s1260_s9 + $0x2c] sm:$0xf]  ;;  %v610_v54 = vld [vmem:[%s1234_s20 + $0x30] sm:$0xf]  ;;  %v850_v56 = vmax.bf16 %v823_v28, %v796_v44  ;;  %v824_v57 = vld [vmem:[%s1269_s13 + $0x28] sm:$0xf] }
  0x33   : > { %v825_v58 = vld [vmem:[%s1269_s13 + $0x2c] sm:$0xf]  ;;  %v583_v59 = vmax.bf16 %v556_v47, %v529_v46  ;;  %v611_v60 = vld [vmem:[%s1234_s20 + $0x34] sm:$0xf]  ;;  %v743_v61 = vmax.bf16 %v716_v35, %v689_v49  ;;  %v584_v63 = vmax.bf16 %v557_v48, %v530_v53  ;;  %v664_v0 = vld [vmem:[%s1243_s23 + $0x30] sm:$0xf] }
  0x34   : > { %v744_v62 = vmax.bf16 %v717_v36, %v690_v50  ;;  %v665_v1 = vld [vmem:[%s1243_s23 + $0x34] sm:$0xf]  ;;  %v718_v2 = vld [vmem:[%s1249_s26 + $0x30] sm:$0xf]  ;;  %v1123_v3 = vcombine.low %v849_v55, %v850_v56  ;;  %v477_v6 = vld [vmem:[%s1216_s11 + $0x38] sm:$0xf] }
  0x35   : > { %v637_v4 = vmax.bf16 %v610_v54, %v583_v59  ;;  %v719_v5 = vld [vmem:[%s1249_s26 + $0x34] sm:$0xf]  ;;  %v478_v7 = vld [vmem:[%s1216_s11 + $0x3c] sm:$0xf]  ;;  %v797_v8 = vmax.bf16 %v770_v51, %v743_v61  ;;  %v638_v10 = vmax.bf16 %v611_v60, %v584_v63  ;;  %v504_v11 = vld [vmem:[%s1222_s14 + $0x38] sm:$0xf] }
  0x36   : > { %v798_v9 = vmax.bf16 %v771_v52, %v744_v62  ;;  %v505_v12 = vld [vmem:[%s1222_s14 + $0x3c] sm:$0xf]  ;;  %v558_v13 = vld [vmem:[%s1228_s17 + $0x38] sm:$0xf]  ;;  %1124 = vst [vmem:[%s1305_s18 + $0x20] sm:$0xff] %v1123_v3   ;;  %v531_v17 = vmax.bf16 %v504_v11, %v477_v6 }
  0x37   : > { %v691_v14 = vmax.bf16 %v664_v0, %v637_v4  ;;  %v772_v15 = vld [vmem:[%s1260_s9 + $0x30] sm:$0xf]  ;;  %v773_v16 = vld [vmem:[%s1260_s9 + $0x34] sm:$0xf]  ;;  %v532_v18 = vmax.bf16 %v505_v12, %v478_v7  ;;  %v559_v19 = vld [vmem:[%s1228_s17 + $0x3c] sm:$0xf]  ;;  %v851_v20 = vmax.bf16 %v824_v57, %v797_v8  ;;  %v692_v22 = vmax.bf16 %v665_v1, %v638_v10 }
  0x38   : > { %v852_v21 = vmax.bf16 %v825_v58, %v798_v9  ;;  %v826_v23 = vld [vmem:[%s1269_s13 + $0x30] sm:$0xf]  ;;  %v612_v24 = vld [vmem:[%s1234_s20 + $0x38] sm:$0xf]  ;;  %v613_v25 = vld [vmem:[%s1234_s20 + $0x3c] sm:$0xf]  ;;  %v585_v28 = vmax.bf16 %v558_v13, %v531_v17 }
  0x39   : > { %v745_v26 = vmax.bf16 %v718_v2, %v691_v14  ;;  %v827_v27 = vld [vmem:[%s1269_s13 + $0x34] sm:$0xf]  ;;  %v586_v29 = vmax.bf16 %v559_v19, %v532_v18  ;;  %v666_v30 = vld [vmem:[%s1243_s23 + $0x38] sm:$0xf]  ;;  %v667_v31 = vld [vmem:[%s1243_s23 + $0x3c] sm:$0xf]  ;;  %v746_v33 = vmax.bf16 %v719_v5, %v692_v22 }
  0x3a   : > { %v1125_v32 = vcombine.low %v851_v20, %v852_v21  ;;  %v720_v34 = vld [vmem:[%s1249_s26 + $0x38] sm:$0xf]  ;;  %v721_v35 = vld [vmem:[%s1249_s26 + $0x3c] sm:$0xf]  ;;  %v479_v36 = vld [vmem:[%s1216_s11 + $0x40] sm:$0xf]  ;;  %v639_v38 = vmax.bf16 %v612_v24, %v585_v28 }
  0x3b   : > { %v799_v37 = vmax.bf16 %v772_v15, %v745_v26  ;;  %v640_v39 = vmax.bf16 %v613_v25, %v586_v29  ;;  %v480_v40 = vld [vmem:[%s1216_s11 + $0x44] sm:$0xf]  ;;  %v506_v41 = vld [vmem:[%s1222_s14 + $0x40] sm:$0xf]  ;;  %v800_v43 = vmax.bf16 %v773_v16, %v746_v33  ;;  %v774_v44 = vld [vmem:[%s1260_s9 + $0x38] sm:$0xf] }
  0x3c   : > { %v507_v42 = vld [vmem:[%s1222_s14 + $0x44] sm:$0xf]  ;;  %1126 = vst [vmem:[%s1305_s18 + $0x28] sm:$0xff] %v1125_v32   ;;  %v533_v45 = vmax.bf16 %v506_v41, %v479_v36  ;;  %v560_v47 = vld [vmem:[%s1228_s17 + $0x40] sm:$0xf]  ;;  %v693_v50 = vmax.bf16 %v666_v30, %v639_v38 }
  0x3d   : > { %v534_v46 = vmax.bf16 %v507_v42, %v480_v40  ;;  %v561_v48 = vld [vmem:[%s1228_s17 + $0x44] sm:$0xf]  ;;  %v853_v49 = vmax.bf16 %v826_v23, %v799_v37  ;;  %v694_v51 = vmax.bf16 %v667_v31, %v640_v39  ;;  %v775_v52 = vld [vmem:[%s1260_s9 + $0x3c] sm:$0xf]  ;;  %v614_v53 = vld [vmem:[%s1234_s20 + $0x40] sm:$0xf]  ;;  %v854_v55 = vmax.bf16 %v827_v27, %v800_v43 }
  0x3e   : > { %v615_v54 = vld [vmem:[%s1234_s20 + $0x44] sm:$0xf]  ;;  %v828_v56 = vld [vmem:[%s1269_s13 + $0x38] sm:$0xf]  ;;  %v829_v57 = vld [vmem:[%s1269_s13 + $0x3c] sm:$0xf]  ;;  %v587_v58 = vmax.bf16 %v560_v47, %v533_v45  ;;  %v747_v61 = vmax.bf16 %v720_v34, %v693_v50 }
  0x3f   : > { %v588_v59 = vmax.bf16 %v561_v48, %v534_v46  ;;  %v668_v60 = vld [vmem:[%s1243_s23 + $0x40] sm:$0xf]  ;;  %v748_v62 = vmax.bf16 %v721_v35, %v694_v51  ;;  %v669_v63 = vld [vmem:[%s1243_s23 + $0x44] sm:$0xf]  ;;  %v1127_v2 = vcombine.low %v853_v49, %v854_v55  ;;  %v481_v5 = vld [vmem:[%s1216_s11 + $0x48] sm:$0xf] }
  0x40   : > { %v722_v0 = vld [vmem:[%s1249_s26 + $0x40] sm:$0xf]  ;;  %v723_v1 = vld [vmem:[%s1249_s26 + $0x44] sm:$0xf]  ;;  %v641_v3 = vmax.bf16 %v614_v53, %v587_v58  ;;  %v482_v6 = vld [vmem:[%s1216_s11 + $0x4c] sm:$0xf]  ;;  %v801_v8 = vmax.bf16 %v774_v44, %v747_v61 }
  0x41   : > { %v642_v4 = vmax.bf16 %v615_v54, %v588_v59  ;;  %v508_v7 = vld [vmem:[%s1222_s14 + $0x48] sm:$0xf]  ;;  %v802_v9 = vmax.bf16 %v775_v52, %v748_v62  ;;  %v509_v10 = vld [vmem:[%s1222_s14 + $0x4c] sm:$0xf]  ;;  %1128 = vst [vmem:[%s1305_s18 + $0x30] sm:$0xff] %v1127_v2  }
  0x42   : > { %v535_v11 = vmax.bf16 %v508_v7, %v481_v5  ;;  %v562_v12 = vld [vmem:[%s1228_s17 + $0x48] sm:$0xf]  ;;  %v563_v13 = vld [vmem:[%s1228_s17 + $0x4c] sm:$0xf]  ;;  %v695_v14 = vmax.bf16 %v668_v60, %v641_v3  ;;  %v776_v16 = vld [vmem:[%s1260_s9 + $0x40] sm:$0xf]  ;;  %v536_v18 = vmax.bf16 %v509_v10, %v482_v6  ;;  %v855_v20 = vmax.bf16 %v828_v56, %v801_v8 }
  0x43   : > { %v696_v15 = vmax.bf16 %v669_v63, %v642_v4  ;;  %v777_v17 = vld [vmem:[%s1260_s9 + $0x44] sm:$0xf]  ;;  %v616_v19 = vld [vmem:[%s1234_s20 + $0x48] sm:$0xf]  ;;  %v856_v21 = vmax.bf16 %v829_v57, %v802_v9  ;;  %v830_v22 = vld [vmem:[%s1269_s13 + $0x40] sm:$0xf] }
  0x44   : > { %v831_v23 = vld [vmem:[%s1269_s13 + $0x44] sm:$0xf]  ;;  %v589_v24 = vmax.bf16 %v562_v12, %v535_v11  ;;  %v617_v25 = vld [vmem:[%s1234_s20 + $0x4c] sm:$0xf]  ;;  %v749_v26 = vmax.bf16 %v722_v0, %v695_v14  ;;  %v590_v28 = vmax.bf16 %v563_v13, %v536_v18  ;;  %v670_v29 = vld [vmem:[%s1243_s23 + $0x48] sm:$0xf] }
  0x45   : > { %v750_v27 = vmax.bf16 %v723_v1, %v696_v15  ;;  %v671_v30 = vld [vmem:[%s1243_s23 + $0x4c] sm:$0xf]  ;;  %v724_v31 = vld [vmem:[%s1249_s26 + $0x48] sm:$0xf]  ;;  %v1129_v32 = vcombine.low %v855_v20, %v856_v21  ;;  %v483_v35 = vld [vmem:[%s1216_s11 + $0x50] sm:$0xf] }
  0x46   : > { %v643_v33 = vmax.bf16 %v616_v19, %v589_v24  ;;  %v725_v34 = vld [vmem:[%s1249_s26 + $0x4c] sm:$0xf]  ;;  %v484_v36 = vld [vmem:[%s1216_s11 + $0x54] sm:$0xf]  ;;  %v803_v37 = vmax.bf16 %v776_v16, %v749_v26  ;;  %v644_v39 = vmax.bf16 %v617_v25, %v590_v28  ;;  %v510_v40 = vld [vmem:[%s1222_s14 + $0x50] sm:$0xf] }
  0x47   : > { %v804_v38 = vmax.bf16 %v777_v17, %v750_v27  ;;  %v511_v41 = vld [vmem:[%s1222_s14 + $0x54] sm:$0xf]  ;;  %v564_v42 = vld [vmem:[%s1228_s17 + $0x50] sm:$0xf]  ;;  %1130 = vst [vmem:[%s1305_s18 + $0x38] sm:$0xff] %v1129_v32   ;;  %v537_v46 = vmax.bf16 %v510_v40, %v483_v35 }
  0x48   : > { %v697_v43 = vmax.bf16 %v670_v29, %v643_v33  ;;  %v778_v44 = vld [vmem:[%s1260_s9 + $0x48] sm:$0xf]  ;;  %v779_v45 = vld [vmem:[%s1260_s9 + $0x4c] sm:$0xf]  ;;  %v538_v47 = vmax.bf16 %v511_v41, %v484_v36  ;;  %v565_v48 = vld [vmem:[%s1228_s17 + $0x54] sm:$0xf]  ;;  %v857_v49 = vmax.bf16 %v830_v22, %v803_v37  ;;  %v698_v51 = vmax.bf16 %v671_v30, %v644_v39 }
  0x49   : > { %v858_v50 = vmax.bf16 %v831_v23, %v804_v38  ;;  %v832_v52 = vld [vmem:[%s1269_s13 + $0x48] sm:$0xf]  ;;  %v618_v53 = vld [vmem:[%s1234_s20 + $0x50] sm:$0xf]  ;;  %v619_v54 = vld [vmem:[%s1234_s20 + $0x54] sm:$0xf]  ;;  %v591_v57 = vmax.bf16 %v564_v42, %v537_v46 }
  0x4a   : > { %v751_v55 = vmax.bf16 %v724_v31, %v697_v43  ;;  %v833_v56 = vld [vmem:[%s1269_s13 + $0x4c] sm:$0xf]  ;;  %v592_v58 = vmax.bf16 %v565_v48, %v538_v47  ;;  %v672_v59 = vld [vmem:[%s1243_s23 + $0x50] sm:$0xf]  ;;  %v673_v60 = vld [vmem:[%s1243_s23 + $0x54] sm:$0xf]  ;;  %v752_v62 = vmax.bf16 %v725_v34, %v698_v51 }
  0x4b   : > { %v1131_v61 = vcombine.low %v857_v49, %v858_v50  ;;  %v726_v63 = vld [vmem:[%s1249_s26 + $0x50] sm:$0xf]  ;;  %v727_v0 = vld [vmem:[%s1249_s26 + $0x54] sm:$0xf]  ;;  %v485_v1 = vld [vmem:[%s1216_s11 + $0x58] sm:$0xf]  ;;  %v645_v3 = vmax.bf16 %v618_v53, %v591_v57 }
  0x4c   : > { %v805_v2 = vmax.bf16 %v778_v44, %v751_v55  ;;  %v646_v4 = vmax.bf16 %v619_v54, %v592_v58  ;;  %v486_v5 = vld [vmem:[%s1216_s11 + $0x5c] sm:$0xf]  ;;  %v512_v6 = vld [vmem:[%s1222_s14 + $0x58] sm:$0xf]  ;;  %v806_v8 = vmax.bf16 %v779_v45, %v752_v62  ;;  %v780_v9 = vld [vmem:[%s1260_s9 + $0x50] sm:$0xf] }
  0x4d   : > { %v513_v7 = vld [vmem:[%s1222_s14 + $0x5c] sm:$0xf]  ;;  %1132 = vst [vmem:[%s1305_s18 + $0x40] sm:$0xff] %v1131_v61   ;;  %v539_v10 = vmax.bf16 %v512_v6, %v485_v1  ;;  %v566_v12 = vld [vmem:[%s1228_s17 + $0x58] sm:$0xf]  ;;  %v699_v15 = vmax.bf16 %v672_v59, %v645_v3 }
  0x4e   : > { %v540_v11 = vmax.bf16 %v513_v7, %v486_v5  ;;  %v567_v13 = vld [vmem:[%s1228_s17 + $0x5c] sm:$0xf]  ;;  %v859_v14 = vmax.bf16 %v832_v52, %v805_v2  ;;  %v700_v16 = vmax.bf16 %v673_v60, %v646_v4  ;;  %v781_v17 = vld [vmem:[%s1260_s9 + $0x54] sm:$0xf]  ;;  %v620_v18 = vld [vmem:[%s1234_s20 + $0x58] sm:$0xf]  ;;  %v860_v20 = vmax.bf16 %v833_v56, %v806_v8 }
  0x4f   : > { %v621_v19 = vld [vmem:[%s1234_s20 + $0x5c] sm:$0xf]  ;;  %v834_v21 = vld [vmem:[%s1269_s13 + $0x50] sm:$0xf]  ;;  %v835_v22 = vld [vmem:[%s1269_s13 + $0x54] sm:$0xf]  ;;  %v593_v23 = vmax.bf16 %v566_v12, %v539_v10  ;;  %v753_v26 = vmax.bf16 %v726_v63, %v699_v15 }
  0x50   : > { %v594_v24 = vmax.bf16 %v567_v13, %v540_v11  ;;  %v674_v25 = vld [vmem:[%s1243_s23 + $0x58] sm:$0xf]  ;;  %v754_v27 = vmax.bf16 %v727_v0, %v700_v16  ;;  %v675_v28 = vld [vmem:[%s1243_s23 + $0x5c] sm:$0xf]  ;;  %v1133_v31 = vcombine.low %v859_v14, %v860_v20  ;;  %v487_v34 = vld [vmem:[%s1216_s11 + $0x60] sm:$0xf] }
  0x51   : > { %v728_v29 = vld [vmem:[%s1249_s26 + $0x58] sm:$0xf]  ;;  %v729_v30 = vld [vmem:[%s1249_s26 + $0x5c] sm:$0xf]  ;;  %v647_v32 = vmax.bf16 %v620_v18, %v593_v23  ;;  %v488_v35 = vld [vmem:[%s1216_s11 + $0x64] sm:$0xf]  ;;  %v807_v37 = vmax.bf16 %v780_v9, %v753_v26 }
  0x52   : > { %v648_v33 = vmax.bf16 %v621_v19, %v594_v24  ;;  %v514_v36 = vld [vmem:[%s1222_s14 + $0x60] sm:$0xf]  ;;  %v808_v38 = vmax.bf16 %v781_v17, %v754_v27  ;;  %v515_v39 = vld [vmem:[%s1222_s14 + $0x64] sm:$0xf]  ;;  %1134 = vst [vmem:[%s1305_s18 + $0x48] sm:$0xff] %v1133_v31  }
  0x53   : > { %v541_v40 = vmax.bf16 %v514_v36, %v487_v34  ;;  %v568_v41 = vld [vmem:[%s1228_s17 + $0x60] sm:$0xf]  ;;  %v569_v42 = vld [vmem:[%s1228_s17 + $0x64] sm:$0xf]  ;;  %v701_v43 = vmax.bf16 %v674_v25, %v647_v32  ;;  %v542_v45 = vmax.bf16 %v515_v39, %v488_v35  ;;  %v861_v47 = vmax.bf16 %v834_v21, %v807_v37  ;;  %v782_v49 = vld [vmem:[%s1260_s9 + $0x58] sm:$0xf] }
  0x54   : > { %v702_v44 = vmax.bf16 %v675_v28, %v648_v33  ;;  %v622_v46 = vld [vmem:[%s1234_s20 + $0x60] sm:$0xf]  ;;  %v862_v48 = vmax.bf16 %v835_v22, %v808_v38  ;;  %v783_v50 = vld [vmem:[%s1260_s9 + $0x5c] sm:$0xf]  ;;  %v623_v52 = vld [vmem:[%s1234_s20 + $0x64] sm:$0xf] }
  0x55   : > { %v595_v51 = vmax.bf16 %v568_v41, %v541_v40  ;;  %v755_v53 = vmax.bf16 %v728_v29, %v701_v43  ;;  %v836_v55 = vld [vmem:[%s1269_s13 + $0x58] sm:$0xf]  ;;  %v837_v56 = vld [vmem:[%s1269_s13 + $0x5c] sm:$0xf]  ;;  %v596_v57 = vmax.bf16 %v569_v42, %v542_v45  ;;  %v676_v58 = vld [vmem:[%s1243_s23 + $0x60] sm:$0xf] }
  0x56   : > { %v756_v54 = vmax.bf16 %v729_v30, %v702_v44  ;;  %v1135_v59 = vcombine.low %v861_v47, %v862_v48  ;;  %v677_v61 = vld [vmem:[%s1243_s23 + $0x64] sm:$0xf]  ;;  %v489_v62 = vld [vmem:[%s1216_s11 + $0x68] sm:$0xf]  ;;  %v730_v3 = vld [vmem:[%s1249_s26 + $0x60] sm:$0xf] }
  0x57   : > { %v649_v60 = vmax.bf16 %v622_v46, %v595_v51  ;;  %v516_v63 = vld [vmem:[%s1222_s14 + $0x68] sm:$0xf]  ;;  %v809_v0 = vmax.bf16 %v782_v49, %v755_v53  ;;  %v650_v2 = vmax.bf16 %v623_v52, %v596_v57  ;;  %v731_v7 = vld [vmem:[%s1249_s26 + $0x64] sm:$0xf]  ;;  %v784_v12 = vld [vmem:[%s1260_s9 + $0x60] sm:$0xf] }
  0x58   : > { %v810_v1 = vmax.bf16 %v783_v50, %v756_v54  ;;  %v543_v4 = vmax.bf16 %v516_v63, %v489_v62  ;;  %v570_v5 = vld [vmem:[%s1228_s17 + $0x68] sm:$0xf]  ;;  %1136 = vst [vmem:[%s1305_s18 + $0x50] sm:$0xff] %v1135_v59   ;;  %v785_v15 = vld [vmem:[%s1260_s9 + $0x64] sm:$0xf] }
  0x59   : > { %v703_v6 = vmax.bf16 %v676_v58, %v649_v60  ;;  %v624_v8 = vld [vmem:[%s1234_s20 + $0x68] sm:$0xf]  ;;  %v863_v9 = vmax.bf16 %v836_v55, %v809_v0  ;;  %v704_v11 = vmax.bf16 %v677_v61, %v650_v2  ;;  %v838_v19 = vld [vmem:[%s1269_s13 + $0x60] sm:$0xf]  ;;  %v839_v22 = vld [vmem:[%s1269_s13 + $0x64] sm:$0xf] }
  0x5a   : > { %v864_v10 = vmax.bf16 %v837_v56, %v810_v1  ;;  %v597_v13 = vmax.bf16 %v570_v5, %v543_v4  ;;  %v678_v16 = vld [vmem:[%s1243_s23 + $0x68] sm:$0xf] }
  0x5b   : > { %v757_v14 = vmax.bf16 %v730_v3, %v703_v6  ;;  %v758_v18 = vmax.bf16 %v731_v7, %v704_v11  ;;  %v732_v23 = vld [vmem:[%s1249_s26 + $0x68] sm:$0xf] }
  0x5c   : > { %v1137_v17 = vcombine.low %v863_v9, %v864_v10  ;;  %v651_v20 = vmax.bf16 %v624_v8, %v597_v13  ;;  %v786_v27 = vld [vmem:[%s1260_s9 + $0x68] sm:$0xf] }
  0x5d   : > { %v811_v21 = vmax.bf16 %v784_v12, %v757_v14  ;;  %v812_v24 = vmax.bf16 %v785_v15, %v758_v18  ;;  %v840_v30 = vld [vmem:[%s1269_s13 + $0x68] sm:$0xf] }
  0x5e   : > { %1138 = vst [vmem:[%s1305_s18 + $0x58] sm:$0xff] %v1137_v17   ;;  %v705_v25 = vmax.bf16 %v678_v16, %v651_v20 }
  0x5f   : > { %v865_v26 = vmax.bf16 %v838_v19, %v811_v21  ;;  %v866_v28 = vmax.bf16 %v839_v22, %v812_v24 }
  0x60   : > { %v759_v29 = vmax.bf16 %v732_v23, %v705_v25 }
  0x61   : > { %v1139_v31 = vcombine.low %v865_v26, %v866_v28 }
  0x62   : > { %v813_v32 = vmax.bf16 %v786_v27, %v759_v29 }
  0x63   : > { %1140 = vst [vmem:[%s1305_s18 + $0x60] sm:$0xff] %v1139_v31  }
  0x64   : > { %v867_v33 = vmax.bf16 %v840_v30, %v813_v32 }
  0x66   : > { %894 = vst [vmem:[%s1305_s18 + $0x68] sm:$0xf] %v867_v33 }
  0x67 PF: > { %s18_s27 = sadd.s32 1, %s1155_s27  }
  0x68   : > { %p15_p4 = scmp.ge.s32.totalorder %s18_s27, 4  }
  0x6a   :  { %17 = sbr.rel (!%p15_p4) target bundleno = 1 (0x1), region = 103 }

// kernel: voxnet_forward.7
= control target key start
LH: loop header
LB: loop body
LE: loop exit
PB: predicated region body
PF: predicated region fallthrough
CT: control target
= control target key end

     0   :  { %vm6514_vm0 = vmmov 0   ;;  %s7973_s1 = inlined_call_operand.vmem [shape: bf16[6912,128], index: 1, kind: input, shape index: {}]   ;;  %s7974_s0 = inlined_call_operand.vmem [shape: bf16[8,6912], index: 0, kind: input, shape index: {}]   ;;  %s7975_s2 = inlined_call_operand.vmem [shape: f32[1,128], index: 2, kind: input, shape index: {}]   ;;  %s7976_s3 = inlined_call_operand.vmem [shape: bf16[128,128], index: 3, kind: input, shape index: {}]   ;;  %s7977_s4 = inlined_call_operand.vmem [shape: f32[1,128], index: 4, kind: input, shape index: {}]   ;;  %s7978_s5 = inlined_call_operand.vmem [shape: f32[8,128], index: 5, kind: output, shape index: {}]  }
   0x1   :  { %v6019_v0 = vld [vmem:[%s7973_s1 + $0x40] sm:$0xff]   ;;  %v6023_v4 = vld [vmem:[%s7973_s1 + $0x48] sm:$0xff]   ;;  %v6027_v8 = vld [vmem:[%s7973_s1 + $0x50] sm:$0xff]  }
   0x2   :  { %v6020_v1 = vld [vmem:[%s7973_s1] sm:$0xff]   ;;  %5394 = vmatprep.subr.bf16.mxu0 %v6019_v0  ;;  %v6024_v5 = vld [vmem:[%s7973_s1 + $0x8] sm:$0xff]   ;;  %v6028_v9 = vld [vmem:[%s7973_s1 + $0x10] sm:$0xff]  }
   0x3   :  { %v6021_v2 = vld [vmem:[%s7973_s1 + $0xc0] sm:$0xff]   ;;  %5395 = vmatpush3.bf16.msra.mxu0 %v6020_v1  ;;  %v6025_v6 = vld [vmem:[%s7973_s1 + $0xc8] sm:$0xff]   ;;  %v6029_v10 = vld [vmem:[%s7973_s1 + $0xd0] sm:$0xff]  }
   0x4   :  { %v6022_v3 = vld [vmem:[%s7973_s1 + $0x80] sm:$0xff]   ;;  %5416 = vmatprep.subr.bf16.mxu1 %v6021_v2  ;;  %5396 = vmatprep.subr.bf16.mxu0 %v6023_v4  ;;  %v6026_v7 = vld [vmem:[%s7973_s1 + $0x88] sm:$0xff]   ;;  %v6030_v11 = vld [vmem:[%s7973_s1 + $0x90] sm:$0xff]  }
   0x5   :  { %5417 = vmatpush3.bf16.msra.mxu1 %v6022_v3  ;;  %v6031_v12 = vld [vmem:[%s7973_s1 + $0x58] sm:$0xff]   ;;  %v6035_v16 = vld [vmem:[%s7973_s1 + $0x60] sm:$0xff]   ;;  %v6039_v20 = vld [vmem:[%s7973_s1 + $0x68] sm:$0xff]  }
   0x6   :  { %5418 = vmatprep.subr.bf16.mxu1 %v6025_v6  ;;  %v6032_v13 = vld [vmem:[%s7973_s1 + $0x18] sm:$0xff]   ;;  %v6036_v17 = vld [vmem:[%s7973_s1 + $0x20] sm:$0xff]   ;;  %v6040_v21 = vld [vmem:[%s7973_s1 + $0x28] sm:$0xff]  }
   0x7   :  { %5397 = vmatpush3.bf16.msra.mxu0 %v6024_v5  ;;  %v6033_v14 = vld [vmem:[%s7973_s1 + $0xd8] sm:$0xff]   ;;  %v6037_v18 = vld [vmem:[%s7973_s1 + $0xe0] sm:$0xff]   ;;  %v6041_v22 = vld [vmem:[%s7973_s1 + $0xe8] sm:$0xff]  }
   0x8   :  { %5398 = vmatprep.subr.bf16.mxu0 %v6027_v8  ;;  %v6034_v15 = vld [vmem:[%s7973_s1 + $0x98] sm:$0xff]   ;;  %v6038_v19 = vld [vmem:[%s7973_s1 + $0xa0] sm:$0xff]   ;;  %v6042_v23 = vld [vmem:[%s7973_s1 + $0xa8] sm:$0xff]  }
   0x9   :  { %5419 = vmatpush3.bf16.msra.mxu1 %v6026_v7  ;;  %v6043_v24 = vld [vmem:[%s7973_s1 + $0x70] sm:$0xff]   ;;  %v6047_v28 = vld [vmem:[%s7973_s1 + $0x78] sm:$0xff]   ;;  %v21_v31 = vld [vmem:[%s7974_s0] sm:$0xff] }
   0xa   :  { %5420 = vmatprep.subr.bf16.mxu1 %v6029_v10  ;;  %v6044_v25 = vld [vmem:[%s7973_s1 + $0x30] sm:$0xff]   ;;  %v6048_v29 = vld [vmem:[%s7973_s1 + $0x38] sm:$0xff]   ;;  %v4899_v32 = vcombine.low %v21_v31, %v21_v31  ;;  %v4900_v33 = vcombine.high %v21_v31, %v21_v31  ;;  %v6053_v35 = vld [vmem:[%s7973_s1 + $0x140] sm:$0xff]  }
   0xb   :  { %5399 = vmatpush3.bf16.msra.mxu0 %v6028_v9  ;;  %v6045_v26 = vld [vmem:[%s7973_s1 + $0xf0] sm:$0xff]   ;;  %v6049_v30 = vld [vmem:[%s7973_s1 + $0xf8] sm:$0xff]   ;;  %v22_v36 = vld [vmem:[%s7974_s0 + $0x8] sm:$0xff] }
   0xc   :  { %5400 = vmatprep.subr.bf16.mxu0 %v6031_v12  ;;  %v6046_v27 = vld [vmem:[%s7973_s1 + $0xb0] sm:$0xff]   ;;  %v6052_v34 = vld [vmem:[%s7973_s1 + $0xb8] sm:$0xff]   ;;  %3732 = vmatprep.mubr.bf16.mxu0 %v4900_v33  ;;  %v4901_v37 = vcombine.low %v22_v36, %v22_v36  ;;  %v4902_v38 = vcombine.high %v22_v36, %v22_v36  ;;  %v6056_v39 = vld [vmem:[%s7973_s1 + $0x100] sm:$0xff]  }
   0xd   :  { %5421 = vmatpush3.bf16.msra.mxu1 %v6030_v11  ;;  %v6057_v40 = vld [vmem:[%s7973_s1 + $0x1c0] sm:$0xff]   ;;  %v6059_v42 = vld [vmem:[%s7973_s1 + $0x148] sm:$0xff]   ;;  %v6063_v46 = vld [vmem:[%s7973_s1 + $0x150] sm:$0xff]  }
   0xe   :  { %5422 = vmatprep.subr.bf16.mxu1 %v6033_v14  ;;  %3772 = vmatprep.mubr.bf16.mxu1 %v4902_v38  ;;  %v6058_v41 = vld [vmem:[%s7973_s1 + $0x180] sm:$0xff]   ;;  %v6060_v43 = vld [vmem:[%s7973_s1 + $0x108] sm:$0xff]   ;;  %v6064_v47 = vld [vmem:[%s7973_s1 + $0x110] sm:$0xff]  }
   0xf   :  { %5401 = vmatpush3.bf16.msra.mxu0 %v6032_v13  ;;  %v6061_v44 = vld [vmem:[%s7973_s1 + $0x1c8] sm:$0xff]   ;;  %v6065_v48 = vld [vmem:[%s7973_s1 + $0x1d0] sm:$0xff]   ;;  %v6067_v50 = vld [vmem:[%s7973_s1 + $0x158] sm:$0xff]  }
  0x10   :  { %5402 = vmatprep.subr.bf16.mxu0 %v6035_v16  ;;  %v6062_v45 = vld [vmem:[%s7973_s1 + $0x188] sm:$0xff]   ;;  %v6066_v49 = vld [vmem:[%s7973_s1 + $0x190] sm:$0xff]   ;;  %v6068_v51 = vld [vmem:[%s7973_s1 + $0x118] sm:$0xff]  }
  0x11   :  { %5423 = vmatpush3.bf16.msra.mxu1 %v6034_v15  ;;  %v6069_v52 = vld [vmem:[%s7973_s1 + $0x1d8] sm:$0xff]   ;;  %v6071_v54 = vld [vmem:[%s7973_s1 + $0x160] sm:$0xff]   ;;  %v6075_v58 = vld [vmem:[%s7973_s1 + $0x168] sm:$0xff]  }
  0x12   :  { %5424 = vmatprep.subr.bf16.mxu1 %v6037_v18  ;;  %v6070_v53 = vld [vmem:[%s7973_s1 + $0x198] sm:$0xff]   ;;  %v6072_v55 = vld [vmem:[%s7973_s1 + $0x120] sm:$0xff]   ;;  %v6076_v59 = vld [vmem:[%s7973_s1 + $0x128] sm:$0xff]  }
  0x13   :  { %5403 = vmatpush3.bf16.msra.mxu0 %v6036_v17  ;;  %v6073_v56 = vld [vmem:[%s7973_s1 + $0x1e0] sm:$0xff]   ;;  %v6077_v60 = vld [vmem:[%s7973_s1 + $0x1e8] sm:$0xff]   ;;  %v6079_v62 = vld [vmem:[%s7973_s1 + $0x170] sm:$0xff]  }
  0x14   :  { %5404 = vmatprep.subr.bf16.mxu0 %v6039_v20  ;;  %v6074_v57 = vld [vmem:[%s7973_s1 + $0x1a0] sm:$0xff]   ;;  %v6078_v61 = vld [vmem:[%s7973_s1 + $0x1a8] sm:$0xff]   ;;  %v6080_v63 = vld [vmem:[%s7973_s1 + $0x130] sm:$0xff]  }
  0x15   :  { %5425 = vmatpush3.bf16.msra.mxu1 %v6038_v19  ;;  %v6081_v0 = vld [vmem:[%s7973_s1 + $0x1f0] sm:$0xff]   ;;  %v6083_v2 = vld [vmem:[%s7973_s1 + $0x178] sm:$0xff]   ;;  %v6089_v9 = vld [vmem:[%s7973_s1 + $0x240] sm:$0xff]  }
  0x16   :  { %5426 = vmatprep.subr.bf16.mxu1 %v6041_v22  ;;  %v6082_v1 = vld [vmem:[%s7973_s1 + $0x1b0] sm:$0xff]   ;;  %v6084_v3 = vld [vmem:[%s7973_s1 + $0x138] sm:$0xff]   ;;  %v6092_v13 = vld [vmem:[%s7973_s1 + $0x200] sm:$0xff]  }
  0x17   :  { %5405 = vmatpush3.bf16.msra.mxu0 %v6040_v21  ;;  %v6085_v4 = vld [vmem:[%s7973_s1 + $0x1f8] sm:$0xff]   ;;  %v23_v5 = vld [vmem:[%s7974_s0 + $0x10] sm:$0xff]  ;;  %v6093_v14 = vld [vmem:[%s7973_s1 + $0x2c0] sm:$0xff]  }
  0x18   :  { %5406 = vmatprep.subr.bf16.mxu0 %v6043_v24  ;;  %v4903_v6 = vcombine.low %v23_v5, %v23_v5  ;;  %v4904_v7 = vcombine.high %v23_v5, %v23_v5  ;;  %v6088_v8 = vld [vmem:[%s7973_s1 + $0x1b8] sm:$0xff]   ;;  %v6094_v15 = vld [vmem:[%s7973_s1 + $0x280] sm:$0xff]   ;;  %v6095_v16 = vld [vmem:[%s7973_s1 + $0x248] sm:$0xff]  }
  0x19   :  { %5427 = vmatpush3.bf16.msra.mxu1 %v6042_v23  ;;  %v24_v10 = vld [vmem:[%s7974_s0 + $0x18] sm:$0xff]  ;;  %v6096_v17 = vld [vmem:[%s7973_s1 + $0x208] sm:$0xff]   ;;  %v6099_v20 = vld [vmem:[%s7973_s1 + $0x250] sm:$0xff]  }
  0x1a   :  { %5428 = vmatprep.subr.bf16.mxu1 %v6045_v26  ;;  %v4905_v11 = vcombine.low %v24_v10, %v24_v10  ;;  %v4906_v12 = vcombine.high %v24_v10, %v24_v10  ;;  %v6097_v18 = vld [vmem:[%s7973_s1 + $0x2c8] sm:$0xff]   ;;  %v6100_v21 = vld [vmem:[%s7973_s1 + $0x210] sm:$0xff]   ;;  %v6103_v24 = vld [vmem:[%s7973_s1 + $0x258] sm:$0xff]  }
  0x1b   :  { %5407 = vmatpush3.bf16.msra.mxu0 %v6044_v25  ;;  %v6098_v19 = vld [vmem:[%s7973_s1 + $0x288] sm:$0xff]   ;;  %v6101_v22 = vld [vmem:[%s7973_s1 + $0x2d0] sm:$0xff]   ;;  %v6104_v25 = vld [vmem:[%s7973_s1 + $0x218] sm:$0xff]  }
  0x1c   :  { %5408 = vmatprep.subr.bf16.mxu0 %v6047_v28  ;;  %v6102_v23 = vld [vmem:[%s7973_s1 + $0x290] sm:$0xff]   ;;  %v6105_v26 = vld [vmem:[%s7973_s1 + $0x2d8] sm:$0xff]   ;;  %v6107_v28 = vld [vmem:[%s7973_s1 + $0x260] sm:$0xff]  }
  0x1d   :  { %5429 = vmatpush3.bf16.msra.mxu1 %v6046_v27  ;;  %v6106_v27 = vld [vmem:[%s7973_s1 + $0x298] sm:$0xff]   ;;  %v6110_v31 = vld [vmem:[%s7973_s1 + $0x2a0] sm:$0xff]   ;;  %v6112_v33 = vld [vmem:[%s7973_s1 + $0x228] sm:$0xff]  }
  0x1e   :  { %5430 = vmatprep.subr.bf16.mxu1 %v6049_v30  ;;  %v6109_v30 = vld [vmem:[%s7973_s1 + $0x2e0] sm:$0xff]   ;;  %v6115_v36 = vld [vmem:[%s7973_s1 + $0x270] sm:$0xff]  }
  0x1f   :  { %5409 = vmatpush3.bf16.msra.mxu0 %v6048_v29  ;;  %v6108_v29 = vld [vmem:[%s7973_s1 + $0x220] sm:$0xff]   ;;  %v6117_v38 = vld [vmem:[%s7973_s1 + $0x2f0] sm:$0xff]  }
  0x20   :  { %5438 = vmatprep.subr.bf16.mxu0 %v6053_v35  ;;  %v6114_v35 = vld [vmem:[%s7973_s1 + $0x2a8] sm:$0xff]   ;;  %v6146_v5 = vld [vmem:[%s7973_s1 + $0x3a0] sm:$0xff]   ;;  %v6151_v10 = vld [vmem:[%s7973_s1 + $0x370] sm:$0xff]  }
  0x21   :  { %5431 = vmatpush3.bf16.msra.mxu1 %v6052_v34  ;;  %v6113_v34 = vld [vmem:[%s7973_s1 + $0x2e8] sm:$0xff]  }
  0x22   :  { %3733 = vmatmul.mubr.bf16.vlgmr.msra.gmra.mrb[0].mxu0 %v4899_v32  ;;  %5460 = vmatprep.subr.bf16.mxu1 %v6057_v40  ;;  %v6111_v32 = vld [vmem:[%s7973_s1 + $0x268] sm:$0xff]   ;;  %v6119_v40 = vld [vmem:[%s7973_s1 + $0x278] sm:$0xff]  }
  0x23   :  { %5439 = vmatpush3.bf16.msra.mxu0 %v6056_v39  ;;  %3812 = vmatprep.mubr.bf16.mxu0 %v4904_v7  ;;  %v6118_v39 = vld [vmem:[%s7973_s1 + $0x2b0] sm:$0xff]   ;;  %v6148_v7 = vld [vmem:[%s7973_s1 + $0x328] sm:$0xff]  }
  0x24   :  { %3773 = vmatmul.mubr.bf16.vlgmr.msra.gmra.mrb[0].mxu1 %v4901_v37  ;;  %5440 = vmatprep.subr.bf16.mxu0 %v6059_v42  ;;  %v6116_v37 = vld [vmem:[%s7973_s1 + $0x230] sm:$0xff]   ;;  %v6121_v42 = vld [vmem:[%s7973_s1 + $0x2f8] sm:$0xff]  }
  0x25   :  { %5461 = vmatpush3.bf16.msra.mxu1 %v6058_v41  ;;  %3852 = vmatprep.mubr.bf16.mxu1 %v4906_v12  ;;  %v6120_v41 = vld [vmem:[%s7973_s1 + $0x238] sm:$0xff]   ;;  %v6153_v12 = vld [vmem:[%s7973_s1 + $0x3f0] sm:$0xff]  }
  0x26   :  { %5462 = vmatprep.subr.bf16.mxu1 %v6061_v44 }
  0x27   :  { %5441 = vmatpush3.bf16.msra.mxu0 %v6060_v43  ;;  %v25_v43 = vld [vmem:[%s7974_s0 + $0x20] sm:$0xff] }
  0x28   :  { %5442 = vmatprep.subr.bf16.mxu0 %v6063_v46  ;;  %v4907_v44 = vcombine.low %v25_v43, %v25_v43  ;;  %v6124_v46 = vld [vmem:[%s7973_s1 + $0x2b8] sm:$0xff]  }
  0x29   :  { %5463 = vmatpush3.bf16.msra.mxu1 %v6062_v45  ;;  %v4908_v45 = vcombine.high %v25_v43, %v25_v43  ;;  %v6182_v43 = vld [vmem:[%s7973_s1 + $0x4a0] sm:$0xff]  }
  0x2a   :  { %5464 = vmatprep.subr.bf16.mxu1 %v6065_v48  ;;  %v26_v48 = vld [vmem:[%s7974_s0 + $0x28] sm:$0xff] }
  0x2b   :  { %5443 = vmatpush3.bf16.msra.mxu0 %v6064_v47  ;;  %v6125_v47 = vld [vmem:[%s7973_s1 + $0x340] sm:$0xff]  }
  0x2c   :  { %5444 = vmatprep.subr.bf16.mxu0 %v6067_v50  ;;  %v4910_v50 = vcombine.high %v26_v48, %v26_v48 }
  0x2d   :  { %5465 = vmatpush3.bf16.msra.mxu1 %v6066_v49  ;;  %v4909_v49 = vcombine.low %v26_v48, %v26_v48  ;;  %v6187_v48 = vld [vmem:[%s7973_s1 + $0x470] sm:$0xff]  }
  0x2e   :  { %5466 = vmatprep.subr.bf16.mxu1 %v6069_v52  ;;  %v6129_v52 = vld [vmem:[%s7973_s1 + $0x3c0] sm:$0xff]  }
  0x2f   :  { %5445 = vmatpush3.bf16.msra.mxu0 %v6068_v51  ;;  %v6128_v51 = vld [vmem:[%s7973_s1 + $0x300] sm:$0xff]  }
  0x30   :  { %5446 = vmatprep.subr.bf16.mxu0 %v6071_v54  ;;  %v6131_v54 = vld [vmem:[%s7973_s1 + $0x348] sm:$0xff]  }
  0x31   :  { %5467 = vmatpush3.bf16.msra.mxu1 %v6070_v53  ;;  %v6130_v53 = vld [vmem:[%s7973_s1 + $0x380] sm:$0xff]  }
  0x32   :  { %5468 = vmatprep.subr.bf16.mxu1 %v6073_v56  ;;  %v6133_v56 = vld [vmem:[%s7973_s1 + $0x3c8] sm:$0xff]  }
  0x33   :  { %5447 = vmatpush3.bf16.msra.mxu0 %v6072_v55  ;;  %v6132_v55 = vld [vmem:[%s7973_s1 + $0x308] sm:$0xff]  }
  0x34   :  { %5448 = vmatprep.subr.bf16.mxu0 %v6075_v58  ;;  %v6135_v58 = vld [vmem:[%s7973_s1 + $0x350] sm:$0xff]  }
  0x35   :  { %5469 = vmatpush3.bf16.msra.mxu1 %v6074_v57  ;;  %v6134_v57 = vld [vmem:[%s7973_s1 + $0x388] sm:$0xff]  }
  0x36   :  { %5470 = vmatprep.subr.bf16.mxu1 %v6077_v60  ;;  %v6137_v60 = vld [vmem:[%s7973_s1 + $0x3d0] sm:$0xff]  }
  0x37   :  { %5449 = vmatpush3.bf16.msra.mxu0 %v6076_v59  ;;  %v6136_v59 = vld [vmem:[%s7973_s1 + $0x310] sm:$0xff]  }
  0x38   :  { %5450 = vmatprep.subr.bf16.mxu0 %v6079_v62  ;;  %v6139_v62 = vld [vmem:[%s7973_s1 + $0x358] sm:$0xff]  }
  0x39   :  { %5471 = vmatpush3.bf16.msra.mxu1 %v6078_v61  ;;  %v6138_v61 = vld [vmem:[%s7973_s1 + $0x390] sm:$0xff]  }
  0x3a   :  { %5472 = vmatprep.subr.bf16.mxu1 %v6081_v0  ;;  %v6141_v0 = vld [vmem:[%s7973_s1 + $0x3d8] sm:$0xff]  }
  0x3b   :  { %5451 = vmatpush3.bf16.msra.mxu0 %v6080_v63  ;;  %v6140_v63 = vld [vmem:[%s7973_s1 + $0x318] sm:$0xff]  }
  0x3c   :  { %5452 = vmatprep.subr.bf16.mxu0 %v6083_v2  ;;  %v6143_v2 = vld [vmem:[%s7973_s1 + $0x360] sm:$0xff]  }
  0x3d   :  { %5473 = vmatpush3.bf16.msra.mxu1 %v6082_v1  ;;  %v6142_v1 = vld [vmem:[%s7973_s1 + $0x398] sm:$0xff]  }
  0x3e   :  { %5474 = vmatprep.subr.bf16.mxu1 %v6085_v4  ;;  %v6145_v4 = vld [vmem:[%s7973_s1 + $0x3e0] sm:$0xff]  }
  0x3f   :  { %5453 = vmatpush3.bf16.msra.mxu0 %v6084_v3  ;;  %v6144_v3 = vld [vmem:[%s7973_s1 + $0x320] sm:$0xff]  }
  0x40   :  { %5482 = vmatprep.subr.bf16.mxu0 %v6089_v9  ;;  %v6150_v9 = vld [vmem:[%s7973_s1 + $0x3a8] sm:$0xff]  }
  0x41   :  { %5475 = vmatpush3.bf16.msra.mxu1 %v6088_v8  ;;  %v6149_v8 = vld [vmem:[%s7973_s1 + $0x3e8] sm:$0xff]  }
  0x42   :  { %3813 = vmatmul.mubr.bf16.vlgmr.msra.gmra.mrb[4].mxu0 %v4903_v6  ;;  %5504 = vmatprep.subr.bf16.mxu1 %v6093_v14  ;;  %v6147_v6 = vld [vmem:[%s7973_s1 + $0x368] sm:$0xff]   ;;  %v6155_v14 = vld [vmem:[%s7973_s1 + $0x378] sm:$0xff]  }
  0x43   :  { %5483 = vmatpush3.bf16.msra.mxu0 %v6092_v13  ;;  %3892 = vmatprep.mubr.bf16.mxu0 %v4908_v45  ;;  %v6154_v13 = vld [vmem:[%s7973_s1 + $0x3b0] sm:$0xff]   ;;  %v6184_v45 = vld [vmem:[%s7973_s1 + $0x428] sm:$0xff]  }
  0x44   :  { %3853 = vmatmul.mubr.bf16.vlgmr.msra.gmra.mrb[4].mxu1 %v4905_v11  ;;  %5484 = vmatprep.subr.bf16.mxu0 %v6095_v16  ;;  %v6152_v11 = vld [vmem:[%s7973_s1 + $0x330] sm:$0xff]   ;;  %v6157_v16 = vld [vmem:[%s7973_s1 + $0x3f8] sm:$0xff]  }
  0x45   :  { %5505 = vmatpush3.bf16.msra.mxu1 %v6094_v15  ;;  %3932 = vmatprep.mubr.bf16.mxu1 %v4910_v50  ;;  %v6156_v15 = vld [vmem:[%s7973_s1 + $0x338] sm:$0xff]   ;;  %v6189_v50 = vld [vmem:[%s7973_s1 + $0x4f0] sm:$0xff]  }
  0x46   :  { %5506 = vmatprep.subr.bf16.mxu1 %v6097_v18 }
  0x47   :  { %5485 = vmatpush3.bf16.msra.mxu0 %v6096_v17  ;;  %v27_v17 = vld [vmem:[%s7974_s0 + $0x30] sm:$0xff] }
  0x48   :  { %5486 = vmatprep.subr.bf16.mxu0 %v6099_v20  ;;  %v4911_v18 = vcombine.low %v27_v17, %v27_v17  ;;  %v6160_v20 = vld [vmem:[%s7973_s1 + $0x3b8] sm:$0xff]  }
  0x49   :  { %5507 = vmatpush3.bf16.msra.mxu1 %v6098_v19  ;;  %v4912_v19 = vcombine.high %v27_v17, %v27_v17  ;;  %v6218_v17 = vld [vmem:[%s7973_s1 + $0x5a0] sm:$0xff]  }
  0x4a   :  { %5508 = vmatprep.subr.bf16.mxu1 %v6101_v22  ;;  %v28_v22 = vld [vmem:[%s7974_s0 + $0x38] sm:$0xff] }
  0x4b   :  { %5487 = vmatpush3.bf16.msra.mxu0 %v6100_v21  ;;  %v6161_v21 = vld [vmem:[%s7973_s1 + $0x440] sm:$0xff]  }
  0x4c   :  { %5488 = vmatprep.subr.bf16.mxu0 %v6103_v24  ;;  %v4914_v24 = vcombine.high %v28_v22, %v28_v22 }
  0x4d   :  { %5509 = vmatpush3.bf16.msra.mxu1 %v6102_v23  ;;  %v4913_v23 = vcombine.low %v28_v22, %v28_v22  ;;  %v6223_v22 = vld [vmem:[%s7973_s1 + $0x570] sm:$0xff]  }
  0x4e   :  { %5510 = vmatprep.subr.bf16.mxu1 %v6105_v26  ;;  %v6165_v26 = vld [vmem:[%s7973_s1 + $0x4c0] sm:$0xff]  }
  0x4f   :  { %5489 = vmatpush3.bf16.msra.mxu0 %v6104_v25  ;;  %v6164_v25 = vld [vmem:[%s7973_s1 + $0x400] sm:$0xff]  }
  0x50   :  { %5490 = vmatprep.subr.bf16.mxu0 %v6107_v28  ;;  %v6167_v28 = vld [vmem:[%s7973_s1 + $0x448] sm:$0xff]  }
  0x51   :  { %5511 = vmatpush3.bf16.msra.mxu1 %v6106_v27  ;;  %v6166_v27 = vld [vmem:[%s7973_s1 + $0x480] sm:$0xff]  }
  0x52   :  { %5512 = vmatprep.subr.bf16.mxu1 %v6109_v30  ;;  %v6169_v30 = vld [vmem:[%s7973_s1 + $0x4c8] sm:$0xff]  }
  0x53   :  { %5491 = vmatpush3.bf16.msra.mxu0 %v6108_v29  ;;  %v6168_v29 = vld [vmem:[%s7973_s1 + $0x408] sm:$0xff]  }
  0x54   :  { %5492 = vmatprep.subr.bf16.mxu0 %v6111_v32  ;;  %v6171_v32 = vld [vmem:[%s7973_s1 + $0x450] sm:$0xff]  }
  0x55   :  { %5513 = vmatpush3.bf16.msra.mxu1 %v6110_v31  ;;  %v6170_v31 = vld [vmem:[%s7973_s1 + $0x488] sm:$0xff]  }
  0x56   :  { %5514 = vmatprep.subr.bf16.mxu1 %v6113_v34  ;;  %v6173_v34 = vld [vmem:[%s7973_s1 + $0x4d0] sm:$0xff]  }
  0x57   :  { %5493 = vmatpush3.bf16.msra.mxu0 %v6112_v33  ;;  %v6172_v33 = vld [vmem:[%s7973_s1 + $0x410] sm:$0xff]  }
  0x58   :  { %5494 = vmatprep.subr.bf16.mxu0 %v6115_v36  ;;  %v6175_v36 = vld [vmem:[%s7973_s1 + $0x458] sm:$0xff]  }
  0x59   :  { %5515 = vmatpush3.bf16.msra.mxu1 %v6114_v35  ;;  %v6174_v35 = vld [vmem:[%s7973_s1 + $0x490] sm:$0xff]  }
  0x5a   :  { %5516 = vmatprep.subr.bf16.mxu1 %v6117_v38  ;;  %v6177_v38 = vld [vmem:[%s7973_s1 + $0x4d8] sm:$0xff]  }
  0x5b   :  { %5495 = vmatpush3.bf16.msra.mxu0 %v6116_v37  ;;  %v6176_v37 = vld [vmem:[%s7973_s1 + $0x418] sm:$0xff]  }
  0x5c   :  { %5496 = vmatprep.subr.bf16.mxu0 %v6119_v40  ;;  %v6179_v40 = vld [vmem:[%s7973_s1 + $0x460] sm:$0xff]  }
  0x5d   :  { %5517 = vmatpush3.bf16.msra.mxu1 %v6118_v39  ;;  %v6178_v39 = vld [vmem:[%s7973_s1 + $0x498] sm:$0xff]  }
  0x5e   :  { %5518 = vmatprep.subr.bf16.mxu1 %v6121_v42  ;;  %v6181_v42 = vld [vmem:[%s7973_s1 + $0x4e0] sm:$0xff]  }
  0x5f   :  { %5497 = vmatpush3.bf16.msra.mxu0 %v6120_v41  ;;  %v6180_v41 = vld [vmem:[%s7973_s1 + $0x420] sm:$0xff]  }
  0x60   :  { %5526 = vmatprep.subr.bf16.mxu0 %v6125_v47  ;;  %v6186_v47 = vld [vmem:[%s7973_s1 + $0x4a8] sm:$0xff]  }
  0x61   :  { %5519 = vmatpush3.bf16.msra.mxu1 %v6124_v46  ;;  %v6185_v46 = vld [vmem:[%s7973_s1 + $0x4e8] sm:$0xff]  }
  0x62   :  { %3893 = vmatmul.mubr.bf16.vlgmr.msra.gmra.mrb[8].mxu0 %v4907_v44  ;;  %5548 = vmatprep.subr.bf16.mxu1 %v6129_v52  ;;  %v6183_v44 = vld [vmem:[%s7973_s1 + $0x468] sm:$0xff]   ;;  %v6191_v52 = vld [vmem:[%s7973_s1 + $0x478] sm:$0xff]  }
  0x63   :  { %5527 = vmatpush3.bf16.msra.mxu0 %v6128_v51  ;;  %3972 = vmatprep.mubr.bf16.mxu0 %v4912_v19  ;;  %v6190_v51 = vld [vmem:[%s7973_s1 + $0x4b0] sm:$0xff]   ;;  %v6220_v19 = vld [vmem:[%s7973_s1 + $0x528] sm:$0xff]  }
  0x64   :  { %3933 = vmatmul.mubr.bf16.vlgmr.msra.gmra.mrb[8].mxu1 %v4909_v49  ;;  %5528 = vmatprep.subr.bf16.mxu0 %v6131_v54  ;;  %v6188_v49 = vld [vmem:[%s7973_s1 + $0x430] sm:$0xff]   ;;  %v6193_v54 = vld [vmem:[%s7973_s1 + $0x4f8] sm:$0xff]  }
  0x65   :  { %5549 = vmatpush3.bf16.msra.mxu1 %v6130_v53  ;;  %4012 = vmatprep.mubr.bf16.mxu1 %v4914_v24  ;;  %v6192_v53 = vld [vmem:[%s7973_s1 + $0x438] sm:$0xff]   ;;  %v6225_v24 = vld [vmem:[%s7973_s1 + $0x5f0] sm:$0xff]  }
  0x66   :  { %5550 = vmatprep.subr.bf16.mxu1 %v6133_v56 }
  0x67   :  { %5529 = vmatpush3.bf16.msra.mxu0 %v6132_v55  ;;  %v29_v55 = vld [vmem:[%s7974_s0 + $0x40] sm:$0xff] }
  0x68   :  { %5530 = vmatprep.subr.bf16.mxu0 %v6135_v58  ;;  %v4915_v56 = vcombine.low %v29_v55, %v29_v55  ;;  %v6196_v58 = vld [vmem:[%s7973_s1 + $0x4b8] sm:$0xff]  }
  0x69   :  { %5551 = vmatpush3.bf16.msra.mxu1 %v6134_v57  ;;  %v4916_v57 = vcombine.high %v29_v55, %v29_v55  ;;  %v6254_v55 = vld [vmem:[%s7973_s1 + $0x6a0] sm:$0xff]  }
  0x6a   :  { %5552 = vmatprep.subr.bf16.mxu1 %v6137_v60  ;;  %v30_v60 = vld [vmem:[%s7974_s0 + $0x48] sm:$0xff] }
  0x6b   :  { %5531 = vmatpush3.bf16.msra.mxu0 %v6136_v59  ;;  %v6197_v59 = vld [vmem:[%s7973_s1 + $0x540] sm:$0xff]  }
  0x6c   :  { %5532 = vmatprep.subr.bf16.mxu0 %v6139_v62  ;;  %v4918_v62 = vcombine.high %v30_v60, %v30_v60 }
  0x6d   :  { %5553 = vmatpush3.bf16.msra.mxu1 %v6138_v61  ;;  %v4917_v61 = vcombine.low %v30_v60, %v30_v60  ;;  %v6259_v60 = vld [vmem:[%s7973_s1 + $0x670] sm:$0xff]  }
  0x6e   :  { %5554 = vmatprep.subr.bf16.mxu1 %v6141_v0  ;;  %v6201_v0 = vld [vmem:[%s7973_s1 + $0x5c0] sm:$0xff]  }
  0x6f   :  { %5533 = vmatpush3.bf16.msra.mxu0 %v6140_v63  ;;  %v6200_v63 = vld [vmem:[%s7973_s1 + $0x500] sm:$0xff]  }
  0x70   :  { %5534 = vmatprep.subr.bf16.mxu0 %v6143_v2  ;;  %v6203_v2 = vld [vmem:[%s7973_s1 + $0x548] sm:$0xff]  }
  0x71   :  { %5555 = vmatpush3.bf16.msra.mxu1 %v6142_v1  ;;  %v6202_v1 = vld [vmem:[%s7973_s1 + $0x580] sm:$0xff]  }
  0x72   :  { %5556 = vmatprep.subr.bf16.mxu1 %v6145_v4  ;;  %v6205_v4 = vld [vmem:[%s7973_s1 + $0x5c8] sm:$0xff]  }
  0x73   :  { %5535 = vmatpush3.bf16.msra.mxu0 %v6144_v3  ;;  %v6204_v3 = vld [vmem:[%s7973_s1 + $0x508] sm:$0xff]  }
  0x74   :  { %5536 = vmatprep.subr.bf16.mxu0 %v6147_v6  ;;  %v6207_v6 = vld [vmem:[%s7973_s1 + $0x550] sm:$0xff]  }
  0x75   :  { %5557 = vmatpush3.bf16.msra.mxu1 %v6146_v5  ;;  %v6206_v5 = vld [vmem:[%s7973_s1 + $0x588] sm:$0xff]  }
  0x76   :  { %5558 = vmatprep.subr.bf16.mxu1 %v6149_v8  ;;  %v6209_v8 = vld [vmem:[%s7973_s1 + $0x5d0] sm:$0xff]  }
  0x77   :  { %5537 = vmatpush3.bf16.msra.mxu0 %v6148_v7  ;;  %v6208_v7 = vld [vmem:[%s7973_s1 + $0x510] sm:$0xff]  }
  0x78   :  { %5538 = vmatprep.subr.bf16.mxu0 %v6151_v10  ;;  %v6211_v10 = vld [vmem:[%s7973_s1 + $0x558] sm:$0xff]  }
  0x79   :  { %5559 = vmatpush3.bf16.msra.mxu1 %v6150_v9  ;;  %v6210_v9 = vld [vmem:[%s7973_s1 + $0x590] sm:$0xff]  }
  0x7a   :  { %5560 = vmatprep.subr.bf16.mxu1 %v6153_v12  ;;  %v6213_v12 = vld [vmem:[%s7973_s1 + $0x5d8] sm:$0xff]  }
  0x7b   :  { %5539 = vmatpush3.bf16.msra.mxu0 %v6152_v11  ;;  %v6212_v11 = vld [vmem:[%s7973_s1 + $0x518] sm:$0xff]  }
  0x7c   :  { %5540 = vmatprep.subr.bf16.mxu0 %v6155_v14  ;;  %v6215_v14 = vld [vmem:[%s7973_s1 + $0x560] sm:$0xff]  }
  0x7d   :  { %5561 = vmatpush3.bf16.msra.mxu1 %v6154_v13  ;;  %v6214_v13 = vld [vmem:[%s7973_s1 + $0x598] sm:$0xff]  }
  0x7e   :  { %5562 = vmatprep.subr.bf16.mxu1 %v6157_v16  ;;  %v6217_v16 = vld [vmem:[%s7973_s1 + $0x5e0] sm:$0xff]  }
  0x7f   :  { %5541 = vmatpush3.bf16.msra.mxu0 %v6156_v15  ;;  %v6216_v15 = vld [vmem:[%s7973_s1 + $0x520] sm:$0xff]  }
  0x80   :  { %5570 = vmatprep.subr.bf16.mxu0 %v6161_v21  ;;  %v6222_v21 = vld [vmem:[%s7973_s1 + $0x5a8] sm:$0xff]  }
  0x81   :  { %5563 = vmatpush3.bf16.msra.mxu1 %v6160_v20  ;;  %v6221_v20 = vld [vmem:[%s7973_s1 + $0x5e8] sm:$0xff]  }
  0x82   :  { %3973 = vmatmul.mubr.bf16.vlgmr.msra.gmra.mrb[12].mxu0 %v4911_v18  ;;  %5592 = vmatprep.subr.bf16.mxu1 %v6165_v26  ;;  %v6219_v18 = vld [vmem:[%s7973_s1 + $0x568] sm:$0xff]   ;;  %v6227_v26 = vld [vmem:[%s7973_s1 + $0x578] sm:$0xff]  }
  0x83   :  { %5571 = vmatpush3.bf16.msra.mxu0 %v6164_v25  ;;  %4052 = vmatprep.mubr.bf16.mxu0 %v4916_v57  ;;  %v6226_v25 = vld [vmem:[%s7973_s1 + $0x5b0] sm:$0xff]   ;;  %v6256_v57 = vld [vmem:[%s7973_s1 + $0x628] sm:$0xff]  }
  0x84   :  { %4013 = vmatmul.mubr.bf16.vlgmr.msra.gmra.mrb[12].mxu1 %v4913_v23  ;;  %5572 = vmatprep.subr.bf16.mxu0 %v6167_v28  ;;  %v6224_v23 = vld [vmem:[%s7973_s1 + $0x530] sm:$0xff]   ;;  %v6229_v28 = vld [vmem:[%s7973_s1 + $0x5f8] sm:$0xff]  }
  0x85   :  { %5593 = vmatpush3.bf16.msra.mxu1 %v6166_v27  ;;  %4092 = vmatprep.mubr.bf16.mxu1 %v4918_v62  ;;  %v6228_v27 = vld [vmem:[%s7973_s1 + $0x538] sm:$0xff]   ;;  %v6261_v62 = vld [vmem:[%s7973_s1 + $0x6f0] sm:$0xff]  }
  0x86   :  { %5594 = vmatprep.subr.bf16.mxu1 %v6169_v30 }
  0x87   :  { %5573 = vmatpush3.bf16.msra.mxu0 %v6168_v29  ;;  %v31_v29 = vld [vmem:[%s7974_s0 + $0x50] sm:$0xff] }
  0x88   :  { %5574 = vmatprep.subr.bf16.mxu0 %v6171_v32  ;;  %v4919_v30 = vcombine.low %v31_v29, %v31_v29  ;;  %v6232_v32 = vld [vmem:[%s7973_s1 + $0x5b8] sm:$0xff]  }
  0x89   :  { %5595 = vmatpush3.bf16.msra.mxu1 %v6170_v31  ;;  %v4920_v31 = vcombine.high %v31_v29, %v31_v29  ;;  %v6289_v29 = vld [vmem:[%s7973_s1 + $0x7e0] sm:$0xff]  }
  0x8a   :  { %5596 = vmatprep.subr.bf16.mxu1 %v6173_v34  ;;  %v32_v34 = vld [vmem:[%s7974_s0 + $0x58] sm:$0xff] }
  0x8b   :  { %5575 = vmatpush3.bf16.msra.mxu0 %v6172_v33  ;;  %v6233_v33 = vld [vmem:[%s7973_s1 + $0x640] sm:$0xff]  }
  0x8c   :  { %5576 = vmatprep.subr.bf16.mxu0 %v6175_v36  ;;  %v4922_v36 = vcombine.high %v32_v34, %v32_v34 }
  0x8d   :  { %5597 = vmatpush3.bf16.msra.mxu1 %v6174_v35  ;;  %v4921_v35 = vcombine.low %v32_v34, %v32_v34 }
  0x8e   :  { %5598 = vmatprep.subr.bf16.mxu1 %v6177_v38  ;;  %v6237_v38 = vld [vmem:[%s7973_s1 + $0x6c0] sm:$0xff]  }
  0x8f   :  { %5577 = vmatpush3.bf16.msra.mxu0 %v6176_v37  ;;  %v6236_v37 = vld [vmem:[%s7973_s1 + $0x600] sm:$0xff]  }
  0x90   :  { %5578 = vmatprep.subr.bf16.mxu0 %v6179_v40  ;;  %v6239_v40 = vld [vmem:[%s7973_s1 + $0x648] sm:$0xff]  }
  0x91   :  { %5599 = vmatpush3.bf16.msra.mxu1 %v6178_v39  ;;  %v6238_v39 = vld [vmem:[%s7973_s1 + $0x680] sm:$0xff]  }
  0x92   :  { %5600 = vmatprep.subr.bf16.mxu1 %v6181_v42  ;;  %v6241_v42 = vld [vmem:[%s7973_s1 + $0x6c8] sm:$0xff]  }
  0x93   :  { %5579 = vmatpush3.bf16.msra.mxu0 %v6180_v41  ;;  %v6240_v41 = vld [vmem:[%s7973_s1 + $0x608] sm:$0xff]  }
  0x94   :  { %5580 = vmatprep.subr.bf16.mxu0 %v6183_v44  ;;  %v6243_v44 = vld [vmem:[%s7973_s1 + $0x650] sm:$0xff]  }
  0x95   :  { %5601 = vmatpush3.bf16.msra.mxu1 %v6182_v43  ;;  %v6242_v43 = vld [vmem:[%s7973_s1 + $0x688] sm:$0xff]  }
  0x96   :  { %5602 = vmatprep.subr.bf16.mxu1 %v6185_v46  ;;  %v6245_v46 = vld [vmem:[%s7973_s1 + $0x6d0] sm:$0xff]  }
  0x97   :  { %5581 = vmatpush3.bf16.msra.mxu0 %v6184_v45  ;;  %v6244_v45 = vld [vmem:[%s7973_s1 + $0x610] sm:$0xff]  }
  0x98   :  { %5582 = vmatprep.subr.bf16.mxu0 %v6187_v48  ;;  %v6247_v48 = vld [vmem:[%s7973_s1 + $0x658] sm:$0xff]  }
  0x99   :  { %5603 = vmatpush3.bf16.msra.mxu1 %v6186_v47  ;;  %v6246_v47 = vld [vmem:[%s7973_s1 + $0x690] sm:$0xff]  }
  0x9a   :  { %5604 = vmatprep.subr.bf16.mxu1 %v6189_v50  ;;  %v6249_v50 = vld [vmem:[%s7973_s1 + $0x6d8] sm:$0xff]  }
  0x9b   :  { %5583 = vmatpush3.bf16.msra.mxu0 %v6188_v49  ;;  %v6248_v49 = vld [vmem:[%s7973_s1 + $0x618] sm:$0xff]  }
  0x9c   :  { %5584 = vmatprep.subr.bf16.mxu0 %v6191_v52  ;;  %v6251_v52 = vld [vmem:[%s7973_s1 + $0x660] sm:$0xff]  }
  0x9d   :  { %5605 = vmatpush3.bf16.msra.mxu1 %v6190_v51  ;;  %v6250_v51 = vld [vmem:[%s7973_s1 + $0x698] sm:$0xff]  }
  0x9e   :  { %5606 = vmatprep.subr.bf16.mxu1 %v6193_v54  ;;  %v6253_v54 = vld [vmem:[%s7973_s1 + $0x6e0] sm:$0xff]  }
  0x9f   :  { %5585 = vmatpush3.bf16.msra.mxu0 %v6192_v53  ;;  %v6252_v53 = vld [vmem:[%s7973_s1 + $0x620] sm:$0xff]  }
  0xa0   :  { %5614 = vmatprep.subr.bf16.mxu0 %v6197_v59  ;;  %v6258_v59 = vld [vmem:[%s7973_s1 + $0x6a8] sm:$0xff]  }
  0xa1   :  { %5607 = vmatpush3.bf16.msra.mxu1 %v6196_v58  ;;  %v6257_v58 = vld [vmem:[%s7973_s1 + $0x6e8] sm:$0xff]  }
  0xa2   :  { %4053 = vmatmul.mubr.bf16.vlgmr.msra.gmra.mrb[16].mxu0 %v4915_v56  ;;  %5636 = vmatprep.subr.bf16.mxu1 %v6201_v0  ;;  %v6255_v56 = vld [vmem:[%s7973_s1 + $0x668] sm:$0xff]   ;;  %v6263_v0 = vld [vmem:[%s7973_s1 + $0x678] sm:$0xff]  }
  0xa3   :  { %5615 = vmatpush3.bf16.msra.mxu0 %v6200_v63  ;;  %4132 = vmatprep.mubr.bf16.mxu0 %v4920_v31  ;;  %v6262_v63 = vld [vmem:[%s7973_s1 + $0x6b0] sm:$0xff]   ;;  %v6290_v31 = vld [vmem:[%s7973_s1 + $0x7a0] sm:$0xff]  }
  0xa4   :  { %4093 = vmatmul.mubr.bf16.vlgmr.msra.gmra.mrb[16].mxu1 %v4917_v61  ;;  %5616 = vmatprep.subr.bf16.mxu0 %v6203_v2  ;;  %v6260_v61 = vld [vmem:[%s7973_s1 + $0x630] sm:$0xff]   ;;  %v6265_v2 = vld [vmem:[%s7973_s1 + $0x6f8] sm:$0xff]  }
  0xa5   :  { %5637 = vmatpush3.bf16.msra.mxu1 %v6202_v1  ;;  %4172 = vmatprep.mubr.bf16.mxu1 %v4922_v36  ;;  %v6264_v1 = vld [vmem:[%s7973_s1 + $0x638] sm:$0xff]  }
  0xa6   :  { %5638 = vmatprep.subr.bf16.mxu1 %v6205_v4 }
  0xa7   :  { %5617 = vmatpush3.bf16.msra.mxu0 %v6204_v3  ;;  %v33_v3 = vld [vmem:[%s7974_s0 + $0x60] sm:$0xff] }
  0xa8   :  { %5618 = vmatprep.subr.bf16.mxu0 %v6207_v6  ;;  %v4923_v4 = vcombine.low %v33_v3, %v33_v3  ;;  %v6268_v6 = vld [vmem:[%s7973_s1 + $0x6b8] sm:$0xff]  }
  0xa9   :  { %5639 = vmatpush3.bf16.msra.mxu1 %v6206_v5  ;;  %v4924_v5 = vcombine.high %v33_v3, %v33_v3  ;;  %v6313_v3 = vld [vmem:[%s7973_s1 + $0x8c8] sm:$0xff]  }
  0xaa   :  { %5640 = vmatprep.subr.bf16.mxu1 %v6209_v8  ;;  %v34_v8 = vld [vmem:[%s7974_s0 + $0x68] sm:$0xff] }
  0xab   :  { %5619 = vmatpush3.bf16.msra.mxu0 %v6208_v7  ;;  %v6269_v7 = vld [vmem:[%s7973_s1 + $0x740] sm:$0xff]  }
  0xac   :  { %5620 = vmatprep.subr.bf16.mxu0 %v6211_v10  ;;  %v4926_v10 = vcombine.high %v34_v8, %v34_v8 }
  0xad   :  { %5641 = vmatpush3.bf16.msra.mxu1 %v6210_v9  ;;  %v4925_v9 = vcombine.low %v34_v8, %v34_v8  ;;  %v6318_v8 = vld [vmem:[%s7973_s1 + $0x890] sm:$0xff]  }
  0xae   :  { %5642 = vmatprep.subr.bf16.mxu1 %v6213_v12  ;;  %v6273_v12 = vld [vmem:[%s7973_s1 + $0x7c0] sm:$0xff]  }
  0xaf   :  { %5621 = vmatpush3.bf16.msra.mxu0 %v6212_v11  ;;  %v6272_v11 = vld [vmem:[%s7973_s1 + $0x700] sm:$0xff]  }
  0xb0   :  { %5622 = vmatprep.subr.bf16.mxu0 %v6215_v14  ;;  %v6275_v14 = vld [vmem:[%s7973_s1 + $0x748] sm:$0xff]  }
  0xb1   :  { %5643 = vmatpush3.bf16.msra.mxu1 %v6214_v13  ;;  %v6274_v13 = vld [vmem:[%s7973_s1 + $0x780] sm:$0xff]  }
  0xb2   :  { %5644 = vmatprep.subr.bf16.mxu1 %v6217_v16  ;;  %v6277_v16 = vld [vmem:[%s7973_s1 + $0x7c8] sm:$0xff]  }
  0xb3   :  { %5623 = vmatpush3.bf16.msra.mxu0 %v6216_v15  ;;  %v6276_v15 = vld [vmem:[%s7973_s1 + $0x708] sm:$0xff]  }
  0xb4   :  { %5624 = vmatprep.subr.bf16.mxu0 %v6219_v18  ;;  %v6279_v18 = vld [vmem:[%s7973_s1 + $0x750] sm:$0xff]  }
  0xb5   :  { %5645 = vmatpush3.bf16.msra.mxu1 %v6218_v17  ;;  %v6278_v17 = vld [vmem:[%s7973_s1 + $0x788] sm:$0xff]  }
  0xb6   :  { %5646 = vmatprep.subr.bf16.mxu1 %v6221_v20  ;;  %v6281_v20 = vld [vmem:[%s7973_s1 + $0x7d0] sm:$0xff]  }
  0xb7   :  { %5625 = vmatpush3.bf16.msra.mxu0 %v6220_v19  ;;  %v6280_v19 = vld [vmem:[%s7973_s1 + $0x710] sm:$0xff]  }
  0xb8   :  { %5626 = vmatprep.subr.bf16.mxu0 %v6223_v22  ;;  %v6283_v22 = vld [vmem:[%s7973_s1 + $0x758] sm:$0xff]  }
  0xb9   :  { %5647 = vmatpush3.bf16.msra.mxu1 %v6222_v21  ;;  %v6282_v21 = vld [vmem:[%s7973_s1 + $0x790] sm:$0xff]  }
  0xba   :  { %5648 = vmatprep.subr.bf16.mxu1 %v6225_v24  ;;  %v6285_v24 = vld [vmem:[%s7973_s1 + $0x7d8] sm:$0xff]  }
  0xbb   :  { %5627 = vmatpush3.bf16.msra.mxu0 %v6224_v23  ;;  %v6284_v23 = vld [vmem:[%s7973_s1 + $0x718] sm:$0xff]  }
  0xbc   :  { %5628 = vmatprep.subr.bf16.mxu0 %v6227_v26  ;;  %v6287_v26 = vld [vmem:[%s7973_s1 + $0x760] sm:$0xff]  }
  0xbd   :  { %5649 = vmatpush3.bf16.msra.mxu1 %v6226_v25  ;;  %v6286_v25 = vld [vmem:[%s7973_s1 + $0x798] sm:$0xff]  }
  0xbe   :  { %5650 = vmatprep.subr.bf16.mxu1 %v6229_v28 }
  0xbf   :  { %5629 = vmatpush3.bf16.msra.mxu0 %v6228_v27  ;;  %v6288_v27 = vld [vmem:[%s7973_s1 + $0x720] sm:$0xff]  }
  0xc0   :  { %5658 = vmatprep.subr.bf16.mxu0 %v6233_v33 }
  0xc1   :  { %5651 = vmatpush3.bf16.msra.mxu1 %v6232_v32  ;;  %v4898_v32 = vld [vmem:[%s7975_s2] ss:$0 sm:$0xff] }
  0xc2   :  { %4133 = vmatmul.mubr.bf16.vlgmr.msra.gmra.mrb[20].mxu0 %v4919_v30  ;;  %5680 = vmatprep.subr.bf16.mxu1 %v6237_v38  ;;  %v6292_v38 = vld [vmem:[%s7973_s1 + $0x728] sm:$0xff]  }
  0xc3   :  { %5659 = vmatpush3.bf16.msra.mxu0 %v6236_v37  ;;  %4212 = vmatprep.mubr.bf16.mxu0 %v4924_v5  ;;  %v6315_v5 = vld [vmem:[%s7973_s1 + $0x850] sm:$0xff]  }
  0xc4   :  { %4173 = vmatmul.mubr.bf16.vlgmr.msra.gmra.mrb[20].mxu1 %v4921_v35  ;;  %5660 = vmatprep.subr.bf16.mxu0 %v6239_v40  ;;  %v6291_v35 = vld [vmem:[%s7973_s1 + $0x768] sm:$0xff]  }
  0xc5   :  { %5681 = vmatpush3.bf16.msra.mxu1 %v6238_v39  ;;  %4252 = vmatprep.mubr.bf16.mxu1 %v4926_v10  ;;  %v6320_v10 = vld [vmem:[%s7973_s1 + $0x818] sm:$0xff]  }
  0xc6   :  { %5682 = vmatprep.subr.bf16.mxu1 %v6241_v42 }
  0xc7   :  { %5661 = vmatpush3.bf16.msra.mxu0 %v6240_v41  ;;  %v6293_v41 = vld [vmem:[%s7973_s1 + $0x7e8] sm:$0xff]  }
  0xc8   :  { %5662 = vmatprep.subr.bf16.mxu0 %v6243_v44 }
  0xc9   :  { %5683 = vmatpush3.bf16.msra.mxu1 %v6242_v43  ;;  %v6294_v43 = vld [vmem:[%s7973_s1 + $0x7a8] sm:$0xff]  }
  0xca   :  { %5684 = vmatprep.subr.bf16.mxu1 %v6245_v46 }
  0xcb   :  { %5663 = vmatpush3.bf16.msra.mxu0 %v6244_v45  ;;  %v6295_v45 = vld [vmem:[%s7973_s1 + $0x770] sm:$0xff]  }
  0xcc   :  { %5664 = vmatprep.subr.bf16.mxu0 %v6247_v48  ;;  %v6296_v48 = vld [vmem:[%s7973_s1 + $0x730] sm:$0xff]  }
  0xcd   :  { %5685 = vmatpush3.bf16.msra.mxu1 %v6246_v47 }
  0xce   :  { %5686 = vmatprep.subr.bf16.mxu1 %v6249_v50  ;;  %v6298_v50 = vld [vmem:[%s7973_s1 + $0x7b0] sm:$0xff]  }
  0xcf   :  { %5665 = vmatpush3.bf16.msra.mxu0 %v6248_v49  ;;  %v6297_v49 = vld [vmem:[%s7973_s1 + $0x7f0] sm:$0xff]  }
  0xd0   :  { %5666 = vmatprep.subr.bf16.mxu0 %v6251_v52  ;;  %v6300_v52 = vld [vmem:[%s7973_s1 + $0x738] sm:$0xff]  }
  0xd1   :  { %5687 = vmatpush3.bf16.msra.mxu1 %v6250_v51  ;;  %v6299_v51 = vld [vmem:[%s7973_s1 + $0x778] sm:$0xff]  }
  0xd2   :  { %5688 = vmatprep.subr.bf16.mxu1 %v6253_v54  ;;  %v35_v54 = vld [vmem:[%s7974_s0 + $0x70] sm:$0xff] }
  0xd3   :  { %5667 = vmatpush3.bf16.msra.mxu0 %v6252_v53  ;;  %v6301_v53 = vld [vmem:[%s7973_s1 + $0x7f8] sm:$0xff]  }
  0xd4   :  { %5668 = vmatprep.subr.bf16.mxu0 %v6255_v56  ;;  %v4928_v56 = vcombine.high %v35_v54, %v35_v54 }
  0xd5   :  { %5689 = vmatpush3.bf16.msra.mxu1 %v6254_v55  ;;  %v4927_v55 = vcombine.low %v35_v54, %v35_v54  ;;  %v6350_v54 = vld [vmem:[%s7973_s1 + $0x988] sm:$0xff]  }
  0xd6   :  { %5690 = vmatprep.subr.bf16.mxu1 %v6257_v58  ;;  %v6305_v58 = vld [vmem:[%s7973_s1 + $0x840] sm:$0xff]  }
  0xd7   :  { %5669 = vmatpush3.bf16.msra.mxu0 %v6256_v57  ;;  %v6304_v57 = vld [vmem:[%s7973_s1 + $0x7b8] sm:$0xff]  }
  0xd8   :  { %5670 = vmatprep.subr.bf16.mxu0 %v6259_v60 }
  0xd9   :  { %5691 = vmatpush3.bf16.msra.mxu1 %v6258_v59  ;;  %v36_v59 = vld [vmem:[%s7974_s0 + $0x78] sm:$0xff] }
  0xda   :  { %5692 = vmatprep.subr.bf16.mxu1 %v6261_v62  ;;  %v4929_v60 = vcombine.low %v36_v59, %v36_v59  ;;  %v6308_v62 = vld [vmem:[%s7973_s1 + $0x800] sm:$0xff]  }
  0xdb   :  { %5671 = vmatpush3.bf16.msra.mxu0 %v6260_v61  ;;  %v4930_v61 = vcombine.high %v36_v59, %v36_v59  ;;  %v6355_v59 = vld [vmem:[%s7973_s1 + $0x958] sm:$0xff]  }
  0xdc   :  { %5672 = vmatprep.subr.bf16.mxu0 %v6263_v0  ;;  %v6310_v0 = vld [vmem:[%s7973_s1 + $0x880] sm:$0xff]  }
  0xdd   :  { %5693 = vmatpush3.bf16.msra.mxu1 %v6262_v63  ;;  %v6309_v63 = vld [vmem:[%s7973_s1 + $0x8c0] sm:$0xff]  }
  0xde   :  { %5694 = vmatprep.subr.bf16.mxu1 %v6265_v2  ;;  %v6312_v2 = vld [vmem:[%s7973_s1 + $0x808] sm:$0xff]  }
  0xdf   :  { %5673 = vmatpush3.bf16.msra.mxu0 %v6264_v1  ;;  %v6311_v1 = vld [vmem:[%s7973_s1 + $0x848] sm:$0xff]  }
  0xe0   :  { %5702 = vmatprep.subr.bf16.mxu0 %v6269_v7  ;;  %v6317_v7 = vld [vmem:[%s7973_s1 + $0x8d0] sm:$0xff]  }
  0xe1   :  { %5695 = vmatpush3.bf16.msra.mxu1 %v6268_v6  ;;  %v6316_v6 = vld [vmem:[%s7973_s1 + $0x810] sm:$0xff]  }
  0xe2   :  { %4213 = vmatmul.mubr.bf16.vlgmr.msra.gmra.mrb[24].mxu0 %v4923_v4  ;;  %5724 = vmatprep.subr.bf16.mxu1 %v6273_v12  ;;  %v6314_v4 = vld [vmem:[%s7973_s1 + $0x888] sm:$0xff]   ;;  %v6322_v12 = vld [vmem:[%s7973_s1 + $0x898] sm:$0xff]  }
  0xe3   :  { %5703 = vmatpush3.bf16.msra.mxu0 %v6272_v11  ;;  %4292 = vmatprep.mubr.bf16.mxu0 %v4928_v56  ;;  %v6321_v11 = vld [vmem:[%s7973_s1 + $0x8d8] sm:$0xff]   ;;  %v6352_v56 = vld [vmem:[%s7973_s1 + $0x910] sm:$0xff]  }
  0xe4   :  { %4253 = vmatmul.mubr.bf16.vlgmr.msra.gmra.mrb[24].mxu1 %v4925_v9  ;;  %5704 = vmatprep.subr.bf16.mxu0 %v6275_v14  ;;  %v6319_v9 = vld [vmem:[%s7973_s1 + $0x858] sm:$0xff]  }
  0xe5   :  { %5725 = vmatpush3.bf16.msra.mxu1 %v6274_v13  ;;  %4332 = vmatprep.mubr.bf16.mxu1 %v4930_v61  ;;  %v6323_v13 = vld [vmem:[%s7973_s1 + $0x860] sm:$0xff]   ;;  %v6357_v61 = vld [vmem:[%s7973_s1 + $0x9d8] sm:$0xff]  }
  0xe6   :  { %5726 = vmatprep.subr.bf16.mxu1 %v6277_v16 }
  0xe7   :  { %5705 = vmatpush3.bf16.msra.mxu0 %v6276_v15  ;;  %v6324_v15 = vld [vmem:[%s7973_s1 + $0x820] sm:$0xff]  }
  0xe8   :  { %5706 = vmatprep.subr.bf16.mxu0 %v6279_v18 }
  0xe9   :  { %5727 = vmatpush3.bf16.msra.mxu1 %v6278_v17  ;;  %v6325_v17 = vld [vmem:[%s7973_s1 + $0x8e0] sm:$0xff]  }
  0xea   :  { %5728 = vmatprep.subr.bf16.mxu1 %v6281_v20  ;;  %v6326_v20 = vld [vmem:[%s7973_s1 + $0x8a0] sm:$0xff]  }
  0xeb   :  { %5707 = vmatpush3.bf16.msra.mxu0 %v6280_v19 }
  0xec   :  { %5708 = vmatprep.subr.bf16.mxu0 %v6283_v22 }
  0xed   :  { %5729 = vmatpush3.bf16.msra.mxu1 %v6282_v21 }
  0xee   :  { %5730 = vmatprep.subr.bf16.mxu1 %v6285_v24 }
  0xef   :  { %5709 = vmatpush3.bf16.msra.mxu0 %v6284_v23  ;;  %v6327_v23 = vld [vmem:[%s7973_s1 + $0x868] sm:$0xff]  }
  0xf0   :  { %5710 = vmatprep.subr.bf16.mxu0 %v6287_v26 }
  0xf1   :  { %5731 = vmatpush3.bf16.msra.mxu1 %v6286_v25  ;;  %v6328_v25 = vld [vmem:[%s7973_s1 + $0x828] sm:$0xff]  }
  0xf2   :  { %5732 = vmatprep.subr.bf16.mxu1 %v6289_v29 }
  0xf3   :  { %5711 = vmatpush3.bf16.msra.mxu0 %v6288_v27 }
  0xf4   :  { %5712 = vmatprep.subr.bf16.mxu0 %v6291_v35  ;;  %v6333_v35 = vld [vmem:[%s7973_s1 + $0x8f0] sm:$0xff]  }
  0xf5   :  { %v5410_v28 = vpop.f32.mrb[0].mxu0  ;;  %5733 = vmatpush3.bf16.msra.mxu1 %v6290_v31 }
  0xf6   :  { %v5411_v30 = vpop.f32.mrb[1].mxu0  ;;  %5734 = vmatprep.subr.bf16.mxu1 %v6293_v41 }
  0xf7   :  { %v5412_v33 = vadd.f32 %v5411_v30, %v5410_v28  ;;  %v5413_v34 = vpop.f32.mrb[2].mxu0  ;;  %v5432_v36 = vpop.f32.mrb[0].mxu1  ;;  %5713 = vmatpush3.bf16.msra.mxu0 %v6292_v38  ;;  %v6329_v28 = vld [vmem:[%s7973_s1 + $0x8e8] sm:$0xff]   ;;  %v6336_v38 = vld [vmem:[%s7973_s1 + $0x838] sm:$0xff]  }
  0xf8   :  { %v5414_v39 = vpop.f32.mrb[3].mxu0  ;;  %v5433_v40 = vpop.f32.mrb[1].mxu1  ;;  %5714 = vmatprep.subr.bf16.mxu0 %v6295_v45  ;;  %v6330_v30 = vld [vmem:[%s7973_s1 + $0x8a8] sm:$0xff]   ;;  %v6332_v34 = vld [vmem:[%s7973_s1 + $0x830] sm:$0xff]  }
  0xf9   :  { %v3735_v37 = vadd.f32 %v5412_v33, %v4898_v32  ;;  %v5434_v42 = vadd.f32 %v5433_v40, %v5432_v36  ;;  %v5435_v44 = vpop.f32.mrb[2].mxu1  ;;  %5735 = vmatpush3.bf16.msra.mxu1 %v6294_v43  ;;  %v6331_v33 = vld [vmem:[%s7973_s1 + $0x870] sm:$0xff]   ;;  %v6337_v39 = vld [vmem:[%s7973_s1 + $0x8f8] sm:$0xff]   ;;  %v37_v40 = vld [vmem:[%s7974_s0 + $0x80] sm:$0xff] }
  0xfa   :  { %v5436_v46 = vpop.f32.mrb[3].mxu1  ;;  %5736 = vmatprep.subr.bf16.mxu1 %v6297_v49  ;;  %v6334_v36 = vld [vmem:[%s7973_s1 + $0x8b0] sm:$0xff]   ;;  %v4931_v41 = vcombine.low %v37_v40, %v37_v40  ;;  %v6340_v43 = vld [vmem:[%s7973_s1 + $0x8b8] sm:$0xff]   ;;  %v6341_v44 = vld [vmem:[%s7973_s1 + $0x940] sm:$0xff]  }
  0xfb   :  { %v7337_v47 = vadd.f32 %v5434_v42, %v3735_v37  ;;  %5715 = vmatpush3.bf16.msra.mxu0 %v6296_v48  ;;  %v6335_v37 = vld [vmem:[%s7973_s1 + $0x878] sm:$0xff]   ;;  %v4932_v42 = vcombine.high %v37_v40, %v37_v40  ;;  %v38_v45 = vld [vmem:[%s7974_s0 + $0x88] sm:$0xff]  ;;  %v6344_v48 = vld [vmem:[%s7973_s1 + $0x900] sm:$0xff]  }
  0xfc   :  { %5716 = vmatprep.subr.bf16.mxu0 %v6299_v51  ;;  %v4933_v46 = vcombine.low %v38_v45, %v38_v45  ;;  %v6345_v49 = vld [vmem:[%s7973_s1 + $0x9c0] sm:$0xff]   ;;  %v6347_v51 = vld [vmem:[%s7973_s1 + $0x948] sm:$0xff]  }
  0xfd   :  { %5737 = vmatpush3.bf16.msra.mxu1 %v6298_v50  ;;  %v6346_v50 = vld [vmem:[%s7973_s1 + $0x980] sm:$0xff]   ;;  %v6386_v40 = vld [vmem:[%s7973_s1 + $0xa88] sm:$0xff]  }
  0xfe   :  { %5738 = vmatprep.subr.bf16.mxu1 %v6301_v53  ;;  %v6349_v53 = vld [vmem:[%s7973_s1 + $0x9c8] sm:$0xff]  }
  0xff   :  { %5717 = vmatpush3.bf16.msra.mxu0 %v6300_v52  ;;  %v6348_v52 = vld [vmem:[%s7973_s1 + $0x908] sm:$0xff]  }
 0x100   :  { %5746 = vmatprep.subr.bf16.mxu0 %v6305_v58  ;;  %v6354_v58 = vld [vmem:[%s7973_s1 + $0x990] sm:$0xff]  }
 0x101   :  { %5739 = vmatpush3.bf16.msra.mxu1 %v6304_v57  ;;  %v6353_v57 = vld [vmem:[%s7973_s1 + $0x9d0] sm:$0xff]  }
 0x102   :  { %4293 = vmatmul.mubr.bf16.vlgmr.msra.gmra.mrb[28].mxu0 %v4927_v55  ;;  %5768 = vmatprep.subr.bf16.mxu1 %v6309_v63  ;;  %v6351_v55 = vld [vmem:[%s7973_s1 + $0x950] sm:$0xff]   ;;  %v6359_v63 = vld [vmem:[%s7973_s1 + $0x960] sm:$0xff]  }
 0x103   :  { %5747 = vmatpush3.bf16.msra.mxu0 %v6308_v62  ;;  %4372 = vmatprep.mubr.bf16.mxu0 %v4932_v42  ;;  %v6358_v62 = vld [vmem:[%s7973_s1 + $0x998] sm:$0xff]   ;;  %v6388_v42 = vld [vmem:[%s7973_s1 + $0xa10] sm:$0xff]  }
 0x104   :  { %4333 = vmatmul.mubr.bf16.vlgmr.msra.gmra.mrb[28].mxu1 %v4929_v60  ;;  %5748 = vmatprep.subr.bf16.mxu0 %v6311_v1  ;;  %v6356_v60 = vld [vmem:[%s7973_s1 + $0x918] sm:$0xff]   ;;  %v6360_v1 = vld [vmem:[%s7973_s1 + $0x920] sm:$0xff]  }
 0x105   :  { %5769 = vmatpush3.bf16.msra.mxu1 %v6310_v0 }
 0x106   :  { %5770 = vmatprep.subr.bf16.mxu1 %v6313_v3  ;;  %v6361_v3 = vld [vmem:[%s7973_s1 + $0x9e0] sm:$0xff]  }
 0x107   :  { %5749 = vmatpush3.bf16.msra.mxu0 %v6312_v2 }
 0x108   :  { %5750 = vmatprep.subr.bf16.mxu0 %v6315_v5 }
 0x109   :  { %5771 = vmatpush3.bf16.msra.mxu1 %v6314_v4 }
 0x10a   :  { %5772 = vmatprep.subr.bf16.mxu1 %v6317_v7 }
 0x10b   :  { %5751 = vmatpush3.bf16.msra.mxu0 %v6316_v6  ;;  %v6362_v6 = vld [vmem:[%s7973_s1 + $0x9a0] sm:$0xff]  }
 0x10c   :  { %5752 = vmatprep.subr.bf16.mxu0 %v6319_v9  ;;  %v6363_v9 = vld [vmem:[%s7973_s1 + $0x968] sm:$0xff]  }
 0x10d   :  { %5773 = vmatpush3.bf16.msra.mxu1 %v6318_v8 }
 0x10e   :  { %5774 = vmatprep.subr.bf16.mxu1 %v6321_v11  ;;  %v6364_v11 = vld [vmem:[%s7973_s1 + $0x928] sm:$0xff]  }
 0x10f   :  { %5753 = vmatpush3.bf16.msra.mxu0 %v6320_v10 }
 0x110   :  { %5754 = vmatprep.subr.bf16.mxu0 %v6323_v13 }
 0x111   :  { %5775 = vmatpush3.bf16.msra.mxu1 %v6322_v12 }
 0x112   :  { %5776 = vmatprep.subr.bf16.mxu1 %v6325_v17 }
 0x113   :  { %5755 = vmatpush3.bf16.msra.mxu0 %v6324_v15 }
 0x114   :  { %5756 = vmatprep.subr.bf16.mxu0 %v6327_v23  ;;  %v6371_v23 = vld [vmem:[%s7973_s1 + $0x978] sm:$0xff]  }
 0x115   :  { %v5454_v14 = vpop.f32.mrb[4].mxu0  ;;  %5777 = vmatpush3.bf16.msra.mxu1 %v6326_v20  ;;  %v6368_v20 = vld [vmem:[%s7973_s1 + $0x930] sm:$0xff]  }
 0x116   :  { %v5455_v16 = vpop.f32.mrb[5].mxu0  ;;  %5778 = vmatprep.subr.bf16.mxu1 %v6329_v28 }
 0x117   :  { %v5456_v18 = vadd.f32 %v5455_v16, %v5454_v14  ;;  %v5457_v19 = vpop.f32.mrb[6].mxu0  ;;  %v5476_v21 = vpop.f32.mrb[4].mxu1  ;;  %5757 = vmatpush3.bf16.msra.mxu0 %v6328_v25  ;;  %v6365_v14 = vld [vmem:[%s7973_s1 + $0x9e8] sm:$0xff]   ;;  %v6373_v25 = vld [vmem:[%s7973_s1 + $0x9f8] sm:$0xff]  }
 0x118   :  { %v5458_v24 = vpop.f32.mrb[7].mxu0  ;;  %v5477_v26 = vpop.f32.mrb[5].mxu1  ;;  %5758 = vmatprep.subr.bf16.mxu0 %v6331_v33  ;;  %v6366_v16 = vld [vmem:[%s7973_s1 + $0x9a8] sm:$0xff]   ;;  %v6367_v19 = vld [vmem:[%s7973_s1 + $0x970] sm:$0xff]  }
 0x119   :  { %v3815_v22 = vadd.f32 %v5456_v18, %v7337_v47  ;;  %v5478_v27 = vadd.f32 %v5477_v26, %v5476_v21  ;;  %v5479_v29 = vpop.f32.mrb[6].mxu1  ;;  %5779 = vmatpush3.bf16.msra.mxu1 %v6330_v30  ;;  %v4934_v47 = vcombine.high %v38_v45, %v38_v45  ;;  %v6369_v21 = vld [vmem:[%s7973_s1 + $0x9f0] sm:$0xff]   ;;  %v6372_v24 = vld [vmem:[%s7973_s1 + $0x938] sm:$0xff]   ;;  %v6377_v30 = vld [vmem:[%s7973_s1 + $0xa40] sm:$0xff]  }
 0x11a   :  { %v5480_v31 = vpop.f32.mrb[7].mxu1  ;;  %5780 = vmatprep.subr.bf16.mxu1 %v6333_v35  ;;  %v39_v26 = vld [vmem:[%s7974_s0 + $0x90] sm:$0xff]  ;;  %v6376_v29 = vld [vmem:[%s7973_s1 + $0x9b8] sm:$0xff]   ;;  %v6381_v35 = vld [vmem:[%s7973_s1 + $0xac0] sm:$0xff]  }
 0x11b   :  { %v7439_v32 = vadd.f32 %v5478_v27, %v3815_v22  ;;  %5759 = vmatpush3.bf16.msra.mxu0 %v6332_v34  ;;  %4412 = vmatprep.mubr.bf16.mxu1 %v4934_v47  ;;  %v6370_v22 = vld [vmem:[%s7973_s1 + $0x9b0] sm:$0xff]   ;;  %v4935_v27 = vcombine.low %v39_v26, %v39_v26  ;;  %v4936_v28 = vcombine.high %v39_v26, %v39_v26  ;;  %v40_v31 = vld [vmem:[%s7974_s0 + $0x98] sm:$0xff]  ;;  %v6380_v34 = vld [vmem:[%s7973_s1 + $0xa00] sm:$0xff]  }
 0x11c   :  { %5760 = vmatprep.subr.bf16.mxu0 %v6335_v37  ;;  %v4938_v33 = vcombine.high %v40_v31, %v40_v31  ;;  %v6383_v37 = vld [vmem:[%s7973_s1 + $0xa48] sm:$0xff]   ;;  %v6391_v45 = vld [vmem:[%s7973_s1 + $0xa58] sm:$0xff]  }
 0x11d   :  { %5781 = vmatpush3.bf16.msra.mxu1 %v6334_v36  ;;  %v6382_v36 = vld [vmem:[%s7973_s1 + $0xa80] sm:$0xff]   ;;  %v6393_v47 = vld [vmem:[%s7973_s1 + $0xad8] sm:$0xff]   ;;  %v6422_v26 = vld [vmem:[%s7973_s1 + $0xb88] sm:$0xff]  }
 0x11e   :  { %5782 = vmatprep.subr.bf16.mxu1 %v6337_v39  ;;  %v6385_v39 = vld [vmem:[%s7973_s1 + $0xac8] sm:$0xff]  }
 0x11f   :  { %5761 = vmatpush3.bf16.msra.mxu0 %v6336_v38  ;;  %v6384_v38 = vld [vmem:[%s7973_s1 + $0xa08] sm:$0xff]  }
 0x120   :  { %5790 = vmatprep.subr.bf16.mxu0 %v6341_v44  ;;  %v6390_v44 = vld [vmem:[%s7973_s1 + $0xa90] sm:$0xff]  }
 0x121   :  { %5783 = vmatpush3.bf16.msra.mxu1 %v6340_v43  ;;  %v6389_v43 = vld [vmem:[%s7973_s1 + $0xad0] sm:$0xff]  }
 0x122   :  { %4373 = vmatmul.mubr.bf16.vlgmr.msra.gmra.mrb[32].mxu0 %v4931_v41  ;;  %5812 = vmatprep.subr.bf16.mxu1 %v6345_v49  ;;  %v6387_v41 = vld [vmem:[%s7973_s1 + $0xa50] sm:$0xff]   ;;  %v6395_v49 = vld [vmem:[%s7973_s1 + $0xa60] sm:$0xff]  }
 0x123   :  { %5791 = vmatpush3.bf16.msra.mxu0 %v6344_v48  ;;  %4452 = vmatprep.mubr.bf16.mxu0 %v4936_v28  ;;  %v6394_v48 = vld [vmem:[%s7973_s1 + $0xa98] sm:$0xff]   ;;  %v6424_v28 = vld [vmem:[%s7973_s1 + $0xb10] sm:$0xff]  }
 0x124   :  { %4413 = vmatmul.mubr.bf16.vlgmr.msra.gmra.mrb[32].mxu1 %v4933_v46  ;;  %5792 = vmatprep.subr.bf16.mxu0 %v6347_v51  ;;  %v6392_v46 = vld [vmem:[%s7973_s1 + $0xa18] sm:$0xff]  }
 0x125   :  { %5813 = vmatpush3.bf16.msra.mxu1 %v6346_v50  ;;  %4492 = vmatprep.mubr.bf16.mxu1 %v4938_v33  ;;  %v6396_v50 = vld [vmem:[%s7973_s1 + $0xa20] sm:$0xff]   ;;  %v6429_v33 = vld [vmem:[%s7973_s1 + $0xbd8] sm:$0xff]  }
 0x126   :  { %5814 = vmatprep.subr.bf16.mxu1 %v6349_v53 }
 0x127   :  { %5793 = vmatpush3.bf16.msra.mxu0 %v6348_v52  ;;  %v6397_v52 = vld [vmem:[%s7973_s1 + $0xae0] sm:$0xff]  }
 0x128   :  { %5794 = vmatprep.subr.bf16.mxu0 %v6351_v55 }
 0x129   :  { %5815 = vmatpush3.bf16.msra.mxu1 %v6350_v54  ;;  %v6398_v54 = vld [vmem:[%s7973_s1 + $0xaa0] sm:$0xff]  }
 0x12a   :  { %5816 = vmatprep.subr.bf16.mxu1 %v6353_v57  ;;  %v6399_v57 = vld [vmem:[%s7973_s1 + $0xa68] sm:$0xff]  }
 0x12b   :  { %5795 = vmatpush3.bf16.msra.mxu0 %v6352_v56 }
 0x12c   :  { %5796 = vmatprep.subr.bf16.mxu0 %v6355_v59 }
 0x12d   :  { %5817 = vmatpush3.bf16.msra.mxu1 %v6354_v58 }
 0x12e   :  { %5818 = vmatprep.subr.bf16.mxu1 %v6357_v61 }
 0x12f   :  { %5797 = vmatpush3.bf16.msra.mxu0 %v6356_v60  ;;  %v6400_v60 = vld [vmem:[%s7973_s1 + $0xa28] sm:$0xff]  }
 0x130   :  { %5798 = vmatprep.subr.bf16.mxu0 %v6359_v63  ;;  %v6401_v63 = vld [vmem:[%s7973_s1 + $0xae8] sm:$0xff]  }
 0x131   :  { %5819 = vmatpush3.bf16.msra.mxu1 %v6358_v62 }
 0x132   :  { %5820 = vmatprep.subr.bf16.mxu1 %v6361_v3  ;;  %v6403_v3 = vld [vmem:[%s7973_s1 + $0xa70] sm:$0xff]  }
 0x133   :  { %5799 = vmatpush3.bf16.msra.mxu0 %v6360_v1  ;;  %v6402_v1 = vld [vmem:[%s7973_s1 + $0xaa8] sm:$0xff]  }
 0x134   :  { %5800 = vmatprep.subr.bf16.mxu0 %v6363_v9  ;;  %v6407_v9 = vld [vmem:[%s7973_s1 + $0xa78] sm:$0xff]  }
 0x135   :  { %v5498_v0 = vpop.f32.mrb[8].mxu0  ;;  %5821 = vmatpush3.bf16.msra.mxu1 %v6362_v6  ;;  %v6404_v6 = vld [vmem:[%s7973_s1 + $0xa30] sm:$0xff]  }
 0x136   :  { %v5499_v2 = vpop.f32.mrb[9].mxu0  ;;  %5822 = vmatprep.subr.bf16.mxu1 %v6365_v14 }
 0x137   :  { %v5500_v4 = vadd.f32 %v5499_v2, %v5498_v0  ;;  %v5501_v5 = vpop.f32.mrb[10].mxu0  ;;  %v5520_v7 = vpop.f32.mrb[8].mxu1  ;;  %5801 = vmatpush3.bf16.msra.mxu0 %v6364_v11  ;;  %v6409_v11 = vld [vmem:[%s7973_s1 + $0xaf8] sm:$0xff]  }
 0x138   :  { %v5502_v10 = vpop.f32.mrb[11].mxu0  ;;  %v5521_v12 = vpop.f32.mrb[9].mxu1  ;;  %5802 = vmatprep.subr.bf16.mxu0 %v6367_v19 }
 0x139   :  { %v3895_v8 = vadd.f32 %v5500_v4, %v7439_v32  ;;  %v5522_v13 = vadd.f32 %v5521_v12, %v5520_v7  ;;  %v5523_v15 = vpop.f32.mrb[10].mxu1  ;;  %5823 = vmatpush3.bf16.msra.mxu1 %v6366_v16  ;;  %v4937_v32 = vcombine.low %v40_v31, %v40_v31  ;;  %v6405_v7 = vld [vmem:[%s7973_s1 + $0xaf0] sm:$0xff]   ;;  %v6408_v10 = vld [vmem:[%s7973_s1 + $0xa38] sm:$0xff]   ;;  %v41_v12 = vld [vmem:[%s7974_s0 + $0xa0] sm:$0xff] }
 0x13a   :  { %v5524_v17 = vpop.f32.mrb[11].mxu1  ;;  %5824 = vmatprep.subr.bf16.mxu1 %v6369_v21  ;;  %v4940_v14 = vcombine.high %v41_v12, %v41_v12  ;;  %v6412_v15 = vld [vmem:[%s7973_s1 + $0xab8] sm:$0xff]   ;;  %v6413_v16 = vld [vmem:[%s7973_s1 + $0xb40] sm:$0xff]  }
 0x13b   :  { %v7544_v18 = vadd.f32 %v5522_v13, %v3895_v8  ;;  %5803 = vmatpush3.bf16.msra.mxu0 %v6368_v20  ;;  %v6406_v8 = vld [vmem:[%s7973_s1 + $0xab0] sm:$0xff]   ;;  %v4939_v13 = vcombine.low %v41_v12, %v41_v12  ;;  %v42_v17 = vld [vmem:[%s7974_s0 + $0xa8] sm:$0xff]  ;;  %v6416_v20 = vld [vmem:[%s7973_s1 + $0xb00] sm:$0xff]  }
 0x13c   :  { %5804 = vmatprep.subr.bf16.mxu0 %v6371_v23  ;;  %v4942_v19 = vcombine.high %v42_v17, %v42_v17  ;;  %v6417_v21 = vld [vmem:[%s7973_s1 + $0xbc0] sm:$0xff]   ;;  %v6419_v23 = vld [vmem:[%s7973_s1 + $0xb48] sm:$0xff]   ;;  %v6427_v31 = vld [vmem:[%s7973_s1 + $0xb58] sm:$0xff]  }
 0x13d   :  { %5825 = vmatpush3.bf16.msra.mxu1 %v6370_v22  ;;  %v6418_v22 = vld [vmem:[%s7973_s1 + $0xb80] sm:$0xff]   ;;  %v6458_v12 = vld [vmem:[%s7973_s1 + $0xc88] sm:$0xff]  }
 0x13e   :  { %5826 = vmatprep.subr.bf16.mxu1 %v6373_v25  ;;  %v6421_v25 = vld [vmem:[%s7973_s1 + $0xbc8] sm:$0xff]  }
 0x13f   :  { %5805 = vmatpush3.bf16.msra.mxu0 %v6372_v24  ;;  %v6420_v24 = vld [vmem:[%s7973_s1 + $0xb08] sm:$0xff]  }
 0x140   :  { %5834 = vmatprep.subr.bf16.mxu0 %v6377_v30  ;;  %v6426_v30 = vld [vmem:[%s7973_s1 + $0xb90] sm:$0xff]  }
 0x141   :  { %5827 = vmatpush3.bf16.msra.mxu1 %v6376_v29  ;;  %v6425_v29 = vld [vmem:[%s7973_s1 + $0xbd0] sm:$0xff]  }
 0x142   :  { %4453 = vmatmul.mubr.bf16.vlgmr.msra.gmra.mrb[36].mxu0 %v4935_v27  ;;  %5856 = vmatprep.subr.bf16.mxu1 %v6381_v35  ;;  %v6423_v27 = vld [vmem:[%s7973_s1 + $0xb50] sm:$0xff]   ;;  %v6431_v35 = vld [vmem:[%s7973_s1 + $0xb60] sm:$0xff]  }
 0x143   :  { %5835 = vmatpush3.bf16.msra.mxu0 %v6380_v34  ;;  %4532 = vmatprep.mubr.bf16.mxu0 %v4940_v14  ;;  %v6430_v34 = vld [vmem:[%s7973_s1 + $0xb98] sm:$0xff]   ;;  %v6460_v14 = vld [vmem:[%s7973_s1 + $0xc10] sm:$0xff]  }
 0x144   :  { %4493 = vmatmul.mubr.bf16.vlgmr.msra.gmra.mrb[36].mxu1 %v4937_v32  ;;  %5836 = vmatprep.subr.bf16.mxu0 %v6383_v37  ;;  %v6428_v32 = vld [vmem:[%s7973_s1 + $0xb18] sm:$0xff]   ;;  %v6432_v37 = vld [vmem:[%s7973_s1 + $0xb20] sm:$0xff]  }
 0x145   :  { %5857 = vmatpush3.bf16.msra.mxu1 %v6382_v36  ;;  %4572 = vmatprep.mubr.bf16.mxu1 %v4942_v19  ;;  %v6465_v19 = vld [vmem:[%s7973_s1 + $0xcd8] sm:$0xff]  }
 0x146   :  { %5858 = vmatprep.subr.bf16.mxu1 %v6385_v39  ;;  %v6433_v39 = vld [vmem:[%s7973_s1 + $0xbe0] sm:$0xff]  }
 0x147   :  { %5837 = vmatpush3.bf16.msra.mxu0 %v6384_v38 }
 0x148   :  { %5838 = vmatprep.subr.bf16.mxu0 %v6387_v41 }
 0x149   :  { %5859 = vmatpush3.bf16.msra.mxu1 %v6386_v40 }
 0x14a   :  { %5860 = vmatprep.subr.bf16.mxu1 %v6389_v43 }
 0x14b   :  { %5839 = vmatpush3.bf16.msra.mxu0 %v6388_v42  ;;  %v6434_v42 = vld [vmem:[%s7973_s1 + $0xba0] sm:$0xff]  }
 0x14c   :  { %5840 = vmatprep.subr.bf16.mxu0 %v6391_v45  ;;  %v6435_v45 = vld [vmem:[%s7973_s1 + $0xb68] sm:$0xff]  }
 0x14d   :  { %5861 = vmatpush3.bf16.msra.mxu1 %v6390_v44 }
 0x14e   :  { %5862 = vmatprep.subr.bf16.mxu1 %v6393_v47  ;;  %v6436_v47 = vld [vmem:[%s7973_s1 + $0xb28] sm:$0xff]  }
 0x14f   :  { %5841 = vmatpush3.bf16.msra.mxu0 %v6392_v46 }
 0x150   :  { %5842 = vmatprep.subr.bf16.mxu0 %v6395_v49 }
 0x151   :  { %5863 = vmatpush3.bf16.msra.mxu1 %v6394_v48 }
 0x152   :  { %5864 = vmatprep.subr.bf16.mxu1 %v6397_v52  ;;  %v6438_v52 = vld [vmem:[%s7973_s1 + $0xba8] sm:$0xff]  }
 0x153   :  { %5843 = vmatpush3.bf16.msra.mxu0 %v6396_v50  ;;  %v6437_v50 = vld [vmem:[%s7973_s1 + $0xbe8] sm:$0xff]  }
 0x154   :  { %5844 = vmatprep.subr.bf16.mxu0 %v6399_v57  ;;  %v6441_v57 = vld [vmem:[%s7973_s1 + $0xbf0] sm:$0xff]  }
 0x155   :  { %v5542_v51 = vpop.f32.mrb[12].mxu0  ;;  %5865 = vmatpush3.bf16.msra.mxu1 %v6398_v54 }
 0x156   :  { %v5543_v53 = vpop.f32.mrb[13].mxu0  ;;  %5866 = vmatprep.subr.bf16.mxu1 %v6401_v63 }
 0x157   :  { %v5544_v55 = vadd.f32 %v5543_v53, %v5542_v51  ;;  %v5545_v56 = vpop.f32.mrb[14].mxu0  ;;  %v5564_v58 = vpop.f32.mrb[12].mxu1  ;;  %5845 = vmatpush3.bf16.msra.mxu0 %v6400_v60  ;;  %v6444_v60 = vld [vmem:[%s7973_s1 + $0xb38] sm:$0xff]  }
 0x158   :  { %v5546_v61 = vpop.f32.mrb[15].mxu0  ;;  %v5565_v62 = vpop.f32.mrb[13].mxu1  ;;  %5846 = vmatprep.subr.bf16.mxu0 %v6403_v3  ;;  %v6440_v56 = vld [vmem:[%s7973_s1 + $0xb30] sm:$0xff]   ;;  %v44_v3 = vld [vmem:[%s7974_s0 + $0xb8] sm:$0xff] }
 0x159   :  { %v3975_v59 = vadd.f32 %v5544_v55, %v7544_v18  ;;  %v5566_v0 = vadd.f32 %v5565_v62, %v5564_v58  ;;  %v5567_v2 = vpop.f32.mrb[14].mxu1  ;;  %5867 = vmatpush3.bf16.msra.mxu1 %v6402_v1  ;;  %v4941_v18 = vcombine.low %v42_v17, %v42_v17  ;;  %v6439_v55 = vld [vmem:[%s7973_s1 + $0xb70] sm:$0xff]   ;;  %v6445_v61 = vld [vmem:[%s7973_s1 + $0xbf8] sm:$0xff]  }
 0x15a   :  { %v5568_v4 = vpop.f32.mrb[15].mxu1  ;;  %5868 = vmatprep.subr.bf16.mxu1 %v6405_v7  ;;  %v6442_v58 = vld [vmem:[%s7973_s1 + $0xbb0] sm:$0xff]   ;;  %v6448_v1 = vld [vmem:[%s7973_s1 + $0xbb8] sm:$0xff]   ;;  %v6449_v2 = vld [vmem:[%s7973_s1 + $0xc40] sm:$0xff]  }
 0x15b   :  { %v7652_v5 = vadd.f32 %v5566_v0, %v3975_v59  ;;  %5847 = vmatpush3.bf16.msra.mxu0 %v6404_v6  ;;  %v6443_v59 = vld [vmem:[%s7973_s1 + $0xb78] sm:$0xff]   ;;  %v43_v62 = vld [vmem:[%s7974_s0 + $0xb0] sm:$0xff]  ;;  %v4945_v4 = vcombine.low %v44_v3, %v44_v3  ;;  %v6452_v6 = vld [vmem:[%s7973_s1 + $0xc00] sm:$0xff]  }
 0x15c   :  { %5848 = vmatprep.subr.bf16.mxu0 %v6407_v9  ;;  %v4943_v63 = vcombine.low %v43_v62, %v43_v62  ;;  %v4944_v0 = vcombine.high %v43_v62, %v43_v62  ;;  %v6453_v7 = vld [vmem:[%s7973_s1 + $0xcc0] sm:$0xff]   ;;  %v6455_v9 = vld [vmem:[%s7973_s1 + $0xc48] sm:$0xff]   ;;  %v6463_v17 = vld [vmem:[%s7973_s1 + $0xc58] sm:$0xff]  }
 0x15d   :  { %5869 = vmatpush3.bf16.msra.mxu1 %v6406_v8  ;;  %v6454_v8 = vld [vmem:[%s7973_s1 + $0xc80] sm:$0xff]   ;;  %v6494_v62 = vld [vmem:[%s7973_s1 + $0xd18] sm:$0xff]  }
 0x15e   :  { %5870 = vmatprep.subr.bf16.mxu1 %v6409_v11  ;;  %v6457_v11 = vld [vmem:[%s7973_s1 + $0xcc8] sm:$0xff]  }
 0x15f   :  { %5849 = vmatpush3.bf16.msra.mxu0 %v6408_v10  ;;  %v6456_v10 = vld [vmem:[%s7973_s1 + $0xc08] sm:$0xff]  }
 0x160   :  { %5878 = vmatprep.subr.bf16.mxu0 %v6413_v16  ;;  %v6462_v16 = vld [vmem:[%s7973_s1 + $0xc90] sm:$0xff]  }
 0x161   :  { %5871 = vmatpush3.bf16.msra.mxu1 %v6412_v15  ;;  %v6461_v15 = vld [vmem:[%s7973_s1 + $0xcd0] sm:$0xff]  }
 0x162   :  { %4533 = vmatmul.mubr.bf16.vlgmr.msra.gmra.mrb[40].mxu0 %v4939_v13  ;;  %5900 = vmatprep.subr.bf16.mxu1 %v6417_v21  ;;  %v6459_v13 = vld [vmem:[%s7973_s1 + $0xc50] sm:$0xff]   ;;  %v6467_v21 = vld [vmem:[%s7973_s1 + $0xc60] sm:$0xff]  }
 0x163   :  { %5879 = vmatpush3.bf16.msra.mxu0 %v6416_v20  ;;  %4612 = vmatprep.mubr.bf16.mxu0 %v4944_v0  ;;  %v6466_v20 = vld [vmem:[%s7973_s1 + $0xc98] sm:$0xff]   ;;  %v6496_v0 = vld [vmem:[%s7973_s1 + $0xd20] sm:$0xff]  }
 0x164   :  { %4573 = vmatmul.mubr.bf16.vlgmr.msra.gmra.mrb[40].mxu1 %v4941_v18  ;;  %5880 = vmatprep.subr.bf16.mxu0 %v6419_v23  ;;  %v6464_v18 = vld [vmem:[%s7973_s1 + $0xc18] sm:$0xff]   ;;  %v6468_v23 = vld [vmem:[%s7973_s1 + $0xc20] sm:$0xff]  }
 0x165   :  { %5901 = vmatpush3.bf16.msra.mxu1 %v6418_v22 }
 0x166   :  { %5902 = vmatprep.subr.bf16.mxu1 %v6421_v25  ;;  %v6469_v25 = vld [vmem:[%s7973_s1 + $0xce0] sm:$0xff]  }
 0x167   :  { %5881 = vmatpush3.bf16.msra.mxu0 %v6420_v24 }
 0x168   :  { %5882 = vmatprep.subr.bf16.mxu0 %v6423_v27 }
 0x169   :  { %5903 = vmatpush3.bf16.msra.mxu1 %v6422_v26 }
 0x16a   :  { %5904 = vmatprep.subr.bf16.mxu1 %v6425_v29 }
 0x16b   :  { %5883 = vmatpush3.bf16.msra.mxu0 %v6424_v28  ;;  %v6470_v28 = vld [vmem:[%s7973_s1 + $0xca0] sm:$0xff]  }
 0x16c   :  { %5884 = vmatprep.subr.bf16.mxu0 %v6427_v31  ;;  %v6471_v31 = vld [vmem:[%s7973_s1 + $0xc68] sm:$0xff]  }
 0x16d   :  { %5905 = vmatpush3.bf16.msra.mxu1 %v6426_v30 }
 0x16e   :  { %5906 = vmatprep.subr.bf16.mxu1 %v6429_v33  ;;  %v6472_v33 = vld [vmem:[%s7973_s1 + $0xc28] sm:$0xff]  }
 0x16f   :  { %5885 = vmatpush3.bf16.msra.mxu0 %v6428_v32 }
 0x170   :  { %5886 = vmatprep.subr.bf16.mxu0 %v6431_v35 }
 0x171   :  { %5907 = vmatpush3.bf16.msra.mxu1 %v6430_v34 }
 0x172   :  { %5908 = vmatprep.subr.bf16.mxu1 %v6433_v39 }
 0x173   :  { %5887 = vmatpush3.bf16.msra.mxu0 %v6432_v37 }
 0x174   :  { %5888 = vmatprep.subr.bf16.mxu0 %v6435_v45  ;;  %v6479_v45 = vld [vmem:[%s7973_s1 + $0xc78] sm:$0xff]  }
 0x175   :  { %v5586_v36 = vpop.f32.mrb[16].mxu0  ;;  %5909 = vmatpush3.bf16.msra.mxu1 %v6434_v42  ;;  %v6476_v42 = vld [vmem:[%s7973_s1 + $0xc30] sm:$0xff]  }
 0x176   :  { %v5587_v38 = vpop.f32.mrb[17].mxu0  ;;  %5910 = vmatprep.subr.bf16.mxu1 %v6437_v50 }
 0x177   :  { %v5588_v40 = vadd.f32 %v5587_v38, %v5586_v36  ;;  %v5589_v41 = vpop.f32.mrb[18].mxu0  ;;  %v5608_v43 = vpop.f32.mrb[16].mxu1  ;;  %5889 = vmatpush3.bf16.msra.mxu0 %v6436_v47  ;;  %v6473_v36 = vld [vmem:[%s7973_s1 + $0xce8] sm:$0xff]   ;;  %v6481_v47 = vld [vmem:[%s7973_s1 + $0xcf8] sm:$0xff]  }
 0x178   :  { %v5590_v46 = vpop.f32.mrb[19].mxu0  ;;  %v5609_v48 = vpop.f32.mrb[17].mxu1  ;;  %5890 = vmatprep.subr.bf16.mxu0 %v6439_v55  ;;  %v6474_v38 = vld [vmem:[%s7973_s1 + $0xca8] sm:$0xff]   ;;  %v6475_v41 = vld [vmem:[%s7973_s1 + $0xc70] sm:$0xff]  }
 0x179   :  { %v4055_v44 = vadd.f32 %v5588_v40, %v7652_v5  ;;  %v5610_v49 = vadd.f32 %v5609_v48, %v5608_v43  ;;  %v5611_v51 = vpop.f32.mrb[18].mxu1  ;;  %5911 = vmatpush3.bf16.msra.mxu1 %v6438_v52  ;;  %v4946_v5 = vcombine.high %v44_v3, %v44_v3  ;;  %v6477_v43 = vld [vmem:[%s7973_s1 + $0xcf0] sm:$0xff]   ;;  %v6480_v46 = vld [vmem:[%s7973_s1 + $0xc38] sm:$0xff]   ;;  %v45_v48 = vld [vmem:[%s7974_s0 + $0xc0] sm:$0xff] }
 0x17a   :  { %v5612_v53 = vpop.f32.mrb[19].mxu1  ;;  %5912 = vmatprep.subr.bf16.mxu1 %v6441_v57  ;;  %v4948_v50 = vcombine.high %v45_v48, %v45_v48  ;;  %v6484_v51 = vld [vmem:[%s7973_s1 + $0xcb8] sm:$0xff]   ;;  %v6485_v52 = vld [vmem:[%s7973_s1 + $0xd40] sm:$0xff]   ;;  %v6489_v57 = vld [vmem:[%s7973_s1 + $0xd48] sm:$0xff]  }
 0x17b   :  { %v7754_v54 = vadd.f32 %v5610_v49, %v4055_v44  ;;  %5891 = vmatpush3.bf16.msra.mxu0 %v6440_v56  ;;  %4652 = vmatprep.mubr.bf16.mxu1 %v4946_v5  ;;  %v6478_v44 = vld [vmem:[%s7973_s1 + $0xcb0] sm:$0xff]   ;;  %v4947_v49 = vcombine.low %v45_v48, %v45_v48  ;;  %v46_v53 = vld [vmem:[%s7974_s0 + $0xc8] sm:$0xff]  ;;  %v6488_v56 = vld [vmem:[%s7973_s1 + $0xd00] sm:$0xff]  }
 0x17c   :  { %5892 = vmatprep.subr.bf16.mxu0 %v6443_v59  ;;  %v4950_v55 = vcombine.high %v46_v53, %v46_v53  ;;  %v6491_v59 = vld [vmem:[%s7973_s1 + $0xd50] sm:$0xff]   ;;  %v6506_v48 = vld [vmem:[%s7976_s3 + $0x8] sm:$0xff]  }
 0x17d   :  { %5913 = vmatpush3.bf16.msra.mxu1 %v6442_v58  ;;  %v6490_v58 = vld [vmem:[%s7973_s1 + $0xd08] sm:$0xff]  }
 0x17e   :  { %5914 = vmatprep.subr.bf16.mxu1 %v6445_v61  ;;  %v6493_v61 = vld [vmem:[%s7973_s1 + $0xd58] sm:$0xff]  }
 0x17f   :  { %5893 = vmatpush3.bf16.msra.mxu0 %v6444_v60  ;;  %v6492_v60 = vld [vmem:[%s7973_s1 + $0xd10] sm:$0xff]  }
 0x180   :  { %5922 = vmatprep.subr.bf16.mxu0 %v6449_v2  ;;  %v47_v2 = vld [vmem:[%s7974_s0 + $0xd0] sm:$0xff] }
 0x181   :  { %5915 = vmatpush3.bf16.msra.mxu1 %v6448_v1  ;;  %v6497_v1 = vld [vmem:[%s7973_s1 + $0xd68] sm:$0xff]  }
 0x182   :  { %4613 = vmatmul.mubr.bf16.vlgmr.msra.gmra.mrb[44].mxu0 %v4943_v63  ;;  %5944 = vmatprep.subr.bf16.mxu1 %v6453_v7  ;;  %v6495_v63 = vld [vmem:[%s7973_s1 + $0xd60] sm:$0xff]  }
 0x183   :  { %5923 = vmatpush3.bf16.msra.mxu0 %v6452_v6  ;;  %4692 = vmatprep.mubr.bf16.mxu0 %v4948_v50  ;;  %v6508_v50 = vld [vmem:[%s7976_s3 + $0x18] sm:$0xff]  }
 0x184   :  { %4653 = vmatmul.mubr.bf16.vlgmr.msra.gmra.mrb[44].mxu1 %v4945_v4  ;;  %5924 = vmatprep.subr.bf16.mxu0 %v6455_v9  ;;  %v4952_v4 = vcombine.high %v47_v2, %v47_v2  ;;  %v6498_v9 = vld [vmem:[%s7973_s1 + $0xd28] sm:$0xff]  }
 0x185   :  { %5945 = vmatpush3.bf16.msra.mxu1 %v6454_v8  ;;  %4732 = vmatprep.mubr.bf16.mxu1 %v4950_v55 }
 0x186   :  { %5946 = vmatprep.subr.bf16.mxu1 %v6457_v11 }
 0x187   :  { %5925 = vmatpush3.bf16.msra.mxu0 %v6456_v10 }
 0x188   :  { %5926 = vmatprep.subr.bf16.mxu0 %v6459_v13 }
 0x189   :  { %5947 = vmatpush3.bf16.msra.mxu1 %v6458_v12  ;;  %v6499_v12 = vld [vmem:[%s7973_s1 + $0xd70] sm:$0xff]  }
 0x18a   :  { %5948 = vmatprep.subr.bf16.mxu1 %v6461_v15 }
 0x18b   :  { %5927 = vmatpush3.bf16.msra.mxu0 %v6460_v14 }
 0x18c   :  { %5928 = vmatprep.subr.bf16.mxu0 %v6463_v17 }
 0x18d   :  { %5949 = vmatpush3.bf16.msra.mxu1 %v6462_v16 }
 0x18e   :  { %5950 = vmatprep.subr.bf16.mxu1 %v6465_v19  ;;  %v6501_v19 = vld [vmem:[%s7973_s1 + $0xd78] sm:$0xff]  }
 0x18f   :  { %5929 = vmatpush3.bf16.msra.mxu0 %v6464_v18  ;;  %v6500_v18 = vld [vmem:[%s7973_s1 + $0xd30] sm:$0xff]  }
 0x190   :  { %5930 = vmatprep.subr.bf16.mxu0 %v6467_v21  ;;  %v4951_v21 = vcombine.low %v47_v2, %v47_v2  ;;  %v6512_v2 = vld [vmem:[%s7976_s3 + $0x38] sm:$0xff]  }
 0x191   :  { %5951 = vmatpush3.bf16.msra.mxu1 %v6466_v20  ;;  %v6502_v20 = vld [vmem:[%s7973_s1 + $0xd38] sm:$0xff]  }
 0x192   :  { %5952 = vmatprep.subr.bf16.mxu1 %v6469_v25 }
 0x193   :  { %5931 = vmatpush3.bf16.msra.mxu0 %v6468_v23 }
 0x194   :  { %5932 = vmatprep.subr.bf16.mxu0 %v6471_v31 }
 0x195   :  { %v5630_v22 = vpop.f32.mrb[20].mxu0  ;;  %5953 = vmatpush3.bf16.msra.mxu1 %v6470_v28 }
 0x196   :  { %v5631_v24 = vpop.f32.mrb[21].mxu0  ;;  %5954 = vmatprep.subr.bf16.mxu1 %v6473_v36 }
 0x197   :  { %v5632_v26 = vadd.f32 %v5631_v24, %v5630_v22  ;;  %v5633_v27 = vpop.f32.mrb[22].mxu0  ;;  %v5652_v29 = vpop.f32.mrb[20].mxu1  ;;  %5933 = vmatpush3.bf16.msra.mxu0 %v6472_v33 }
 0x198   :  { %v5634_v32 = vpop.f32.mrb[23].mxu0  ;;  %v5653_v34 = vpop.f32.mrb[21].mxu1  ;;  %5934 = vmatprep.subr.bf16.mxu0 %v6475_v41 }
 0x199   :  { %v4135_v30 = vadd.f32 %v5632_v26, %v7754_v54  ;;  %v5654_v35 = vadd.f32 %v5653_v34, %v5652_v29  ;;  %v5655_v37 = vpop.f32.mrb[22].mxu1  ;;  %5955 = vmatpush3.bf16.msra.mxu1 %v6474_v38  ;;  %v4949_v54 = vcombine.low %v46_v53, %v46_v53 }
 0x19a   :  { %v5656_v39 = vpop.f32.mrb[23].mxu1  ;;  %5956 = vmatprep.subr.bf16.mxu1 %v6477_v43 }
 0x19b   :  { %v7859_v40 = vadd.f32 %v5654_v35, %v4135_v30  ;;  %5935 = vmatpush3.bf16.msra.mxu0 %v6476_v42 }
 0x19c   :  { %5936 = vmatprep.subr.bf16.mxu0 %v6479_v45 }
 0x19d   :  { %5957 = vmatpush3.bf16.msra.mxu1 %v6478_v44 }
 0x19e   :  { %5958 = vmatprep.subr.bf16.mxu1 %v6481_v47  ;;  %v6505_v47 = vld [vmem:[%s7976_s3] sm:$0xff]  }
 0x19f   :  { %5937 = vmatpush3.bf16.msra.mxu0 %v6480_v46  ;;  %v6513_v46 = vmov 0.0  }
 0x1a0   :  { %5966 = vmatprep.subr.bf16.mxu0 %v6485_v52  ;;  %v6510_v52 = vld [vmem:[%s7976_s3 + $0x28] sm:$0xff]  }
 0x1a1   :  { %5959 = vmatpush3.bf16.msra.mxu1 %v6484_v51  ;;  %v6509_v51 = vld [vmem:[%s7976_s3 + $0x20] sm:$0xff]  }
 0x1a2   :  { %4693 = vmatmul.mubr.bf16.vlgmr.msra.gmra.mrb[48].mxu0 %v4947_v49  ;;  %5997 = vmatprep.subr.bf16.mxu1 %v6513_v46  ;;  %v6507_v49 = vld [vmem:[%s7976_s3 + $0x10] sm:$0xff]  }
 0x1a3   :  { %5967 = vmatpush3.bf16.msra.mxu0 %v6488_v56  ;;  %4772 = vmatprep.mubr.bf16.mxu0 %v4952_v4 }
 0x1a4   :  { %4733 = vmatmul.mubr.bf16.vlgmr.msra.gmra.mrb[48].mxu1 %v4949_v54  ;;  %5968 = vmatprep.subr.bf16.mxu0 %v6489_v57 }
 0x1a5   :  { %5998 = vmatpush3.bf16.msra.mxu1 %v6505_v47  ;;  %6013 = vmatprep.mubr.msk.bf16.mxu1 %vm6514_vm0, %v6513_v46  ;;  %v5385_v47 = vld [vmem:[%s7977_s4] ss:$0 sm:$0xff] }
 0x1a6   :  { %5999 = vmatprep.subr.bf16.mxu1 %v6513_v46 }
 0x1a7   :  { %5969 = vmatpush3.bf16.msra.mxu0 %v6490_v58 }
 0x1a8   :  { %5970 = vmatprep.subr.bf16.mxu0 %v6491_v59 }
 0x1a9   :  { %6000 = vmatpush3.bf16.msra.mxu1 %v6506_v48 }
 0x1aa   :  { %6001 = vmatprep.subr.bf16.mxu1 %v6513_v46 }
 0x1ab   :  { %5971 = vmatpush3.bf16.msra.mxu0 %v6492_v60  ;;  %v6511_v60 = vld [vmem:[%s7976_s3 + $0x30] sm:$0xff]  }
 0x1ac   :  { %5972 = vmatprep.subr.bf16.mxu0 %v6493_v61 }
 0x1ad   :  { %6002 = vmatpush3.bf16.msra.mxu1 %v6507_v49 }
 0x1ae   :  { %6003 = vmatprep.subr.bf16.mxu1 %v6513_v46 }
 0x1af   :  { %5973 = vmatpush3.bf16.msra.mxu0 %v6494_v62 }
 0x1b0   :  { %5974 = vmatprep.subr.bf16.mxu0 %v6495_v63 }
 0x1b1   :  { %6004 = vmatpush3.bf16.msra.mxu1 %v6508_v50 }
 0x1b2   :  { %6005 = vmatprep.subr.bf16.mxu1 %v6513_v46 }
 0x1b3   :  { %5975 = vmatpush3.bf16.msra.mxu0 %v6496_v0 }
 0x1b4   :  { %5976 = vmatprep.subr.bf16.mxu0 %v6497_v1 }
 0x1b5   :  { %v5674_v3 = vpop.f32.mrb[24].mxu0  ;;  %6006 = vmatpush3.bf16.msra.mxu1 %v6509_v51 }
 0x1b6   :  { %v5675_v5 = vpop.f32.mrb[25].mxu0  ;;  %6007 = vmatprep.subr.bf16.mxu1 %v6513_v46 }
 0x1b7   :  { %v5676_v6 = vadd.f32 %v5675_v5, %v5674_v3  ;;  %v5677_v7 = vpop.f32.mrb[26].mxu0  ;;  %v5696_v8 = vpop.f32.mrb[24].mxu1  ;;  %5977 = vmatpush3.bf16.msra.mxu0 %v6498_v9 }
 0x1b8   :  { %v5678_v10 = vpop.f32.mrb[27].mxu0  ;;  %v5697_v11 = vpop.f32.mrb[25].mxu1  ;;  %5978 = vmatprep.subr.bf16.mxu0 %v6499_v12 }
 0x1b9   :  { %v4215_v13 = vadd.f32 %v5676_v6, %v7859_v40  ;;  %v5698_v14 = vadd.f32 %v5697_v11, %v5696_v8  ;;  %v5699_v15 = vpop.f32.mrb[26].mxu1  ;;  %6008 = vmatpush3.bf16.msra.mxu1 %v6510_v52 }
 0x1ba   :  { %v5700_v16 = vpop.f32.mrb[27].mxu1  ;;  %6009 = vmatprep.subr.bf16.mxu1 %v6513_v46 }
 0x1bb   :  { %v4255_v17 = vadd.f32 %v5698_v14, %v4215_v13  ;;  %5979 = vmatpush3.bf16.msra.mxu0 %v6500_v18 }
 0x1bc   :  { %5980 = vmatprep.subr.bf16.mxu0 %v6501_v19 }
 0x1bd   :  { %6010 = vmatpush3.bf16.msra.mxu1 %v6511_v60 }
 0x1be   :  { %6011 = vmatprep.subr.bf16.mxu1 %v6513_v46 }
 0x1bf   :  { %5981 = vmatpush3.bf16.msra.mxu0 %v6502_v20 }
 0x1c1   :  { %6012 = vmatpush3.bf16.msra.mxu1 %v6512_v2 }
 0x1c2   :  { %4773 = vmatmul.mubr.bf16.vlgmr.msra.gmra.mrb[52].mxu0 %v4951_v21 }
 0x1d5   :  { %v5718_v22 = vpop.f32.mrb[28].mxu0 }
 0x1d6   :  { %v5719_v23 = vpop.f32.mrb[29].mxu0 }
 0x1d7   :  { %v5720_v24 = vadd.f32 %v5719_v23, %v5718_v22  ;;  %v5721_v25 = vpop.f32.mrb[30].mxu0  ;;  %v5740_v26 = vpop.f32.mrb[28].mxu1 }
 0x1d8   :  { %v5722_v27 = vpop.f32.mrb[31].mxu0  ;;  %v5741_v28 = vpop.f32.mrb[29].mxu1 }
 0x1d9   :  { %v4295_v29 = vadd.f32 %v5720_v24, %v4255_v17  ;;  %v5742_v30 = vadd.f32 %v5741_v28, %v5740_v26  ;;  %v5743_v31 = vpop.f32.mrb[30].mxu1 }
 0x1da   :  { %v5744_v32 = vpop.f32.mrb[31].mxu1 }
 0x1db   :  { %v4335_v33 = vadd.f32 %v5742_v30, %v4295_v29 }
 0x1f5   :  { %v5762_v34 = vpop.f32.mrb[32].mxu0 }
 0x1f6   :  { %v5763_v35 = vpop.f32.mrb[33].mxu0 }
 0x1f7   :  { %v5764_v36 = vadd.f32 %v5763_v35, %v5762_v34  ;;  %v5765_v37 = vpop.f32.mrb[34].mxu0  ;;  %v5784_v38 = vpop.f32.mrb[32].mxu1 }
 0x1f8   :  { %v5766_v39 = vpop.f32.mrb[35].mxu0  ;;  %v5785_v41 = vpop.f32.mrb[33].mxu1 }
 0x1f9   :  { %v4375_v40 = vadd.f32 %v5764_v36, %v4335_v33  ;;  %v5786_v42 = vadd.f32 %v5785_v41, %v5784_v38  ;;  %v5787_v43 = vpop.f32.mrb[34].mxu1 }
 0x1fa   :  { %v5788_v44 = vpop.f32.mrb[35].mxu1 }
 0x1fb   :  { %v4415_v45 = vadd.f32 %v5786_v42, %v4375_v40 }
 0x215   :  { %v5806_v53 = vpop.f32.mrb[36].mxu0 }
 0x216   :  { %v5807_v54 = vpop.f32.mrb[37].mxu0 }
 0x217   :  { %v5808_v55 = vadd.f32 %v5807_v54, %v5806_v53  ;;  %v5809_v56 = vpop.f32.mrb[38].mxu0  ;;  %v5828_v57 = vpop.f32.mrb[36].mxu1 }
 0x218   :  { %v5810_v58 = vpop.f32.mrb[39].mxu0  ;;  %v5829_v59 = vpop.f32.mrb[37].mxu1 }
 0x219   :  { %v4455_v61 = vadd.f32 %v5808_v55, %v4415_v45  ;;  %v5830_v62 = vadd.f32 %v5829_v59, %v5828_v57  ;;  %v5831_v63 = vpop.f32.mrb[38].mxu1 }
 0x21a   :  { %v5832_v0 = vpop.f32.mrb[39].mxu1 }
 0x21b   :  { %v4495_v1 = vadd.f32 %v5830_v62, %v4455_v61 }
 0x235   :  { %v5850_v3 = vpop.f32.mrb[40].mxu0 }
 0x236   :  { %v5851_v4 = vpop.f32.mrb[41].mxu0 }
 0x237   :  { %v5852_v5 = vadd.f32 %v5851_v4, %v5850_v3  ;;  %v5853_v6 = vpop.f32.mrb[42].mxu0  ;;  %v5872_v7 = vpop.f32.mrb[40].mxu1 }
 0x238   :  { %v5854_v8 = vpop.f32.mrb[43].mxu0  ;;  %v5873_v9 = vpop.f32.mrb[41].mxu1 }
 0x239   :  { %v4535_v10 = vadd.f32 %v5852_v5, %v4495_v1  ;;  %v5874_v11 = vadd.f32 %v5873_v9, %v5872_v7  ;;  %v5875_v12 = vpop.f32.mrb[42].mxu1 }
 0x23a   :  { %v5876_v13 = vpop.f32.mrb[43].mxu1 }
 0x23b   :  { %v4575_v14 = vadd.f32 %v5874_v11, %v4535_v10 }
 0x255   :  { %v5894_v15 = vpop.f32.mrb[44].mxu0 }
 0x256   :  { %v5895_v16 = vpop.f32.mrb[45].mxu0 }
 0x257   :  { %v5896_v17 = vadd.f32 %v5895_v16, %v5894_v15  ;;  %v5897_v18 = vpop.f32.mrb[46].mxu0  ;;  %v5916_v19 = vpop.f32.mrb[44].mxu1 }
 0x258   :  { %v5898_v20 = vpop.f32.mrb[47].mxu0  ;;  %v5917_v22 = vpop.f32.mrb[45].mxu1 }
 0x259   :  { %v4615_v21 = vadd.f32 %v5896_v17, %v4575_v14  ;;  %v5918_v23 = vadd.f32 %v5917_v22, %v5916_v19  ;;  %v5919_v24 = vpop.f32.mrb[46].mxu1 }
 0x25a   :  { %v5920_v25 = vpop.f32.mrb[47].mxu1 }
 0x25b   :  { %v4655_v26 = vadd.f32 %v5918_v23, %v4615_v21 }
 0x275   :  { %v5938_v27 = vpop.f32.mrb[48].mxu0 }
 0x276   :  { %v5939_v28 = vpop.f32.mrb[49].mxu0 }
 0x277   :  { %v5940_v29 = vadd.f32 %v5939_v28, %v5938_v27  ;;  %v5941_v30 = vpop.f32.mrb[50].mxu0  ;;  %v5960_v31 = vpop.f32.mrb[48].mxu1 }
 0x278   :  { %v5942_v32 = vpop.f32.mrb[51].mxu0  ;;  %v5961_v33 = vpop.f32.mrb[49].mxu1 }
 0x279   :  { %v4695_v34 = vadd.f32 %v5940_v29, %v4655_v26  ;;  %v5962_v35 = vadd.f32 %v5961_v33, %v5960_v31  ;;  %v5963_v36 = vpop.f32.mrb[50].mxu1 }
 0x27a   :  { %v5964_v37 = vpop.f32.mrb[51].mxu1 }
 0x27b   :  { %v4735_v38 = vadd.f32 %v5962_v35, %v4695_v34 }
 0x295   :  { %v5982_v39 = vpop.f32.mrb[52].mxu0 }
 0x296   :  { %v5983_v40 = vpop.f32.mrb[53].mxu0 }
 0x297   :  { %v5984_v41 = vadd.f32 %v5983_v40, %v5982_v39  ;;  %v5985_v42 = vpop.f32.mrb[54].mxu0 }
 0x298   :  { %v5986_v43 = vpop.f32.mrb[55].mxu0 }
 0x299   :  { %v4775_v44 = vadd.f32 %v5984_v41, %v4735_v38 }
 0x29b   :  { %v4780_v45 = vmax.f32 %v4775_v44, 0.0 }
 0x29d   :  { %v4781_v46 = vpack.c.bf16 %v4780_v45, %v4780_v45 }
 0x29f   :  { %6014 = vmatmul.mubr.bf16.vlgmr.msra.gmra.mrb[52].mxu1 %v4781_v46 }
 0x372   :  { %v4887_v48 = vpop.f32.mrb[52].mxu1 }
 0x373   :  { %v4888_v49 = vadd.f32 %v5385_v47, %v4887_v48  ;;  %v6015_v50 = vpop.f32.mrb[53].mxu1 }
 0x374   :  { %v4890_v51 = vpop.f32.mrb[54].mxu1 }
 0x375   :  { %4893 = vst [vmem:[%s7978_s5] sm:$0xff] %v4888_v49  ;;  %v6016_v52 = vpop.f32.mrb[55].mxu1 }

</bundles_post_ra>
